<compile_context>
chip_gen: v7x
topology: tpu7x:2x2x1
jax: 0.10.0
libtpu: 0.0.40
codegen_flags: <defaults>
</compile_context>

<pallas_src>
import numpy as np

import jax
import jax.numpy as jnp
from jax.experimental import pallas as pl
from jax.experimental.pallas import tpu as pltpu


def _round_up(x, m):
    return (x + m - 1) // m * m


# ----------------------------------------------------------------------------
# Constant 0/1 selection matrices (built with vectorized numpy at trace time)
# ----------------------------------------------------------------------------
def _build_conv_selection(n, h, w, stride, rows_in_pad, rows_out_pad):
    """S[tap, r_out, r_in] = 1 iff input row r_in feeds output row r_out at
    kernel tap (kh, kw); out-of-bounds taps (zero padding) stay all-zero."""
    ho = (h - 1) // stride + 1
    wo = (w - 1) // stride + 1
    s = np.zeros((9, rows_out_pad, rows_in_pad), np.float32)
    b = np.arange(n)[:, None, None]
    oh = np.arange(ho)[None, :, None]
    ow = np.arange(wo)[None, None, :]
    rn = np.broadcast_to((b * ho + oh) * wo + ow, (n, ho, wo))
    for kh in range(3):
        for kw in range(3):
            ih = stride * oh + kh - 1                      # (1, ho, 1)
            iw = stride * ow + kw - 1                      # (1, 1, wo)
            valid = np.broadcast_to((ih >= 0) & (ih < h) & (iw >= 0) & (iw < w),
                                    (n, ho, wo))
            rp = np.broadcast_to((b * h + ih) * w + iw, (n, ho, wo))
            s[kh * 3 + kw, rn[valid], rp[valid]] = 1.0
    return s


def _build_fc_selection(n, p4, rows_in_pad):
    """T[p, b, :] selects conv4 row (b * p4 + p) for batch element b."""
    t = np.zeros((p4, n, rows_in_pad), np.float32)
    p = np.arange(p4)[:, None]
    b = np.arange(n)[None, :]
    t[p, b, b * p4 + p] = 1.0
    return t


# ----------------------------------------------------------------------------
# Fused Pallas kernel (whole encoder)
# ----------------------------------------------------------------------------
def _make_fused_kernel(layer_cfg, p4, n_batch, out_dim):
    """layer_cfg: tuple of (cin, cout, rows_out_pad, rows_out_true) per conv."""

    def _conv_bn_lrelu(a, s_ref, w_ref, g_ref, b_ref, cin, cout, rpad, rtrue):
        a16 = a.astype(jnp.bfloat16)
        acc = jnp.zeros((rpad, cout), jnp.float32)
        for tap in range(9):
            # Exact gather (0/1 matrix) of the shifted, zero-padded input rows.
            patch = jnp.dot(s_ref[tap], a16,
                            preferred_element_type=jnp.float32).astype(jnp.bfloat16)
            w_tap = w_ref[tap * cin:(tap + 1) * cin, :]
            acc = acc + jnp.dot(patch, w_tap, preferred_element_type=jnp.float32)
        # BatchNorm2d, training mode: biased stats over the true rows only
        # (padded rows of `acc` are exactly zero), one pass via E[x^2] - mean^2,
        # folded into a per-channel scale/shift.
        inv_n = 1.0 / float(rtrue)
        mean = jnp.sum(acc, axis=0, keepdims=True) * inv_n
        ex2 = jnp.sum(acc * acc, axis=0, keepdims=True) * inv_n
        var = jnp.maximum(ex2 - mean * mean, 0.0)
        scale = g_ref[...] * jax.lax.rsqrt(var + 1e-5)
        shift = b_ref[...] - scale * mean
        yv = acc * scale + shift
        return jnp.where(yv >= 0.0, yv, 0.01 * yv)          # LeakyReLU(0.01)

    def kernel(x0_ref,
               s1, w1, g1, b1,
               s2, w2, g2, b2,
               s3, w3, g3, b3,
               s4, w4, g4, b4,
               t_ref, wfc_ref, bfc_ref,
               out_ref):
        a = x0_ref[...]
        srefs = (s1, s2, s3, s4)
        wrefs = (w1, w2, w3, w4)
        grefs = (g1, g2, g3, g4)
        brefs = (b1, b2, b3, b4)
        for l, (cin, cout, rpad, rtrue) in enumerate(layer_cfg):
            a = _conv_bn_lrelu(a, srefs[l], wrefs[l], grefs[l], brefs[l],
                               cin, cout, rpad, rtrue)
        # Fused fc_mu | fc_var heads, consuming conv4 in its (rows, C) form.
        cout4 = layer_cfg[-1][1]
        a16 = a.astype(jnp.bfloat16)
        acc = jnp.zeros((n_batch, out_dim), jnp.float32)
        for pos in range(p4):
            sel = jnp.dot(t_ref[pos], a16,
                          preferred_element_type=jnp.float32).astype(jnp.bfloat16)
            w_pos = wfc_ref[pos * cout4:(pos + 1) * cout4, :]
            acc = acc + jnp.dot(sel, w_pos, preferred_element_type=jnp.float32)
        out_ref[...] = acc + bfc_ref[...]

    return kernel


def _full_spec(arr):
    nd = arr.ndim
    return pl.BlockSpec(arr.shape, lambda i, _nd=nd: (0,) * _nd)


# ----------------------------------------------------------------------------
# Parameters
# ----------------------------------------------------------------------------
def init_params(key, in_channels=4, grid_size=(9, 9), hid_channels=32,
                num_classes=3):
    gh, gw = grid_size
    ks = jax.random.split(key, 12)
    p = {}
    p["emb"] = 0.1 * jax.random.normal(
        ks[0], (num_classes, in_channels * gh * gw), jnp.float32)

    chans = [in_channels * 2, hid_channels, hid_channels * 2,
             hid_channels * 2, hid_channels * 4]
    for l in range(4):
        cin, cout = chans[l], chans[l + 1]
        p[f"c{l + 1}_w"] = (jax.random.normal(ks[1 + l], (3, 3, cin, cout),
                                              jnp.float32)
                            / jnp.sqrt(jnp.float32(9 * cin)))
        # Conv bias intentionally omitted: training-mode BatchNorm subtracts the
        # per-channel batch mean, which cancels a per-channel bias exactly.
        p[f"c{l + 1}_g"] = jnp.ones((cout,), jnp.float32)    # BN gamma
        p[f"c{l + 1}_b"] = jnp.zeros((cout,), jnp.float32)   # BN beta

    h, w = gh, gw
    for s in (1, 2, 1, 2):
        h = (h - 1) // s + 1
        w = (w - 1) // s + 1
    feat_dim = hid_channels * 4 * h * w   # NCHW-flatten feature dim

    def lin(kw_, kb_, fin, fout):
        wl = jax.random.normal(kw_, (fin, fout), jnp.float32) / jnp.sqrt(
            jnp.float32(fin))
        bl = 0.01 * jax.random.normal(kb_, (fout,), jnp.float32)
        return wl, bl

    p["fc_mu_w"], p["fc_mu_b"] = lin(ks[5], ks[6], feat_dim, hid_channels)
    p["fc_var_w"], p["fc_var_b"] = lin(ks[7], ks[8], feat_dim, hid_channels)
    return p


# ----------------------------------------------------------------------------
# BCEncoder forward (single fused pallas_call)
# ----------------------------------------------------------------------------
@jax.jit
def bc_encoder_forward(params, x_nchw, y):
    """x_nchw: (N, in_channels, H, W) float32; y: (N,) int32 labels."""
    N, C, H, W = x_nchw.shape
    hid = params["c1_w"].shape[-1]
    strides = (1, 2, 1, 2)
    chans = [2 * C, hid, 2 * hid, 2 * hid, 4 * hid]

    # spatial sizes / row counts per stage (padding=1, kernel=3)
    hs, ws = [H], [W]
    for s in strides:
        hs.append((hs[-1] - 1) // s + 1)
        ws.append((ws[-1] - 1) // s + 1)
    rows = [N * hs[i] * ws[i] for i in range(5)]
    rpad = [_round_up(r, 8) for r in rows]
    p4 = hs[4] * ws[4]
    cout4 = chans[4]

    # --- trace-time constants: selection matrices (exact in bf16) ---
    sels = [jnp.asarray(
        _build_conv_selection(N, hs[l], ws[l], strides[l], rpad[l], rpad[l + 1]),
        jnp.bfloat16) for l in range(4)]
    t_sel = jnp.asarray(_build_fc_selection(N, p4, rpad[4]), jnp.bfloat16)

    # --- tiny XLA glue: embedding lookup, channel concat, NHWC row matrix ---
    label_emb = params["emb"][y].reshape(N, C, H, W)
    x = jnp.concatenate([x_nchw, label_emb], axis=1)          # (N, 2C, H, W)
    a0 = jnp.transpose(x, (0, 2, 3, 1)).reshape(N * H * W, 2 * C)
    a0 = jnp.pad(a0, ((0, rpad[0] - rows[0]), (0, 0))).astype(jnp.float32)

    # --- weights in kernel-friendly layouts ---
    conv_ws, gammas, betas = [], [], []
    for l in range(4):
        wcv = params[f"c{l + 1}_w"]                            # (3,3,cin,cout)
        cin, cout = chans[l], chans[l + 1]
        conv_ws.append(wcv.reshape(9 * cin, cout).astype(jnp.bfloat16))
        gammas.append(params[f"c{l + 1}_g"].reshape(1, cout).astype(jnp.float32))
        betas.append(params[f"c{l + 1}_b"].reshape(1, cout).astype(jnp.float32))

    def _perm_fc(wfc):  # rows: NCHW-flatten (c*p4 + p)  ->  (p*cout4 + c)
        return wfc.reshape(cout4, p4, -1).transpose(1, 0, 2).reshape(
            p4 * cout4, -1)

    wfc = jnp.concatenate([_perm_fc(params["fc_mu_w"]),
                           _perm_fc(params["fc_var_w"])],
                          axis=1).astype(jnp.bfloat16)          # (feat, 2*hid)
    bfc = jnp.concatenate([params["fc_mu_b"], params["fc_var_b"]]
                          ).reshape(1, 2 * hid).astype(jnp.float32)

    layer_cfg = tuple((chans[l], chans[l + 1], rpad[l + 1], rows[l + 1])
                      for l in range(4))
    kernel = _make_fused_kernel(layer_cfg, p4, N, 2 * hid)

    operands = [a0]
    for l in range(4):
        operands += [sels[l], conv_ws[l], gammas[l], betas[l]]
    operands += [t_sel, wfc, bfc]

    out = pl.pallas_call(
        kernel,
        grid=(1,),
        in_specs=[_full_spec(op) for op in operands],
        out_specs=pl.BlockSpec((N, 2 * hid), lambda i: (0, 0)),
        out_shape=jax.ShapeDtypeStruct((N, 2 * hid), jnp.float32),
        compiler_params=pltpu.CompilerParams(
            dimension_semantics=("arbitrary",)),
    )(*operands)

    mu = out[:, :hid]
    logvar = out[:, hid:]
    return mu, logvar


if __name__ == "__main__":
    in_channels = 4
    grid_size = (9, 9)
    hid_channels = 32
    num_classes = 3
    batch = 2

    key = jax.random.PRNGKey(0)
    kp, kx, ky = jax.random.split(key, 3)

    params = init_params(kp, in_channels, grid_size, hid_channels, num_classes)
    x = jax.random.normal(kx, (batch, in_channels, *grid_size), jnp.float32)
    y = jax.random.randint(ky, (batch,), 0, num_classes, jnp.int32)

    mu, logvar = bc_encoder_forward(params, x, y)
    mu = jax.block_until_ready(mu)
    logvar = jax.block_until_ready(logvar)

    assert mu.shape == (batch, hid_channels)
    assert logvar.shape == (batch, hid_channels)
    assert bool(jnp.all(jnp.isfinite(mu))) and bool(jnp.all(jnp.isfinite(logvar)))
    print("KERNEL_OK")
</pallas_src>

<mosaic_0001>
module attributes {stable_mosaic.version = 11 : i64} {
  func.func @kernel(%arg0: i32, %arg1: memref<168x8xf32, #tpu.memory_space<vmem>>, %arg2: memref<9x168x168xbf16, #tpu.memory_space<vmem>>, %arg3: memref<72x32xbf16, #tpu.memory_space<vmem>>, %arg4: memref<1x32xf32, #tpu.memory_space<vmem>>, %arg5: memref<1x32xf32, #tpu.memory_space<vmem>>, %arg6: memref<9x56x168xbf16, #tpu.memory_space<vmem>>, %arg7: memref<288x64xbf16, #tpu.memory_space<vmem>>, %arg8: memref<1x64xf32, #tpu.memory_space<vmem>>, %arg9: memref<1x64xf32, #tpu.memory_space<vmem>>, %arg10: memref<9x56x56xbf16, #tpu.memory_space<vmem>>, %arg11: memref<576x64xbf16, #tpu.memory_space<vmem>>, %arg12: memref<1x64xf32, #tpu.memory_space<vmem>>, %arg13: memref<1x64xf32, #tpu.memory_space<vmem>>, %arg14: memref<9x24x56xbf16, #tpu.memory_space<vmem>>, %arg15: memref<576x128xbf16, #tpu.memory_space<vmem>>, %arg16: memref<1x128xf32, #tpu.memory_space<vmem>>, %arg17: memref<1x128xf32, #tpu.memory_space<vmem>>, %arg18: memref<9x2x24xbf16, #tpu.memory_space<vmem>>, %arg19: memref<1152x64xbf16, #tpu.memory_space<vmem>>, %arg20: memref<1x64xf32, #tpu.memory_space<vmem>>, %arg21: memref<2x64xf32, #tpu.memory_space<vmem>>) attributes {dimension_semantics = [#tpu.dimension_semantics<arbitrary>], iteration_bounds = array<i64: 1>, scalar_prefetch = 0 : i64, scratch_operands = 0 : i64, tpu.core_type = #tpu.core_type<tc>, window_params = [{pipeline_mode = #tpu.pipeline_mode<synchronous>, transform_indices = @transform_0, window_bounds = array<i64: 168, 8>}, {pipeline_mode = #tpu.pipeline_mode<synchronous>, transform_indices = @transform_1, window_bounds = array<i64: 9, 168, 168>}, {pipeline_mode = #tpu.pipeline_mode<synchronous>, transform_indices = @transform_2, window_bounds = array<i64: 72, 32>}, {pipeline_mode = #tpu.pipeline_mode<synchronous>, transform_indices = @transform_3, window_bounds = array<i64: 1, 32>}, {pipeline_mode = #tpu.pipeline_mode<synchronous>, transform_indices = @transform_4, window_bounds = array<i64: 1, 32>}, {pipeline_mode = #tpu.pipeline_mode<synchronous>, transform_indices = @transform_5, window_bounds = array<i64: 9, 56, 168>}, {pipeline_mode = #tpu.pipeline_mode<synchronous>, transform_indices = @transform_6, window_bounds = array<i64: 288, 64>}, {pipeline_mode = #tpu.pipeline_mode<synchronous>, transform_indices = @transform_7, window_bounds = array<i64: 1, 64>}, {pipeline_mode = #tpu.pipeline_mode<synchronous>, transform_indices = @transform_8, window_bounds = array<i64: 1, 64>}, {pipeline_mode = #tpu.pipeline_mode<synchronous>, transform_indices = @transform_9, window_bounds = array<i64: 9, 56, 56>}, {pipeline_mode = #tpu.pipeline_mode<synchronous>, transform_indices = @transform_10, window_bounds = array<i64: 576, 64>}, {pipeline_mode = #tpu.pipeline_mode<synchronous>, transform_indices = @transform_11, window_bounds = array<i64: 1, 64>}, {pipeline_mode = #tpu.pipeline_mode<synchronous>, transform_indices = @transform_12, window_bounds = array<i64: 1, 64>}, {pipeline_mode = #tpu.pipeline_mode<synchronous>, transform_indices = @transform_13, window_bounds = array<i64: 9, 24, 56>}, {pipeline_mode = #tpu.pipeline_mode<synchronous>, transform_indices = @transform_14, window_bounds = array<i64: 576, 128>}, {pipeline_mode = #tpu.pipeline_mode<synchronous>, transform_indices = @transform_15, window_bounds = array<i64: 1, 128>}, {pipeline_mode = #tpu.pipeline_mode<synchronous>, transform_indices = @transform_16, window_bounds = array<i64: 1, 128>}, {pipeline_mode = #tpu.pipeline_mode<synchronous>, transform_indices = @transform_17, window_bounds = array<i64: 9, 2, 24>}, {pipeline_mode = #tpu.pipeline_mode<synchronous>, transform_indices = @transform_18, window_bounds = array<i64: 1152, 64>}, {pipeline_mode = #tpu.pipeline_mode<synchronous>, transform_indices = @transform_19, window_bounds = array<i64: 1, 64>}, {pipeline_mode = #tpu.pipeline_mode<synchronous>, transform_indices = @transform_20, window_bounds = array<i64: 2, 64>}]} {
    %c0 = arith.constant 0 : index
    %c0_0 = arith.constant 0 : index
    %0 = vector.load %arg1[%c0, %c0_0] : memref<168x8xf32, #tpu.memory_space<vmem>>, vector<168x8xf32>
    %1 = arith.truncf %0 : vector<168x8xf32> to vector<168x8xbf16>
    %cst = arith.constant 0.000000e+00 : f32
    %2 = vector.broadcast %cst : f32 to vector<168x32xf32>
    %c0_1 = arith.constant 0 : index
    %c0_2 = arith.constant 0 : index
    %c0_3 = arith.constant 0 : index
    %3 = vector.load %arg2[%c0_1, %c0_2, %c0_3] : memref<9x168x168xbf16, #tpu.memory_space<vmem>>, vector<1x168x168xbf16>
    %4 = vector.shape_cast %3 : vector<1x168x168xbf16> to vector<168x168xbf16>
    %cst_4 = arith.constant dense<0.000000e+00> : vector<168x8xf32>
    %5 = tpu.matmul %4, %1, %cst_4 {dimension_numbers = #tpu.dot_dimension_numbers<[1], [0], [0], [1], [0, 0, 1, 1], [], []>} : vector<168x168xbf16>, vector<168x8xbf16>, vector<168x8xf32> -> vector<168x8xf32>
    %6 = arith.truncf %5 : vector<168x8xf32> to vector<168x8xbf16>
    %c0_5 = arith.constant 0 : index
    %c0_6 = arith.constant 0 : index
    %7 = vector.load %arg3[%c0_5, %c0_6] : memref<72x32xbf16, #tpu.memory_space<vmem>>, vector<8x32xbf16>
    %cst_7 = arith.constant dense<0.000000e+00> : vector<168x32xf32>
    %8 = tpu.matmul %6, %7, %cst_7 {dimension_numbers = #tpu.dot_dimension_numbers<[1], [0], [0], [1], [0, 0, 1, 1], [], []>} : vector<168x8xbf16>, vector<8x32xbf16>, vector<168x32xf32> -> vector<168x32xf32>
    %9 = arith.addf %2, %8 : vector<168x32xf32>
    %c1 = arith.constant 1 : index
    %c0_8 = arith.constant 0 : index
    %c0_9 = arith.constant 0 : index
    %10 = vector.load %arg2[%c1, %c0_8, %c0_9] : memref<9x168x168xbf16, #tpu.memory_space<vmem>>, vector<1x168x168xbf16>
    %11 = vector.shape_cast %10 : vector<1x168x168xbf16> to vector<168x168xbf16>
    %cst_10 = arith.constant dense<0.000000e+00> : vector<168x8xf32>
    %12 = tpu.matmul %11, %1, %cst_10 {dimension_numbers = #tpu.dot_dimension_numbers<[1], [0], [0], [1], [0, 0, 1, 1], [], []>} : vector<168x168xbf16>, vector<168x8xbf16>, vector<168x8xf32> -> vector<168x8xf32>
    %13 = arith.truncf %12 : vector<168x8xf32> to vector<168x8xbf16>
    %c8 = arith.constant 8 : index
    %c0_11 = arith.constant 0 : index
    %14 = vector.load %arg3[%c8, %c0_11] : memref<72x32xbf16, #tpu.memory_space<vmem>>, vector<8x32xbf16>
    %cst_12 = arith.constant dense<0.000000e+00> : vector<168x32xf32>
    %15 = tpu.matmul %13, %14, %cst_12 {dimension_numbers = #tpu.dot_dimension_numbers<[1], [0], [0], [1], [0, 0, 1, 1], [], []>} : vector<168x8xbf16>, vector<8x32xbf16>, vector<168x32xf32> -> vector<168x32xf32>
    %16 = arith.addf %9, %15 : vector<168x32xf32>
    %c2 = arith.constant 2 : index
    %c0_13 = arith.constant 0 : index
    %c0_14 = arith.constant 0 : index
    %17 = vector.load %arg2[%c2, %c0_13, %c0_14] : memref<9x168x168xbf16, #tpu.memory_space<vmem>>, vector<1x168x168xbf16>
    %18 = vector.shape_cast %17 : vector<1x168x168xbf16> to vector<168x168xbf16>
    %cst_15 = arith.constant dense<0.000000e+00> : vector<168x8xf32>
    %19 = tpu.matmul %18, %1, %cst_15 {dimension_numbers = #tpu.dot_dimension_numbers<[1], [0], [0], [1], [0, 0, 1, 1], [], []>} : vector<168x168xbf16>, vector<168x8xbf16>, vector<168x8xf32> -> vector<168x8xf32>
    %20 = arith.truncf %19 : vector<168x8xf32> to vector<168x8xbf16>
    %c16 = arith.constant 16 : index
    %c0_16 = arith.constant 0 : index
    %21 = vector.load %arg3[%c16, %c0_16] : memref<72x32xbf16, #tpu.memory_space<vmem>>, vector<8x32xbf16>
    %cst_17 = arith.constant dense<0.000000e+00> : vector<168x32xf32>
    %22 = tpu.matmul %20, %21, %cst_17 {dimension_numbers = #tpu.dot_dimension_numbers<[1], [0], [0], [1], [0, 0, 1, 1], [], []>} : vector<168x8xbf16>, vector<8x32xbf16>, vector<168x32xf32> -> vector<168x32xf32>
    %23 = arith.addf %16, %22 : vector<168x32xf32>
    %c3 = arith.constant 3 : index
    %c0_18 = arith.constant 0 : index
    %c0_19 = arith.constant 0 : index
    %24 = vector.load %arg2[%c3, %c0_18, %c0_19] : memref<9x168x168xbf16, #tpu.memory_space<vmem>>, vector<1x168x168xbf16>
    %25 = vector.shape_cast %24 : vector<1x168x168xbf16> to vector<168x168xbf16>
    %cst_20 = arith.constant dense<0.000000e+00> : vector<168x8xf32>
    %26 = tpu.matmul %25, %1, %cst_20 {dimension_numbers = #tpu.dot_dimension_numbers<[1], [0], [0], [1], [0, 0, 1, 1], [], []>} : vector<168x168xbf16>, vector<168x8xbf16>, vector<168x8xf32> -> vector<168x8xf32>
    %27 = arith.truncf %26 : vector<168x8xf32> to vector<168x8xbf16>
    %c24 = arith.constant 24 : index
    %c0_21 = arith.constant 0 : index
    %28 = vector.load %arg3[%c24, %c0_21] : memref<72x32xbf16, #tpu.memory_space<vmem>>, vector<8x32xbf16>
    %cst_22 = arith.constant dense<0.000000e+00> : vector<168x32xf32>
    %29 = tpu.matmul %27, %28, %cst_22 {dimension_numbers = #tpu.dot_dimension_numbers<[1], [0], [0], [1], [0, 0, 1, 1], [], []>} : vector<168x8xbf16>, vector<8x32xbf16>, vector<168x32xf32> -> vector<168x32xf32>
    %30 = arith.addf %23, %29 : vector<168x32xf32>
    %c4 = arith.constant 4 : index
    %c0_23 = arith.constant 0 : index
    %c0_24 = arith.constant 0 : index
    %31 = vector.load %arg2[%c4, %c0_23, %c0_24] : memref<9x168x168xbf16, #tpu.memory_space<vmem>>, vector<1x168x168xbf16>
    %32 = vector.shape_cast %31 : vector<1x168x168xbf16> to vector<168x168xbf16>
    %cst_25 = arith.constant dense<0.000000e+00> : vector<168x8xf32>
    %33 = tpu.matmul %32, %1, %cst_25 {dimension_numbers = #tpu.dot_dimension_numbers<[1], [0], [0], [1], [0, 0, 1, 1], [], []>} : vector<168x168xbf16>, vector<168x8xbf16>, vector<168x8xf32> -> vector<168x8xf32>
    %34 = arith.truncf %33 : vector<168x8xf32> to vector<168x8xbf16>
    %c32 = arith.constant 32 : index
    %c0_26 = arith.constant 0 : index
    %35 = vector.load %arg3[%c32, %c0_26] : memref<72x32xbf16, #tpu.memory_space<vmem>>, vector<8x32xbf16>
    %cst_27 = arith.constant dense<0.000000e+00> : vector<168x32xf32>
    %36 = tpu.matmul %34, %35, %cst_27 {dimension_numbers = #tpu.dot_dimension_numbers<[1], [0], [0], [1], [0, 0, 1, 1], [], []>} : vector<168x8xbf16>, vector<8x32xbf16>, vector<168x32xf32> -> vector<168x32xf32>
    %37 = arith.addf %30, %36 : vector<168x32xf32>
    %c5 = arith.constant 5 : index
    %c0_28 = arith.constant 0 : index
    %c0_29 = arith.constant 0 : index
    %38 = vector.load %arg2[%c5, %c0_28, %c0_29] : memref<9x168x168xbf16, #tpu.memory_space<vmem>>, vector<1x168x168xbf16>
    %39 = vector.shape_cast %38 : vector<1x168x168xbf16> to vector<168x168xbf16>
    %cst_30 = arith.constant dense<0.000000e+00> : vector<168x8xf32>
    %40 = tpu.matmul %39, %1, %cst_30 {dimension_numbers = #tpu.dot_dimension_numbers<[1], [0], [0], [1], [0, 0, 1, 1], [], []>} : vector<168x168xbf16>, vector<168x8xbf16>, vector<168x8xf32> -> vector<168x8xf32>
    %41 = arith.truncf %40 : vector<168x8xf32> to vector<168x8xbf16>
    %c40 = arith.constant 40 : index
    %c0_31 = arith.constant 0 : index
    %42 = vector.load %arg3[%c40, %c0_31] : memref<72x32xbf16, #tpu.memory_space<vmem>>, vector<8x32xbf16>
    %cst_32 = arith.constant dense<0.000000e+00> : vector<168x32xf32>
    %43 = tpu.matmul %41, %42, %cst_32 {dimension_numbers = #tpu.dot_dimension_numbers<[1], [0], [0], [1], [0, 0, 1, 1], [], []>} : vector<168x8xbf16>, vector<8x32xbf16>, vector<168x32xf32> -> vector<168x32xf32>
    %44 = arith.addf %37, %43 : vector<168x32xf32>
    %c6 = arith.constant 6 : index
    %c0_33 = arith.constant 0 : index
    %c0_34 = arith.constant 0 : index
    %45 = vector.load %arg2[%c6, %c0_33, %c0_34] : memref<9x168x168xbf16, #tpu.memory_space<vmem>>, vector<1x168x168xbf16>
    %46 = vector.shape_cast %45 : vector<1x168x168xbf16> to vector<168x168xbf16>
    %cst_35 = arith.constant dense<0.000000e+00> : vector<168x8xf32>
    %47 = tpu.matmul %46, %1, %cst_35 {dimension_numbers = #tpu.dot_dimension_numbers<[1], [0], [0], [1], [0, 0, 1, 1], [], []>} : vector<168x168xbf16>, vector<168x8xbf16>, vector<168x8xf32> -> vector<168x8xf32>
    %48 = arith.truncf %47 : vector<168x8xf32> to vector<168x8xbf16>
    %c48 = arith.constant 48 : index
    %c0_36 = arith.constant 0 : index
    %49 = vector.load %arg3[%c48, %c0_36] : memref<72x32xbf16, #tpu.memory_space<vmem>>, vector<8x32xbf16>
    %cst_37 = arith.constant dense<0.000000e+00> : vector<168x32xf32>
    %50 = tpu.matmul %48, %49, %cst_37 {dimension_numbers = #tpu.dot_dimension_numbers<[1], [0], [0], [1], [0, 0, 1, 1], [], []>} : vector<168x8xbf16>, vector<8x32xbf16>, vector<168x32xf32> -> vector<168x32xf32>
    %51 = arith.addf %44, %50 : vector<168x32xf32>
    %c7 = arith.constant 7 : index
    %c0_38 = arith.constant 0 : index
    %c0_39 = arith.constant 0 : index
    %52 = vector.load %arg2[%c7, %c0_38, %c0_39] : memref<9x168x168xbf16, #tpu.memory_space<vmem>>, vector<1x168x168xbf16>
    %53 = vector.shape_cast %52 : vector<1x168x168xbf16> to vector<168x168xbf16>
    %cst_40 = arith.constant dense<0.000000e+00> : vector<168x8xf32>
    %54 = tpu.matmul %53, %1, %cst_40 {dimension_numbers = #tpu.dot_dimension_numbers<[1], [0], [0], [1], [0, 0, 1, 1], [], []>} : vector<168x168xbf16>, vector<168x8xbf16>, vector<168x8xf32> -> vector<168x8xf32>
    %55 = arith.truncf %54 : vector<168x8xf32> to vector<168x8xbf16>
    %c56 = arith.constant 56 : index
    %c0_41 = arith.constant 0 : index
    %56 = vector.load %arg3[%c56, %c0_41] : memref<72x32xbf16, #tpu.memory_space<vmem>>, vector<8x32xbf16>
    %cst_42 = arith.constant dense<0.000000e+00> : vector<168x32xf32>
    %57 = tpu.matmul %55, %56, %cst_42 {dimension_numbers = #tpu.dot_dimension_numbers<[1], [0], [0], [1], [0, 0, 1, 1], [], []>} : vector<168x8xbf16>, vector<8x32xbf16>, vector<168x32xf32> -> vector<168x32xf32>
    %58 = arith.addf %51, %57 : vector<168x32xf32>
    %c8_43 = arith.constant 8 : index
    %c0_44 = arith.constant 0 : index
    %c0_45 = arith.constant 0 : index
    %59 = vector.load %arg2[%c8_43, %c0_44, %c0_45] : memref<9x168x168xbf16, #tpu.memory_space<vmem>>, vector<1x168x168xbf16>
    %60 = vector.shape_cast %59 : vector<1x168x168xbf16> to vector<168x168xbf16>
    %cst_46 = arith.constant dense<0.000000e+00> : vector<168x8xf32>
    %61 = tpu.matmul %60, %1, %cst_46 {dimension_numbers = #tpu.dot_dimension_numbers<[1], [0], [0], [1], [0, 0, 1, 1], [], []>} : vector<168x168xbf16>, vector<168x8xbf16>, vector<168x8xf32> -> vector<168x8xf32>
    %62 = arith.truncf %61 : vector<168x8xf32> to vector<168x8xbf16>
    %c64 = arith.constant 64 : index
    %c0_47 = arith.constant 0 : index
    %63 = vector.load %arg3[%c64, %c0_47] : memref<72x32xbf16, #tpu.memory_space<vmem>>, vector<8x32xbf16>
    %cst_48 = arith.constant dense<0.000000e+00> : vector<168x32xf32>
    %64 = tpu.matmul %62, %63, %cst_48 {dimension_numbers = #tpu.dot_dimension_numbers<[1], [0], [0], [1], [0, 0, 1, 1], [], []>} : vector<168x8xbf16>, vector<8x32xbf16>, vector<168x32xf32> -> vector<168x32xf32>
    %65 = arith.addf %58, %64 : vector<168x32xf32>
    %cst_49 = arith.constant dense<0.000000e+00> : vector<32xf32>
    %66 = vector.multi_reduction <add>, %65, %cst_49 [0] : vector<168x32xf32> to vector<32xf32>
    %67 = vector.shape_cast %66 : vector<32xf32> to vector<1x32xf32>
    %cst_50 = arith.constant 0.00617283955 : f32
    %68 = vector.broadcast %cst_50 : f32 to vector<1x32xf32>
    %69 = arith.mulf %67, %68 : vector<1x32xf32>
    %70 = arith.mulf %65, %65 : vector<168x32xf32>
    %cst_51 = arith.constant dense<0.000000e+00> : vector<32xf32>
    %71 = vector.multi_reduction <add>, %70, %cst_51 [0] : vector<168x32xf32> to vector<32xf32>
    %72 = vector.shape_cast %71 : vector<32xf32> to vector<1x32xf32>
    %cst_52 = arith.constant 0.00617283955 : f32
    %73 = vector.broadcast %cst_52 : f32 to vector<1x32xf32>
    %74 = arith.mulf %72, %73 : vector<1x32xf32>
    %75 = arith.mulf %69, %69 : vector<1x32xf32>
    %76 = arith.subf %74, %75 : vector<1x32xf32>
    %cst_53 = arith.constant 0.000000e+00 : f32
    %77 = vector.broadcast %cst_53 : f32 to vector<1x32xf32>
    %78 = arith.maximumf %76, %77 : vector<1x32xf32>
    %c0_54 = arith.constant 0 : index
    %c0_55 = arith.constant 0 : index
    %79 = vector.load %arg4[%c0_54, %c0_55] : memref<1x32xf32, #tpu.memory_space<vmem>>, vector<1x32xf32>
    %cst_56 = arith.constant 9.99999974E-6 : f32
    %80 = vector.broadcast %cst_56 : f32 to vector<1x32xf32>
    %81 = arith.addf %78, %80 : vector<1x32xf32>
    %82 = math.rsqrt %81 : vector<1x32xf32>
    %83 = arith.mulf %79, %82 : vector<1x32xf32>
    %c0_57 = arith.constant 0 : index
    %c0_58 = arith.constant 0 : index
    %84 = vector.load %arg5[%c0_57, %c0_58] : memref<1x32xf32, #tpu.memory_space<vmem>>, vector<1x32xf32>
    %85 = arith.mulf %83, %69 : vector<1x32xf32>
    %86 = arith.subf %84, %85 : vector<1x32xf32>
    %87 = vector.broadcast %83 : vector<1x32xf32> to vector<168x32xf32>
    %88 = arith.mulf %65, %87 : vector<168x32xf32>
    %89 = vector.broadcast %86 : vector<1x32xf32> to vector<168x32xf32>
    %90 = arith.addf %88, %89 : vector<168x32xf32>
    %cst_59 = arith.constant 0.000000e+00 : f32
    %91 = vector.broadcast %cst_59 : f32 to vector<168x32xf32>
    %92 = arith.cmpf oge, %90, %91 : vector<168x32xf32>
    %cst_60 = arith.constant 0.00999999977 : f32
    %93 = vector.broadcast %cst_60 : f32 to vector<168x32xf32>
    %94 = arith.mulf %93, %90 : vector<168x32xf32>
    %95 = arith.select %92, %90, %94 : vector<168x32xi1>, vector<168x32xf32>
    %96 = arith.truncf %95 : vector<168x32xf32> to vector<168x32xbf16>
    %cst_61 = arith.constant 0.000000e+00 : f32
    %97 = vector.broadcast %cst_61 : f32 to vector<56x64xf32>
    %c0_62 = arith.constant 0 : index
    %c0_63 = arith.constant 0 : index
    %c0_64 = arith.constant 0 : index
    %98 = vector.load %arg6[%c0_62, %c0_63, %c0_64] : memref<9x56x168xbf16, #tpu.memory_space<vmem>>, vector<1x56x168xbf16>
    %99 = vector.shape_cast %98 : vector<1x56x168xbf16> to vector<56x168xbf16>
    %cst_65 = arith.constant dense<0.000000e+00> : vector<56x32xf32>
    %100 = tpu.matmul %99, %96, %cst_65 {dimension_numbers = #tpu.dot_dimension_numbers<[1], [0], [0], [1], [0, 0, 1, 1], [], []>} : vector<56x168xbf16>, vector<168x32xbf16>, vector<56x32xf32> -> vector<56x32xf32>
    %101 = arith.truncf %100 : vector<56x32xf32> to vector<56x32xbf16>
    %c0_66 = arith.constant 0 : index
    %c0_67 = arith.constant 0 : index
    %102 = vector.load %arg7[%c0_66, %c0_67] : memref<288x64xbf16, #tpu.memory_space<vmem>>, vector<32x64xbf16>
    %cst_68 = arith.constant dense<0.000000e+00> : vector<56x64xf32>
    %103 = tpu.matmul %101, %102, %cst_68 {dimension_numbers = #tpu.dot_dimension_numbers<[1], [0], [0], [1], [0, 0, 1, 1], [], []>} : vector<56x32xbf16>, vector<32x64xbf16>, vector<56x64xf32> -> vector<56x64xf32>
    %104 = arith.addf %97, %103 : vector<56x64xf32>
    %c1_69 = arith.constant 1 : index
    %c0_70 = arith.constant 0 : index
    %c0_71 = arith.constant 0 : index
    %105 = vector.load %arg6[%c1_69, %c0_70, %c0_71] : memref<9x56x168xbf16, #tpu.memory_space<vmem>>, vector<1x56x168xbf16>
    %106 = vector.shape_cast %105 : vector<1x56x168xbf16> to vector<56x168xbf16>
    %cst_72 = arith.constant dense<0.000000e+00> : vector<56x32xf32>
    %107 = tpu.matmul %106, %96, %cst_72 {dimension_numbers = #tpu.dot_dimension_numbers<[1], [0], [0], [1], [0, 0, 1, 1], [], []>} : vector<56x168xbf16>, vector<168x32xbf16>, vector<56x32xf32> -> vector<56x32xf32>
    %108 = arith.truncf %107 : vector<56x32xf32> to vector<56x32xbf16>
    %c32_73 = arith.constant 32 : index
    %c0_74 = arith.constant 0 : index
    %109 = vector.load %arg7[%c32_73, %c0_74] : memref<288x64xbf16, #tpu.memory_space<vmem>>, vector<32x64xbf16>
    %cst_75 = arith.constant dense<0.000000e+00> : vector<56x64xf32>
    %110 = tpu.matmul %108, %109, %cst_75 {dimension_numbers = #tpu.dot_dimension_numbers<[1], [0], [0], [1], [0, 0, 1, 1], [], []>} : vector<56x32xbf16>, vector<32x64xbf16>, vector<56x64xf32> -> vector<56x64xf32>
    %111 = arith.addf %104, %110 : vector<56x64xf32>
    %c2_76 = arith.constant 2 : index
    %c0_77 = arith.constant 0 : index
    %c0_78 = arith.constant 0 : index
    %112 = vector.load %arg6[%c2_76, %c0_77, %c0_78] : memref<9x56x168xbf16, #tpu.memory_space<vmem>>, vector<1x56x168xbf16>
    %113 = vector.shape_cast %112 : vector<1x56x168xbf16> to vector<56x168xbf16>
    %cst_79 = arith.constant dense<0.000000e+00> : vector<56x32xf32>
    %114 = tpu.matmul %113, %96, %cst_79 {dimension_numbers = #tpu.dot_dimension_numbers<[1], [0], [0], [1], [0, 0, 1, 1], [], []>} : vector<56x168xbf16>, vector<168x32xbf16>, vector<56x32xf32> -> vector<56x32xf32>
    %115 = arith.truncf %114 : vector<56x32xf32> to vector<56x32xbf16>
    %c64_80 = arith.constant 64 : index
    %c0_81 = arith.constant 0 : index
    %116 = vector.load %arg7[%c64_80, %c0_81] : memref<288x64xbf16, #tpu.memory_space<vmem>>, vector<32x64xbf16>
    %cst_82 = arith.constant dense<0.000000e+00> : vector<56x64xf32>
    %117 = tpu.matmul %115, %116, %cst_82 {dimension_numbers = #tpu.dot_dimension_numbers<[1], [0], [0], [1], [0, 0, 1, 1], [], []>} : vector<56x32xbf16>, vector<32x64xbf16>, vector<56x64xf32> -> vector<56x64xf32>
    %118 = arith.addf %111, %117 : vector<56x64xf32>
    %c3_83 = arith.constant 3 : index
    %c0_84 = arith.constant 0 : index
    %c0_85 = arith.constant 0 : index
    %119 = vector.load %arg6[%c3_83, %c0_84, %c0_85] : memref<9x56x168xbf16, #tpu.memory_space<vmem>>, vector<1x56x168xbf16>
    %120 = vector.shape_cast %119 : vector<1x56x168xbf16> to vector<56x168xbf16>
    %cst_86 = arith.constant dense<0.000000e+00> : vector<56x32xf32>
    %121 = tpu.matmul %120, %96, %cst_86 {dimension_numbers = #tpu.dot_dimension_numbers<[1], [0], [0], [1], [0, 0, 1, 1], [], []>} : vector<56x168xbf16>, vector<168x32xbf16>, vector<56x32xf32> -> vector<56x32xf32>
    %122 = arith.truncf %121 : vector<56x32xf32> to vector<56x32xbf16>
    %c96 = arith.constant 96 : index
    %c0_87 = arith.constant 0 : index
    %123 = vector.load %arg7[%c96, %c0_87] : memref<288x64xbf16, #tpu.memory_space<vmem>>, vector<32x64xbf16>
    %cst_88 = arith.constant dense<0.000000e+00> : vector<56x64xf32>
    %124 = tpu.matmul %122, %123, %cst_88 {dimension_numbers = #tpu.dot_dimension_numbers<[1], [0], [0], [1], [0, 0, 1, 1], [], []>} : vector<56x32xbf16>, vector<32x64xbf16>, vector<56x64xf32> -> vector<56x64xf32>
    %125 = arith.addf %118, %124 : vector<56x64xf32>
    %c4_89 = arith.constant 4 : index
    %c0_90 = arith.constant 0 : index
    %c0_91 = arith.constant 0 : index
    %126 = vector.load %arg6[%c4_89, %c0_90, %c0_91] : memref<9x56x168xbf16, #tpu.memory_space<vmem>>, vector<1x56x168xbf16>
    %127 = vector.shape_cast %126 : vector<1x56x168xbf16> to vector<56x168xbf16>
    %cst_92 = arith.constant dense<0.000000e+00> : vector<56x32xf32>
    %128 = tpu.matmul %127, %96, %cst_92 {dimension_numbers = #tpu.dot_dimension_numbers<[1], [0], [0], [1], [0, 0, 1, 1], [], []>} : vector<56x168xbf16>, vector<168x32xbf16>, vector<56x32xf32> -> vector<56x32xf32>
    %129 = arith.truncf %128 : vector<56x32xf32> to vector<56x32xbf16>
    %c128 = arith.constant 128 : index
    %c0_93 = arith.constant 0 : index
    %130 = vector.load %arg7[%c128, %c0_93] : memref<288x64xbf16, #tpu.memory_space<vmem>>, vector<32x64xbf16>
    %cst_94 = arith.constant dense<0.000000e+00> : vector<56x64xf32>
    %131 = tpu.matmul %129, %130, %cst_94 {dimension_numbers = #tpu.dot_dimension_numbers<[1], [0], [0], [1], [0, 0, 1, 1], [], []>} : vector<56x32xbf16>, vector<32x64xbf16>, vector<56x64xf32> -> vector<56x64xf32>
    %132 = arith.addf %125, %131 : vector<56x64xf32>
    %c5_95 = arith.constant 5 : index
    %c0_96 = arith.constant 0 : index
    %c0_97 = arith.constant 0 : index
    %133 = vector.load %arg6[%c5_95, %c0_96, %c0_97] : memref<9x56x168xbf16, #tpu.memory_space<vmem>>, vector<1x56x168xbf16>
    %134 = vector.shape_cast %133 : vector<1x56x168xbf16> to vector<56x168xbf16>
    %cst_98 = arith.constant dense<0.000000e+00> : vector<56x32xf32>
    %135 = tpu.matmul %134, %96, %cst_98 {dimension_numbers = #tpu.dot_dimension_numbers<[1], [0], [0], [1], [0, 0, 1, 1], [], []>} : vector<56x168xbf16>, vector<168x32xbf16>, vector<56x32xf32> -> vector<56x32xf32>
    %136 = arith.truncf %135 : vector<56x32xf32> to vector<56x32xbf16>
    %c160 = arith.constant 160 : index
    %c0_99 = arith.constant 0 : index
    %137 = vector.load %arg7[%c160, %c0_99] : memref<288x64xbf16, #tpu.memory_space<vmem>>, vector<32x64xbf16>
    %cst_100 = arith.constant dense<0.000000e+00> : vector<56x64xf32>
    %138 = tpu.matmul %136, %137, %cst_100 {dimension_numbers = #tpu.dot_dimension_numbers<[1], [0], [0], [1], [0, 0, 1, 1], [], []>} : vector<56x32xbf16>, vector<32x64xbf16>, vector<56x64xf32> -> vector<56x64xf32>
    %139 = arith.addf %132, %138 : vector<56x64xf32>
    %c6_101 = arith.constant 6 : index
    %c0_102 = arith.constant 0 : index
    %c0_103 = arith.constant 0 : index
    %140 = vector.load %arg6[%c6_101, %c0_102, %c0_103] : memref<9x56x168xbf16, #tpu.memory_space<vmem>>, vector<1x56x168xbf16>
    %141 = vector.shape_cast %140 : vector<1x56x168xbf16> to vector<56x168xbf16>
    %cst_104 = arith.constant dense<0.000000e+00> : vector<56x32xf32>
    %142 = tpu.matmul %141, %96, %cst_104 {dimension_numbers = #tpu.dot_dimension_numbers<[1], [0], [0], [1], [0, 0, 1, 1], [], []>} : vector<56x168xbf16>, vector<168x32xbf16>, vector<56x32xf32> -> vector<56x32xf32>
    %143 = arith.truncf %142 : vector<56x32xf32> to vector<56x32xbf16>
    %c192 = arith.constant 192 : index
    %c0_105 = arith.constant 0 : index
    %144 = vector.load %arg7[%c192, %c0_105] : memref<288x64xbf16, #tpu.memory_space<vmem>>, vector<32x64xbf16>
    %cst_106 = arith.constant dense<0.000000e+00> : vector<56x64xf32>
    %145 = tpu.matmul %143, %144, %cst_106 {dimension_numbers = #tpu.dot_dimension_numbers<[1], [0], [0], [1], [0, 0, 1, 1], [], []>} : vector<56x32xbf16>, vector<32x64xbf16>, vector<56x64xf32> -> vector<56x64xf32>
    %146 = arith.addf %139, %145 : vector<56x64xf32>
    %c7_107 = arith.constant 7 : index
    %c0_108 = arith.constant 0 : index
    %c0_109 = arith.constant 0 : index
    %147 = vector.load %arg6[%c7_107, %c0_108, %c0_109] : memref<9x56x168xbf16, #tpu.memory_space<vmem>>, vector<1x56x168xbf16>
    %148 = vector.shape_cast %147 : vector<1x56x168xbf16> to vector<56x168xbf16>
    %cst_110 = arith.constant dense<0.000000e+00> : vector<56x32xf32>
    %149 = tpu.matmul %148, %96, %cst_110 {dimension_numbers = #tpu.dot_dimension_numbers<[1], [0], [0], [1], [0, 0, 1, 1], [], []>} : vector<56x168xbf16>, vector<168x32xbf16>, vector<56x32xf32> -> vector<56x32xf32>
    %150 = arith.truncf %149 : vector<56x32xf32> to vector<56x32xbf16>
    %c224 = arith.constant 224 : index
    %c0_111 = arith.constant 0 : index
    %151 = vector.load %arg7[%c224, %c0_111] : memref<288x64xbf16, #tpu.memory_space<vmem>>, vector<32x64xbf16>
    %cst_112 = arith.constant dense<0.000000e+00> : vector<56x64xf32>
    %152 = tpu.matmul %150, %151, %cst_112 {dimension_numbers = #tpu.dot_dimension_numbers<[1], [0], [0], [1], [0, 0, 1, 1], [], []>} : vector<56x32xbf16>, vector<32x64xbf16>, vector<56x64xf32> -> vector<56x64xf32>
    %153 = arith.addf %146, %152 : vector<56x64xf32>
    %c8_113 = arith.constant 8 : index
    %c0_114 = arith.constant 0 : index
    %c0_115 = arith.constant 0 : index
    %154 = vector.load %arg6[%c8_113, %c0_114, %c0_115] : memref<9x56x168xbf16, #tpu.memory_space<vmem>>, vector<1x56x168xbf16>
    %155 = vector.shape_cast %154 : vector<1x56x168xbf16> to vector<56x168xbf16>
    %cst_116 = arith.constant dense<0.000000e+00> : vector<56x32xf32>
    %156 = tpu.matmul %155, %96, %cst_116 {dimension_numbers = #tpu.dot_dimension_numbers<[1], [0], [0], [1], [0, 0, 1, 1], [], []>} : vector<56x168xbf16>, vector<168x32xbf16>, vector<56x32xf32> -> vector<56x32xf32>
    %157 = arith.truncf %156 : vector<56x32xf32> to vector<56x32xbf16>
    %c256 = arith.constant 256 : index
    %c0_117 = arith.constant 0 : index
    %158 = vector.load %arg7[%c256, %c0_117] : memref<288x64xbf16, #tpu.memory_space<vmem>>, vector<32x64xbf16>
    %cst_118 = arith.constant dense<0.000000e+00> : vector<56x64xf32>
    %159 = tpu.matmul %157, %158, %cst_118 {dimension_numbers = #tpu.dot_dimension_numbers<[1], [0], [0], [1], [0, 0, 1, 1], [], []>} : vector<56x32xbf16>, vector<32x64xbf16>, vector<56x64xf32> -> vector<56x64xf32>
    %160 = arith.addf %153, %159 : vector<56x64xf32>
    %cst_119 = arith.constant dense<0.000000e+00> : vector<64xf32>
    %161 = vector.multi_reduction <add>, %160, %cst_119 [0] : vector<56x64xf32> to vector<64xf32>
    %162 = vector.shape_cast %161 : vector<64xf32> to vector<1x64xf32>
    %cst_120 = arith.constant 2.000000e-02 : f32
    %163 = vector.broadcast %cst_120 : f32 to vector<1x64xf32>
    %164 = arith.mulf %162, %163 : vector<1x64xf32>
    %165 = arith.mulf %160, %160 : vector<56x64xf32>
    %cst_121 = arith.constant dense<0.000000e+00> : vector<64xf32>
    %166 = vector.multi_reduction <add>, %165, %cst_121 [0] : vector<56x64xf32> to vector<64xf32>
    %167 = vector.shape_cast %166 : vector<64xf32> to vector<1x64xf32>
    %cst_122 = arith.constant 2.000000e-02 : f32
    %168 = vector.broadcast %cst_122 : f32 to vector<1x64xf32>
    %169 = arith.mulf %167, %168 : vector<1x64xf32>
    %170 = arith.mulf %164, %164 : vector<1x64xf32>
    %171 = arith.subf %169, %170 : vector<1x64xf32>
    %cst_123 = arith.constant 0.000000e+00 : f32
    %172 = vector.broadcast %cst_123 : f32 to vector<1x64xf32>
    %173 = arith.maximumf %171, %172 : vector<1x64xf32>
    %c0_124 = arith.constant 0 : index
    %c0_125 = arith.constant 0 : index
    %174 = vector.load %arg8[%c0_124, %c0_125] : memref<1x64xf32, #tpu.memory_space<vmem>>, vector<1x64xf32>
    %cst_126 = arith.constant 9.99999974E-6 : f32
    %175 = vector.broadcast %cst_126 : f32 to vector<1x64xf32>
    %176 = arith.addf %173, %175 : vector<1x64xf32>
    %177 = math.rsqrt %176 : vector<1x64xf32>
    %178 = arith.mulf %174, %177 : vector<1x64xf32>
    %c0_127 = arith.constant 0 : index
    %c0_128 = arith.constant 0 : index
    %179 = vector.load %arg9[%c0_127, %c0_128] : memref<1x64xf32, #tpu.memory_space<vmem>>, vector<1x64xf32>
    %180 = arith.mulf %178, %164 : vector<1x64xf32>
    %181 = arith.subf %179, %180 : vector<1x64xf32>
    %182 = vector.broadcast %178 : vector<1x64xf32> to vector<56x64xf32>
    %183 = arith.mulf %160, %182 : vector<56x64xf32>
    %184 = vector.broadcast %181 : vector<1x64xf32> to vector<56x64xf32>
    %185 = arith.addf %183, %184 : vector<56x64xf32>
    %cst_129 = arith.constant 0.000000e+00 : f32
    %186 = vector.broadcast %cst_129 : f32 to vector<56x64xf32>
    %187 = arith.cmpf oge, %185, %186 : vector<56x64xf32>
    %cst_130 = arith.constant 0.00999999977 : f32
    %188 = vector.broadcast %cst_130 : f32 to vector<56x64xf32>
    %189 = arith.mulf %188, %185 : vector<56x64xf32>
    %190 = arith.select %187, %185, %189 : vector<56x64xi1>, vector<56x64xf32>
    %191 = arith.truncf %190 : vector<56x64xf32> to vector<56x64xbf16>
    %cst_131 = arith.constant 0.000000e+00 : f32
    %192 = vector.broadcast %cst_131 : f32 to vector<56x64xf32>
    %c0_132 = arith.constant 0 : index
    %c0_133 = arith.constant 0 : index
    %c0_134 = arith.constant 0 : index
    %193 = vector.load %arg10[%c0_132, %c0_133, %c0_134] : memref<9x56x56xbf16, #tpu.memory_space<vmem>>, vector<1x56x56xbf16>
    %194 = vector.shape_cast %193 : vector<1x56x56xbf16> to vector<56x56xbf16>
    %cst_135 = arith.constant dense<0.000000e+00> : vector<56x64xf32>
    %195 = tpu.matmul %194, %191, %cst_135 {dimension_numbers = #tpu.dot_dimension_numbers<[1], [0], [0], [1], [0, 0, 1, 1], [], []>} : vector<56x56xbf16>, vector<56x64xbf16>, vector<56x64xf32> -> vector<56x64xf32>
    %196 = arith.truncf %195 : vector<56x64xf32> to vector<56x64xbf16>
    %c0_136 = arith.constant 0 : index
    %c0_137 = arith.constant 0 : index
    %197 = vector.load %arg11[%c0_136, %c0_137] : memref<576x64xbf16, #tpu.memory_space<vmem>>, vector<64x64xbf16>
    %cst_138 = arith.constant dense<0.000000e+00> : vector<56x64xf32>
    %198 = tpu.matmul %196, %197, %cst_138 {dimension_numbers = #tpu.dot_dimension_numbers<[1], [0], [0], [1], [0, 0, 1, 1], [], []>} : vector<56x64xbf16>, vector<64x64xbf16>, vector<56x64xf32> -> vector<56x64xf32>
    %199 = arith.addf %192, %198 : vector<56x64xf32>
    %c1_139 = arith.constant 1 : index
    %c0_140 = arith.constant 0 : index
    %c0_141 = arith.constant 0 : index
    %200 = vector.load %arg10[%c1_139, %c0_140, %c0_141] : memref<9x56x56xbf16, #tpu.memory_space<vmem>>, vector<1x56x56xbf16>
    %201 = vector.shape_cast %200 : vector<1x56x56xbf16> to vector<56x56xbf16>
    %cst_142 = arith.constant dense<0.000000e+00> : vector<56x64xf32>
    %202 = tpu.matmul %201, %191, %cst_142 {dimension_numbers = #tpu.dot_dimension_numbers<[1], [0], [0], [1], [0, 0, 1, 1], [], []>} : vector<56x56xbf16>, vector<56x64xbf16>, vector<56x64xf32> -> vector<56x64xf32>
    %203 = arith.truncf %202 : vector<56x64xf32> to vector<56x64xbf16>
    %c64_143 = arith.constant 64 : index
    %c0_144 = arith.constant 0 : index
    %204 = vector.load %arg11[%c64_143, %c0_144] : memref<576x64xbf16, #tpu.memory_space<vmem>>, vector<64x64xbf16>
    %cst_145 = arith.constant dense<0.000000e+00> : vector<56x64xf32>
    %205 = tpu.matmul %203, %204, %cst_145 {dimension_numbers = #tpu.dot_dimension_numbers<[1], [0], [0], [1], [0, 0, 1, 1], [], []>} : vector<56x64xbf16>, vector<64x64xbf16>, vector<56x64xf32> -> vector<56x64xf32>
    %206 = arith.addf %199, %205 : vector<56x64xf32>
    %c2_146 = arith.constant 2 : index
    %c0_147 = arith.constant 0 : index
    %c0_148 = arith.constant 0 : index
    %207 = vector.load %arg10[%c2_146, %c0_147, %c0_148] : memref<9x56x56xbf16, #tpu.memory_space<vmem>>, vector<1x56x56xbf16>
    %208 = vector.shape_cast %207 : vector<1x56x56xbf16> to vector<56x56xbf16>
    %cst_149 = arith.constant dense<0.000000e+00> : vector<56x64xf32>
    %209 = tpu.matmul %208, %191, %cst_149 {dimension_numbers = #tpu.dot_dimension_numbers<[1], [0], [0], [1], [0, 0, 1, 1], [], []>} : vector<56x56xbf16>, vector<56x64xbf16>, vector<56x64xf32> -> vector<56x64xf32>
    %210 = arith.truncf %209 : vector<56x64xf32> to vector<56x64xbf16>
    %c128_150 = arith.constant 128 : index
    %c0_151 = arith.constant 0 : index
    %211 = vector.load %arg11[%c128_150, %c0_151] : memref<576x64xbf16, #tpu.memory_space<vmem>>, vector<64x64xbf16>
    %cst_152 = arith.constant dense<0.000000e+00> : vector<56x64xf32>
    %212 = tpu.matmul %210, %211, %cst_152 {dimension_numbers = #tpu.dot_dimension_numbers<[1], [0], [0], [1], [0, 0, 1, 1], [], []>} : vector<56x64xbf16>, vector<64x64xbf16>, vector<56x64xf32> -> vector<56x64xf32>
    %213 = arith.addf %206, %212 : vector<56x64xf32>
    %c3_153 = arith.constant 3 : index
    %c0_154 = arith.constant 0 : index
    %c0_155 = arith.constant 0 : index
    %214 = vector.load %arg10[%c3_153, %c0_154, %c0_155] : memref<9x56x56xbf16, #tpu.memory_space<vmem>>, vector<1x56x56xbf16>
    %215 = vector.shape_cast %214 : vector<1x56x56xbf16> to vector<56x56xbf16>
    %cst_156 = arith.constant dense<0.000000e+00> : vector<56x64xf32>
    %216 = tpu.matmul %215, %191, %cst_156 {dimension_numbers = #tpu.dot_dimension_numbers<[1], [0], [0], [1], [0, 0, 1, 1], [], []>} : vector<56x56xbf16>, vector<56x64xbf16>, vector<56x64xf32> -> vector<56x64xf32>
    %217 = arith.truncf %216 : vector<56x64xf32> to vector<56x64xbf16>
    %c192_157 = arith.constant 192 : index
    %c0_158 = arith.constant 0 : index
    %218 = vector.load %arg11[%c192_157, %c0_158] : memref<576x64xbf16, #tpu.memory_space<vmem>>, vector<64x64xbf16>
    %cst_159 = arith.constant dense<0.000000e+00> : vector<56x64xf32>
    %219 = tpu.matmul %217, %218, %cst_159 {dimension_numbers = #tpu.dot_dimension_numbers<[1], [0], [0], [1], [0, 0, 1, 1], [], []>} : vector<56x64xbf16>, vector<64x64xbf16>, vector<56x64xf32> -> vector<56x64xf32>
    %220 = arith.addf %213, %219 : vector<56x64xf32>
    %c4_160 = arith.constant 4 : index
    %c0_161 = arith.constant 0 : index
    %c0_162 = arith.constant 0 : index
    %221 = vector.load %arg10[%c4_160, %c0_161, %c0_162] : memref<9x56x56xbf16, #tpu.memory_space<vmem>>, vector<1x56x56xbf16>
    %222 = vector.shape_cast %221 : vector<1x56x56xbf16> to vector<56x56xbf16>
    %cst_163 = arith.constant dense<0.000000e+00> : vector<56x64xf32>
    %223 = tpu.matmul %222, %191, %cst_163 {dimension_numbers = #tpu.dot_dimension_numbers<[1], [0], [0], [1], [0, 0, 1, 1], [], []>} : vector<56x56xbf16>, vector<56x64xbf16>, vector<56x64xf32> -> vector<56x64xf32>
    %224 = arith.truncf %223 : vector<56x64xf32> to vector<56x64xbf16>
    %c256_164 = arith.constant 256 : index
    %c0_165 = arith.constant 0 : index
    %225 = vector.load %arg11[%c256_164, %c0_165] : memref<576x64xbf16, #tpu.memory_space<vmem>>, vector<64x64xbf16>
    %cst_166 = arith.constant dense<0.000000e+00> : vector<56x64xf32>
    %226 = tpu.matmul %224, %225, %cst_166 {dimension_numbers = #tpu.dot_dimension_numbers<[1], [0], [0], [1], [0, 0, 1, 1], [], []>} : vector<56x64xbf16>, vector<64x64xbf16>, vector<56x64xf32> -> vector<56x64xf32>
    %227 = arith.addf %220, %226 : vector<56x64xf32>
    %c5_167 = arith.constant 5 : index
    %c0_168 = arith.constant 0 : index
    %c0_169 = arith.constant 0 : index
    %228 = vector.load %arg10[%c5_167, %c0_168, %c0_169] : memref<9x56x56xbf16, #tpu.memory_space<vmem>>, vector<1x56x56xbf16>
    %229 = vector.shape_cast %228 : vector<1x56x56xbf16> to vector<56x56xbf16>
    %cst_170 = arith.constant dense<0.000000e+00> : vector<56x64xf32>
    %230 = tpu.matmul %229, %191, %cst_170 {dimension_numbers = #tpu.dot_dimension_numbers<[1], [0], [0], [1], [0, 0, 1, 1], [], []>} : vector<56x56xbf16>, vector<56x64xbf16>, vector<56x64xf32> -> vector<56x64xf32>
    %231 = arith.truncf %230 : vector<56x64xf32> to vector<56x64xbf16>
    %c320 = arith.constant 320 : index
    %c0_171 = arith.constant 0 : index
    %232 = vector.load %arg11[%c320, %c0_171] : memref<576x64xbf16, #tpu.memory_space<vmem>>, vector<64x64xbf16>
    %cst_172 = arith.constant dense<0.000000e+00> : vector<56x64xf32>
    %233 = tpu.matmul %231, %232, %cst_172 {dimension_numbers = #tpu.dot_dimension_numbers<[1], [0], [0], [1], [0, 0, 1, 1], [], []>} : vector<56x64xbf16>, vector<64x64xbf16>, vector<56x64xf32> -> vector<56x64xf32>
    %234 = arith.addf %227, %233 : vector<56x64xf32>
    %c6_173 = arith.constant 6 : index
    %c0_174 = arith.constant 0 : index
    %c0_175 = arith.constant 0 : index
    %235 = vector.load %arg10[%c6_173, %c0_174, %c0_175] : memref<9x56x56xbf16, #tpu.memory_space<vmem>>, vector<1x56x56xbf16>
    %236 = vector.shape_cast %235 : vector<1x56x56xbf16> to vector<56x56xbf16>
    %cst_176 = arith.constant dense<0.000000e+00> : vector<56x64xf32>
    %237 = tpu.matmul %236, %191, %cst_176 {dimension_numbers = #tpu.dot_dimension_numbers<[1], [0], [0], [1], [0, 0, 1, 1], [], []>} : vector<56x56xbf16>, vector<56x64xbf16>, vector<56x64xf32> -> vector<56x64xf32>
    %238 = arith.truncf %237 : vector<56x64xf32> to vector<56x64xbf16>
    %c384 = arith.constant 384 : index
    %c0_177 = arith.constant 0 : index
    %239 = vector.load %arg11[%c384, %c0_177] : memref<576x64xbf16, #tpu.memory_space<vmem>>, vector<64x64xbf16>
    %cst_178 = arith.constant dense<0.000000e+00> : vector<56x64xf32>
    %240 = tpu.matmul %238, %239, %cst_178 {dimension_numbers = #tpu.dot_dimension_numbers<[1], [0], [0], [1], [0, 0, 1, 1], [], []>} : vector<56x64xbf16>, vector<64x64xbf16>, vector<56x64xf32> -> vector<56x64xf32>
    %241 = arith.addf %234, %240 : vector<56x64xf32>
    %c7_179 = arith.constant 7 : index
    %c0_180 = arith.constant 0 : index
    %c0_181 = arith.constant 0 : index
    %242 = vector.load %arg10[%c7_179, %c0_180, %c0_181] : memref<9x56x56xbf16, #tpu.memory_space<vmem>>, vector<1x56x56xbf16>
    %243 = vector.shape_cast %242 : vector<1x56x56xbf16> to vector<56x56xbf16>
    %cst_182 = arith.constant dense<0.000000e+00> : vector<56x64xf32>
    %244 = tpu.matmul %243, %191, %cst_182 {dimension_numbers = #tpu.dot_dimension_numbers<[1], [0], [0], [1], [0, 0, 1, 1], [], []>} : vector<56x56xbf16>, vector<56x64xbf16>, vector<56x64xf32> -> vector<56x64xf32>
    %245 = arith.truncf %244 : vector<56x64xf32> to vector<56x64xbf16>
    %c448 = arith.constant 448 : index
    %c0_183 = arith.constant 0 : index
    %246 = vector.load %arg11[%c448, %c0_183] : memref<576x64xbf16, #tpu.memory_space<vmem>>, vector<64x64xbf16>
    %cst_184 = arith.constant dense<0.000000e+00> : vector<56x64xf32>
    %247 = tpu.matmul %245, %246, %cst_184 {dimension_numbers = #tpu.dot_dimension_numbers<[1], [0], [0], [1], [0, 0, 1, 1], [], []>} : vector<56x64xbf16>, vector<64x64xbf16>, vector<56x64xf32> -> vector<56x64xf32>
    %248 = arith.addf %241, %247 : vector<56x64xf32>
    %c8_185 = arith.constant 8 : index
    %c0_186 = arith.constant 0 : index
    %c0_187 = arith.constant 0 : index
    %249 = vector.load %arg10[%c8_185, %c0_186, %c0_187] : memref<9x56x56xbf16, #tpu.memory_space<vmem>>, vector<1x56x56xbf16>
    %250 = vector.shape_cast %249 : vector<1x56x56xbf16> to vector<56x56xbf16>
    %cst_188 = arith.constant dense<0.000000e+00> : vector<56x64xf32>
    %251 = tpu.matmul %250, %191, %cst_188 {dimension_numbers = #tpu.dot_dimension_numbers<[1], [0], [0], [1], [0, 0, 1, 1], [], []>} : vector<56x56xbf16>, vector<56x64xbf16>, vector<56x64xf32> -> vector<56x64xf32>
    %252 = arith.truncf %251 : vector<56x64xf32> to vector<56x64xbf16>
    %c512 = arith.constant 512 : index
    %c0_189 = arith.constant 0 : index
    %253 = vector.load %arg11[%c512, %c0_189] : memref<576x64xbf16, #tpu.memory_space<vmem>>, vector<64x64xbf16>
    %cst_190 = arith.constant dense<0.000000e+00> : vector<56x64xf32>
    %254 = tpu.matmul %252, %253, %cst_190 {dimension_numbers = #tpu.dot_dimension_numbers<[1], [0], [0], [1], [0, 0, 1, 1], [], []>} : vector<56x64xbf16>, vector<64x64xbf16>, vector<56x64xf32> -> vector<56x64xf32>
    %255 = arith.addf %248, %254 : vector<56x64xf32>
    %cst_191 = arith.constant dense<0.000000e+00> : vector<64xf32>
    %256 = vector.multi_reduction <add>, %255, %cst_191 [0] : vector<56x64xf32> to vector<64xf32>
    %257 = vector.shape_cast %256 : vector<64xf32> to vector<1x64xf32>
    %cst_192 = arith.constant 2.000000e-02 : f32
    %258 = vector.broadcast %cst_192 : f32 to vector<1x64xf32>
    %259 = arith.mulf %257, %258 : vector<1x64xf32>
    %260 = arith.mulf %255, %255 : vector<56x64xf32>
    %cst_193 = arith.constant dense<0.000000e+00> : vector<64xf32>
    %261 = vector.multi_reduction <add>, %260, %cst_193 [0] : vector<56x64xf32> to vector<64xf32>
    %262 = vector.shape_cast %261 : vector<64xf32> to vector<1x64xf32>
    %cst_194 = arith.constant 2.000000e-02 : f32
    %263 = vector.broadcast %cst_194 : f32 to vector<1x64xf32>
    %264 = arith.mulf %262, %263 : vector<1x64xf32>
    %265 = arith.mulf %259, %259 : vector<1x64xf32>
    %266 = arith.subf %264, %265 : vector<1x64xf32>
    %cst_195 = arith.constant 0.000000e+00 : f32
    %267 = vector.broadcast %cst_195 : f32 to vector<1x64xf32>
    %268 = arith.maximumf %266, %267 : vector<1x64xf32>
    %c0_196 = arith.constant 0 : index
    %c0_197 = arith.constant 0 : index
    %269 = vector.load %arg12[%c0_196, %c0_197] : memref<1x64xf32, #tpu.memory_space<vmem>>, vector<1x64xf32>
    %cst_198 = arith.constant 9.99999974E-6 : f32
    %270 = vector.broadcast %cst_198 : f32 to vector<1x64xf32>
    %271 = arith.addf %268, %270 : vector<1x64xf32>
    %272 = math.rsqrt %271 : vector<1x64xf32>
    %273 = arith.mulf %269, %272 : vector<1x64xf32>
    %c0_199 = arith.constant 0 : index
    %c0_200 = arith.constant 0 : index
    %274 = vector.load %arg13[%c0_199, %c0_200] : memref<1x64xf32, #tpu.memory_space<vmem>>, vector<1x64xf32>
    %275 = arith.mulf %273, %259 : vector<1x64xf32>
    %276 = arith.subf %274, %275 : vector<1x64xf32>
    %277 = vector.broadcast %273 : vector<1x64xf32> to vector<56x64xf32>
    %278 = arith.mulf %255, %277 : vector<56x64xf32>
    %279 = vector.broadcast %276 : vector<1x64xf32> to vector<56x64xf32>
    %280 = arith.addf %278, %279 : vector<56x64xf32>
    %cst_201 = arith.constant 0.000000e+00 : f32
    %281 = vector.broadcast %cst_201 : f32 to vector<56x64xf32>
    %282 = arith.cmpf oge, %280, %281 : vector<56x64xf32>
    %cst_202 = arith.constant 0.00999999977 : f32
    %283 = vector.broadcast %cst_202 : f32 to vector<56x64xf32>
    %284 = arith.mulf %283, %280 : vector<56x64xf32>
    %285 = arith.select %282, %280, %284 : vector<56x64xi1>, vector<56x64xf32>
    %286 = arith.truncf %285 : vector<56x64xf32> to vector<56x64xbf16>
    %cst_203 = arith.constant 0.000000e+00 : f32
    %287 = vector.broadcast %cst_203 : f32 to vector<24x128xf32>
    %c0_204 = arith.constant 0 : index
    %c0_205 = arith.constant 0 : index
    %c0_206 = arith.constant 0 : index
    %288 = vector.load %arg14[%c0_204, %c0_205, %c0_206] : memref<9x24x56xbf16, #tpu.memory_space<vmem>>, vector<1x24x56xbf16>
    %289 = vector.shape_cast %288 : vector<1x24x56xbf16> to vector<24x56xbf16>
    %cst_207 = arith.constant dense<0.000000e+00> : vector<24x64xf32>
    %290 = tpu.matmul %289, %286, %cst_207 {dimension_numbers = #tpu.dot_dimension_numbers<[1], [0], [0], [1], [0, 0, 1, 1], [], []>} : vector<24x56xbf16>, vector<56x64xbf16>, vector<24x64xf32> -> vector<24x64xf32>
    %291 = arith.truncf %290 : vector<24x64xf32> to vector<24x64xbf16>
    %c0_208 = arith.constant 0 : index
    %c0_209 = arith.constant 0 : index
    %292 = vector.load %arg15[%c0_208, %c0_209] : memref<576x128xbf16, #tpu.memory_space<vmem>>, vector<64x128xbf16>
    %cst_210 = arith.constant dense<0.000000e+00> : vector<24x128xf32>
    %293 = tpu.matmul %291, %292, %cst_210 {dimension_numbers = #tpu.dot_dimension_numbers<[1], [0], [0], [1], [0, 0, 1, 1], [], []>} : vector<24x64xbf16>, vector<64x128xbf16>, vector<24x128xf32> -> vector<24x128xf32>
    %294 = arith.addf %287, %293 : vector<24x128xf32>
    %c1_211 = arith.constant 1 : index
    %c0_212 = arith.constant 0 : index
    %c0_213 = arith.constant 0 : index
    %295 = vector.load %arg14[%c1_211, %c0_212, %c0_213] : memref<9x24x56xbf16, #tpu.memory_space<vmem>>, vector<1x24x56xbf16>
    %296 = vector.shape_cast %295 : vector<1x24x56xbf16> to vector<24x56xbf16>
    %cst_214 = arith.constant dense<0.000000e+00> : vector<24x64xf32>
    %297 = tpu.matmul %296, %286, %cst_214 {dimension_numbers = #tpu.dot_dimension_numbers<[1], [0], [0], [1], [0, 0, 1, 1], [], []>} : vector<24x56xbf16>, vector<56x64xbf16>, vector<24x64xf32> -> vector<24x64xf32>
    %298 = arith.truncf %297 : vector<24x64xf32> to vector<24x64xbf16>
    %c64_215 = arith.constant 64 : index
    %c0_216 = arith.constant 0 : index
    %299 = vector.load %arg15[%c64_215, %c0_216] : memref<576x128xbf16, #tpu.memory_space<vmem>>, vector<64x128xbf16>
    %cst_217 = arith.constant dense<0.000000e+00> : vector<24x128xf32>
    %300 = tpu.matmul %298, %299, %cst_217 {dimension_numbers = #tpu.dot_dimension_numbers<[1], [0], [0], [1], [0, 0, 1, 1], [], []>} : vector<24x64xbf16>, vector<64x128xbf16>, vector<24x128xf32> -> vector<24x128xf32>
    %301 = arith.addf %294, %300 : vector<24x128xf32>
    %c2_218 = arith.constant 2 : index
    %c0_219 = arith.constant 0 : index
    %c0_220 = arith.constant 0 : index
    %302 = vector.load %arg14[%c2_218, %c0_219, %c0_220] : memref<9x24x56xbf16, #tpu.memory_space<vmem>>, vector<1x24x56xbf16>
    %303 = vector.shape_cast %302 : vector<1x24x56xbf16> to vector<24x56xbf16>
    %cst_221 = arith.constant dense<0.000000e+00> : vector<24x64xf32>
    %304 = tpu.matmul %303, %286, %cst_221 {dimension_numbers = #tpu.dot_dimension_numbers<[1], [0], [0], [1], [0, 0, 1, 1], [], []>} : vector<24x56xbf16>, vector<56x64xbf16>, vector<24x64xf32> -> vector<24x64xf32>
    %305 = arith.truncf %304 : vector<24x64xf32> to vector<24x64xbf16>
    %c128_222 = arith.constant 128 : index
    %c0_223 = arith.constant 0 : index
    %306 = vector.load %arg15[%c128_222, %c0_223] : memref<576x128xbf16, #tpu.memory_space<vmem>>, vector<64x128xbf16>
    %cst_224 = arith.constant dense<0.000000e+00> : vector<24x128xf32>
    %307 = tpu.matmul %305, %306, %cst_224 {dimension_numbers = #tpu.dot_dimension_numbers<[1], [0], [0], [1], [0, 0, 1, 1], [], []>} : vector<24x64xbf16>, vector<64x128xbf16>, vector<24x128xf32> -> vector<24x128xf32>
    %308 = arith.addf %301, %307 : vector<24x128xf32>
    %c3_225 = arith.constant 3 : index
    %c0_226 = arith.constant 0 : index
    %c0_227 = arith.constant 0 : index
    %309 = vector.load %arg14[%c3_225, %c0_226, %c0_227] : memref<9x24x56xbf16, #tpu.memory_space<vmem>>, vector<1x24x56xbf16>
    %310 = vector.shape_cast %309 : vector<1x24x56xbf16> to vector<24x56xbf16>
    %cst_228 = arith.constant dense<0.000000e+00> : vector<24x64xf32>
    %311 = tpu.matmul %310, %286, %cst_228 {dimension_numbers = #tpu.dot_dimension_numbers<[1], [0], [0], [1], [0, 0, 1, 1], [], []>} : vector<24x56xbf16>, vector<56x64xbf16>, vector<24x64xf32> -> vector<24x64xf32>
    %312 = arith.truncf %311 : vector<24x64xf32> to vector<24x64xbf16>
    %c192_229 = arith.constant 192 : index
    %c0_230 = arith.constant 0 : index
    %313 = vector.load %arg15[%c192_229, %c0_230] : memref<576x128xbf16, #tpu.memory_space<vmem>>, vector<64x128xbf16>
    %cst_231 = arith.constant dense<0.000000e+00> : vector<24x128xf32>
    %314 = tpu.matmul %312, %313, %cst_231 {dimension_numbers = #tpu.dot_dimension_numbers<[1], [0], [0], [1], [0, 0, 1, 1], [], []>} : vector<24x64xbf16>, vector<64x128xbf16>, vector<24x128xf32> -> vector<24x128xf32>
    %315 = arith.addf %308, %314 : vector<24x128xf32>
    %c4_232 = arith.constant 4 : index
    %c0_233 = arith.constant 0 : index
    %c0_234 = arith.constant 0 : index
    %316 = vector.load %arg14[%c4_232, %c0_233, %c0_234] : memref<9x24x56xbf16, #tpu.memory_space<vmem>>, vector<1x24x56xbf16>
    %317 = vector.shape_cast %316 : vector<1x24x56xbf16> to vector<24x56xbf16>
    %cst_235 = arith.constant dense<0.000000e+00> : vector<24x64xf32>
    %318 = tpu.matmul %317, %286, %cst_235 {dimension_numbers = #tpu.dot_dimension_numbers<[1], [0], [0], [1], [0, 0, 1, 1], [], []>} : vector<24x56xbf16>, vector<56x64xbf16>, vector<24x64xf32> -> vector<24x64xf32>
    %319 = arith.truncf %318 : vector<24x64xf32> to vector<24x64xbf16>
    %c256_236 = arith.constant 256 : index
    %c0_237 = arith.constant 0 : index
    %320 = vector.load %arg15[%c256_236, %c0_237] : memref<576x128xbf16, #tpu.memory_space<vmem>>, vector<64x128xbf16>
    %cst_238 = arith.constant dense<0.000000e+00> : vector<24x128xf32>
    %321 = tpu.matmul %319, %320, %cst_238 {dimension_numbers = #tpu.dot_dimension_numbers<[1], [0], [0], [1], [0, 0, 1, 1], [], []>} : vector<24x64xbf16>, vector<64x128xbf16>, vector<24x128xf32> -> vector<24x128xf32>
    %322 = arith.addf %315, %321 : vector<24x128xf32>
    %c5_239 = arith.constant 5 : index
    %c0_240 = arith.constant 0 : index
    %c0_241 = arith.constant 0 : index
    %323 = vector.load %arg14[%c5_239, %c0_240, %c0_241] : memref<9x24x56xbf16, #tpu.memory_space<vmem>>, vector<1x24x56xbf16>
    %324 = vector.shape_cast %323 : vector<1x24x56xbf16> to vector<24x56xbf16>
    %cst_242 = arith.constant dense<0.000000e+00> : vector<24x64xf32>
    %325 = tpu.matmul %324, %286, %cst_242 {dimension_numbers = #tpu.dot_dimension_numbers<[1], [0], [0], [1], [0, 0, 1, 1], [], []>} : vector<24x56xbf16>, vector<56x64xbf16>, vector<24x64xf32> -> vector<24x64xf32>
    %326 = arith.truncf %325 : vector<24x64xf32> to vector<24x64xbf16>
    %c320_243 = arith.constant 320 : index
    %c0_244 = arith.constant 0 : index
    %327 = vector.load %arg15[%c320_243, %c0_244] : memref<576x128xbf16, #tpu.memory_space<vmem>>, vector<64x128xbf16>
    %cst_245 = arith.constant dense<0.000000e+00> : vector<24x128xf32>
    %328 = tpu.matmul %326, %327, %cst_245 {dimension_numbers = #tpu.dot_dimension_numbers<[1], [0], [0], [1], [0, 0, 1, 1], [], []>} : vector<24x64xbf16>, vector<64x128xbf16>, vector<24x128xf32> -> vector<24x128xf32>
    %329 = arith.addf %322, %328 : vector<24x128xf32>
    %c6_246 = arith.constant 6 : index
    %c0_247 = arith.constant 0 : index
    %c0_248 = arith.constant 0 : index
    %330 = vector.load %arg14[%c6_246, %c0_247, %c0_248] : memref<9x24x56xbf16, #tpu.memory_space<vmem>>, vector<1x24x56xbf16>
    %331 = vector.shape_cast %330 : vector<1x24x56xbf16> to vector<24x56xbf16>
    %cst_249 = arith.constant dense<0.000000e+00> : vector<24x64xf32>
    %332 = tpu.matmul %331, %286, %cst_249 {dimension_numbers = #tpu.dot_dimension_numbers<[1], [0], [0], [1], [0, 0, 1, 1], [], []>} : vector<24x56xbf16>, vector<56x64xbf16>, vector<24x64xf32> -> vector<24x64xf32>
    %333 = arith.truncf %332 : vector<24x64xf32> to vector<24x64xbf16>
    %c384_250 = arith.constant 384 : index
    %c0_251 = arith.constant 0 : index
    %334 = vector.load %arg15[%c384_250, %c0_251] : memref<576x128xbf16, #tpu.memory_space<vmem>>, vector<64x128xbf16>
    %cst_252 = arith.constant dense<0.000000e+00> : vector<24x128xf32>
    %335 = tpu.matmul %333, %334, %cst_252 {dimension_numbers = #tpu.dot_dimension_numbers<[1], [0], [0], [1], [0, 0, 1, 1], [], []>} : vector<24x64xbf16>, vector<64x128xbf16>, vector<24x128xf32> -> vector<24x128xf32>
    %336 = arith.addf %329, %335 : vector<24x128xf32>
    %c7_253 = arith.constant 7 : index
    %c0_254 = arith.constant 0 : index
    %c0_255 = arith.constant 0 : index
    %337 = vector.load %arg14[%c7_253, %c0_254, %c0_255] : memref<9x24x56xbf16, #tpu.memory_space<vmem>>, vector<1x24x56xbf16>
    %338 = vector.shape_cast %337 : vector<1x24x56xbf16> to vector<24x56xbf16>
    %cst_256 = arith.constant dense<0.000000e+00> : vector<24x64xf32>
    %339 = tpu.matmul %338, %286, %cst_256 {dimension_numbers = #tpu.dot_dimension_numbers<[1], [0], [0], [1], [0, 0, 1, 1], [], []>} : vector<24x56xbf16>, vector<56x64xbf16>, vector<24x64xf32> -> vector<24x64xf32>
    %340 = arith.truncf %339 : vector<24x64xf32> to vector<24x64xbf16>
    %c448_257 = arith.constant 448 : index
    %c0_258 = arith.constant 0 : index
    %341 = vector.load %arg15[%c448_257, %c0_258] : memref<576x128xbf16, #tpu.memory_space<vmem>>, vector<64x128xbf16>
    %cst_259 = arith.constant dense<0.000000e+00> : vector<24x128xf32>
    %342 = tpu.matmul %340, %341, %cst_259 {dimension_numbers = #tpu.dot_dimension_numbers<[1], [0], [0], [1], [0, 0, 1, 1], [], []>} : vector<24x64xbf16>, vector<64x128xbf16>, vector<24x128xf32> -> vector<24x128xf32>
    %343 = arith.addf %336, %342 : vector<24x128xf32>
    %c8_260 = arith.constant 8 : index
    %c0_261 = arith.constant 0 : index
    %c0_262 = arith.constant 0 : index
    %344 = vector.load %arg14[%c8_260, %c0_261, %c0_262] : memref<9x24x56xbf16, #tpu.memory_space<vmem>>, vector<1x24x56xbf16>
    %345 = vector.shape_cast %344 : vector<1x24x56xbf16> to vector<24x56xbf16>
    %cst_263 = arith.constant dense<0.000000e+00> : vector<24x64xf32>
    %346 = tpu.matmul %345, %286, %cst_263 {dimension_numbers = #tpu.dot_dimension_numbers<[1], [0], [0], [1], [0, 0, 1, 1], [], []>} : vector<24x56xbf16>, vector<56x64xbf16>, vector<24x64xf32> -> vector<24x64xf32>
    %347 = arith.truncf %346 : vector<24x64xf32> to vector<24x64xbf16>
    %c512_264 = arith.constant 512 : index
    %c0_265 = arith.constant 0 : index
    %348 = vector.load %arg15[%c512_264, %c0_265] : memref<576x128xbf16, #tpu.memory_space<vmem>>, vector<64x128xbf16>
    %cst_266 = arith.constant dense<0.000000e+00> : vector<24x128xf32>
    %349 = tpu.matmul %347, %348, %cst_266 {dimension_numbers = #tpu.dot_dimension_numbers<[1], [0], [0], [1], [0, 0, 1, 1], [], []>} : vector<24x64xbf16>, vector<64x128xbf16>, vector<24x128xf32> -> vector<24x128xf32>
    %350 = arith.addf %343, %349 : vector<24x128xf32>
    %cst_267 = arith.constant dense<0.000000e+00> : vector<128xf32>
    %351 = vector.multi_reduction <add>, %350, %cst_267 [0] : vector<24x128xf32> to vector<128xf32>
    %352 = vector.shape_cast %351 : vector<128xf32> to vector<1x128xf32>
    %cst_268 = arith.constant 0.055555556 : f32
    %353 = vector.broadcast %cst_268 : f32 to vector<1x128xf32>
    %354 = arith.mulf %352, %353 : vector<1x128xf32>
    %355 = arith.mulf %350, %350 : vector<24x128xf32>
    %cst_269 = arith.constant dense<0.000000e+00> : vector<128xf32>
    %356 = vector.multi_reduction <add>, %355, %cst_269 [0] : vector<24x128xf32> to vector<128xf32>
    %357 = vector.shape_cast %356 : vector<128xf32> to vector<1x128xf32>
    %cst_270 = arith.constant 0.055555556 : f32
    %358 = vector.broadcast %cst_270 : f32 to vector<1x128xf32>
    %359 = arith.mulf %357, %358 : vector<1x128xf32>
    %360 = arith.mulf %354, %354 : vector<1x128xf32>
    %361 = arith.subf %359, %360 : vector<1x128xf32>
    %cst_271 = arith.constant 0.000000e+00 : f32
    %362 = vector.broadcast %cst_271 : f32 to vector<1x128xf32>
    %363 = arith.maximumf %361, %362 : vector<1x128xf32>
    %c0_272 = arith.constant 0 : index
    %c0_273 = arith.constant 0 : index
    %364 = vector.load %arg16[%c0_272, %c0_273] : memref<1x128xf32, #tpu.memory_space<vmem>>, vector<1x128xf32>
    %cst_274 = arith.constant 9.99999974E-6 : f32
    %365 = vector.broadcast %cst_274 : f32 to vector<1x128xf32>
    %366 = arith.addf %363, %365 : vector<1x128xf32>
    %367 = math.rsqrt %366 : vector<1x128xf32>
    %368 = arith.mulf %364, %367 : vector<1x128xf32>
    %c0_275 = arith.constant 0 : index
    %c0_276 = arith.constant 0 : index
    %369 = vector.load %arg17[%c0_275, %c0_276] : memref<1x128xf32, #tpu.memory_space<vmem>>, vector<1x128xf32>
    %370 = arith.mulf %368, %354 : vector<1x128xf32>
    %371 = arith.subf %369, %370 : vector<1x128xf32>
    %372 = vector.broadcast %368 : vector<1x128xf32> to vector<24x128xf32>
    %373 = arith.mulf %350, %372 : vector<24x128xf32>
    %374 = vector.broadcast %371 : vector<1x128xf32> to vector<24x128xf32>
    %375 = arith.addf %373, %374 : vector<24x128xf32>
    %cst_277 = arith.constant 0.000000e+00 : f32
    %376 = vector.broadcast %cst_277 : f32 to vector<24x128xf32>
    %377 = arith.cmpf oge, %375, %376 : vector<24x128xf32>
    %cst_278 = arith.constant 0.00999999977 : f32
    %378 = vector.broadcast %cst_278 : f32 to vector<24x128xf32>
    %379 = arith.mulf %378, %375 : vector<24x128xf32>
    %380 = arith.select %377, %375, %379 : vector<24x128xi1>, vector<24x128xf32>
    %381 = arith.truncf %380 : vector<24x128xf32> to vector<24x128xbf16>
    %cst_279 = arith.constant 0.000000e+00 : f32
    %382 = vector.broadcast %cst_279 : f32 to vector<2x64xf32>
    %c0_280 = arith.constant 0 : index
    %c0_281 = arith.constant 0 : index
    %c0_282 = arith.constant 0 : index
    %383 = vector.load %arg18[%c0_280, %c0_281, %c0_282] : memref<9x2x24xbf16, #tpu.memory_space<vmem>>, vector<1x2x24xbf16>
    %384 = vector.shape_cast %383 : vector<1x2x24xbf16> to vector<2x24xbf16>
    %cst_283 = arith.constant dense<0.000000e+00> : vector<2x128xf32>
    %385 = tpu.matmul %384, %381, %cst_283 {dimension_numbers = #tpu.dot_dimension_numbers<[1], [0], [0], [1], [0, 0, 1, 1], [], []>} : vector<2x24xbf16>, vector<24x128xbf16>, vector<2x128xf32> -> vector<2x128xf32>
    %386 = arith.truncf %385 : vector<2x128xf32> to vector<2x128xbf16>
    %c0_284 = arith.constant 0 : index
    %c0_285 = arith.constant 0 : index
    %387 = vector.load %arg19[%c0_284, %c0_285] : memref<1152x64xbf16, #tpu.memory_space<vmem>>, vector<128x64xbf16>
    %cst_286 = arith.constant dense<0.000000e+00> : vector<2x64xf32>
    %388 = tpu.matmul %386, %387, %cst_286 {dimension_numbers = #tpu.dot_dimension_numbers<[1], [0], [0], [1], [0, 0, 1, 1], [], []>} : vector<2x128xbf16>, vector<128x64xbf16>, vector<2x64xf32> -> vector<2x64xf32>
    %389 = arith.addf %382, %388 : vector<2x64xf32>
    %c1_287 = arith.constant 1 : index
    %c0_288 = arith.constant 0 : index
    %c0_289 = arith.constant 0 : index
    %390 = vector.load %arg18[%c1_287, %c0_288, %c0_289] : memref<9x2x24xbf16, #tpu.memory_space<vmem>>, vector<1x2x24xbf16>
    %391 = vector.shape_cast %390 : vector<1x2x24xbf16> to vector<2x24xbf16>
    %cst_290 = arith.constant dense<0.000000e+00> : vector<2x128xf32>
    %392 = tpu.matmul %391, %381, %cst_290 {dimension_numbers = #tpu.dot_dimension_numbers<[1], [0], [0], [1], [0, 0, 1, 1], [], []>} : vector<2x24xbf16>, vector<24x128xbf16>, vector<2x128xf32> -> vector<2x128xf32>
    %393 = arith.truncf %392 : vector<2x128xf32> to vector<2x128xbf16>
    %c128_291 = arith.constant 128 : index
    %c0_292 = arith.constant 0 : index
    %394 = vector.load %arg19[%c128_291, %c0_292] : memref<1152x64xbf16, #tpu.memory_space<vmem>>, vector<128x64xbf16>
    %cst_293 = arith.constant dense<0.000000e+00> : vector<2x64xf32>
    %395 = tpu.matmul %393, %394, %cst_293 {dimension_numbers = #tpu.dot_dimension_numbers<[1], [0], [0], [1], [0, 0, 1, 1], [], []>} : vector<2x128xbf16>, vector<128x64xbf16>, vector<2x64xf32> -> vector<2x64xf32>
    %396 = arith.addf %389, %395 : vector<2x64xf32>
    %c2_294 = arith.constant 2 : index
    %c0_295 = arith.constant 0 : index
    %c0_296 = arith.constant 0 : index
    %397 = vector.load %arg18[%c2_294, %c0_295, %c0_296] : memref<9x2x24xbf16, #tpu.memory_space<vmem>>, vector<1x2x24xbf16>
    %398 = vector.shape_cast %397 : vector<1x2x24xbf16> to vector<2x24xbf16>
    %cst_297 = arith.constant dense<0.000000e+00> : vector<2x128xf32>
    %399 = tpu.matmul %398, %381, %cst_297 {dimension_numbers = #tpu.dot_dimension_numbers<[1], [0], [0], [1], [0, 0, 1, 1], [], []>} : vector<2x24xbf16>, vector<24x128xbf16>, vector<2x128xf32> -> vector<2x128xf32>
    %400 = arith.truncf %399 : vector<2x128xf32> to vector<2x128xbf16>
    %c256_298 = arith.constant 256 : index
    %c0_299 = arith.constant 0 : index
    %401 = vector.load %arg19[%c256_298, %c0_299] : memref<1152x64xbf16, #tpu.memory_space<vmem>>, vector<128x64xbf16>
    %cst_300 = arith.constant dense<0.000000e+00> : vector<2x64xf32>
    %402 = tpu.matmul %400, %401, %cst_300 {dimension_numbers = #tpu.dot_dimension_numbers<[1], [0], [0], [1], [0, 0, 1, 1], [], []>} : vector<2x128xbf16>, vector<128x64xbf16>, vector<2x64xf32> -> vector<2x64xf32>
    %403 = arith.addf %396, %402 : vector<2x64xf32>
    %c3_301 = arith.constant 3 : index
    %c0_302 = arith.constant 0 : index
    %c0_303 = arith.constant 0 : index
    %404 = vector.load %arg18[%c3_301, %c0_302, %c0_303] : memref<9x2x24xbf16, #tpu.memory_space<vmem>>, vector<1x2x24xbf16>
    %405 = vector.shape_cast %404 : vector<1x2x24xbf16> to vector<2x24xbf16>
    %cst_304 = arith.constant dense<0.000000e+00> : vector<2x128xf32>
    %406 = tpu.matmul %405, %381, %cst_304 {dimension_numbers = #tpu.dot_dimension_numbers<[1], [0], [0], [1], [0, 0, 1, 1], [], []>} : vector<2x24xbf16>, vector<24x128xbf16>, vector<2x128xf32> -> vector<2x128xf32>
    %407 = arith.truncf %406 : vector<2x128xf32> to vector<2x128xbf16>
    %c384_305 = arith.constant 384 : index
    %c0_306 = arith.constant 0 : index
    %408 = vector.load %arg19[%c384_305, %c0_306] : memref<1152x64xbf16, #tpu.memory_space<vmem>>, vector<128x64xbf16>
    %cst_307 = arith.constant dense<0.000000e+00> : vector<2x64xf32>
    %409 = tpu.matmul %407, %408, %cst_307 {dimension_numbers = #tpu.dot_dimension_numbers<[1], [0], [0], [1], [0, 0, 1, 1], [], []>} : vector<2x128xbf16>, vector<128x64xbf16>, vector<2x64xf32> -> vector<2x64xf32>
    %410 = arith.addf %403, %409 : vector<2x64xf32>
    %c4_308 = arith.constant 4 : index
    %c0_309 = arith.constant 0 : index
    %c0_310 = arith.constant 0 : index
    %411 = vector.load %arg18[%c4_308, %c0_309, %c0_310] : memref<9x2x24xbf16, #tpu.memory_space<vmem>>, vector<1x2x24xbf16>
    %412 = vector.shape_cast %411 : vector<1x2x24xbf16> to vector<2x24xbf16>
    %cst_311 = arith.constant dense<0.000000e+00> : vector<2x128xf32>
    %413 = tpu.matmul %412, %381, %cst_311 {dimension_numbers = #tpu.dot_dimension_numbers<[1], [0], [0], [1], [0, 0, 1, 1], [], []>} : vector<2x24xbf16>, vector<24x128xbf16>, vector<2x128xf32> -> vector<2x128xf32>
    %414 = arith.truncf %413 : vector<2x128xf32> to vector<2x128xbf16>
    %c512_312 = arith.constant 512 : index
    %c0_313 = arith.constant 0 : index
    %415 = vector.load %arg19[%c512_312, %c0_313] : memref<1152x64xbf16, #tpu.memory_space<vmem>>, vector<128x64xbf16>
    %cst_314 = arith.constant dense<0.000000e+00> : vector<2x64xf32>
    %416 = tpu.matmul %414, %415, %cst_314 {dimension_numbers = #tpu.dot_dimension_numbers<[1], [0], [0], [1], [0, 0, 1, 1], [], []>} : vector<2x128xbf16>, vector<128x64xbf16>, vector<2x64xf32> -> vector<2x64xf32>
    %417 = arith.addf %410, %416 : vector<2x64xf32>
    %c5_315 = arith.constant 5 : index
    %c0_316 = arith.constant 0 : index
    %c0_317 = arith.constant 0 : index
    %418 = vector.load %arg18[%c5_315, %c0_316, %c0_317] : memref<9x2x24xbf16, #tpu.memory_space<vmem>>, vector<1x2x24xbf16>
    %419 = vector.shape_cast %418 : vector<1x2x24xbf16> to vector<2x24xbf16>
    %cst_318 = arith.constant dense<0.000000e+00> : vector<2x128xf32>
    %420 = tpu.matmul %419, %381, %cst_318 {dimension_numbers = #tpu.dot_dimension_numbers<[1], [0], [0], [1], [0, 0, 1, 1], [], []>} : vector<2x24xbf16>, vector<24x128xbf16>, vector<2x128xf32> -> vector<2x128xf32>
    %421 = arith.truncf %420 : vector<2x128xf32> to vector<2x128xbf16>
    %c640 = arith.constant 640 : index
    %c0_319 = arith.constant 0 : index
    %422 = vector.load %arg19[%c640, %c0_319] : memref<1152x64xbf16, #tpu.memory_space<vmem>>, vector<128x64xbf16>
    %cst_320 = arith.constant dense<0.000000e+00> : vector<2x64xf32>
    %423 = tpu.matmul %421, %422, %cst_320 {dimension_numbers = #tpu.dot_dimension_numbers<[1], [0], [0], [1], [0, 0, 1, 1], [], []>} : vector<2x128xbf16>, vector<128x64xbf16>, vector<2x64xf32> -> vector<2x64xf32>
    %424 = arith.addf %417, %423 : vector<2x64xf32>
    %c6_321 = arith.constant 6 : index
    %c0_322 = arith.constant 0 : index
    %c0_323 = arith.constant 0 : index
    %425 = vector.load %arg18[%c6_321, %c0_322, %c0_323] : memref<9x2x24xbf16, #tpu.memory_space<vmem>>, vector<1x2x24xbf16>
    %426 = vector.shape_cast %425 : vector<1x2x24xbf16> to vector<2x24xbf16>
    %cst_324 = arith.constant dense<0.000000e+00> : vector<2x128xf32>
    %427 = tpu.matmul %426, %381, %cst_324 {dimension_numbers = #tpu.dot_dimension_numbers<[1], [0], [0], [1], [0, 0, 1, 1], [], []>} : vector<2x24xbf16>, vector<24x128xbf16>, vector<2x128xf32> -> vector<2x128xf32>
    %428 = arith.truncf %427 : vector<2x128xf32> to vector<2x128xbf16>
    %c768 = arith.constant 768 : index
    %c0_325 = arith.constant 0 : index
    %429 = vector.load %arg19[%c768, %c0_325] : memref<1152x64xbf16, #tpu.memory_space<vmem>>, vector<128x64xbf16>
    %cst_326 = arith.constant dense<0.000000e+00> : vector<2x64xf32>
    %430 = tpu.matmul %428, %429, %cst_326 {dimension_numbers = #tpu.dot_dimension_numbers<[1], [0], [0], [1], [0, 0, 1, 1], [], []>} : vector<2x128xbf16>, vector<128x64xbf16>, vector<2x64xf32> -> vector<2x64xf32>
    %431 = arith.addf %424, %430 : vector<2x64xf32>
    %c7_327 = arith.constant 7 : index
    %c0_328 = arith.constant 0 : index
    %c0_329 = arith.constant 0 : index
    %432 = vector.load %arg18[%c7_327, %c0_328, %c0_329] : memref<9x2x24xbf16, #tpu.memory_space<vmem>>, vector<1x2x24xbf16>
    %433 = vector.shape_cast %432 : vector<1x2x24xbf16> to vector<2x24xbf16>
    %cst_330 = arith.constant dense<0.000000e+00> : vector<2x128xf32>
    %434 = tpu.matmul %433, %381, %cst_330 {dimension_numbers = #tpu.dot_dimension_numbers<[1], [0], [0], [1], [0, 0, 1, 1], [], []>} : vector<2x24xbf16>, vector<24x128xbf16>, vector<2x128xf32> -> vector<2x128xf32>
    %435 = arith.truncf %434 : vector<2x128xf32> to vector<2x128xbf16>
    %c896 = arith.constant 896 : index
    %c0_331 = arith.constant 0 : index
    %436 = vector.load %arg19[%c896, %c0_331] : memref<1152x64xbf16, #tpu.memory_space<vmem>>, vector<128x64xbf16>
    %cst_332 = arith.constant dense<0.000000e+00> : vector<2x64xf32>
    %437 = tpu.matmul %435, %436, %cst_332 {dimension_numbers = #tpu.dot_dimension_numbers<[1], [0], [0], [1], [0, 0, 1, 1], [], []>} : vector<2x128xbf16>, vector<128x64xbf16>, vector<2x64xf32> -> vector<2x64xf32>
    %438 = arith.addf %431, %437 : vector<2x64xf32>
    %c8_333 = arith.constant 8 : index
    %c0_334 = arith.constant 0 : index
    %c0_335 = arith.constant 0 : index
    %439 = vector.load %arg18[%c8_333, %c0_334, %c0_335] : memref<9x2x24xbf16, #tpu.memory_space<vmem>>, vector<1x2x24xbf16>
    %440 = vector.shape_cast %439 : vector<1x2x24xbf16> to vector<2x24xbf16>
    %cst_336 = arith.constant dense<0.000000e+00> : vector<2x128xf32>
    %441 = tpu.matmul %440, %381, %cst_336 {dimension_numbers = #tpu.dot_dimension_numbers<[1], [0], [0], [1], [0, 0, 1, 1], [], []>} : vector<2x24xbf16>, vector<24x128xbf16>, vector<2x128xf32> -> vector<2x128xf32>
    %442 = arith.truncf %441 : vector<2x128xf32> to vector<2x128xbf16>
    %c1024 = arith.constant 1024 : index
    %c0_337 = arith.constant 0 : index
    %443 = vector.load %arg19[%c1024, %c0_337] : memref<1152x64xbf16, #tpu.memory_space<vmem>>, vector<128x64xbf16>
    %cst_338 = arith.constant dense<0.000000e+00> : vector<2x64xf32>
    %444 = tpu.matmul %442, %443, %cst_338 {dimension_numbers = #tpu.dot_dimension_numbers<[1], [0], [0], [1], [0, 0, 1, 1], [], []>} : vector<2x128xbf16>, vector<128x64xbf16>, vector<2x64xf32> -> vector<2x64xf32>
    %445 = arith.addf %438, %444 : vector<2x64xf32>
    %c0_339 = arith.constant 0 : index
    %c0_340 = arith.constant 0 : index
    %446 = vector.load %arg20[%c0_339, %c0_340] : memref<1x64xf32, #tpu.memory_space<vmem>>, vector<1x64xf32>
    %447 = vector.broadcast %446 : vector<1x64xf32> to vector<2x64xf32>
    %448 = arith.addf %445, %447 : vector<2x64xf32>
    %c0_341 = arith.constant 0 : index
    %c0_342 = arith.constant 0 : index
    %449 = vector.load %arg21[%c0_341, %c0_342] : memref<2x64xf32, #tpu.memory_space<vmem>>, vector<2x64xf32>
    tpu.vector_store %arg21[%c0_341, %c0_342], %448 {strides = array<i32>} : memref<2x64xf32, #tpu.memory_space<vmem>>, vector<2x64xf32>,
    return
  }
  func.func @transform_0(%arg0: i32) -> (i32, i32) {
    %c0_i32 = arith.constant 0 : i32
    %c0_i32_0 = arith.constant 0 : i32
    %c0_i32_1 = arith.constant 0 : i32
    return %c0_i32, %c0_i32_0 : i32, i32
  }
  func.func @transform_1(%arg0: i32) -> (i32, i32, i32) {
    %c0_i32 = arith.constant 0 : i32
    %c0_i32_0 = arith.constant 0 : i32
    %c0_i32_1 = arith.constant 0 : i32
    %c0_i32_2 = arith.constant 0 : i32
    return %c0_i32, %c0_i32_0, %c0_i32_1 : i32, i32, i32
  }
  func.func @transform_2(%arg0: i32) -> (i32, i32) {
    %c0_i32 = arith.constant 0 : i32
    %c0_i32_0 = arith.constant 0 : i32
    %c0_i32_1 = arith.constant 0 : i32
    return %c0_i32, %c0_i32_0 : i32, i32
  }
  func.func @transform_3(%arg0: i32) -> (i32, i32) {
    %c0_i32 = arith.constant 0 : i32
    %c0_i32_0 = arith.constant 0 : i32
    %c0_i32_1 = arith.constant 0 : i32
    return %c0_i32, %c0_i32_0 : i32, i32
  }
  func.func @transform_4(%arg0: i32) -> (i32, i32) {
    %c0_i32 = arith.constant 0 : i32
    %c0_i32_0 = arith.constant 0 : i32
    %c0_i32_1 = arith.constant 0 : i32
    return %c0_i32, %c0_i32_0 : i32, i32
  }
  func.func @transform_5(%arg0: i32) -> (i32, i32, i32) {
    %c0_i32 = arith.constant 0 : i32
    %c0_i32_0 = arith.constant 0 : i32
    %c0_i32_1 = arith.constant 0 : i32
    %c0_i32_2 = arith.constant 0 : i32
    return %c0_i32, %c0_i32_0, %c0_i32_1 : i32, i32, i32
  }
  func.func @transform_6(%arg0: i32) -> (i32, i32) {
    %c0_i32 = arith.constant 0 : i32
    %c0_i32_0 = arith.constant 0 : i32
    %c0_i32_1 = arith.constant 0 : i32
    return %c0_i32, %c0_i32_0 : i32, i32
  }
  func.func @transform_7(%arg0: i32) -> (i32, i32) {
    %c0_i32 = arith.constant 0 : i32
    %c0_i32_0 = arith.constant 0 : i32
    %c0_i32_1 = arith.constant 0 : i32
    return %c0_i32, %c0_i32_0 : i32, i32
  }
  func.func @transform_8(%arg0: i32) -> (i32, i32) {
    %c0_i32 = arith.constant 0 : i32
    %c0_i32_0 = arith.constant 0 : i32
    %c0_i32_1 = arith.constant 0 : i32
    return %c0_i32, %c0_i32_0 : i32, i32
  }
  func.func @transform_9(%arg0: i32) -> (i32, i32, i32) {
    %c0_i32 = arith.constant 0 : i32
    %c0_i32_0 = arith.constant 0 : i32
    %c0_i32_1 = arith.constant 0 : i32
    %c0_i32_2 = arith.constant 0 : i32
    return %c0_i32, %c0_i32_0, %c0_i32_1 : i32, i32, i32
  }
  func.func @transform_10(%arg0: i32) -> (i32, i32) {
    %c0_i32 = arith.constant 0 : i32
    %c0_i32_0 = arith.constant 0 : i32
    %c0_i32_1 = arith.constant 0 : i32
    return %c0_i32, %c0_i32_0 : i32, i32
  }
  func.func @transform_11(%arg0: i32) -> (i32, i32) {
    %c0_i32 = arith.constant 0 : i32
    %c0_i32_0 = arith.constant 0 : i32
    %c0_i32_1 = arith.constant 0 : i32
    return %c0_i32, %c0_i32_0 : i32, i32
  }
  func.func @transform_12(%arg0: i32) -> (i32, i32) {
    %c0_i32 = arith.constant 0 : i32
    %c0_i32_0 = arith.constant 0 : i32
    %c0_i32_1 = arith.constant 0 : i32
    return %c0_i32, %c0_i32_0 : i32, i32
  }
  func.func @transform_13(%arg0: i32) -> (i32, i32, i32) {
    %c0_i32 = arith.constant 0 : i32
    %c0_i32_0 = arith.constant 0 : i32
    %c0_i32_1 = arith.constant 0 : i32
    %c0_i32_2 = arith.constant 0 : i32
    return %c0_i32, %c0_i32_0, %c0_i32_1 : i32, i32, i32
  }
  func.func @transform_14(%arg0: i32) -> (i32, i32) {
    %c0_i32 = arith.constant 0 : i32
    %c0_i32_0 = arith.constant 0 : i32
    %c0_i32_1 = arith.constant 0 : i32
    return %c0_i32, %c0_i32_0 : i32, i32
  }
  func.func @transform_15(%arg0: i32) -> (i32, i32) {
    %c0_i32 = arith.constant 0 : i32
    %c0_i32_0 = arith.constant 0 : i32
    %c0_i32_1 = arith.constant 0 : i32
    return %c0_i32, %c0_i32_0 : i32, i32
  }
  func.func @transform_16(%arg0: i32) -> (i32, i32) {
    %c0_i32 = arith.constant 0 : i32
    %c0_i32_0 = arith.constant 0 : i32
    %c0_i32_1 = arith.constant 0 : i32
    return %c0_i32, %c0_i32_0 : i32, i32
  }
  func.func @transform_17(%arg0: i32) -> (i32, i32, i32) {
    %c0_i32 = arith.constant 0 : i32
    %c0_i32_0 = arith.constant 0 : i32
    %c0_i32_1 = arith.constant 0 : i32
    %c0_i32_2 = arith.constant 0 : i32
    return %c0_i32, %c0_i32_0, %c0_i32_1 : i32, i32, i32
  }
  func.func @transform_18(%arg0: i32) -> (i32, i32) {
    %c0_i32 = arith.constant 0 : i32
    %c0_i32_0 = arith.constant 0 : i32
    %c0_i32_1 = arith.constant 0 : i32
    return %c0_i32, %c0_i32_0 : i32, i32
  }
  func.func @transform_19(%arg0: i32) -> (i32, i32) {
    %c0_i32 = arith.constant 0 : i32
    %c0_i32_0 = arith.constant 0 : i32
    %c0_i32_1 = arith.constant 0 : i32
    return %c0_i32, %c0_i32_0 : i32, i32
  }
  func.func @transform_20(%arg0: i32) -> (i32, i32) {
    %c0_i32 = arith.constant 0 : i32
    %c0_i32_0 = arith.constant 0 : i32
    %c0_i32_1 = arith.constant 0 : i32
    return %c0_i32, %c0_i32_0 : i32, i32
  }
}

</mosaic_0001>

<bundles_post_ra>
// kernel: bc_encoder_forward.1
= control target key start
LH: loop header
LB: loop body
LE: loop exit
PB: predicated region body
PF: predicated region fallthrough
CT: control target
= control target key end

     0   :  { %v15592_v0 = vmov 0   ;;  %vm215_vm0 = vcmask 326656   ;;  %vm249_vm1 = vcmask 1043456   ;;  %v15593_v41 = vmov 0.0   ;;  %s19949_s0 = inlined_call_operand.vmem [shape: f32[168,8], index: 0, kind: input, shape index: {}]   ;;  %s19950_s1 = inlined_call_operand.vmem [shape: bf16[9,168,168], index: 1, kind: input, shape index: {}]   ;;  %s19951_s2 = inlined_call_operand.vmem [shape: bf16[72,32], index: 2, kind: input, shape index: {}]   ;;  %s19952_s5 = inlined_call_operand.vmem [shape: bf16[9,56,168], index: 5, kind: input, shape index: {}]   ;;  %s19953_s3 = inlined_call_operand.vmem [shape: f32[1,32], index: 3, kind: input, shape index: {}]   ;;  %s19954_s4 = inlined_call_operand.vmem [shape: f32[1,32], index: 4, kind: input, shape index: {}]   ;;  %s19955_s6 = inlined_call_operand.vmem [shape: bf16[288,64], index: 6, kind: input, shape index: {}]   ;;  %s19956_s9 = inlined_call_operand.vmem [shape: bf16[9,56,56], index: 9, kind: input, shape index: {}]   ;;  %s19957_s7 = inlined_call_operand.vmem [shape: f32[1,64], index: 7, kind: input, shape index: {}]   ;;  %s19958_s8 = inlined_call_operand.vmem [shape: f32[1,64], index: 8, kind: input, shape index: {}]   ;;  %s19959_s10 = inlined_call_operand.vmem [shape: bf16[576,64], index: 10, kind: input, shape index: {}]   ;;  %s19960_s13 = inlined_call_operand.vmem [shape: bf16[9,24,56], index: 13, kind: input, shape index: {}]   ;;  %s19961_s11 = inlined_call_operand.vmem [shape: f32[1,64], index: 11, kind: input, shape index: {}]   ;;  %s19962_s12 = inlined_call_operand.vmem [shape: f32[1,64], index: 12, kind: input, shape index: {}]   ;;  %s19963_s14 = inlined_call_operand.vmem [shape: bf16[576,128], index: 14, kind: input, shape index: {}]   ;;  %s19964_s18 = inlined_call_operand.vmem [shape: bf16[1152,64], index: 18, kind: input, shape index: {}]   ;;  %s19965_s15 = inlined_call_operand.vmem [shape: f32[1,128], index: 15, kind: input, shape index: {}]   ;;  %s19966_s16 = inlined_call_operand.vmem [shape: f32[1,128], index: 16, kind: input, shape index: {}]   ;;  %s19967_s17 = inlined_call_operand.vmem [shape: bf16[9,2,24], index: 17, kind: input, shape index: {}]   ;;  %s19968_s19 = inlined_call_operand.vmem [shape: f32[1,64], index: 19, kind: input, shape index: {}]   ;;  %s19969_s20 = inlined_call_operand.vmem [shape: f32[2,64], index: 20, kind: output, shape index: {}]  }
   0x1   :  { %19974 = sst [smem:[#allocation2_spill]] %s19949_s0  ;;  %536 = vmatprep.subr.bf16.mxu1 %v15592_v0  ;;  %253 = vmatprep.subr.bf16.mxu0 %v15592_v0  ;;  %vm15594_vm2 = vmmov 0   ;;  %vm668_vm3 = vcmask 64512   ;;  %vm4201_vm4 = vcmask 261120  }
   0x2   :  { %19975 = sst [smem:[#allocation3_spill]] %s19950_s1  ;;  %s19979_s23 = sld [smem:[#allocation2_spill]] }
   0x3   :  { %19976 = sst [smem:[#allocation4_spill]] %s19951_s2  ;;  %s19980_s25 = sld [smem:[#allocation3_spill]] }
   0x4   :  { %19977 = sst [smem:[#allocation5_spill]] %s19952_s5  ;;  %s19981_s24 = sld [smem:[#allocation4_spill]] }
   0x5   :  { %19978 = sst [smem:[#allocation6_spill]] %s19953_s3  ;;  %s19982_s28 = sld [smem:[#allocation5_spill]] }
   0x6   :  { %s19983_s21 = sld [smem:[#allocation6_spill]] }
   0x8   :  { %v66_v1 = vld [vmem:[%s19979_s23] sm:$0xff]  ;;  %v67_v2 = vld [vmem:[%s19979_s23 + $0x8] sm:$0xff]  ;;  %v68_v3 = vld [vmem:[%s19979_s23 + $0x10] sm:$0xff] }
   0x9   :  { %v15711_v4 = vpack.c.bf16 %v67_v2, %v66_v1  ;;  %v69_v5 = vld [vmem:[%s19979_s23 + $0x18] sm:$0xff]  ;;  %v70_v7 = vld [vmem:[%s19979_s23 + $0x20] sm:$0xff]  ;;  %v71_v8 = vld [vmem:[%s19979_s23 + $0x28] sm:$0xff] }
   0xa   :  { %v15717_v6 = vpack.c.bf16 %v69_v5, %v68_v3  ;;  %v72_v9 = vld [vmem:[%s19979_s23 + $0x30] sm:$0xff]  ;;  %v15732_v10 = vpack.c.bf16 %v71_v8, %v70_v7  ;;  %v73_v11 = vld [vmem:[%s19979_s23 + $0x38] sm:$0xff]  ;;  %v74_v14 = vld [vmem:[%s19979_s23 + $0x40] sm:$0xff] }
   0xb   :  { %537 = vmatpush1.bf16.msra.mxu1 %v15711_v4  ;;  %254 = vmatpush1.bf16.msra.mxu0 %v15711_v4  ;;  %v14983_v12 = vld [vmem:[%s19980_s25 + $0xac] ss:$8 sps:$4 sm:$0xff]   ;;  %v15745_v13 = vpack.c.bf16 %v73_v11, %v72_v9  ;;  %v77_v18 = vld [vmem:[%s19979_s23 + $0x58] sm:$0xff]  ;;  %v78_v20 = vld [vmem:[%s19979_s23 + $0x60] sm:$0xff] }
   0xc   :  { %538 = vmatprep.subr.bf16.mxu1 %v15592_v0  ;;  %255 = vmatprep.subr.bf16.mxu0 %v15592_v0  ;;  %v75_v15 = vld [vmem:[%s19979_s23 + $0x48] sm:$0xff]  ;;  %v76_v17 = vld [vmem:[%s19979_s23 + $0x50] sm:$0xff]  ;;  %v81_v25 = vld [vmem:[%s19979_s23 + $0x78] sm:$0xff] }
   0xd   :  { %11539 = vmatprep.mubr.msk.bf16.mxu1 %vm215_vm0, %v14983_v12  ;;  %v15757_v16 = vpack.c.bf16 %v75_v15, %v74_v14  ;;  %v15769_v19 = vpack.c.bf16 %v77_v18, %v76_v17  ;;  %v79_v21 = vld [vmem:[%s19979_s23 + $0x68] sm:$0xff]  ;;  %v80_v24 = vld [vmem:[%s19979_s23 + $0x70] sm:$0xff]  ;;  %v82_v27 = vld [vmem:[%s19979_s23 + $0x80] sm:$0xff] }
   0xe   :  { %v15015_v22 = vld [vmem:[%s19980_s25 + $0x4] ss:$8 sps:$4 sm:$0xff]   ;;  %v15784_v23 = vpack.c.bf16 %v79_v21, %v78_v20  ;;  %v15797_v26 = vpack.c.bf16 %v81_v25, %v80_v24  ;;  %v84_v30 = vld [vmem:[%s19979_s23 + $0x90] sm:$0xff]  ;;  %v85_v31 = vld [vmem:[%s19979_s23 + $0x98] sm:$0xff] }
   0xf   :  { %539 = vmatpush1.bf16.msra.mxu1 %v15717_v6  ;;  %256 = vmatpush1.bf16.msra.mxu0 %v15717_v6  ;;  %v83_v28 = vld [vmem:[%s19979_s23 + $0x88] sm:$0xff]  ;;  %v86_v32 = vld [vmem:[%s19979_s23 + $0xa0] sm:$0xff]  ;;  %v15824_v33 = vpack.c.bf16 %v85_v31, %v84_v30  ;;  %v15016_v39 = vld [vmem:[%s19980_s25 + $0x14] ss:$8 sps:$4 sm:$0xff]  }
  0x10   :  { %540 = vmatprep.subr.bf16.mxu1 %v15592_v0  ;;  %257 = vmatprep.subr.bf16.mxu0 %v15592_v0  ;;  %v15809_v29 = vpack.c.bf16 %v83_v28, %v82_v27  ;;  %v97_v34 = vpack.c.bf16 %v86_v32, %v86_v32  ;;  %v14981_v36 = vld [vmem:[%s19980_s25 + $0xa8] ss:$8 sps:$4 sm:$0xff]   ;;  %v14984_v38 = vld [vmem:[%s19980_s25 + $0xbc] ss:$8 sps:$4 sm:$0xff]   ;;  %v14986_v43 = vld [vmem:[%s19980_s25 + $0xb8] ss:$8 sps:$4 sm:$0xff]  }
  0x11   :  { %11485 = vmatprep.mubr.msk.bf16.mxu0 %vm215_vm0, %v15015_v22  ;;  %v15013_v37 = vld [vmem:[%s19980_s25] ss:$8 sps:$4 sm:$0xff]   ;;  %v667_v40 = vld [vmem:[%s19981_s24 + $0x4] sm:$0xf]  ;;  %v15018_v44 = vld [vmem:[%s19980_s25 + $0x10] ss:$8 sps:$4 sm:$0xff]  }
  0x12   :  { %v15833_v35 = vsel %vm249_vm1, %v97_v34, 0  ;;  %v703_v42 = vsel %vm249_vm1, %v667_v40, 0  ;;  %v14987_v45 = vld [vmem:[%s19980_s25 + $0xcc] ss:$8 sps:$4 sm:$0xff]   ;;  %v14989_v47 = vld [vmem:[%s19980_s25 + $0xc8] ss:$8 sps:$4 sm:$0xff]  }
  0x13   :  { %541 = vmatpush1.bf16.msra.mxu1 %v15732_v10  ;;  %258 = vmatpush1.bf16.msra.mxu0 %v15732_v10  ;;  %v15019_v46 = vld [vmem:[%s19980_s25 + $0x24] ss:$8 sps:$4 sm:$0xff]   ;;  %v15021_v48 = vld [vmem:[%s19980_s25 + $0x20] ss:$8 sps:$4 sm:$0xff]   ;;  %v15022_v50 = vld [vmem:[%s19980_s25 + $0x34] ss:$8 sps:$4 sm:$0xff]  }
  0x14   :  { %542 = vmatprep.subr.bf16.mxu1 %v15592_v0  ;;  %259 = vmatprep.subr.bf16.mxu0 %v15592_v0  ;;  %v14990_v49 = vld [vmem:[%s19980_s25 + $0xdc] ss:$8 sps:$4 sm:$0xff]   ;;  %v14992_v51 = vld [vmem:[%s19980_s25 + $0xd8] ss:$8 sps:$4 sm:$0xff]   ;;  %v14993_v53 = vld [vmem:[%s19980_s25 + $0xec] ss:$8 sps:$4 sm:$0xff]  }
  0x15   :  { %v15024_v52 = vld [vmem:[%s19980_s25 + $0x30] ss:$8 sps:$4 sm:$0xff]   ;;  %v15025_v54 = vld [vmem:[%s19980_s25 + $0x44] ss:$8 sps:$4 sm:$0xff]   ;;  %v15027_v56 = vld [vmem:[%s19980_s25 + $0x40] ss:$8 sps:$4 sm:$0xff]  }
  0x16   :  { %v14995_v55 = vld [vmem:[%s19980_s25 + $0xe8] ss:$8 sps:$4 sm:$0xff]   ;;  %v14996_v57 = vld [vmem:[%s19980_s25 + $0xfc] ss:$8 sps:$4 sm:$0xff]   ;;  %v14998_v59 = vld [vmem:[%s19980_s25 + $0xf8] ss:$8 sps:$4 sm:$0xff]  }
  0x17   :  { %543 = vmatpush1.bf16.msra.mxu1 %v15745_v13  ;;  %260 = vmatpush1.bf16.msra.mxu0 %v15745_v13  ;;  %v15028_v58 = vld [vmem:[%s19980_s25 + $0x54] ss:$8 sps:$4 sm:$0xff]   ;;  %v15030_v60 = vld [vmem:[%s19980_s25 + $0x50] ss:$8 sps:$4 sm:$0xff]   ;;  %v15031_v62 = vld [vmem:[%s19980_s25 + $0x64] ss:$8 sps:$4 sm:$0xff]  }
  0x18   :  { %544 = vmatprep.subr.bf16.mxu1 %v15592_v0  ;;  %261 = vmatprep.subr.bf16.mxu0 %v15592_v0  ;;  %v14999_v61 = vld [vmem:[%s19980_s25 + $0x10c] ss:$8 sps:$4 sm:$0xff]   ;;  %v15001_v63 = vld [vmem:[%s19980_s25 + $0x108] ss:$8 sps:$4 sm:$0xff]   ;;  %v15002_v2 = vld [vmem:[%s19980_s25 + $0x11c] ss:$8 sps:$4 sm:$0xff]  }
  0x19   :  { %v15033_v1 = vld [vmem:[%s19980_s25 + $0x60] ss:$8 sps:$4 sm:$0xff]   ;;  %v15034_v3 = vld [vmem:[%s19980_s25 + $0x74] ss:$8 sps:$4 sm:$0xff]   ;;  %v15036_v7 = vld [vmem:[%s19980_s25 + $0x70] ss:$8 sps:$4 sm:$0xff]  }
  0x1a   :  { %v15004_v5 = vld [vmem:[%s19980_s25 + $0x118] ss:$8 sps:$4 sm:$0xff]   ;;  %v15005_v8 = vld [vmem:[%s19980_s25 + $0x12c] ss:$8 sps:$4 sm:$0xff]   ;;  %v15007_v11 = vld [vmem:[%s19980_s25 + $0x128] ss:$8 sps:$4 sm:$0xff]  }
  0x1b   :  { %545 = vmatpush1.bf16.msra.mxu1 %v15757_v16  ;;  %262 = vmatpush1.bf16.msra.mxu0 %v15757_v16  ;;  %v15037_v9 = vld [vmem:[%s19980_s25 + $0x84] ss:$8 sps:$4 sm:$0xff]   ;;  %v15039_v12 = vld [vmem:[%s19980_s25 + $0x80] ss:$8 sps:$4 sm:$0xff]   ;;  %v15040_v15 = vld [vmem:[%s19980_s25 + $0x94] ss:$8 sps:$4 sm:$0xff]  }
  0x1c   :  { %546 = vmatprep.subr.bf16.mxu1 %v15592_v0  ;;  %263 = vmatprep.subr.bf16.mxu0 %v15592_v0  ;;  %v15008_v14 = vld [vmem:[%s19980_s25 + $0x13c] ss:$8 sps:$4 sm:$0xff]   ;;  %v11516_v17 = vld [vmem:[%s19980_s25 + $0x148] sm:$0xff]  ;;  %v15010_v20 = vld [vmem:[%s19980_s25 + $0x138] ss:$8 sps:$4 sm:$0xff]  }
  0x1d   :  { %v118_v18 = vld [vmem:[%s19980_s25 + $0xa0] sm:$0xff]  ;;  %v15042_v21 = vld [vmem:[%s19980_s25 + $0x90] ss:$8 sps:$4 sm:$0xff]   ;;  %v11538_v22 = vcombine.high %v11516_v17, %v11516_v17  ;;  %v11537_v25 = vcombine.low %v11516_v17, %v11516_v17  ;;  %v15047_v28 = vld [vmem:[%s19980_s25 + $0x154] ss:$8 sps:$4 sm:$0xff]  }
  0x1e   :  { %v11484_v24 = vcombine.high %v118_v18, %v118_v18  ;;  %v11483_v27 = vcombine.low %v118_v18, %v118_v18  ;;  %v15045_v30 = vld [vmem:[%s19980_s25 + $0x150] ss:$8 sps:$4 sm:$0xff]   ;;  %v15048_v31 = vld [vmem:[%s19980_s25 + $0x164] ss:$8 sps:$4 sm:$0xff]   ;;  %v15050_v32 = vld [vmem:[%s19980_s25 + $0x160] ss:$8 sps:$4 sm:$0xff]  }
  0x1f   :  { %547 = vmatpush1.bf16.msra.mxu1 %v15769_v19  ;;  %264 = vmatpush1.bf16.msra.mxu0 %v15769_v19  ;;  %v15051_v34 = vld [vmem:[%s19980_s25 + $0x174] ss:$8 sps:$4 sm:$0xff]   ;;  %v15059_v40 = vld [vmem:[%s19980_s25 + $0x190] ss:$8 sps:$4 sm:$0xff]  }
  0x20   :  { %548 = vmatprep.subr.bf16.mxu1 %v15592_v0  ;;  %265 = vmatprep.subr.bf16.mxu0 %v15592_v0 }
  0x23   :  { %549 = vmatpush1.bf16.msra.mxu1 %v15784_v23  ;;  %266 = vmatpush1.bf16.msra.mxu0 %v15784_v23 }
  0x24   :  { %550 = vmatprep.subr.bf16.mxu1 %v15592_v0  ;;  %267 = vmatprep.subr.bf16.mxu0 %v15592_v0 }
  0x27   :  { %551 = vmatpush1.bf16.msra.mxu1 %v15797_v26  ;;  %268 = vmatpush1.bf16.msra.mxu0 %v15797_v26 }
  0x28   :  { %552 = vmatprep.subr.bf16.mxu1 %v15592_v0  ;;  %269 = vmatprep.subr.bf16.mxu0 %v15592_v0 }
  0x2b   :  { %553 = vmatpush1.bf16.msra.mxu1 %v15809_v29  ;;  %270 = vmatpush1.bf16.msra.mxu0 %v15809_v29 }
  0x2c   :  { %554 = vmatprep.subr.bf16.mxu1 %v15592_v0  ;;  %271 = vmatprep.subr.bf16.mxu0 %v15592_v0 }
  0x2f   :  { %555 = vmatpush1.bf16.msra.mxu1 %v15824_v33  ;;  %272 = vmatpush1.bf16.msra.mxu0 %v15824_v33 }
  0x30   :  { %556 = vmatprep.subr.bf16.mxu1 %v15592_v0  ;;  %273 = vmatprep.subr.bf16.mxu0 %v15592_v0 }
  0x33   :  { %557 = vmatpush1.bf16.msra.mxu1 %v15833_v35  ;;  %274 = vmatpush1.bf16.msra.mxu0 %v15833_v35 }
  0x34   :  { %1132 = vmatprep.subr.bf16.mxu1 %v15592_v0  ;;  %13171 = vmatprep.subr.bf16.mxu0 %v15593_v41 }
  0x36   :  { %569 = vmatmul.mubr.bf16.vlgmr.msra.gmra.mrb[0].mxu1 %v14981_v36  ;;  %286 = vmatmul.mubr.bf16.vlgmr.msra.gmra.mrb[0].mxu0 %v15013_v37  ;;  %v15053_v36 = vld [vmem:[%s19980_s25 + $0x170] ss:$8 sps:$4 sm:$0xff]   ;;  %v15054_v37 = vld [vmem:[%s19980_s25 + $0x184] ss:$8 sps:$4 sm:$0xff]  }
  0x37   :  { %11540 = vmatprep.mubr.msk.bf16.mxu1 %vm215_vm0, %v14984_v38  ;;  %11486 = vmatprep.mubr.msk.bf16.mxu0 %vm215_vm0, %v15016_v39  ;;  %v15056_v38 = vld [vmem:[%s19980_s25 + $0x180] ss:$8 sps:$4 sm:$0xff]   ;;  %v15057_v39 = vld [vmem:[%s19980_s25 + $0x194] ss:$8 sps:$4 sm:$0xff]  }
  0x38   :  { %1133 = vmatpush1.bf16.msra.mxu1 %v15711_v4  ;;  %13172 = vmatpush3.bf16.msra.mxu0 %v703_v42  ;;  %v15060_v42 = vld [vmem:[%s19980_s25 + $0x1a4] ss:$8 sps:$4 sm:$0xff]  }
  0x39   :  { %1134 = vmatprep.subr.bf16.mxu1 %v15592_v0  ;;  %13217 = vmatprep.subr.bf16.mxu0 %v15593_v41 }
  0x3c   :  { %1135 = vmatpush1.bf16.msra.mxu1 %v15717_v6 }
  0x3d   :  { %1136 = vmatprep.subr.bf16.mxu1 %v15592_v0 }
  0x3e   :  { %577 = vmatmul.mubr.bf16.gmra.mrb[4].mxu1 %v14986_v43  ;;  %294 = vmatmul.mubr.bf16.gmra.mrb[4].mxu0 %v15018_v44  ;;  %v15062_v43 = vld [vmem:[%s19980_s25 + $0x1a0] ss:$8 sps:$4 sm:$0xff]   ;;  %v15063_v44 = vld [vmem:[%s19980_s25 + $0x1b4] ss:$8 sps:$4 sm:$0xff]  }
  0x3f   :  { %11541 = vmatprep.mubr.msk.bf16.mxu1 %vm215_vm0, %v14987_v45  ;;  %11487 = vmatprep.mubr.msk.bf16.mxu0 %vm215_vm0, %v15019_v46  ;;  %v15065_v45 = vld [vmem:[%s19980_s25 + $0x1b0] ss:$8 sps:$4 sm:$0xff]   ;;  %v15066_v46 = vld [vmem:[%s19980_s25 + $0x1c4] ss:$8 sps:$4 sm:$0xff]  }
  0x40   :  { %1137 = vmatpush1.bf16.msra.mxu1 %v15732_v10 }
  0x41   :  { %1138 = vmatprep.subr.bf16.mxu1 %v15592_v0 }
  0x44   :  { %1139 = vmatpush1.bf16.msra.mxu1 %v15745_v13 }
  0x45   :  { %1140 = vmatprep.subr.bf16.mxu1 %v15592_v0 }
  0x46   :  { %585 = vmatmul.mubr.bf16.gmra.mrb[8].mxu1 %v14989_v47  ;;  %302 = vmatmul.mubr.bf16.gmra.mrb[8].mxu0 %v15021_v48  ;;  %v15068_v47 = vld [vmem:[%s19980_s25 + $0x1c0] ss:$8 sps:$4 sm:$0xff]   ;;  %v15069_v48 = vld [vmem:[%s19980_s25 + $0x1d4] ss:$8 sps:$4 sm:$0xff]  }
  0x47   :  { %11542 = vmatprep.mubr.msk.bf16.mxu1 %vm215_vm0, %v14990_v49  ;;  %11488 = vmatprep.mubr.msk.bf16.mxu0 %vm215_vm0, %v15022_v50  ;;  %v15071_v49 = vld [vmem:[%s19980_s25 + $0x1d0] ss:$8 sps:$4 sm:$0xff]   ;;  %v15072_v50 = vld [vmem:[%s19980_s25 + $0x1e4] ss:$8 sps:$4 sm:$0xff]  }
  0x48   :  { %1141 = vmatpush1.bf16.msra.mxu1 %v15757_v16 }
  0x49   :  { %1142 = vmatprep.subr.bf16.mxu1 %v15592_v0 }
  0x4c   :  { %1143 = vmatpush1.bf16.msra.mxu1 %v15769_v19 }
  0x4d   :  { %1144 = vmatprep.subr.bf16.mxu1 %v15592_v0 }
  0x4e   :  { %593 = vmatmul.mubr.bf16.gmra.mrb[12].mxu1 %v14992_v51  ;;  %310 = vmatmul.mubr.bf16.gmra.mrb[12].mxu0 %v15024_v52  ;;  %v11592_v51 = vld [vmem:[%s19980_s25 + $0x1f0] sm:$0xff]  ;;  %v15074_v52 = vld [vmem:[%s19980_s25 + $0x1e0] ss:$8 sps:$4 sm:$0xff]  }
  0x4f   :  { %11543 = vmatprep.mubr.msk.bf16.mxu1 %vm215_vm0, %v14993_v53  ;;  %11489 = vmatprep.mubr.msk.bf16.mxu0 %vm215_vm0, %v15025_v54  ;;  %v11614_v53 = vcombine.high %v11592_v51, %v11592_v51  ;;  %v11613_v54 = vcombine.low %v11592_v51, %v11592_v51 }
  0x50   :  { %1145 = vmatpush1.bf16.msra.mxu1 %v15784_v23 }
  0x51   :  { %1146 = vmatprep.subr.bf16.mxu1 %v15592_v0 }
  0x54   :  { %1147 = vmatpush1.bf16.msra.mxu1 %v15797_v26 }
  0x55   :  { %1148 = vmatprep.subr.bf16.mxu1 %v15592_v0 }
  0x56   :  { %601 = vmatmul.mubr.bf16.gmra.mrb[16].mxu1 %v14995_v55  ;;  %318 = vmatmul.mubr.bf16.gmra.mrb[16].mxu0 %v15027_v56  ;;  %v15079_v55 = vld [vmem:[%s19980_s25 + $0x1fc] ss:$8 sps:$4 sm:$0xff]   ;;  %v15077_v56 = vld [vmem:[%s19980_s25 + $0x1f8] ss:$8 sps:$4 sm:$0xff]  }
  0x57   :  { %11544 = vmatprep.mubr.msk.bf16.mxu1 %vm215_vm0, %v14996_v57  ;;  %11490 = vmatprep.mubr.msk.bf16.mxu0 %vm215_vm0, %v15028_v58  ;;  %v15080_v57 = vld [vmem:[%s19980_s25 + $0x20c] ss:$8 sps:$4 sm:$0xff]   ;;  %v15082_v58 = vld [vmem:[%s19980_s25 + $0x208] ss:$8 sps:$4 sm:$0xff]  }
  0x58   :  { %1149 = vmatpush1.bf16.msra.mxu1 %v15809_v29 }
  0x59   :  { %1150 = vmatprep.subr.bf16.mxu1 %v15592_v0 }
  0x5c   :  { %1151 = vmatpush1.bf16.msra.mxu1 %v15824_v33 }
  0x5d   :  { %1152 = vmatprep.subr.bf16.mxu1 %v15592_v0 }
  0x5e   :  { %609 = vmatmul.mubr.bf16.gmra.mrb[20].mxu1 %v14998_v59  ;;  %326 = vmatmul.mubr.bf16.gmra.mrb[20].mxu0 %v15030_v60  ;;  %v15083_v59 = vld [vmem:[%s19980_s25 + $0x21c] ss:$8 sps:$4 sm:$0xff]   ;;  %v15085_v60 = vld [vmem:[%s19980_s25 + $0x218] ss:$8 sps:$4 sm:$0xff]  }
  0x5f   :  { %11545 = vmatprep.mubr.msk.bf16.mxu1 %vm215_vm0, %v14999_v61  ;;  %11491 = vmatprep.mubr.msk.bf16.mxu0 %vm215_vm0, %v15031_v62  ;;  %v15086_v61 = vld [vmem:[%s19980_s25 + $0x22c] ss:$8 sps:$4 sm:$0xff]   ;;  %v15088_v62 = vld [vmem:[%s19980_s25 + $0x228] ss:$8 sps:$4 sm:$0xff]  }
  0x60   :  { %1153 = vmatpush1.bf16.msra.mxu1 %v15833_v35 }
  0x61   :  { %1592 = vmatprep.subr.bf16.mxu1 %v15592_v0 }
  0x66   :  { %617 = vmatmul.mubr.bf16.gmra.mrb[24].mxu1 %v15001_v63  ;;  %334 = vmatmul.mubr.bf16.gmra.mrb[24].mxu0 %v15033_v1  ;;  %v15089_v63 = vld [vmem:[%s19980_s25 + $0x23c] ss:$8 sps:$4 sm:$0xff]   ;;  %v15091_v1 = vld [vmem:[%s19980_s25 + $0x238] ss:$8 sps:$4 sm:$0xff]  }
  0x67   :  { %11546 = vmatprep.mubr.msk.bf16.mxu1 %vm215_vm0, %v15002_v2  ;;  %11492 = vmatprep.mubr.msk.bf16.mxu0 %vm215_vm0, %v15034_v3  ;;  %v15092_v2 = vld [vmem:[%s19980_s25 + $0x24c] ss:$8 sps:$4 sm:$0xff]  }
  0x6e   :  { %625 = vmatmul.mubr.bf16.gmra.mrb[28].mxu1 %v15004_v5  ;;  %342 = vmatmul.mubr.bf16.gmra.mrb[28].mxu0 %v15036_v7  ;;  %v384_v5 = vld [vmem:[%s19981_s24] sm:$0xf] }
  0x6f   :  { %11547 = vmatprep.mubr.msk.bf16.mxu1 %vm215_vm0, %v15005_v8  ;;  %11493 = vmatprep.mubr.msk.bf16.mxu0 %vm215_vm0, %v15037_v9  ;;  %v859_v18 = vsel %vm249_vm1, %v384_v5, 0 }
  0x76   :  { %633 = vmatmul.mubr.bf16.gmra.mrb[32].mxu1 %v15007_v11  ;;  %350 = vmatmul.mubr.bf16.gmra.mrb[32].mxu0 %v15039_v12  ;;  %v15094_v11 = vld [vmem:[%s19980_s25 + $0x248] ss:$8 sps:$4 sm:$0xff]  }
  0x77   :  { %11548 = vmatprep.mubr.msk.bf16.mxu1 %vm215_vm0, %v15008_v14  ;;  %11494 = vmatprep.mubr.msk.bf16.mxu0 %vm215_vm0, %v15040_v15 }
  0x7e   :  { %641 = vmatmul.mubr.bf16.gmra.mrb[36].mxu1 %v15010_v20  ;;  %358 = vmatmul.mubr.bf16.gmra.mrb[36].mxu0 %v15042_v21 }
  0x7f   :  { %11549 = vmatprep.mubr.msk.bf16.mxu1 %vm215_vm0, %v11538_v22  ;;  %11495 = vmatprep.mubr.msk.bf16.mxu0 %vm215_vm0, %v11484_v24  ;;  %v15095_v22 = vld [vmem:[%s19980_s25 + $0x25c] ss:$8 sps:$4 sm:$0xff]  }
  0x86   :  { %649 = vmatmul.mubr.bf16.gmra.mrb[40].mxu1 %v11537_v25  ;;  %366 = vmatmul.mubr.bf16.gmra.mrb[40].mxu0 %v11483_v27 }
  0x87   :  { %11615 = vmatprep.mubr.msk.bf16.mxu1 %vm215_vm0, %v15047_v28  ;;  %13173 = vmatprep.mubr.msk.bf16.mxu0 %vm15594_vm2, %v15593_v41 }
  0x8e   :  { %1165 = vmatmul.mubr.bf16.vlgmr.msra.gmra.mrb[44].mxu1 %v15045_v30  ;;  %v15097_v30 = vld [vmem:[%s19980_s25 + $0x258] ss:$8 sps:$4 sm:$0xff]  }
  0x8f   :  { %11616 = vmatprep.mubr.msk.bf16.mxu1 %vm215_vm0, %v15048_v31  ;;  %1593 = vmatpush1.bf16.msra.mxu1 %v15711_v4 }
  0x90   :  { %1594 = vmatprep.subr.bf16.mxu1 %v15592_v0 }
  0x93   :  { %1595 = vmatpush1.bf16.msra.mxu1 %v15717_v6 }
  0x94   :  { %1596 = vmatprep.subr.bf16.mxu1 %v15592_v0 }
  0x96   :  { %1173 = vmatmul.mubr.bf16.gmra.mrb[48].mxu1 %v15050_v32 }
  0x97   :  { %11617 = vmatprep.mubr.msk.bf16.mxu1 %vm215_vm0, %v15051_v34  ;;  %1597 = vmatpush1.bf16.msra.mxu1 %v15732_v10  ;;  %v15098_v34 = vld [vmem:[%s19980_s25 + $0x26c] ss:$8 sps:$4 sm:$0xff]  }
  0x98   :  { %1598 = vmatprep.subr.bf16.mxu1 %v15592_v0 }
  0x9b   :  { %1599 = vmatpush1.bf16.msra.mxu1 %v15745_v13 }
  0x9c   :  { %1600 = vmatprep.subr.bf16.mxu1 %v15592_v0 }
  0x9e   :  { %1181 = vmatmul.mubr.bf16.gmra.mrb[52].mxu1 %v15053_v36 }
  0x9f   :  { %11618 = vmatprep.mubr.msk.bf16.mxu1 %vm215_vm0, %v15054_v37  ;;  %1601 = vmatpush1.bf16.msra.mxu1 %v15757_v16 }
  0xa0   :  { %1602 = vmatprep.subr.bf16.mxu1 %v15592_v0 }
  0xa3   :  { %1603 = vmatpush1.bf16.msra.mxu1 %v15769_v19 }
  0xa4   :  { %1604 = vmatprep.subr.bf16.mxu1 %v15592_v0 }
  0xa6   :  { %1189 = vmatmul.mubr.bf16.gmra.mrb[56].mxu1 %v15056_v38 }
  0xa7   :  { %11619 = vmatprep.mubr.msk.bf16.mxu1 %vm215_vm0, %v15057_v39  ;;  %1605 = vmatpush1.bf16.msra.mxu1 %v15784_v23 }
  0xa8   :  { %1606 = vmatprep.subr.bf16.mxu1 %v15592_v0 }
  0xab   :  { %1607 = vmatpush1.bf16.msra.mxu1 %v15797_v26 }
  0xac   :  { %1608 = vmatprep.subr.bf16.mxu1 %v15592_v0 }
  0xae   :  { %1197 = vmatmul.mubr.bf16.gmra.mrb[60].mxu1 %v15059_v40 }
  0xaf   :  { %11620 = vmatprep.mubr.msk.bf16.mxu1 %vm215_vm0, %v15060_v42  ;;  %1609 = vmatpush1.bf16.msra.mxu1 %v15809_v29 }
  0xb0   :  { %1610 = vmatprep.subr.bf16.mxu1 %v15592_v0 }
  0xb3   :  { %1611 = vmatpush1.bf16.msra.mxu1 %v15824_v33 }
  0xb4   :  { %1612 = vmatprep.subr.bf16.mxu1 %v15592_v0 }
  0xb6   :  { %1205 = vmatmul.mubr.bf16.gmra.mrb[64].mxu1 %v15062_v43 }
  0xb7   :  { %11621 = vmatprep.mubr.msk.bf16.mxu1 %vm215_vm0, %v15063_v44  ;;  %1613 = vmatpush1.bf16.msra.mxu1 %v15833_v35 }
  0xb8   :  { %2052 = vmatprep.subr.bf16.mxu1 %v15592_v0 }
  0xbe   :  { %1213 = vmatmul.mubr.bf16.gmra.mrb[68].mxu1 %v15065_v45  ;;  %v15100_v45 = vld [vmem:[%s19980_s25 + $0x268] ss:$8 sps:$4 sm:$0xff]  }
  0xbf   :  { %11622 = vmatprep.mubr.msk.bf16.mxu1 %vm215_vm0, %v15066_v46 }
  0xc6   :  { %1221 = vmatmul.mubr.bf16.gmra.mrb[72].mxu1 %v15068_v47 }
  0xc7   :  { %11623 = vmatprep.mubr.msk.bf16.mxu1 %vm215_vm0, %v15069_v48  ;;  %v15101_v48 = vld [vmem:[%s19980_s25 + $0x27c] ss:$8 sps:$4 sm:$0xff]  }
  0xce   :  { %1229 = vmatmul.mubr.bf16.gmra.mrb[76].mxu1 %v15071_v49 }
  0xcf   :  { %11624 = vmatprep.mubr.msk.bf16.mxu1 %vm215_vm0, %v15072_v50 }
  0xd6   :  { %1237 = vmatmul.mubr.bf16.gmra.mrb[80].mxu1 %v15074_v52 }
  0xd7   :  { %11625 = vmatprep.mubr.msk.bf16.mxu1 %vm215_vm0, %v11614_v53 }
  0xde   :  { %1245 = vmatmul.mubr.bf16.gmra.mrb[84].mxu1 %v11613_v54 }
  0xdf   :  { %11680 = vmatprep.mubr.msk.bf16.mxu1 %vm215_vm0, %v15079_v55 }
  0xe6   :  { %1625 = vmatmul.mubr.bf16.vlgmr.msra.gmra.mrb[88].mxu1 %v15077_v56 }
  0xe7   :  { %11681 = vmatprep.mubr.msk.bf16.mxu1 %vm215_vm0, %v15080_v57  ;;  %2053 = vmatpush1.bf16.msra.mxu1 %v15711_v4  ;;  %v15103_v57 = vld [vmem:[%s19980_s25 + $0x278] ss:$8 sps:$4 sm:$0xff]  }
  0xe8   :  { %2054 = vmatprep.subr.bf16.mxu1 %v15592_v0 }
  0xeb   :  { %2055 = vmatpush1.bf16.msra.mxu1 %v15717_v6 }
  0xec   :  { %2056 = vmatprep.subr.bf16.mxu1 %v15592_v0 }
  0xee   :  { %1633 = vmatmul.mubr.bf16.gmra.mrb[92].mxu1 %v15082_v58 }
  0xef   :  { %11682 = vmatprep.mubr.msk.bf16.mxu1 %vm215_vm0, %v15083_v59  ;;  %2057 = vmatpush1.bf16.msra.mxu1 %v15732_v10 }
  0xf0   :  { %2058 = vmatprep.subr.bf16.mxu1 %v15592_v0 }
  0xf3   :  { %2059 = vmatpush1.bf16.msra.mxu1 %v15745_v13 }
  0xf4   :  { %2060 = vmatprep.subr.bf16.mxu1 %v15592_v0 }
  0xf6   :  { %1641 = vmatmul.mubr.bf16.gmra.mrb[96].mxu1 %v15085_v60  ;;  %v15104_v60 = vld [vmem:[%s19980_s25 + $0x28c] ss:$8 sps:$4 sm:$0xff]  }
  0xf7   :  { %11683 = vmatprep.mubr.msk.bf16.mxu1 %vm215_vm0, %v15086_v61  ;;  %2061 = vmatpush1.bf16.msra.mxu1 %v15757_v16 }
  0xf8   :  { %2062 = vmatprep.subr.bf16.mxu1 %v15592_v0 }
  0xfb   :  { %2063 = vmatpush1.bf16.msra.mxu1 %v15769_v19 }
  0xfc   :  { %2064 = vmatprep.subr.bf16.mxu1 %v15592_v0 }
  0xfe   :  { %1649 = vmatmul.mubr.bf16.gmra.mrb[100].mxu1 %v15088_v62 }
  0xff   :  { %11684 = vmatprep.mubr.msk.bf16.mxu1 %vm215_vm0, %v15089_v63  ;;  %2065 = vmatpush1.bf16.msra.mxu1 %v15784_v23 }
 0x100   :  { %2066 = vmatprep.subr.bf16.mxu1 %v15592_v0 }
 0x103   :  { %2067 = vmatpush1.bf16.msra.mxu1 %v15797_v26 }
 0x104   :  { %2068 = vmatprep.subr.bf16.mxu1 %v15592_v0 }
 0x106   :  { %1657 = vmatmul.mubr.bf16.gmra.mrb[104].mxu1 %v15091_v1 }
 0x107   :  { %11685 = vmatprep.mubr.msk.bf16.mxu1 %vm215_vm0, %v15092_v2  ;;  %2069 = vmatpush1.bf16.msra.mxu1 %v15809_v29  ;;  %v11657_v2 = vld [vmem:[%s19980_s25 + $0x298] sm:$0xff] }
 0x108   :  { %2070 = vmatprep.subr.bf16.mxu1 %v15592_v0 }
 0x109   :  { %v570_v3 = vpop.f32.mrb[0].mxu1  ;;  %v16165_v7 = vpop.f32.mrb[0].mxu0 }
 0x10a   :  { %v572_v8 = vpop.f32.mrb[1].mxu1  ;;  %v289_v9 = vpop.f32.mrb[1].mxu0 }
 0x10b   :  { %v573_v12 = vpop.f32.mrb[2].mxu1  ;;  %v16170_v14 = vpop.f32.mrb[2].mxu0  ;;  %2071 = vmatpush1.bf16.msra.mxu1 %v15824_v33 }
 0x10c   :  { %v656_v15 = vpack.c.bf16 %v573_v12, %v570_v3  ;;  %v575_v17 = vpop.f32.mrb[3].mxu1  ;;  %v373_v20 = vpack.c.bf16 %v16170_v14, %v16165_v7  ;;  %v292_v21 = vpop.f32.mrb[3].mxu0  ;;  %2072 = vmatprep.subr.bf16.mxu1 %v15592_v0  ;;  %v15129_v7 = vld [vmem:[%s19980_s25 + $0x300] ss:$8 sps:$4 sm:$0xff]  }
 0x10d   :  { %v11679_v17 = vcombine.high %v11657_v2, %v11657_v2 }
 0x10e   :  { %13174 = vmatmul.mubr.msk.bf16.vlgmr.msra.gmra.mrb[44].mxu0 %vm668_vm3, %v656_v15  ;;  %1665 = vmatmul.mubr.bf16.gmra.mrb[108].mxu1 %v15094_v11  ;;  %v15106_v11 = vld [vmem:[%s19980_s25 + $0x288] ss:$8 sps:$4 sm:$0xff]  }
 0x10f   :  { %13177 = vmatprep.mubr.msk.bf16.mxu0 %vm15594_vm2, %v15593_v41  ;;  %13218 = vmatpush3.bf16.msra.mxu0 %v859_v18 }
 0x110   :  { %11686 = vmatprep.mubr.msk.bf16.mxu1 %vm215_vm0, %v15095_v22  ;;  %2073 = vmatpush1.bf16.msra.mxu1 %v15833_v35 }
 0x111   :  { %v578_v24 = vpop.f32.mrb[4].mxu1  ;;  %v16185_v25 = vpop.f32.mrb[4].mxu0  ;;  %13263 = vmatprep.subr.bf16.mxu0 %v15593_v41  ;;  %2512 = vmatprep.subr.bf16.mxu1 %v15592_v0 }
 0x112   :  { %v580_v27 = vpop.f32.mrb[5].mxu1  ;;  %v297_v28 = vpop.f32.mrb[5].mxu0 }
 0x113   :  { %v581_v31 = vpop.f32.mrb[6].mxu1  ;;  %v16192_v32 = vpop.f32.mrb[6].mxu0 }
 0x114   :  { %v657_v36 = vpack.c.bf16 %v581_v31, %v578_v24  ;;  %v583_v37 = vpop.f32.mrb[7].mxu1  ;;  %v374_v38 = vpack.c.bf16 %v16192_v32, %v16185_v25  ;;  %v300_v39 = vpop.f32.mrb[7].mxu0  ;;  %v15133_v25 = vld [vmem:[%s19980_s25 + $0x324] ss:$8 sps:$4 sm:$0xff]  }
 0x115   :  { %v15111_v39 = vld [vmem:[%s19980_s25 + $0x2a4] ss:$8 sps:$4 sm:$0xff]  }
 0x116   :  { %13178 = vmatmul.mubr.msk.bf16.gmra.mrb[48].mxu0 %vm668_vm3, %v657_v36  ;;  %1673 = vmatmul.mubr.bf16.gmra.mrb[112].mxu1 %v15097_v30 }
 0x117   :  { %13181 = vmatprep.mubr.msk.bf16.mxu0 %vm15594_vm2, %v15593_v41  ;;  %11687 = vmatprep.mubr.msk.bf16.mxu1 %vm215_vm0, %v15098_v34  ;;  %v11678_v34 = vcombine.low %v11657_v2, %v11657_v2 }
 0x119   :  { %v586_v40 = vpop.f32.mrb[8].mxu1  ;;  %v16203_v42 = vpop.f32.mrb[8].mxu0 }
 0x11a   :  { %v588_v43 = vpop.f32.mrb[9].mxu1  ;;  %v305_v44 = vpop.f32.mrb[9].mxu0 }
 0x11b   :  { %v589_v46 = vpop.f32.mrb[10].mxu1  ;;  %v16208_v47 = vpop.f32.mrb[10].mxu0 }
 0x11c   :  { %v658_v49 = vpack.c.bf16 %v589_v46, %v586_v40  ;;  %v591_v50 = vpop.f32.mrb[11].mxu1  ;;  %v375_v51 = vpack.c.bf16 %v16208_v47, %v16203_v42  ;;  %v308_v52 = vpop.f32.mrb[11].mxu0  ;;  %v15136_v42 = vld [vmem:[%s19980_s25 + $0x334] ss:$8 sps:$4 sm:$0xff]  }
 0x11d   :  { %v15109_v52 = vld [vmem:[%s19980_s25 + $0x2a0] ss:$8 sps:$4 sm:$0xff]  }
 0x11e   :  { %13182 = vmatmul.mubr.msk.bf16.gmra.mrb[52].mxu0 %vm668_vm3, %v658_v49  ;;  %1681 = vmatmul.mubr.bf16.gmra.mrb[116].mxu1 %v15100_v45 }
 0x11f   :  { %13185 = vmatprep.mubr.msk.bf16.mxu0 %vm15594_vm2, %v15593_v41  ;;  %11688 = vmatprep.mubr.msk.bf16.mxu1 %vm215_vm0, %v15101_v48 }
 0x121   :  { %v594_v53 = vpop.f32.mrb[12].mxu1  ;;  %v16219_v54 = vpop.f32.mrb[12].mxu0 }
 0x122   :  { %v596_v55 = vpop.f32.mrb[13].mxu1  ;;  %v313_v56 = vpop.f32.mrb[13].mxu0 }
 0x123   :  { %v597_v58 = vpop.f32.mrb[14].mxu1  ;;  %v16224_v59 = vpop.f32.mrb[14].mxu0  ;;  %v15112_v56 = vld [vmem:[%s19980_s25 + $0x2b4] ss:$8 sps:$4 sm:$0xff]  }
 0x124   :  { %v659_v61 = vpack.c.bf16 %v597_v58, %v594_v53  ;;  %v599_v62 = vpop.f32.mrb[15].mxu1  ;;  %v376_v63 = vpack.c.bf16 %v16224_v59, %v16219_v54  ;;  %v316_v1 = vpop.f32.mrb[15].mxu0 }
 0x126   :  { %13186 = vmatmul.mubr.msk.bf16.gmra.mrb[56].mxu0 %vm668_vm3, %v659_v61  ;;  %1689 = vmatmul.mubr.bf16.gmra.mrb[120].mxu1 %v15103_v57 }
 0x127   :  { %13189 = vmatprep.mubr.msk.bf16.mxu0 %vm15594_vm2, %v15593_v41  ;;  %11689 = vmatprep.mubr.msk.bf16.mxu1 %vm215_vm0, %v15104_v60 }
 0x129   :  { %v602_v3 = vpop.f32.mrb[16].mxu1  ;;  %v16238_v5 = vpop.f32.mrb[16].mxu0 }
 0x12a   :  { %v604_v8 = vpop.f32.mrb[17].mxu1  ;;  %v321_v9 = vpop.f32.mrb[17].mxu0 }
 0x12b   :  { %v605_v12 = vpop.f32.mrb[18].mxu1  ;;  %v16243_v15 = vpop.f32.mrb[18].mxu0  ;;  %v15114_v8 = vld [vmem:[%s19980_s25 + $0x2b0] ss:$8 sps:$4 sm:$0xff]  }
 0x12c   :  { %v660_v18 = vpack.c.bf16 %v605_v12, %v602_v3  ;;  %v607_v21 = vpop.f32.mrb[19].mxu1  ;;  %v377_v22 = vpack.c.bf16 %v16243_v15, %v16238_v5  ;;  %v324_v24 = vpop.f32.mrb[19].mxu0  ;;  %v15115_v12 = vld [vmem:[%s19980_s25 + $0x2c4] ss:$8 sps:$4 sm:$0xff]  }
 0x12e   :  { %13190 = vmatmul.mubr.msk.bf16.gmra.mrb[60].mxu0 %vm668_vm3, %v660_v18  ;;  %1697 = vmatmul.mubr.bf16.gmra.mrb[124].mxu1 %v15106_v11 }
 0x12f   :  { %13193 = vmatprep.mubr.msk.bf16.mxu0 %vm15594_vm2, %v15593_v41  ;;  %11690 = vmatprep.mubr.msk.bf16.mxu1 %vm215_vm0, %v11679_v17 }
 0x131   :  { %v610_v27 = vpop.f32.mrb[20].mxu1  ;;  %v16251_v28 = vpop.f32.mrb[20].mxu0 }
 0x132   :  { %v612_v30 = vpop.f32.mrb[21].mxu1  ;;  %v329_v31 = vpop.f32.mrb[21].mxu0 }
 0x133   :  { %v613_v36 = vpop.f32.mrb[22].mxu1  ;;  %v16253_v37 = vpop.f32.mrb[22].mxu0 }
 0x134   :  { %v661_v40 = vpack.c.bf16 %v613_v36, %v610_v27  ;;  %v615_v43 = vpop.f32.mrb[23].mxu1  ;;  %v378_v44 = vpack.c.bf16 %v16253_v37, %v16251_v28  ;;  %v332_v45 = vpop.f32.mrb[23].mxu0  ;;  %v15117_v36 = vld [vmem:[%s19980_s25 + $0x2c0] ss:$8 sps:$4 sm:$0xff]   ;;  %v15144_v28 = vld [vmem:[%s19980_s25 + $0x35c] ss:$8 sps:$4 sm:$0xff]  }
 0x135   :  { %v15118_v43 = vld [vmem:[%s19980_s25 + $0x2d4] ss:$8 sps:$4 sm:$0xff]  }
 0x136   :  { %13194 = vmatmul.mubr.msk.bf16.gmra.mrb[64].mxu0 %vm668_vm3, %v661_v40  ;;  %1705 = vmatmul.mubr.bf16.gmra.mrb[128].mxu1 %v11678_v34 }
 0x137   :  { %13197 = vmatprep.mubr.msk.bf16.mxu0 %vm15594_vm2, %v15593_v41  ;;  %11745 = vmatprep.mubr.msk.bf16.mxu1 %vm215_vm0, %v15111_v39 }
 0x139   :  { %v618_v46 = vpop.f32.mrb[24].mxu1  ;;  %v16264_v48 = vpop.f32.mrb[24].mxu0 }
 0x13a   :  { %v620_v49 = vpop.f32.mrb[25].mxu1  ;;  %v337_v50 = vpop.f32.mrb[25].mxu0 }
 0x13b   :  { %v621_v53 = vpop.f32.mrb[26].mxu1  ;;  %v16269_v55 = vpop.f32.mrb[26].mxu0 }
 0x13c   :  { %v662_v57 = vpack.c.bf16 %v621_v53, %v618_v46  ;;  %v623_v58 = vpop.f32.mrb[27].mxu1  ;;  %v379_v60 = vpack.c.bf16 %v16269_v55, %v16264_v48  ;;  %v340_v61 = vpop.f32.mrb[27].mxu0  ;;  %v15147_v55 = vld [vmem:[%s19980_s25 + $0x36c] ss:$8 sps:$4 sm:$0xff]  }
 0x13d   :  { %v15120_v58 = vld [vmem:[%s19980_s25 + $0x2d0] ss:$8 sps:$4 sm:$0xff]  }
 0x13e   :  { %13198 = vmatmul.mubr.msk.bf16.gmra.mrb[68].mxu0 %vm668_vm3, %v662_v57  ;;  %2085 = vmatmul.mubr.bf16.vlgmr.msra.gmra.mrb[132].mxu1 %v15109_v52 }
 0x13f   :  { %13201 = vmatprep.mubr.msk.bf16.mxu0 %vm15594_vm2, %v15593_v41  ;;  %11746 = vmatprep.mubr.msk.bf16.mxu1 %vm215_vm0, %v15112_v56 }
 0x140   :  { %2513 = vmatpush1.bf16.msra.mxu1 %v15711_v4 }
 0x141   :  { %v626_v62 = vpop.f32.mrb[28].mxu1  ;;  %v16281_v1 = vpop.f32.mrb[28].mxu0  ;;  %2514 = vmatprep.subr.bf16.mxu1 %v15592_v0 }
 0x142   :  { %v628_v2 = vpop.f32.mrb[29].mxu1  ;;  %v345_v3 = vpop.f32.mrb[29].mxu0 }
 0x143   :  { %v629_v9 = vpop.f32.mrb[30].mxu1  ;;  %v16287_v11 = vpop.f32.mrb[30].mxu0  ;;  %v15121_v2 = vld [vmem:[%s19980_s25 + $0x2e4] ss:$8 sps:$4 sm:$0xff]  }
 0x144   :  { %v663_v17 = vpack.c.bf16 %v629_v9, %v626_v62  ;;  %v631_v18 = vpop.f32.mrb[31].mxu1  ;;  %v380_v21 = vpack.c.bf16 %v16287_v11, %v16281_v1  ;;  %v348_v24 = vpop.f32.mrb[31].mxu0  ;;  %2515 = vmatpush1.bf16.msra.mxu1 %v15717_v6  ;;  %v15150_v11 = vld [vmem:[%s19980_s25 + $0x37c] ss:$8 sps:$4 sm:$0xff]  }
 0x145   :  { %2516 = vmatprep.subr.bf16.mxu1 %v15592_v0 }
 0x146   :  { %13202 = vmatmul.mubr.msk.bf16.gmra.mrb[72].mxu0 %vm668_vm3, %v663_v17  ;;  %2093 = vmatmul.mubr.bf16.gmra.mrb[136].mxu1 %v15114_v8 }
 0x147   :  { %13205 = vmatprep.mubr.msk.bf16.mxu0 %vm15594_vm2, %v15593_v41  ;;  %11747 = vmatprep.mubr.msk.bf16.mxu1 %vm215_vm0, %v15115_v12 }
 0x148   :  { %2517 = vmatpush1.bf16.msra.mxu1 %v15732_v10 }
 0x149   :  { %v634_v27 = vpop.f32.mrb[32].mxu1  ;;  %v16301_v30 = vpop.f32.mrb[32].mxu0  ;;  %2518 = vmatprep.subr.bf16.mxu1 %v15592_v0 }
 0x14a   :  { %v636_v31 = vpop.f32.mrb[33].mxu1  ;;  %v353_v34 = vpop.f32.mrb[33].mxu0 }
 0x14b   :  { %v637_v39 = vpop.f32.mrb[34].mxu1  ;;  %v16307_v40 = vpop.f32.mrb[34].mxu0  ;;  %v15123_v34 = vld [vmem:[%s19980_s25 + $0x2e0] ss:$8 sps:$4 sm:$0xff]  }
 0x14c   :  { %v664_v45 = vpack.c.bf16 %v637_v39, %v634_v27  ;;  %v639_v46 = vpop.f32.mrb[35].mxu1  ;;  %v381_v49 = vpack.c.bf16 %v16307_v40, %v16301_v30  ;;  %v356_v50 = vpop.f32.mrb[35].mxu0  ;;  %2519 = vmatpush1.bf16.msra.mxu1 %v15745_v13  ;;  %v15153_v40 = vld [vmem:[%s19980_s25 + $0x38c] ss:$8 sps:$4 sm:$0xff]  }
 0x14d   :  { %2520 = vmatprep.subr.bf16.mxu1 %v15592_v0  ;;  %v1263_v50 = vld [vmem:[%s19981_s24 + $0x8] sm:$0xf] }
 0x14e   :  { %13206 = vmatmul.mubr.msk.bf16.gmra.mrb[76].mxu0 %vm668_vm3, %v664_v45  ;;  %2101 = vmatmul.mubr.bf16.gmra.mrb[140].mxu1 %v15117_v36 }
 0x14f   :  { %13209 = vmatprep.mubr.msk.bf16.mxu0 %vm15594_vm2, %v15593_v41  ;;  %11748 = vmatprep.mubr.msk.bf16.mxu1 %vm215_vm0, %v15118_v43  ;;  %v15124_v43 = vld [vmem:[%s19980_s25 + $0x2f4] ss:$8 sps:$4 sm:$0xff]  }
 0x150   :  { %2521 = vmatpush1.bf16.msra.mxu1 %v15757_v16 }
 0x151   :  { %v642_v52 = vpop.f32.mrb[36].mxu1  ;;  %v16321_v53 = vpop.f32.mrb[36].mxu0  ;;  %2522 = vmatprep.subr.bf16.mxu1 %v15592_v0 }
 0x152   :  { %v644_v56 = vpop.f32.mrb[37].mxu1  ;;  %v361_v57 = vpop.f32.mrb[37].mxu0 }
 0x153   :  { %v645_v61 = vpop.f32.mrb[38].mxu1  ;;  %v16327_v62 = vpop.f32.mrb[38].mxu0  ;;  %v15126_v57 = vld [vmem:[%s19980_s25 + $0x2f0] ss:$8 sps:$4 sm:$0xff]  }
 0x154   :  { %v665_v3 = vpack.c.bf16 %v645_v61, %v642_v52  ;;  %v647_v8 = vpop.f32.mrb[39].mxu1  ;;  %v382_v9 = vpack.c.bf16 %v16327_v62, %v16321_v53  ;;  %v364_v12 = vpop.f32.mrb[39].mxu0  ;;  %2523 = vmatpush1.bf16.msra.mxu1 %v15769_v19  ;;  %v1298_v61 = vsel %vm249_vm1, %v1263_v50, 0  ;;  %v15155_v53 = vld [vmem:[%s19980_s25 + $0x388] ss:$8 sps:$4 sm:$0xff]  }
 0x155   :  { %2524 = vmatprep.subr.bf16.mxu1 %v15592_v0  ;;  %v15127_v8 = vld [vmem:[%s19980_s25 + $0x304] ss:$8 sps:$4 sm:$0xff]  }
 0x156   :  { %13210 = vmatmul.mubr.msk.bf16.gmra.mrb[80].mxu0 %vm668_vm3, %v665_v3  ;;  %2109 = vmatmul.mubr.bf16.gmra.mrb[144].mxu1 %v15120_v58 }
 0x157   :  { %13213 = vmatprep.mubr.msk.bf16.mxu0 %vm15594_vm2, %v15593_v41  ;;  %11749 = vmatprep.mubr.msk.bf16.mxu1 %vm215_vm0, %v15121_v2 }
 0x158   :  { %2525 = vmatpush1.bf16.msra.mxu1 %v15784_v23 }
 0x159   :  { %v650_v17 = vpop.f32.mrb[40].mxu1  ;;  %v16341_v18 = vpop.f32.mrb[40].mxu0  ;;  %2526 = vmatprep.subr.bf16.mxu1 %v15592_v0 }
 0x15a   :  { %v666_v24 = vpack.c.bf16 %v650_v17, %v650_v17  ;;  %v652_v27 = vpop.f32.mrb[41].mxu1  ;;  %v369_v31 = vpop.f32.mrb[41].mxu0 }
 0x15b   :  { %v653_v36 = vpop.f32.mrb[42].mxu1  ;;  %v370_v39 = vpop.f32.mrb[42].mxu0 }
 0x15c   :  { %v654_v45 = vpop.f32.mrb[43].mxu1  ;;  %v371_v46 = vpop.f32.mrb[43].mxu0  ;;  %2527 = vmatpush1.bf16.msra.mxu1 %v15797_v26  ;;  %v15132_v36 = vld [vmem:[%s19980_s25 + $0x310] ss:$8 sps:$4 sm:$0xff]  }
 0x15d   :  { %2528 = vmatprep.subr.bf16.mxu1 %v15592_v0  ;;  %v15135_v46 = vld [vmem:[%s19980_s25 + $0x320] ss:$8 sps:$4 sm:$0xff]  }
 0x15e   :  { %13214 = vmatmul.mubr.msk.bf16.gmra.mrb[84].mxu0 %vm668_vm3, %v666_v24  ;;  %2117 = vmatmul.mubr.bf16.gmra.mrb[148].mxu1 %v15123_v34 }
 0x15f   :  { %13219 = vmatprep.mubr.msk.bf16.mxu0 %vm15594_vm2, %v15593_v41  ;;  %11750 = vmatprep.mubr.msk.bf16.mxu1 %vm215_vm0, %v15124_v43 }
 0x160   :  { %2529 = vmatpush1.bf16.msra.mxu1 %v15809_v29 }
 0x161   :  { %v16360_v52 = vpop.f32.mrb[44].mxu1  ;;  %2530 = vmatprep.subr.bf16.mxu1 %v15592_v0 }
 0x162   :  { %v1168_v56 = vpop.f32.mrb[45].mxu1 }
 0x163   :  { %v16366_v58 = vpop.f32.mrb[46].mxu1  ;;  %v11722_v56 = vld [vmem:[%s19980_s25 + $0x340] sm:$0xff] }
 0x164   :  { %v1252_v2 = vpack.c.bf16 %v16366_v58, %v16360_v52  ;;  %v1171_v3 = vpop.f32.mrb[47].mxu1  ;;  %2531 = vmatpush1.bf16.msra.mxu1 %v15824_v33  ;;  %v11744_v59 = vcombine.high %v11722_v56, %v11722_v56  ;;  %v15161_v52 = vld [vmem:[%s19980_s25 + $0x3a8] ss:$8 sps:$4 sm:$0xff]  }
 0x165   :  { %2532 = vmatprep.subr.bf16.mxu1 %v15592_v0  ;;  %v15138_v3 = vld [vmem:[%s19980_s25 + $0x330] ss:$8 sps:$4 sm:$0xff]  }
 0x166   :  { %13220 = vmatmul.mubr.msk.bf16.vlgmr.msra.gmra.mrb[44].mxu0 %vm668_vm3, %v373_v20  ;;  %2125 = vmatmul.mubr.bf16.gmra.mrb[152].mxu1 %v15126_v57  ;;  %v15130_v20 = vld [vmem:[%s19980_s25 + $0x314] ss:$8 sps:$4 sm:$0xff]  }
 0x167   :  { %13223 = vmatprep.mubr.msk.bf16.mxu0 %vm15594_vm2, %v15593_v41  ;;  %13264 = vmatpush3.bf16.msra.mxu0 %v1298_v61 }
 0x168   :  { %11751 = vmatprep.mubr.msk.bf16.mxu1 %vm215_vm0, %v15127_v8  ;;  %2533 = vmatpush1.bf16.msra.mxu1 %v15833_v35 }
 0x169   :  { %v16384_v12 = vpop.f32.mrb[48].mxu1  ;;  %13309 = vmatprep.subr.bf16.mxu0 %v15593_v41  ;;  %2972 = vmatprep.subr.bf16.mxu1 %v15592_v0 }
 0x16a   :  { %v1176_v17 = vpop.f32.mrb[49].mxu1 }
 0x16b   :  { %v16391_v14 = vpop.f32.mrb[50].mxu1 }
 0x16c   :  { %v1253_v24 = vpack.c.bf16 %v16391_v14, %v16384_v12  ;;  %v1179_v27 = vpop.f32.mrb[51].mxu1  ;;  %v15165_v12 = vld [vmem:[%s19980_s25 + $0x3cc] ss:$8 sps:$4 sm:$0xff]  }
 0x16e   :  { %13224 = vmatmul.mubr.msk.bf16.gmra.mrb[48].mxu0 %vm668_vm3, %v374_v38  ;;  %2133 = vmatmul.mubr.bf16.gmra.mrb[156].mxu1 %v15129_v7 }
 0x16f   :  { %13227 = vmatprep.mubr.msk.bf16.mxu0 %vm15594_vm2, %v15593_v41  ;;  %11752 = vmatprep.mubr.msk.bf16.mxu1 %vm215_vm0, %v15130_v20  ;;  %v11743_v20 = vcombine.low %v11722_v56, %v11722_v56 }
 0x171   :  { %v16405_v31 = vpop.f32.mrb[52].mxu1 }
 0x172   :  { %v1184_v34 = vpop.f32.mrb[53].mxu1 }
 0x173   :  { %v16410_v39 = vpop.f32.mrb[54].mxu1  ;;  %v15143_v34 = vld [vmem:[%s19980_s25 + $0x34c] ss:$8 sps:$4 sm:$0xff]  }
 0x174   :  { %v1254_v32 = vpack.c.bf16 %v16410_v39, %v16405_v31  ;;  %v1187_v38 = vpop.f32.mrb[55].mxu1  ;;  %v15168_v31 = vld [vmem:[%s19980_s25 + $0x3dc] ss:$8 sps:$4 sm:$0xff]  }
 0x176   :  { %13228 = vmatmul.mubr.msk.bf16.gmra.mrb[52].mxu0 %vm668_vm3, %v375_v51  ;;  %2141 = vmatmul.mubr.bf16.gmra.mrb[160].mxu1 %v15132_v36 }
 0x177   :  { %13231 = vmatprep.mubr.msk.bf16.mxu0 %vm15594_vm2, %v15593_v41  ;;  %11753 = vmatprep.mubr.msk.bf16.mxu1 %vm215_vm0, %v15133_v25  ;;  %v15141_v25 = vld [vmem:[%s19980_s25 + $0x348] ss:$8 sps:$4 sm:$0xff]  }
 0x179   :  { %v16424_v43 = vpop.f32.mrb[56].mxu1 }
 0x17a   :  { %v1192_v45 = vpop.f32.mrb[57].mxu1 }
 0x17b   :  { %v16429_v50 = vpop.f32.mrb[58].mxu1 }
 0x17c   :  { %v1255_v47 = vpack.c.bf16 %v16429_v50, %v16424_v43  ;;  %v1195_v51 = vpop.f32.mrb[59].mxu1 }
 0x17e   :  { %13232 = vmatmul.mubr.msk.bf16.gmra.mrb[56].mxu0 %vm668_vm3, %v376_v63  ;;  %2149 = vmatmul.mubr.bf16.gmra.mrb[164].mxu1 %v15135_v46 }
 0x17f   :  { %13235 = vmatprep.mubr.msk.bf16.mxu0 %vm15594_vm2, %v15593_v41  ;;  %11754 = vmatprep.mubr.msk.bf16.mxu1 %vm215_vm0, %v15136_v42  ;;  %v15146_v42 = vld [vmem:[%s19980_s25 + $0x358] ss:$8 sps:$4 sm:$0xff]  }
 0x181   :  { %v16446_v57 = vpop.f32.mrb[60].mxu1 }
 0x182   :  { %v1200_v61 = vpop.f32.mrb[61].mxu1 }
 0x183   :  { %v16451_v54 = vpop.f32.mrb[62].mxu1 }
 0x184   :  { %v1256_v63 = vpack.c.bf16 %v16451_v54, %v16446_v57  ;;  %v1203_v8 = vpop.f32.mrb[63].mxu1 }
 0x186   :  { %13236 = vmatmul.mubr.msk.bf16.gmra.mrb[60].mxu0 %vm668_vm3, %v377_v22  ;;  %2157 = vmatmul.mubr.bf16.gmra.mrb[168].mxu1 %v15138_v3  ;;  %v15149_v3 = vld [vmem:[%s19980_s25 + $0x368] ss:$8 sps:$4 sm:$0xff]  }
 0x187   :  { %13239 = vmatprep.mubr.msk.bf16.mxu0 %vm15594_vm2, %v15593_v41  ;;  %11755 = vmatprep.mubr.msk.bf16.mxu1 %vm215_vm0, %v11744_v59 }
 0x189   :  { %v16462_v17 = vpop.f32.mrb[64].mxu1 }
 0x18a   :  { %v1208_v7 = vpop.f32.mrb[65].mxu1 }
 0x18b   :  { %v16464_v27 = vpop.f32.mrb[66].mxu1 }
 0x18c   :  { %v1257_v5 = vpack.c.bf16 %v16464_v27, %v16462_v17  ;;  %v1211_v15 = vpop.f32.mrb[67].mxu1  ;;  %v15176_v17 = vld [vmem:[%s19980_s25 + $0x404] ss:$8 sps:$4 sm:$0xff]  }
 0x18e   :  { %13240 = vmatmul.mubr.msk.bf16.gmra.mrb[64].mxu0 %vm668_vm3, %v378_v44  ;;  %2165 = vmatmul.mubr.bf16.gmra.mrb[172].mxu1 %v11743_v20  ;;  %v15152_v20 = vld [vmem:[%s19980_s25 + $0x378] ss:$8 sps:$4 sm:$0xff]  }
 0x18f   :  { %13243 = vmatprep.mubr.msk.bf16.mxu0 %vm15594_vm2, %v15593_v41  ;;  %11810 = vmatprep.mubr.msk.bf16.mxu1 %vm215_vm0, %v15143_v34 }
 0x191   :  { %v16478_v22 = vpop.f32.mrb[68].mxu1 }
 0x192   :  { %v1216_v36 = vpop.f32.mrb[69].mxu1 }
 0x193   :  { %v16483_v38 = vpop.f32.mrb[70].mxu1  ;;  %v383_v36 = vpack.c.bf16 %v16341_v18, %v16341_v18  ;;  %v1723_v18 = vld [vmem:[%s19981_s24 + $0xc] sm:$0xf] }
 0x194   :  { %v1258_v37 = vpack.c.bf16 %v16483_v38, %v16478_v22  ;;  %v1219_v44 = vpop.f32.mrb[71].mxu1  ;;  %v15179_v38 = vld [vmem:[%s19980_s25 + $0x414] ss:$8 sps:$4 sm:$0xff]  }
 0x196   :  { %13244 = vmatmul.mubr.msk.bf16.gmra.mrb[68].mxu0 %vm668_vm3, %v379_v60  ;;  %2545 = vmatmul.mubr.bf16.vlgmr.msra.gmra.mrb[176].mxu1 %v15141_v25 }
 0x197   :  { %13247 = vmatprep.mubr.msk.bf16.mxu0 %vm15594_vm2, %v15593_v41  ;;  %11811 = vmatprep.mubr.msk.bf16.mxu1 %vm215_vm0, %v15144_v28 }
 0x198   :  { %2973 = vmatpush1.bf16.msra.mxu1 %v15711_v4 }
 0x199   :  { %v16498_v45 = vpop.f32.mrb[72].mxu1  ;;  %2974 = vmatprep.subr.bf16.mxu1 %v15592_v0 }
 0x19a   :  { %v1224_v46 = vpop.f32.mrb[73].mxu1 }
 0x19b   :  { %v16504_v48 = vpop.f32.mrb[74].mxu1 }
 0x19c   :  { %v1259_v60 = vpack.c.bf16 %v16504_v48, %v16498_v45  ;;  %v1227_v51 = vpop.f32.mrb[75].mxu1  ;;  %2975 = vmatpush1.bf16.msra.mxu1 %v15717_v6  ;;  %v15182_v48 = vld [vmem:[%s19980_s25 + $0x424] ss:$8 sps:$4 sm:$0xff]  }
 0x19d   :  { %2976 = vmatprep.subr.bf16.mxu1 %v15592_v0  ;;  %v1758_v51 = vsel %vm249_vm1, %v1723_v18, 0 }
 0x19e   :  { %13248 = vmatmul.mubr.msk.bf16.gmra.mrb[72].mxu0 %vm668_vm3, %v380_v21  ;;  %2553 = vmatmul.mubr.bf16.gmra.mrb[180].mxu1 %v15146_v42  ;;  %v15158_v42 = vld [vmem:[%s19980_s25 + $0x398] ss:$8 sps:$4 sm:$0xff]  }
 0x19f   :  { %13251 = vmatprep.mubr.msk.bf16.mxu0 %vm15594_vm2, %v15593_v41  ;;  %11812 = vmatprep.mubr.msk.bf16.mxu1 %vm215_vm0, %v15147_v55 }
 0x1a0   :  { %2977 = vmatpush1.bf16.msra.mxu1 %v15732_v10 }
 0x1a1   :  { %v16521_v56 = vpop.f32.mrb[76].mxu1  ;;  %2978 = vmatprep.subr.bf16.mxu1 %v15592_v0 }
 0x1a2   :  { %v1232_v61 = vpop.f32.mrb[77].mxu1 }
 0x1a3   :  { %v16527_v1 = vpop.f32.mrb[78].mxu1 }
 0x1a4   :  { %v1260_v21 = vpack.c.bf16 %v16527_v1, %v16521_v56  ;;  %v1235_v59 = vpop.f32.mrb[79].mxu1  ;;  %2979 = vmatpush1.bf16.msra.mxu1 %v15745_v13  ;;  %v15185_v1 = vld [vmem:[%s19980_s25 + $0x434] ss:$8 sps:$4 sm:$0xff]  }
 0x1a5   :  { %2980 = vmatprep.subr.bf16.mxu1 %v15592_v0 }
 0x1a6   :  { %13252 = vmatmul.mubr.msk.bf16.gmra.mrb[76].mxu0 %vm668_vm3, %v381_v49  ;;  %2561 = vmatmul.mubr.bf16.gmra.mrb[184].mxu1 %v15149_v3 }
 0x1a7   :  { %13255 = vmatprep.mubr.msk.bf16.mxu0 %vm15594_vm2, %v15593_v41  ;;  %11813 = vmatprep.mubr.msk.bf16.mxu1 %vm215_vm0, %v15150_v11  ;;  %v15159_v11 = vld [vmem:[%s19980_s25 + $0x3ac] ss:$8 sps:$4 sm:$0xff]  }
 0x1a8   :  { %2981 = vmatpush1.bf16.msra.mxu1 %v15757_v16 }
 0x1a9   :  { %v16544_v8 = vpop.f32.mrb[80].mxu1  ;;  %2982 = vmatprep.subr.bf16.mxu1 %v15592_v0 }
 0x1aa   :  { %v1240_v7 = vpop.f32.mrb[81].mxu1 }
 0x1ab   :  { %v16550_v30 = vpop.f32.mrb[82].mxu1 }
 0x1ac   :  { %v1261_v49 = vpack.c.bf16 %v16550_v30, %v16544_v8  ;;  %v1243_v34 = vpop.f32.mrb[83].mxu1  ;;  %2983 = vmatpush1.bf16.msra.mxu1 %v15769_v19  ;;  %v15188_v30 = vld [vmem:[%s19980_s25 + $0x444] ss:$8 sps:$4 sm:$0xff]  }
 0x1ad   :  { %2984 = vmatprep.subr.bf16.mxu1 %v15592_v0 }
 0x1ae   :  { %13256 = vmatmul.mubr.msk.bf16.gmra.mrb[80].mxu0 %vm668_vm3, %v382_v9  ;;  %2569 = vmatmul.mubr.bf16.gmra.mrb[188].mxu1 %v15152_v20  ;;  %v15156_v9 = vld [vmem:[%s19980_s25 + $0x39c] ss:$8 sps:$4 sm:$0xff]  }
 0x1af   :  { %13259 = vmatprep.mubr.msk.bf16.mxu0 %vm15594_vm2, %v15593_v41  ;;  %11814 = vmatprep.mubr.msk.bf16.mxu1 %vm215_vm0, %v15153_v40 }
 0x1b0   :  { %2985 = vmatpush1.bf16.msra.mxu1 %v15784_v23 }
 0x1b1   :  { %v16567_v15 = vpop.f32.mrb[84].mxu1  ;;  %2986 = vmatprep.subr.bf16.mxu1 %v15592_v0 }
 0x1b2   :  { %v1248_v25 = vpop.f32.mrb[85].mxu1 }
 0x1b3   :  { %v1249_v62 = vpop.f32.mrb[86].mxu1  ;;  %v15164_v25 = vld [vmem:[%s19980_s25 + $0x3b8] ss:$8 sps:$4 sm:$0xff]  }
 0x1b4   :  { %v1250_v28 = vpop.f32.mrb[87].mxu1  ;;  %2987 = vmatpush1.bf16.msra.mxu1 %v15797_v26 }
 0x1b5   :  { %2988 = vmatprep.subr.bf16.mxu1 %v15592_v0  ;;  %v15167_v28 = vld [vmem:[%s19980_s25 + $0x3c8] ss:$8 sps:$4 sm:$0xff]  }
 0x1b6   :  { %13260 = vmatmul.mubr.msk.bf16.gmra.mrb[84].mxu0 %vm668_vm3, %v383_v36  ;;  %2577 = vmatmul.mubr.bf16.gmra.mrb[192].mxu1 %v15155_v53 }
 0x1b7   :  { %13265 = vmatprep.mubr.msk.bf16.mxu0 %vm15594_vm2, %v15593_v41  ;;  %11815 = vmatprep.mubr.msk.bf16.mxu1 %vm215_vm0, %v15156_v9 }
 0x1b8   :  { %2989 = vmatpush1.bf16.msra.mxu1 %v15809_v29 }
 0x1b9   :  { %v16588_v44 = vpop.f32.mrb[88].mxu1  ;;  %2990 = vmatprep.subr.bf16.mxu1 %v15592_v0 }
 0x1ba   :  { %v1628_v46 = vpop.f32.mrb[89].mxu1 }
 0x1bb   :  { %v16594_v55 = vpop.f32.mrb[90].mxu1  ;;  %v11787_v46 = vld [vmem:[%s19980_s25 + $0x3e8] sm:$0xff] }
 0x1bc   :  { %v1712_v61 = vpack.c.bf16 %v16594_v55, %v16588_v44  ;;  %v1631_v3 = vpop.f32.mrb[91].mxu1  ;;  %2991 = vmatpush1.bf16.msra.mxu1 %v15824_v33  ;;  %v11809_v50 = vcombine.high %v11787_v46, %v11787_v46  ;;  %v15193_v44 = vld [vmem:[%s19980_s25 + $0x450] ss:$8 sps:$4 sm:$0xff]  }
 0x1bd   :  { %2992 = vmatprep.subr.bf16.mxu1 %v15592_v0  ;;  %v15170_v3 = vld [vmem:[%s19980_s25 + $0x3d8] ss:$8 sps:$4 sm:$0xff]  }
 0x1be   :  { %13266 = vmatmul.mubr.msk.bf16.vlgmr.msra.gmra.mrb[44].mxu0 %vm668_vm3, %v1252_v2  ;;  %2585 = vmatmul.mubr.bf16.gmra.mrb[196].mxu1 %v15158_v42  ;;  %v15162_v2 = vld [vmem:[%s19980_s25 + $0x3bc] ss:$8 sps:$4 sm:$0xff]  }
 0x1bf   :  { %13269 = vmatprep.mubr.msk.bf16.mxu0 %vm15594_vm2, %v15593_v41  ;;  %13310 = vmatpush3.bf16.msra.mxu0 %v1758_v51 }
 0x1c0   :  { %11816 = vmatprep.mubr.msk.bf16.mxu1 %vm215_vm0, %v15159_v11  ;;  %2993 = vmatpush1.bf16.msra.mxu1 %v15833_v35 }
 0x1c1   :  { %v16612_v59 = vpop.f32.mrb[92].mxu1  ;;  %13355 = vmatprep.subr.bf16.mxu0 %v15593_v41  ;;  %3432 = vmatprep.subr.bf16.mxu1 %v15592_v0 }
 0x1c2   :  { %v1636_v7 = vpop.f32.mrb[93].mxu1 }
 0x1c3   :  { %v16619_v58 = vpop.f32.mrb[94].mxu1 }
 0x1c4   :  { %v1713_v20 = vpack.c.bf16 %v16619_v58, %v16612_v59  ;;  %v1639_v40 = vpop.f32.mrb[95].mxu1  ;;  %v15197_v59 = vld [vmem:[%s19980_s25 + $0x474] ss:$8 sps:$4 sm:$0xff]  }
 0x1c6   :  { %13270 = vmatmul.mubr.msk.bf16.gmra.mrb[48].mxu0 %vm668_vm3, %v1253_v24  ;;  %2593 = vmatmul.mubr.bf16.gmra.mrb[200].mxu1 %v15161_v52 }
 0x1c7   :  { %13273 = vmatprep.mubr.msk.bf16.mxu0 %vm15594_vm2, %v15593_v41  ;;  %11817 = vmatprep.mubr.msk.bf16.mxu1 %vm215_vm0, %v15162_v2  ;;  %v11808_v2 = vcombine.low %v11787_v46, %v11787_v46 }
 0x1c9   :  { %v16633_v34 = vpop.f32.mrb[96].mxu1 }
 0x1ca   :  { %v1644_v36 = vpop.f32.mrb[97].mxu1 }
 0x1cb   :  { %v16638_v53 = vpop.f32.mrb[98].mxu1  ;;  %v15175_v36 = vld [vmem:[%s19980_s25 + $0x3f4] ss:$8 sps:$4 sm:$0xff]  }
 0x1cc   :  { %v1714_v14 = vpack.c.bf16 %v16638_v53, %v16633_v34  ;;  %v1647_v24 = vpop.f32.mrb[99].mxu1  ;;  %v15202_v34 = vld [vmem:[%s19980_s25 + $0x484] ss:$8 sps:$4 sm:$0xff]  }
 0x1ce   :  { %13274 = vmatmul.mubr.msk.bf16.gmra.mrb[52].mxu0 %vm668_vm3, %v1254_v32  ;;  %2601 = vmatmul.mubr.bf16.gmra.mrb[204].mxu1 %v15164_v25 }
 0x1cf   :  { %13277 = vmatprep.mubr.msk.bf16.mxu0 %vm15594_vm2, %v15593_v41  ;;  %11818 = vmatprep.mubr.msk.bf16.mxu1 %vm215_vm0, %v15165_v12  ;;  %v15173_v12 = vld [vmem:[%s19980_s25 + $0x3f0] ss:$8 sps:$4 sm:$0xff]  }
 0x1d1   :  { %v16652_v62 = vpop.f32.mrb[100].mxu1 }
 0x1d2   :  { %v1652_v9 = vpop.f32.mrb[101].mxu1 }
 0x1d3   :  { %v16657_v18 = vpop.f32.mrb[102].mxu1 }
 0x1d4   :  { %v1715_v39 = vpack.c.bf16 %v16657_v18, %v16652_v62  ;;  %v1655_v32 = vpop.f32.mrb[103].mxu1 }
 0x1d6   :  { %13278 = vmatmul.mubr.msk.bf16.gmra.mrb[56].mxu0 %vm668_vm3, %v1255_v47  ;;  %2609 = vmatmul.mubr.bf16.gmra.mrb[208].mxu1 %v15167_v28 }
 0x1d7   :  { %13281 = vmatprep.mubr.msk.bf16.mxu0 %vm15594_vm2, %v15593_v41  ;;  %11819 = vmatprep.mubr.msk.bf16.mxu1 %vm215_vm0, %v15168_v31  ;;  %v15178_v31 = vld [vmem:[%s19980_s25 + $0x400] ss:$8 sps:$4 sm:$0xff]  }
 0x1d9   :  { %v16674_v42 = vpop.f32.mrb[104].mxu1 }
 0x1da   :  { %v1660_v51 = vpop.f32.mrb[105].mxu1 }
 0x1db   :  { %v16679_v43 = vpop.f32.mrb[106].mxu1 }
 0x1dc   :  { %v1716_v47 = vpack.c.bf16 %v16679_v43, %v16674_v42  ;;  %v1663_v11 = vpop.f32.mrb[107].mxu1 }
 0x1de   :  { %13282 = vmatmul.mubr.msk.bf16.gmra.mrb[60].mxu0 %vm668_vm3, %v1256_v63  ;;  %2617 = vmatmul.mubr.bf16.gmra.mrb[212].mxu1 %v15170_v3  ;;  %v15181_v3 = vld [vmem:[%s19980_s25 + $0x410] ss:$8 sps:$4 sm:$0xff]  }
 0x1df   :  { %13285 = vmatprep.mubr.msk.bf16.mxu0 %vm15594_vm2, %v15593_v41  ;;  %11820 = vmatprep.mubr.msk.bf16.mxu1 %vm215_vm0, %v11809_v50 }
 0x1e1   :  { %v16690_v7 = vpop.f32.mrb[108].mxu1 }
 0x1e2   :  { %v1668_v52 = vpop.f32.mrb[109].mxu1 }
 0x1e3   :  { %v16692_v40 = vpop.f32.mrb[110].mxu1 }
 0x1e4   :  { %v1717_v57 = vpack.c.bf16 %v16692_v40, %v16690_v7  ;;  %v1671_v54 = vpop.f32.mrb[111].mxu1  ;;  %v15210_v7 = vld [vmem:[%s19980_s25 + $0x4ac] ss:$8 sps:$4 sm:$0xff]  }
 0x1e6   :  { %13286 = vmatmul.mubr.msk.bf16.gmra.mrb[64].mxu0 %vm668_vm3, %v1257_v5  ;;  %2625 = vmatmul.mubr.bf16.gmra.mrb[216].mxu1 %v11808_v2  ;;  %v15184_v2 = vld [vmem:[%s19980_s25 + $0x420] ss:$8 sps:$4 sm:$0xff]  }
 0x1e7   :  { %13289 = vmatprep.mubr.msk.bf16.mxu0 %vm15594_vm2, %v15593_v41  ;;  %11875 = vmatprep.mubr.msk.bf16.mxu1 %vm215_vm0, %v15175_v36 }
 0x1e9   :  { %v16706_v63 = vpop.f32.mrb[112].mxu1 }
 0x1ea   :  { %v1676_v25 = vpop.f32.mrb[113].mxu1 }
 0x1eb   :  { %v16711_v24 = vpop.f32.mrb[114].mxu1 }
 0x1ec   :  { %v1718_v27 = vpack.c.bf16 %v16711_v24, %v16706_v63  ;;  %v1679_v5 = vpop.f32.mrb[115].mxu1  ;;  %v15213_v24 = vld [vmem:[%s19980_s25 + $0x4bc] ss:$8 sps:$4 sm:$0xff]  }
 0x1ed   :  { %v2183_v5 = vld [vmem:[%s19981_s24 + $0x10] sm:$0xf] }
 0x1ee   :  { %13290 = vmatmul.mubr.msk.bf16.gmra.mrb[68].mxu0 %vm668_vm3, %v1258_v37  ;;  %3005 = vmatmul.mubr.bf16.vlgmr.msra.gmra.mrb[220].mxu1 %v15173_v12  ;;  %v15187_v12 = vld [vmem:[%s19980_s25 + $0x430] ss:$8 sps:$4 sm:$0xff]  }
 0x1ef   :  { %13293 = vmatprep.mubr.msk.bf16.mxu0 %vm15594_vm2, %v15593_v41  ;;  %11876 = vmatprep.mubr.msk.bf16.mxu1 %vm215_vm0, %v15176_v17 }
 0x1f0   :  { %3433 = vmatpush1.bf16.msra.mxu1 %v15711_v4 }
 0x1f1   :  { %v16726_v9 = vpop.f32.mrb[116].mxu1  ;;  %3434 = vmatprep.subr.bf16.mxu1 %v15592_v0 }
 0x1f2   :  { %v1684_v28 = vpop.f32.mrb[117].mxu1 }
 0x1f3   :  { %v16732_v22 = vpop.f32.mrb[118].mxu1 }
 0x1f4   :  { %v1719_v37 = vpack.c.bf16 %v16732_v22, %v16726_v9  ;;  %v1687_v32 = vpop.f32.mrb[119].mxu1  ;;  %3435 = vmatpush1.bf16.msra.mxu1 %v15717_v6  ;;  %v15216_v22 = vld [vmem:[%s19980_s25 + $0x4cc] ss:$8 sps:$4 sm:$0xff]  }
 0x1f5   :  { %3436 = vmatprep.subr.bf16.mxu1 %v15592_v0  ;;  %v2218_v32 = vsel %vm249_vm1, %v2183_v5, 0 }
 0x1f6   :  { %13294 = vmatmul.mubr.msk.bf16.gmra.mrb[72].mxu0 %vm668_vm3, %v1259_v60  ;;  %3013 = vmatmul.mubr.bf16.gmra.mrb[224].mxu1 %v15178_v31  ;;  %v15190_v31 = vld [vmem:[%s19980_s25 + $0x440] ss:$8 sps:$4 sm:$0xff]  }
 0x1f7   :  { %13297 = vmatprep.mubr.msk.bf16.mxu0 %vm15594_vm2, %v15593_v41  ;;  %11877 = vmatprep.mubr.msk.bf16.mxu1 %vm215_vm0, %v15179_v38 }
 0x1f8   :  { %3437 = vmatpush1.bf16.msra.mxu1 %v15732_v10 }
 0x1f9   :  { %v16749_v46 = vpop.f32.mrb[120].mxu1  ;;  %3438 = vmatprep.subr.bf16.mxu1 %v15592_v0 }
 0x1fa   :  { %v1692_v51 = vpop.f32.mrb[121].mxu1 }
 0x1fb   :  { %v16755_v45 = vpop.f32.mrb[122].mxu1 }
 0x1fc   :  { %v1720_v60 = vpack.c.bf16 %v16755_v45, %v16749_v46  ;;  %v1695_v50 = vpop.f32.mrb[123].mxu1  ;;  %3439 = vmatpush1.bf16.msra.mxu1 %v15745_v13  ;;  %v15219_v45 = vld [vmem:[%s19980_s25 + $0x4dc] ss:$8 sps:$4 sm:$0xff]  }
 0x1fd   :  { %3440 = vmatprep.subr.bf16.mxu1 %v15592_v0 }
 0x1fe   :  { %13298 = vmatmul.mubr.msk.bf16.gmra.mrb[76].mxu0 %vm668_vm3, %v1260_v21  ;;  %3021 = vmatmul.mubr.bf16.gmra.mrb[228].mxu1 %v15181_v3 }
 0x1ff   :  { %13301 = vmatprep.mubr.msk.bf16.mxu0 %vm15594_vm2, %v15593_v41  ;;  %11878 = vmatprep.mubr.msk.bf16.mxu1 %vm215_vm0, %v15182_v48  ;;  %v15191_v48 = vld [vmem:[%s19980_s25 + $0x454] ss:$8 sps:$4 sm:$0xff]  }
 0x200   :  { %3441 = vmatpush1.bf16.msra.mxu1 %v15757_v16 }
 0x201   :  { %v16772_v11 = vpop.f32.mrb[124].mxu1  ;;  %3442 = vmatprep.subr.bf16.mxu1 %v15592_v0 }
 0x202   :  { %v1700_v52 = vpop.f32.mrb[125].mxu1 }
 0x203   :  { %v16778_v56 = vpop.f32.mrb[126].mxu1 }
 0x204   :  { %v1721_v21 = vpack.c.bf16 %v16778_v56, %v16772_v11  ;;  %v1703_v36 = vpop.f32.mrb[127].mxu1  ;;  %3443 = vmatpush1.bf16.msra.mxu1 %v15769_v19  ;;  %v15222_v56 = vld [vmem:[%s19980_s25 + $0x4ec] ss:$8 sps:$4 sm:$0xff]  }
 0x205   :  { %3444 = vmatprep.subr.bf16.mxu1 %v15592_v0 }
 0x206   :  { %13302 = vmatmul.mubr.msk.bf16.gmra.mrb[80].mxu0 %vm668_vm3, %v1261_v49  ;;  %3029 = vmatmul.mubr.bf16.gmra.mrb[232].mxu1 %v15184_v2  ;;  %v1262_v49 = vpack.c.bf16 %v16567_v15, %v16567_v15 }
 0x207   :  { %13305 = vmatprep.mubr.msk.bf16.mxu0 %vm15594_vm2, %v15593_v41  ;;  %11879 = vmatprep.mubr.msk.bf16.mxu1 %vm215_vm0, %v15185_v1 }
 0x208   :  { %3445 = vmatpush1.bf16.msra.mxu1 %v15784_v23 }
 0x209   :  { %v16795_v54 = vpop.f32.mrb[128].mxu1  ;;  %3446 = vmatprep.subr.bf16.mxu1 %v15592_v0 }
 0x20a   :  { %v1708_v25 = vpop.f32.mrb[129].mxu1 }
 0x20b   :  { %v1709_v8 = vpop.f32.mrb[130].mxu1 }
 0x20c   :  { %v1710_v17 = vpop.f32.mrb[131].mxu1  ;;  %3447 = vmatpush1.bf16.msra.mxu1 %v15797_v26 }
 0x20d   :  { %3448 = vmatprep.subr.bf16.mxu1 %v15592_v0  ;;  %v15199_v17 = vld [vmem:[%s19980_s25 + $0x470] ss:$8 sps:$4 sm:$0xff]  }
 0x20e   :  { %13306 = vmatmul.mubr.msk.bf16.gmra.mrb[84].mxu0 %vm668_vm3, %v1262_v49  ;;  %3037 = vmatmul.mubr.bf16.gmra.mrb[236].mxu1 %v15187_v12  ;;  %v15196_v12 = vld [vmem:[%s19980_s25 + $0x460] ss:$8 sps:$4 sm:$0xff]  }
 0x20f   :  { %13311 = vmatprep.mubr.msk.bf16.mxu0 %vm15594_vm2, %v15593_v41  ;;  %11880 = vmatprep.mubr.msk.bf16.mxu1 %vm215_vm0, %v15188_v30 }
 0x210   :  { %3449 = vmatpush1.bf16.msra.mxu1 %v15809_v29 }
 0x211   :  { %v16816_v15 = vpop.f32.mrb[132].mxu1  ;;  %3450 = vmatprep.subr.bf16.mxu1 %v15592_v0 }
 0x212   :  { %v2088_v28 = vpop.f32.mrb[133].mxu1 }
 0x213   :  { %v16822_v38 = vpop.f32.mrb[134].mxu1  ;;  %v11852_v28 = vld [vmem:[%s19980_s25 + $0x490] sm:$0xff] }
 0x214   :  { %v2091_v51 = vpop.f32.mrb[135].mxu1  ;;  %v2172_v3 = vpack.c.bf16 %v16822_v38, %v16816_v15  ;;  %3451 = vmatpush1.bf16.msra.mxu1 %v15824_v33  ;;  %v11874_v18 = vcombine.high %v11852_v28, %v11852_v28  ;;  %v15223_v15 = vld [vmem:[%s19980_s25 + $0x4f8] ss:$8 sps:$4 sm:$0xff]  }
 0x215   :  { %3452 = vmatprep.subr.bf16.mxu1 %v15592_v0  ;;  %v15200_v51 = vld [vmem:[%s19980_s25 + $0x480] ss:$8 sps:$4 sm:$0xff]  }
 0x216   :  { %13312 = vmatmul.mubr.msk.bf16.vlgmr.msra.gmra.mrb[44].mxu0 %vm668_vm3, %v1712_v61  ;;  %3045 = vmatmul.mubr.bf16.gmra.mrb[240].mxu1 %v15190_v31  ;;  %v15194_v61 = vld [vmem:[%s19980_s25 + $0x464] ss:$8 sps:$4 sm:$0xff]  }
 0x217   :  { %13315 = vmatprep.mubr.msk.bf16.mxu0 %vm15594_vm2, %v15593_v41  ;;  %13356 = vmatpush3.bf16.msra.mxu0 %v2218_v32 }
 0x218   :  { %11881 = vmatprep.mubr.msk.bf16.mxu1 %vm215_vm0, %v15191_v48  ;;  %3453 = vmatpush1.bf16.msra.mxu1 %v15833_v35 }
 0x219   :  { %v16840_v50 = vpop.f32.mrb[136].mxu1  ;;  %13401 = vmatprep.subr.bf16.mxu0 %v15593_v41  ;;  %3892 = vmatprep.subr.bf16.mxu1 %v15592_v0 }
 0x21a   :  { %v2096_v52 = vpop.f32.mrb[137].mxu1 }
 0x21b   :  { %v16847_v55 = vpop.f32.mrb[138].mxu1 }
 0x21c   :  { %v2173_v2 = vpack.c.bf16 %v16847_v55, %v16840_v50  ;;  %v2099_v1 = vpop.f32.mrb[139].mxu1  ;;  %v15231_v50 = vld [vmem:[%s19980_s25 + $0x51c] ss:$8 sps:$4 sm:$0xff]  }
 0x21e   :  { %13316 = vmatmul.mubr.msk.bf16.gmra.mrb[48].mxu0 %vm668_vm3, %v1713_v20  ;;  %3053 = vmatmul.mubr.bf16.gmra.mrb[244].mxu1 %v15193_v44 }
 0x21f   :  { %13319 = vmatprep.mubr.msk.bf16.mxu0 %vm15594_vm2, %v15593_v41  ;;  %11882 = vmatprep.mubr.msk.bf16.mxu1 %vm215_vm0, %v15194_v61  ;;  %v11873_v61 = vcombine.low %v11852_v28, %v11852_v28  ;;  %v15211_v28 = vld [vmem:[%s19980_s25 + $0x4b8] ss:$8 sps:$4 sm:$0xff]  }
 0x221   :  { %v16861_v36 = vpop.f32.mrb[140].mxu1 }
 0x222   :  { %v2104_v25 = vpop.f32.mrb[141].mxu1 }
 0x223   :  { %v16866_v8 = vpop.f32.mrb[142].mxu1  ;;  %v15207_v25 = vld [vmem:[%s19980_s25 + $0x49c] ss:$8 sps:$4 sm:$0xff]  }
 0x224   :  { %v2174_v58 = vpack.c.bf16 %v16866_v8, %v16861_v36  ;;  %v2107_v20 = vpop.f32.mrb[143].mxu1  ;;  %v15234_v36 = vld [vmem:[%s19980_s25 + $0x52c] ss:$8 sps:$4 sm:$0xff]  }
 0x226   :  { %13320 = vmatmul.mubr.msk.bf16.gmra.mrb[52].mxu0 %vm668_vm3, %v1714_v14  ;;  %3061 = vmatmul.mubr.bf16.gmra.mrb[248].mxu1 %v15196_v12 }
 0x227   :  { %13323 = vmatprep.mubr.msk.bf16.mxu0 %vm15594_vm2, %v15593_v41  ;;  %11883 = vmatprep.mubr.msk.bf16.mxu1 %vm215_vm0, %v15197_v59  ;;  %v15205_v59 = vld [vmem:[%s19980_s25 + $0x498] ss:$8 sps:$4 sm:$0xff]  }
 0x229   :  { %v16880_v30 = vpop.f32.mrb[144].mxu1 }
 0x22a   :  { %v2112_v49 = vpop.f32.mrb[145].mxu1 }
 0x22b   :  { %v16885_v5 = vpop.f32.mrb[146].mxu1 }
 0x22c   :  { %v2175_v53 = vpack.c.bf16 %v16885_v5, %v16880_v30  ;;  %v2115_v14 = vpop.f32.mrb[147].mxu1 }
 0x22e   :  { %13324 = vmatmul.mubr.msk.bf16.gmra.mrb[56].mxu0 %vm668_vm3, %v1715_v39  ;;  %3069 = vmatmul.mubr.bf16.gmra.mrb[252].mxu1 %v15199_v17 }
 0x22f   :  { %13327 = vmatprep.mubr.msk.bf16.mxu0 %vm15594_vm2, %v15593_v41  ;;  %11884 = vmatprep.mubr.msk.bf16.mxu1 %vm215_vm0, %v15202_v34  ;;  %v15208_v34 = vld [vmem:[%s19980_s25 + $0x4a8] ss:$8 sps:$4 sm:$0xff]  }
 0x231   :  { %v16902_v31 = vpop.f32.mrb[148].mxu1 }
 0x232   :  { %v2120_v32 = vpop.f32.mrb[149].mxu1 }
 0x233   :  { %v16907_v62 = vpop.f32.mrb[150].mxu1 }
 0x234   :  { %v2176_v39 = vpack.c.bf16 %v16907_v62, %v16902_v31  ;;  %v2123_v48 = vpop.f32.mrb[151].mxu1 }
 0x235   :  { %v15217_v48 = vld [vmem:[%s19980_s25 + $0x4d8] ss:$8 sps:$4 sm:$0xff]  }
 0x236   :  { %13328 = vmatmul.mubr.msk.bf16.gmra.mrb[60].mxu0 %vm668_vm3, %v1716_v47  ;;  %3077 = vmatmul.mubr.bf16.gmra.mrb[0].mxu1 %v15200_v51  ;;  %v15214_v51 = vld [vmem:[%s19980_s25 + $0x4c8] ss:$8 sps:$4 sm:$0xff]  }
 0x237   :  { %13331 = vmatprep.mubr.msk.bf16.mxu0 %vm15594_vm2, %v15593_v41  ;;  %11885 = vmatprep.mubr.msk.bf16.mxu1 %vm215_vm0, %v11874_v18 }
 0x239   :  { %v16918_v52 = vpop.f32.mrb[152].mxu1 }
 0x23a   :  { %v2128_v44 = vpop.f32.mrb[153].mxu1 }
 0x23b   :  { %v16920_v1 = vpop.f32.mrb[154].mxu1 }
 0x23c   :  { %v2177_v42 = vpack.c.bf16 %v16920_v1, %v16918_v52  ;;  %v2131_v43 = vpop.f32.mrb[155].mxu1  ;;  %v15242_v52 = vld [vmem:[%s19980_s25 + $0x554] ss:$8 sps:$4 sm:$0xff]  }
 0x23e   :  { %13332 = vmatmul.mubr.msk.bf16.gmra.mrb[64].mxu0 %vm668_vm3, %v1717_v57  ;;  %3085 = vmatmul.mubr.bf16.gmra.mrb[4].mxu1 %v11873_v61  ;;  %v15220_v61 = vld [vmem:[%s19980_s25 + $0x4e8] ss:$8 sps:$4 sm:$0xff]  }
 0x23f   :  { %13335 = vmatprep.mubr.msk.bf16.mxu0 %vm15594_vm2, %v15593_v41  ;;  %11940 = vmatprep.mubr.msk.bf16.mxu1 %vm215_vm0, %v15207_v25 }
 0x241   :  { %v16934_v47 = vpop.f32.mrb[156].mxu1 }
 0x242   :  { %v2136_v12 = vpop.f32.mrb[157].mxu1 }
 0x243   :  { %v16939_v20 = vpop.f32.mrb[158].mxu1 }
 0x244   :  { %v2178_v40 = vpack.c.bf16 %v16939_v20, %v16934_v47  ;;  %v2139_v57 = vpop.f32.mrb[159].mxu1  ;;  %v15245_v47 = vld [vmem:[%s19980_s25 + $0x564] ss:$8 sps:$4 sm:$0xff]  }
 0x246   :  { %13336 = vmatmul.mubr.msk.bf16.gmra.mrb[68].mxu0 %vm668_vm3, %v1718_v27  ;;  %3465 = vmatmul.mubr.bf16.vlgmr.msra.gmra.mrb[8].mxu1 %v15205_v59  ;;  %v15225_v59 = vld [vmem:[%s19980_s25 + $0x4fc] ss:$8 sps:$4 sm:$0xff]  }
 0x247   :  { %13339 = vmatprep.mubr.msk.bf16.mxu0 %vm15594_vm2, %v15593_v41  ;;  %11941 = vmatprep.mubr.msk.bf16.mxu1 %vm215_vm0, %v15210_v7 }
 0x248   :  { %3893 = vmatpush1.bf16.msra.mxu1 %v15711_v4 }
 0x249   :  { %v16954_v49 = vpop.f32.mrb[160].mxu1  ;;  %3894 = vmatprep.subr.bf16.mxu1 %v15592_v0 }
 0x24a   :  { %v2144_v17 = vpop.f32.mrb[161].mxu1 }
 0x24b   :  { %v16960_v63 = vpop.f32.mrb[162].mxu1 }
 0x24c   :  { %v2179_v27 = vpack.c.bf16 %v16960_v63, %v16954_v49  ;;  %v2147_v14 = vpop.f32.mrb[163].mxu1  ;;  %3895 = vmatpush1.bf16.msra.mxu1 %v15717_v6  ;;  %v15248_v49 = vld [vmem:[%s19980_s25 + $0x574] ss:$8 sps:$4 sm:$0xff]  }
 0x24d   :  { %3896 = vmatprep.subr.bf16.mxu1 %v15592_v0 }
 0x24e   :  { %13340 = vmatmul.mubr.msk.bf16.gmra.mrb[72].mxu0 %vm668_vm3, %v1719_v37  ;;  %3473 = vmatmul.mubr.bf16.gmra.mrb[12].mxu1 %v15208_v34 }
 0x24f   :  { %13343 = vmatprep.mubr.msk.bf16.mxu0 %vm15594_vm2, %v15593_v41  ;;  %11942 = vmatprep.mubr.msk.bf16.mxu1 %vm215_vm0, %v15213_v24  ;;  %v15226_v24 = vld [vmem:[%s19980_s25 + $0x508] ss:$8 sps:$4 sm:$0xff]  }
 0x250   :  { %3897 = vmatpush1.bf16.msra.mxu1 %v15732_v10 }
 0x251   :  { %v16977_v4 = vpop.f32.mrb[164].mxu1  ;;  %3898 = vmatprep.subr.bf16.mxu1 %v15592_v0 }
 0x252   :  { %v2152_v6 = vpop.f32.mrb[165].mxu1 }
 0x253   :  { %v16983_v9 = vpop.f32.mrb[166].mxu1 }
 0x254   :  { %v2180_v37 = vpack.c.bf16 %v16983_v9, %v16977_v4  ;;  %v2155_v32 = vpop.f32.mrb[167].mxu1  ;;  %3899 = vmatpush1.bf16.msra.mxu1 %v15745_v13  ;;  %v15251_v4 = vld [vmem:[%s19980_s25 + $0x584] ss:$8 sps:$4 sm:$0xff]  }
 0x255   :  { %3900 = vmatprep.subr.bf16.mxu1 %v15592_v0 }
 0x256   :  { %13344 = vmatmul.mubr.msk.bf16.gmra.mrb[76].mxu0 %vm668_vm3, %v1720_v60  ;;  %3481 = vmatmul.mubr.bf16.gmra.mrb[16].mxu1 %v15211_v28 }
 0x257   :  { %13347 = vmatprep.mubr.msk.bf16.mxu0 %vm15594_vm2, %v15593_v41  ;;  %11943 = vmatprep.mubr.msk.bf16.mxu1 %vm215_vm0, %v15216_v22  ;;  %v15229_v22 = vld [vmem:[%s19980_s25 + $0x518] ss:$8 sps:$4 sm:$0xff]  }
 0x258   :  { %3901 = vmatpush1.bf16.msra.mxu1 %v15757_v16 }
 0x259   :  { %v17000_v10 = vpop.f32.mrb[168].mxu1  ;;  %3902 = vmatprep.subr.bf16.mxu1 %v15592_v0 }
 0x25a   :  { %v2160_v13 = vpop.f32.mrb[169].mxu1 }
 0x25b   :  { %v17006_v46 = vpop.f32.mrb[170].mxu1  ;;  %v11917_v13 = vld [vmem:[%s19980_s25 + $0x538] sm:$0xff] }
 0x25c   :  { %v2181_v60 = vpack.c.bf16 %v17006_v46, %v17000_v10  ;;  %v2163_v18 = vpop.f32.mrb[171].mxu1  ;;  %3903 = vmatpush1.bf16.msra.mxu1 %v15769_v19  ;;  %v11939_v5 = vcombine.high %v11917_v13, %v11917_v13  ;;  %v15254_v10 = vld [vmem:[%s19980_s25 + $0x594] ss:$8 sps:$4 sm:$0xff]  }
 0x25d   :  { %3904 = vmatprep.subr.bf16.mxu1 %v15592_v0  ;;  %v15232_v18 = vld [vmem:[%s19980_s25 + $0x528] ss:$8 sps:$4 sm:$0xff]  }
 0x25e   :  { %13348 = vmatmul.mubr.msk.bf16.gmra.mrb[80].mxu0 %vm668_vm3, %v1721_v21  ;;  %3489 = vmatmul.mubr.bf16.gmra.mrb[20].mxu1 %v15214_v51  ;;  %v1722_v21 = vpack.c.bf16 %v16795_v54, %v16795_v54 }
 0x25f   :  { %13351 = vmatprep.mubr.msk.bf16.mxu0 %vm15594_vm2, %v15593_v41  ;;  %11944 = vmatprep.mubr.msk.bf16.mxu1 %vm215_vm0, %v15219_v45 }
 0x260   :  { %3905 = vmatpush1.bf16.msra.mxu1 %v15784_v23  ;;  %v2643_v23 = vld [vmem:[%s19981_s24 + $0x14] sm:$0xf] }
 0x261   :  { %v17023_v16 = vpop.f32.mrb[172].mxu1  ;;  %3906 = vmatprep.subr.bf16.mxu1 %v15592_v0  ;;  %v2678_v43 = vsel %vm249_vm1, %v2643_v23, 0 }
 0x262   :  { %v2168_v19 = vpop.f32.mrb[173].mxu1  ;;  %v2182_v46 = vpack.c.bf16 %v17023_v16, %v17023_v16  ;;  %v15252_v16 = vld [vmem:[%s19980_s25 + $0x590] ss:$8 sps:$4 sm:$0xff]  }
 0x263   :  { %v2169_v11 = vpop.f32.mrb[174].mxu1 }
 0x264   :  { %v2170_v44 = vpop.f32.mrb[175].mxu1  ;;  %3907 = vmatpush1.bf16.msra.mxu1 %v15797_v26 }
 0x265   :  { %3908 = vmatprep.subr.bf16.mxu1 %v15592_v0  ;;  %v15239_v44 = vld [vmem:[%s19980_s25 + $0x544] ss:$8 sps:$4 sm:$0xff]  }
 0x266   :  { %13352 = vmatmul.mubr.msk.bf16.gmra.mrb[84].mxu0 %vm668_vm3, %v1722_v21  ;;  %3497 = vmatmul.mubr.bf16.gmra.mrb[24].mxu1 %v15217_v48 }
 0x267   :  { %13357 = vmatprep.mubr.msk.bf16.mxu0 %vm15594_vm2, %v15593_v41  ;;  %11945 = vmatprep.mubr.msk.bf16.mxu1 %vm215_vm0, %v15222_v56  ;;  %v11938_v56 = vcombine.low %v11917_v13, %v11917_v13 }
 0x268   :  { %3909 = vmatpush1.bf16.msra.mxu1 %v15809_v29 }
 0x269   :  { %v17044_v54 = vpop.f32.mrb[176].mxu1  ;;  %3910 = vmatprep.subr.bf16.mxu1 %v15592_v0 }
 0x26a   :  { %v2548_v26 = vpop.f32.mrb[177].mxu1 }
 0x26b   :  { %v17050_v25 = vpop.f32.mrb[178].mxu1  ;;  %v15237_v26 = vld [vmem:[%s19980_s25 + $0x540] ss:$8 sps:$4 sm:$0xff]  }
 0x26c   :  { %v2632_v29 = vpack.c.bf16 %v17050_v25, %v17044_v54  ;;  %v2551_v12 = vpop.f32.mrb[179].mxu1  ;;  %3911 = vmatpush1.bf16.msra.mxu1 %v15824_v33  ;;  %v15260_v54 = vld [vmem:[%s19980_s25 + $0x5b4] ss:$8 sps:$4 sm:$0xff]  }
 0x26d   :  { %3912 = vmatprep.subr.bf16.mxu1 %v15592_v0 }
 0x26e   :  { %13358 = vmatmul.mubr.msk.bf16.vlgmr.msra.gmra.mrb[44].mxu0 %vm668_vm3, %v2172_v3  ;;  %3505 = vmatmul.mubr.bf16.gmra.mrb[28].mxu1 %v15220_v61  ;;  %v15228_v3 = vld [vmem:[%s19980_s25 + $0x50c] ss:$8 sps:$4 sm:$0xff]  }
 0x26f   :  { %13361 = vmatprep.mubr.msk.bf16.mxu0 %vm15594_vm2, %v15593_v41  ;;  %13402 = vmatpush3.bf16.msra.mxu0 %v2678_v43 }
 0x270   :  { %11946 = vmatprep.mubr.msk.bf16.mxu1 %vm215_vm0, %v15225_v59  ;;  %3913 = vmatpush1.bf16.msra.mxu1 %v15833_v35  ;;  %v15240_v59 = vld [vmem:[%s19980_s25 + $0x550] ss:$8 sps:$4 sm:$0xff]  }
 0x271   :  { %v17068_v7 = vpop.f32.mrb[180].mxu1  ;;  %13447 = vmatprep.subr.bf16.mxu0 %v15593_v41  ;;  %4512 = vmatprep.subr.bf16.mxu1 %v15592_v0 }
 0x272   :  { %v2556_v33 = vpop.f32.mrb[181].mxu1 }
 0x273   :  { %v17075_v38 = vpop.f32.mrb[182].mxu1 }
 0x274   :  { %v2633_v35 = vpack.c.bf16 %v17075_v38, %v17068_v7  ;;  %v2559_v57 = vpop.f32.mrb[183].mxu1  ;;  %v15263_v7 = vld [vmem:[%s19980_s25 + $0x5c4] ss:$8 sps:$4 sm:$0xff]  }
 0x275   :  { %v15243_v57 = vld [vmem:[%s19980_s25 + $0x560] ss:$8 sps:$4 sm:$0xff]  }
 0x276   :  { %13362 = vmatmul.mubr.msk.bf16.gmra.mrb[48].mxu0 %vm668_vm3, %v2173_v2  ;;  %3513 = vmatmul.mubr.bf16.gmra.mrb[32].mxu1 %v15223_v15 }
 0x277   :  { %13365 = vmatprep.mubr.msk.bf16.mxu0 %vm15594_vm2, %v15593_v41  ;;  %11947 = vmatprep.mubr.msk.bf16.mxu1 %vm215_vm0, %v15228_v3 }
 0x279   :  { %v17089_v17 = vpop.f32.mrb[184].mxu1 }
 0x27a   :  { %v2564_v34 = vpop.f32.mrb[185].mxu1 }
 0x27b   :  { %v17094_v14 = vpop.f32.mrb[186].mxu1 }
 0x27c   :  { %v2567_v55 = vpop.f32.mrb[187].mxu1  ;;  %v2634_v2 = vpack.c.bf16 %v17094_v14, %v17089_v17  ;;  %v15266_v17 = vld [vmem:[%s19980_s25 + $0x5d4] ss:$8 sps:$4 sm:$0xff]  }
 0x27d   :  { %v15246_v55 = vld [vmem:[%s19980_s25 + $0x570] ss:$8 sps:$4 sm:$0xff]  }
 0x27e   :  { %13366 = vmatmul.mubr.msk.bf16.gmra.mrb[52].mxu0 %vm668_vm3, %v2174_v58  ;;  %3521 = vmatmul.mubr.bf16.gmra.mrb[36].mxu1 %v15226_v24 }
 0x27f   :  { %13369 = vmatprep.mubr.msk.bf16.mxu0 %vm15594_vm2, %v15593_v41  ;;  %11948 = vmatprep.mubr.msk.bf16.mxu1 %vm215_vm0, %v15231_v50 }
 0x281   :  { %v17108_v6 = vpop.f32.mrb[188].mxu1 }
 0x282   :  { %v2572_v28 = vpop.f32.mrb[189].mxu1 }
 0x283   :  { %v17113_v32 = vpop.f32.mrb[190].mxu1 }
 0x284   :  { %v2575_v8 = vpop.f32.mrb[191].mxu1  ;;  %v2635_v58 = vpack.c.bf16 %v17113_v32, %v17108_v6 }
 0x285   :  { %v15249_v8 = vld [vmem:[%s19980_s25 + $0x580] ss:$8 sps:$4 sm:$0xff]  }
 0x286   :  { %13370 = vmatmul.mubr.msk.bf16.gmra.mrb[56].mxu0 %vm668_vm3, %v2175_v53  ;;  %3529 = vmatmul.mubr.bf16.gmra.mrb[40].mxu1 %v15229_v22 }
 0x287   :  { %13373 = vmatprep.mubr.msk.bf16.mxu0 %vm15594_vm2, %v15593_v41  ;;  %11949 = vmatprep.mubr.msk.bf16.mxu1 %vm215_vm0, %v15234_v36 }
 0x289   :  { %v17130_v51 = vpop.f32.mrb[192].mxu1 }
 0x28a   :  { %v2580_v45 = vpop.f32.mrb[193].mxu1 }
 0x28b   :  { %v17135_v30 = vpop.f32.mrb[194].mxu1  ;;  %v3103_v45 = vld [vmem:[%s19981_s24 + $0x18] sm:$0xf] }
 0x28c   :  { %v2583_v53 = vpop.f32.mrb[195].mxu1  ;;  %v2636_v19 = vpack.c.bf16 %v17135_v30, %v17130_v51 }
 0x28e   :  { %13374 = vmatmul.mubr.msk.bf16.gmra.mrb[60].mxu0 %vm668_vm3, %v2176_v39  ;;  %3537 = vmatmul.mubr.bf16.gmra.mrb[44].mxu1 %v15232_v18 }
 0x28f   :  { %13377 = vmatprep.mubr.msk.bf16.mxu0 %vm15594_vm2, %v15593_v41  ;;  %11950 = vmatprep.mubr.msk.bf16.mxu1 %vm215_vm0, %v11939_v5 }
 0x291   :  { %v17146_v48 = vpop.f32.mrb[196].mxu1 }
 0x292   :  { %v2588_v11 = vpop.f32.mrb[197].mxu1 }
 0x293   :  { %v17148_v21 = vpop.f32.mrb[198].mxu1  ;;  %v3138_v11 = vsel %vm249_vm1, %v3103_v45, 0 }
 0x294   :  { %v2637_v31 = vpack.c.bf16 %v17148_v21, %v17146_v48  ;;  %v2591_v62 = vpop.f32.mrb[199].mxu1 }
 0x295   :  { %v15257_v62 = vld [vmem:[%s19980_s25 + $0x5a4] ss:$8 sps:$4 sm:$0xff]  }
 0x296   :  { %13378 = vmatmul.mubr.msk.bf16.gmra.mrb[64].mxu0 %vm668_vm3, %v2177_v42  ;;  %3545 = vmatmul.mubr.bf16.gmra.mrb[48].mxu1 %v11938_v56 }
 0x297   :  { %13381 = vmatprep.mubr.msk.bf16.mxu0 %vm15594_vm2, %v15593_v41  ;;  %12005 = vmatprep.mubr.msk.bf16.mxu1 %vm215_vm0, %v15239_v44 }
 0x299   :  { %v17162_v39 = vpop.f32.mrb[200].mxu1 }
 0x29a   :  { %v2596_v23 = vpop.f32.mrb[201].mxu1 }
 0x29b   :  { %v17167_v61 = vpop.f32.mrb[202].mxu1 }
 0x29c   :  { %v2638_v1 = vpack.c.bf16 %v17167_v61, %v17162_v39  ;;  %v2599_v42 = vpop.f32.mrb[203].mxu1 }
 0x29e   :  { %13382 = vmatmul.mubr.msk.bf16.gmra.mrb[68].mxu0 %vm668_vm3, %v2178_v40  ;;  %3925 = vmatmul.mubr.bf16.vlgmr.msra.gmra.mrb[52].mxu1 %v15237_v26 }
 0x29f   :  { %13385 = vmatprep.mubr.msk.bf16.mxu0 %vm15594_vm2, %v15593_v41  ;;  %12006 = vmatprep.mubr.msk.bf16.mxu1 %vm215_vm0, %v15242_v52  ;;  %v15255_v52 = vld [vmem:[%s19980_s25 + $0x5a0] ss:$8 sps:$4 sm:$0xff]  }
 0x2a1   :  { %v17181_v43 = vpop.f32.mrb[204].mxu1 }
 0x2a2   :  { %v2604_v12 = vpop.f32.mrb[205].mxu1 }
 0x2a3   :  { %v17186_v33 = vpop.f32.mrb[206].mxu1 }
 0x2a4   :  { %v2639_v20 = vpack.c.bf16 %v17186_v33, %v17181_v43  ;;  %v2607_v40 = vpop.f32.mrb[207].mxu1 }
 0x2a6   :  { %13386 = vmatmul.mubr.msk.bf16.gmra.mrb[72].mxu0 %vm668_vm3, %v2179_v27  ;;  %3933 = vmatmul.mubr.bf16.gmra.mrb[56].mxu1 %v15240_v59 }
 0x2a7   :  { %13389 = vmatprep.mubr.msk.bf16.mxu0 %vm15594_vm2, %v15593_v41  ;;  %12007 = vmatprep.mubr.msk.bf16.mxu1 %vm215_vm0, %v15245_v47  ;;  %v15258_v47 = vld [vmem:[%s19980_s25 + $0x5b0] ss:$8 sps:$4 sm:$0xff]  }
 0x2a9   :  { %v17200_v15 = vpop.f32.mrb[208].mxu1 }
 0x2aa   :  { %v2612_v3 = vpop.f32.mrb[209].mxu1 }
 0x2ab   :  { %v17205_v34 = vpop.f32.mrb[210].mxu1 }
 0x2ac   :  { %v2640_v63 = vpack.c.bf16 %v17205_v34, %v17200_v15  ;;  %v2615_v27 = vpop.f32.mrb[211].mxu1 }
 0x2ae   :  { %13390 = vmatmul.mubr.msk.bf16.gmra.mrb[76].mxu0 %vm668_vm3, %v2180_v37  ;;  %3941 = vmatmul.mubr.bf16.gmra.mrb[60].mxu1 %v15243_v57 }
 0x2af   :  { %13393 = vmatprep.mubr.msk.bf16.mxu0 %vm15594_vm2, %v15593_v41  ;;  %12008 = vmatprep.mubr.msk.bf16.mxu1 %vm215_vm0, %v15248_v49  ;;  %v15261_v49 = vld [vmem:[%s19980_s25 + $0x5c0] ss:$8 sps:$4 sm:$0xff]  }
 0x2b1   :  { %v17219_v24 = vpop.f32.mrb[212].mxu1 }
 0x2b2   :  { %v2620_v50 = vpop.f32.mrb[213].mxu1 }
 0x2b3   :  { %v17224_v28 = vpop.f32.mrb[214].mxu1  ;;  %v11982_v50 = vld [vmem:[%s19980_s25 + $0x5e0] sm:$0xff] }
 0x2b4   :  { %v2641_v9 = vpack.c.bf16 %v17224_v28, %v17219_v24  ;;  %v2623_v37 = vpop.f32.mrb[215].mxu1  ;;  %v12004_v32 = vcombine.high %v11982_v50, %v11982_v50  ;;  %v3563_v24 = vld [vmem:[%s19981_s24 + $0x1c] sm:$0xf] }
 0x2b5   :  { %v15264_v37 = vld [vmem:[%s19980_s25 + $0x5d0] ss:$8 sps:$4 sm:$0xff]  }
 0x2b6   :  { %13394 = vmatmul.mubr.msk.bf16.gmra.mrb[80].mxu0 %vm668_vm3, %v2181_v60  ;;  %3949 = vmatmul.mubr.bf16.gmra.mrb[64].mxu1 %v15246_v55 }
 0x2b7   :  { %13397 = vmatprep.mubr.msk.bf16.mxu0 %vm15594_vm2, %v15593_v41  ;;  %12009 = vmatprep.mubr.msk.bf16.mxu1 %vm215_vm0, %v15251_v4 }
 0x2b9   :  { %v17238_v22 = vpop.f32.mrb[216].mxu1 }
 0x2ba   :  { %v2628_v36 = vpop.f32.mrb[217].mxu1 }
 0x2bb   :  { %v2629_v13 = vpop.f32.mrb[218].mxu1 }
 0x2bc   :  { %v2630_v60 = vpop.f32.mrb[219].mxu1 }
 0x2be   :  { %13398 = vmatmul.mubr.msk.bf16.gmra.mrb[84].mxu0 %vm668_vm3, %v2182_v46  ;;  %3957 = vmatmul.mubr.bf16.gmra.mrb[68].mxu1 %v15249_v8 }
 0x2bf   :  { %13403 = vmatprep.mubr.msk.bf16.mxu0 %vm15594_vm2, %v15593_v41  ;;  %12010 = vmatprep.mubr.msk.bf16.mxu1 %vm215_vm0, %v15254_v10  ;;  %v12003_v10 = vcombine.low %v11982_v50, %v11982_v50 }
 0x2c1   :  { %v17255_v18 = vpop.f32.mrb[220].mxu1 }
 0x2c2   :  { %v3008_v5 = vpop.f32.mrb[221].mxu1 }
 0x2c3   :  { %v17260_v53 = vpop.f32.mrb[222].mxu1 }
 0x2c4   :  { %v3092_v56 = vpack.c.bf16 %v17260_v53, %v17255_v18  ;;  %v3011_v44 = vpop.f32.mrb[223].mxu1 }
 0x2c6   :  { %13404 = vmatmul.mubr.msk.bf16.vlgmr.msra.gmra.mrb[44].mxu0 %vm668_vm3, %v2632_v29  ;;  %3965 = vmatmul.mubr.bf16.gmra.mrb[72].mxu1 %v15252_v16 }
 0x2c7   :  { %13407 = vmatprep.mubr.msk.bf16.mxu0 %vm15594_vm2, %v15593_v41  ;;  %13448 = vmatpush3.bf16.msra.mxu0 %v3138_v11 }
 0x2c8   :  { %12011 = vmatprep.mubr.msk.bf16.mxu1 %vm215_vm0, %v15257_v62  ;;  %13493 = vmatprep.subr.bf16.mxu0 %v15593_v41 }
 0x2c9   :  { %v17276_v23 = vpop.f32.mrb[224].mxu1 }
 0x2ca   :  { %v3016_v26 = vpop.f32.mrb[225].mxu1 }
 0x2cb   :  { %v17281_v42 = vpop.f32.mrb[226].mxu1 }
 0x2cc   :  { %v3093_v25 = vpack.c.bf16 %v17281_v42, %v17276_v23  ;;  %v3019_v29 = vpop.f32.mrb[227].mxu1 }
 0x2cd   :  { %v2642_v29 = vpack.c.bf16 %v17238_v22, %v17238_v22 }
 0x2ce   :  { %13408 = vmatmul.mubr.msk.bf16.gmra.mrb[48].mxu0 %vm668_vm3, %v2633_v35  ;;  %3973 = vmatmul.mubr.bf16.gmra.mrb[76].mxu1 %v15255_v52 }
 0x2cf   :  { %13411 = vmatprep.mubr.msk.bf16.mxu0 %vm15594_vm2, %v15593_v41  ;;  %12012 = vmatprep.mubr.msk.bf16.mxu1 %vm215_vm0, %v15260_v54 }
 0x2d1   :  { %v17295_v12 = vpop.f32.mrb[228].mxu1 }
 0x2d2   :  { %v3024_v59 = vpop.f32.mrb[229].mxu1 }
 0x2d3   :  { %v17300_v40 = vpop.f32.mrb[230].mxu1 }
 0x2d4   :  { %v3094_v38 = vpack.c.bf16 %v17300_v40, %v17295_v12  ;;  %v3027_v35 = vpop.f32.mrb[231].mxu1 }
 0x2d6   :  { %13412 = vmatmul.mubr.msk.bf16.gmra.mrb[52].mxu0 %vm668_vm3, %v2634_v2  ;;  %3981 = vmatmul.mubr.bf16.gmra.mrb[80].mxu1 %v15258_v47 }
 0x2d7   :  { %13415 = vmatprep.mubr.msk.bf16.mxu0 %vm15594_vm2, %v15593_v41  ;;  %12013 = vmatprep.mubr.msk.bf16.mxu1 %vm215_vm0, %v15263_v7  ;;  %v3598_v7 = vsel %vm249_vm1, %v3563_v24, 0 }
 0x2d9   :  { %v17314_v3 = vpop.f32.mrb[232].mxu1 }
 0x2da   :  { %v3032_v57 = vpop.f32.mrb[233].mxu1 }
 0x2db   :  { %v17319_v27 = vpop.f32.mrb[234].mxu1 }
 0x2dc   :  { %v3095_v14 = vpack.c.bf16 %v17319_v27, %v17314_v3  ;;  %v3035_v2 = vpop.f32.mrb[235].mxu1 }
 0x2de   :  { %13416 = vmatmul.mubr.msk.bf16.gmra.mrb[56].mxu0 %vm668_vm3, %v2635_v58  ;;  %3989 = vmatmul.mubr.bf16.gmra.mrb[84].mxu1 %v15261_v49 }
 0x2df   :  { %13419 = vmatprep.mubr.msk.bf16.mxu0 %vm15594_vm2, %v15593_v41  ;;  %12014 = vmatprep.mubr.msk.bf16.mxu1 %vm215_vm0, %v15266_v17 }
 0x2e1   :  { %v17336_v55 = vpop.f32.mrb[236].mxu1 }
 0x2e2   :  { %v3040_v4 = vpop.f32.mrb[237].mxu1 }
 0x2e3   :  { %v17341_v6 = vpop.f32.mrb[238].mxu1 }
 0x2e4   :  { %v3096_v58 = vpack.c.bf16 %v17341_v6, %v17336_v55  ;;  %v3043_v36 = vpop.f32.mrb[239].mxu1 }
 0x2e6   :  { %13420 = vmatmul.mubr.msk.bf16.gmra.mrb[60].mxu0 %vm668_vm3, %v2636_v19  ;;  %3997 = vmatmul.mubr.bf16.gmra.mrb[88].mxu1 %v15264_v37 }
 0x2e7   :  { %13423 = vmatprep.mubr.msk.bf16.mxu0 %vm15594_vm2, %v15593_v41  ;;  %12015 = vmatprep.mubr.msk.bf16.mxu1 %vm215_vm0, %v12004_v32 }
 0x2e9   :  { %v17352_v8 = vpop.f32.mrb[240].mxu1 }
 0x2ea   :  { %v3048_v13 = vpop.f32.mrb[241].mxu1 }
 0x2eb   :  { %v17354_v46 = vpop.f32.mrb[242].mxu1 }
 0x2ec   :  { %v3097_v60 = vpack.c.bf16 %v17354_v46, %v17352_v8  ;;  %v3051_v45 = vpop.f32.mrb[243].mxu1 }
 0x2ee   :  { %13424 = vmatmul.mubr.msk.bf16.gmra.mrb[64].mxu0 %vm668_vm3, %v2637_v31  ;;  %4005 = vmatmul.mubr.bf16.gmra.mrb[92].mxu1 %v12003_v10 }
 0x2ef   :  { %13427 = vmatprep.mubr.msk.bf16.mxu0 %vm15594_vm2, %v15593_v41 }
 0x2f1   :  { %v17364_v51 = vpop.f32.mrb[244].mxu1 }
 0x2f2   :  { %v3056_v30 = vpop.f32.mrb[245].mxu1 }
 0x2f3   :  { %v17366_v19 = vpop.f32.mrb[246].mxu1 }
 0x2f4   :  { %v3098_v5 = vpack.c.bf16 %v17366_v19, %v17364_v51  ;;  %v3059_v16 = vpop.f32.mrb[247].mxu1 }
 0x2f6   :  { %13428 = vmatmul.mubr.msk.bf16.gmra.mrb[68].mxu0 %vm668_vm3, %v2638_v1 }
 0x2f7   :  { %13431 = vmatprep.mubr.msk.bf16.mxu0 %vm15594_vm2, %v15593_v41 }
 0x2f9   :  { %v17376_v48 = vpop.f32.mrb[248].mxu1 }
 0x2fa   :  { %v3064_v21 = vpop.f32.mrb[249].mxu1 }
 0x2fb   :  { %v17378_v31 = vpop.f32.mrb[250].mxu1 }
 0x2fc   :  { %v3099_v11 = vpack.c.bf16 %v17378_v31, %v17376_v48  ;;  %v3067_v44 = vpop.f32.mrb[251].mxu1 }
 0x2fe   :  { %13432 = vmatmul.mubr.msk.bf16.gmra.mrb[72].mxu0 %vm668_vm3, %v2639_v20 }
 0x2ff   :  { %13435 = vmatprep.mubr.msk.bf16.mxu0 %vm15594_vm2, %v15593_v41 }
 0x301   :  { %v17388_v39 = vpop.f32.mrb[252].mxu1 }
 0x302   :  { %v3072_v61 = vpop.f32.mrb[253].mxu1 }
 0x303   :  { %v17390_v1 = vpop.f32.mrb[254].mxu1 }
 0x304   :  { %v3100_v62 = vpack.c.bf16 %v17390_v1, %v17388_v39  ;;  %v3075_v26 = vpop.f32.mrb[255].mxu1 }
 0x306   :  { %13436 = vmatmul.mubr.msk.bf16.gmra.mrb[76].mxu0 %vm668_vm3, %v2640_v63 }
 0x307   :  { %13439 = vmatprep.mubr.msk.bf16.mxu0 %vm15594_vm2, %v15593_v41 }
 0x309   :  { %v17400_v43 = vpop.f32.mrb[0].mxu1 }
 0x30a   :  { %v3080_v33 = vpop.f32.mrb[1].mxu1 }
 0x30b   :  { %v17402_v20 = vpop.f32.mrb[2].mxu1 }
 0x30c   :  { %v3101_v52 = vpack.c.bf16 %v17402_v20, %v17400_v43  ;;  %v3083_v54 = vpop.f32.mrb[3].mxu1  ;;  %v4023_v43 = vld [vmem:[%s19981_s24 + $0x20] sm:$0xf] }
 0x30d   :  { %v4058_v24 = vsel %vm249_vm1, %v4023_v43, 0 }
 0x30e   :  { %13440 = vmatmul.mubr.msk.bf16.gmra.mrb[80].mxu0 %vm668_vm3, %v2641_v9 }
 0x30f   :  { %13443 = vmatprep.mubr.msk.bf16.mxu0 %vm15594_vm2, %v15593_v41 }
 0x311   :  { %v17412_v15 = vpop.f32.mrb[4].mxu1 }
 0x312   :  { %v3088_v34 = vpop.f32.mrb[5].mxu1 }
 0x313   :  { %v3089_v63 = vpop.f32.mrb[6].mxu1 }
 0x314   :  { %v3090_v59 = vpop.f32.mrb[7].mxu1  ;;  %v3102_v63 = vpack.c.bf16 %v17412_v15, %v17412_v15 }
 0x316   :  { %13444 = vmatmul.mubr.msk.bf16.gmra.mrb[84].mxu0 %vm668_vm3, %v2642_v29 }
 0x317   :  { %13449 = vmatprep.mubr.msk.bf16.mxu0 %vm15594_vm2, %v15593_v41 }
 0x319   :  { %v17422_v28 = vpop.f32.mrb[8].mxu1 }
 0x31a   :  { %v3468_v9 = vpop.f32.mrb[9].mxu1 }
 0x31b   :  { %v17424_v47 = vpop.f32.mrb[10].mxu1 }
 0x31c   :  { %v3552_v22 = vpack.c.bf16 %v17424_v47, %v17422_v28  ;;  %v3471_v35 = vpop.f32.mrb[11].mxu1 }
 0x31e   :  { %13450 = vmatmul.mubr.msk.bf16.vlgmr.msra.gmra.mrb[44].mxu0 %vm668_vm3, %v3092_v56 }
 0x31f   :  { %13453 = vmatprep.mubr.msk.bf16.mxu0 %vm15594_vm2, %v15593_v41  ;;  %13494 = vmatpush3.bf16.msra.mxu0 %v3598_v7 }
 0x320   :  { %13539 = vmatprep.subr.bf16.mxu0 %v15593_v41 }
 0x321   :  { %v17436_v57 = vpop.f32.mrb[12].mxu1 }
 0x322   :  { %v3476_v49 = vpop.f32.mrb[13].mxu1 }
 0x323   :  { %v17438_v17 = vpop.f32.mrb[14].mxu1 }
 0x324   :  { %v3553_v2 = vpack.c.bf16 %v17438_v17, %v17436_v57  ;;  %v3479_v50 = vpop.f32.mrb[15].mxu1 }
 0x326   :  { %13454 = vmatmul.mubr.msk.bf16.gmra.mrb[48].mxu0 %vm668_vm3, %v3093_v25 }
 0x327   :  { %13457 = vmatprep.mubr.msk.bf16.mxu0 %vm15594_vm2, %v15593_v41 }
 0x329   :  { %v17448_v18 = vpop.f32.mrb[16].mxu1 }
 0x32a   :  { %v3484_v53 = vpop.f32.mrb[17].mxu1 }
 0x32b   :  { %v17450_v56 = vpop.f32.mrb[18].mxu1 }
 0x32c   :  { %v3554_v4 = vpack.c.bf16 %v17450_v56, %v17448_v18  ;;  %v3487_v37 = vpop.f32.mrb[19].mxu1 }
 0x32e   :  { %13458 = vmatmul.mubr.msk.bf16.gmra.mrb[52].mxu0 %vm668_vm3, %v3094_v38 }
 0x32f   :  { %13461 = vmatprep.mubr.msk.bf16.mxu0 %vm15594_vm2, %v15593_v41 }
 0x331   :  { %v17460_v23 = vpop.f32.mrb[20].mxu1 }
 0x332   :  { %v3492_v42 = vpop.f32.mrb[21].mxu1 }
 0x333   :  { %v17462_v25 = vpop.f32.mrb[22].mxu1 }
 0x334   :  { %v3555_v32 = vpack.c.bf16 %v17462_v25, %v17460_v23  ;;  %v3495_v36 = vpop.f32.mrb[23].mxu1 }
 0x336   :  { %13462 = vmatmul.mubr.msk.bf16.gmra.mrb[56].mxu0 %vm668_vm3, %v3095_v14 }
 0x337   :  { %13465 = vmatprep.mubr.msk.bf16.mxu0 %vm15594_vm2, %v15593_v41 }
 0x339   :  { %v17472_v12 = vpop.f32.mrb[24].mxu1 }
 0x33a   :  { %v3500_v40 = vpop.f32.mrb[25].mxu1 }
 0x33b   :  { %v17474_v38 = vpop.f32.mrb[26].mxu1 }
 0x33c   :  { %v3556_v13 = vpack.c.bf16 %v17474_v38, %v17472_v12  ;;  %v3503_v10 = vpop.f32.mrb[27].mxu1 }
 0x33e   :  { %13466 = vmatmul.mubr.msk.bf16.gmra.mrb[60].mxu0 %vm668_vm3, %v3096_v58 }
 0x33f   :  { %13469 = vmatprep.mubr.msk.bf16.mxu0 %vm15594_vm2, %v15593_v41 }
 0x341   :  { %v17484_v3 = vpop.f32.mrb[28].mxu1 }
 0x342   :  { %v3508_v27 = vpop.f32.mrb[29].mxu1 }
 0x343   :  { %v17486_v14 = vpop.f32.mrb[30].mxu1 }
 0x344   :  { %v3557_v45 = vpack.c.bf16 %v17486_v14, %v17484_v3  ;;  %v3511_v30 = vpop.f32.mrb[31].mxu1 }
 0x346   :  { %13470 = vmatmul.mubr.msk.bf16.gmra.mrb[64].mxu0 %vm668_vm3, %v3097_v60 }
 0x347   :  { %13473 = vmatprep.mubr.msk.bf16.mxu0 %vm15594_vm2, %v15593_v41 }
 0x349   :  { %v17496_v55 = vpop.f32.mrb[32].mxu1 }
 0x34a   :  { %v3516_v6 = vpop.f32.mrb[33].mxu1 }
 0x34b   :  { %v17498_v58 = vpop.f32.mrb[34].mxu1 }
 0x34c   :  { %v3558_v16 = vpack.c.bf16 %v17498_v58, %v17496_v55  ;;  %v3519_v21 = vpop.f32.mrb[35].mxu1 }
 0x34e   :  { %13474 = vmatmul.mubr.msk.bf16.gmra.mrb[68].mxu0 %vm668_vm3, %v3098_v5 }
 0x34f   :  { %13477 = vmatprep.mubr.msk.bf16.mxu0 %vm15594_vm2, %v15593_v41 }
 0x351   :  { %v17508_v8 = vpop.f32.mrb[36].mxu1 }
 0x352   :  { %v3524_v46 = vpop.f32.mrb[37].mxu1 }
 0x353   :  { %v17510_v60 = vpop.f32.mrb[38].mxu1 }
 0x354   :  { %v3559_v44 = vpack.c.bf16 %v17510_v60, %v17508_v8  ;;  %v3527_v61 = vpop.f32.mrb[39].mxu1 }
 0x356   :  { %13478 = vmatmul.mubr.msk.bf16.gmra.mrb[72].mxu0 %vm668_vm3, %v3099_v11 }
 0x357   :  { %13481 = vmatprep.mubr.msk.bf16.mxu0 %vm15594_vm2, %v15593_v41 }
 0x359   :  { %v17520_v51 = vpop.f32.mrb[40].mxu1 }
 0x35a   :  { %v3532_v19 = vpop.f32.mrb[41].mxu1 }
 0x35b   :  { %v17522_v5 = vpop.f32.mrb[42].mxu1 }
 0x35c   :  { %v3560_v26 = vpack.c.bf16 %v17522_v5, %v17520_v51  ;;  %v3535_v33 = vpop.f32.mrb[43].mxu1 }
 0x35e   :  { %13482 = vmatmul.mubr.msk.bf16.gmra.mrb[76].mxu0 %vm668_vm3, %v3100_v62 }
 0x35f   :  { %13485 = vmatprep.mubr.msk.bf16.mxu0 %vm15594_vm2, %v15593_v41 }
 0x361   :  { %v17532_v48 = vpop.f32.mrb[44].mxu1 }
 0x362   :  { %v3540_v31 = vpop.f32.mrb[45].mxu1 }
 0x363   :  { %v17534_v11 = vpop.f32.mrb[46].mxu1 }
 0x364   :  { %v3561_v54 = vpack.c.bf16 %v17534_v11, %v17532_v48  ;;  %v3543_v34 = vpop.f32.mrb[47].mxu1 }
 0x366   :  { %13486 = vmatmul.mubr.msk.bf16.gmra.mrb[80].mxu0 %vm668_vm3, %v3101_v52 }
 0x367   :  { %13489 = vmatprep.mubr.msk.bf16.mxu0 %vm15594_vm2, %v15593_v41 }
 0x369   :  { %v17544_v39 = vpop.f32.mrb[48].mxu1 }
 0x36a   :  { %v3548_v1 = vpop.f32.mrb[49].mxu1 }
 0x36b   :  { %v3549_v62 = vpop.f32.mrb[50].mxu1 }
 0x36c   :  { %v3550_v29 = vpop.f32.mrb[51].mxu1 }
 0x36e   :  { %13490 = vmatmul.mubr.msk.bf16.gmra.mrb[84].mxu0 %vm668_vm3, %v3102_v63 }
 0x36f   :  { %13495 = vmatprep.mubr.msk.bf16.mxu0 %vm15594_vm2, %v15593_v41 }
 0x371   :  { %v17554_v20 = vpop.f32.mrb[52].mxu1 }
 0x372   :  { %v3928_v52 = vpop.f32.mrb[53].mxu1 }
 0x373   :  { %v17556_v59 = vpop.f32.mrb[54].mxu1 }
 0x374   :  { %v4012_v15 = vpack.c.bf16 %v17556_v59, %v17554_v20  ;;  %v3931_v9 = vpop.f32.mrb[55].mxu1 }
 0x376   :  { %13496 = vmatmul.mubr.msk.bf16.vlgmr.msra.gmra.mrb[44].mxu0 %vm668_vm3, %v3552_v22 }
 0x377   :  { %13499 = vmatprep.mubr.msk.bf16.mxu0 %vm15594_vm2, %v15593_v41  ;;  %13540 = vmatpush3.bf16.msra.mxu0 %v4058_v24 }
 0x378   :  { %5158 = vmatprep.subr.bf16.mxu0 %v15592_v0 }
 0x379   :  { %v17568_v7 = vpop.f32.mrb[56].mxu1 }
 0x37a   :  { %v3936_v35 = vpop.f32.mrb[57].mxu1 }
 0x37b   :  { %v17570_v49 = vpop.f32.mrb[58].mxu1 }
 0x37c   :  { %v4013_v50 = vpack.c.bf16 %v17570_v49, %v17568_v7  ;;  %v3939_v53 = vpop.f32.mrb[59].mxu1 }
 0x37e   :  { %13500 = vmatmul.mubr.msk.bf16.gmra.mrb[48].mxu0 %vm668_vm3, %v3553_v2 }
 0x37f   :  { %13503 = vmatprep.mubr.msk.bf16.mxu0 %vm15594_vm2, %v15593_v41 }
 0x381   :  { %v17580_v28 = vpop.f32.mrb[60].mxu1 }
 0x382   :  { %v3944_v47 = vpop.f32.mrb[61].mxu1 }
 0x383   :  { %v17582_v22 = vpop.f32.mrb[62].mxu1 }
 0x384   :  { %v4014_v37 = vpack.c.bf16 %v17582_v22, %v17580_v28  ;;  %v3947_v42 = vpop.f32.mrb[63].mxu1 }
 0x386   :  { %13504 = vmatmul.mubr.msk.bf16.gmra.mrb[52].mxu0 %vm668_vm3, %v3554_v4 }
 0x387   :  { %13507 = vmatprep.mubr.msk.bf16.mxu0 %vm15594_vm2, %v15593_v41 }
 0x389   :  { %v17592_v57 = vpop.f32.mrb[64].mxu1 }
 0x38a   :  { %v3952_v17 = vpop.f32.mrb[65].mxu1 }
 0x38b   :  { %v3953_v2 = vpop.f32.mrb[66].mxu1 }
 0x38c   :  { %v4015_v36 = vpack.c.bf16 %v3953_v2, %v17592_v57  ;;  %v3955_v40 = vpop.f32.mrb[67].mxu1 }
 0x38e   :  { %13508 = vmatmul.mubr.msk.bf16.gmra.mrb[56].mxu0 %vm668_vm3, %v3555_v32 }
 0x38f   :  { %13511 = vmatprep.mubr.msk.bf16.mxu0 %vm15594_vm2, %v15593_v41 }
 0x391   :  { %v3958_v18 = vpop.f32.mrb[68].mxu1 }
 0x392   :  { %v3960_v56 = vpop.f32.mrb[69].mxu1 }
 0x393   :  { %v3961_v4 = vpop.f32.mrb[70].mxu1 }
 0x394   :  { %v4016_v10 = vpack.c.bf16 %v3961_v4, %v3958_v18  ;;  %v3963_v27 = vpop.f32.mrb[71].mxu1 }
 0x396   :  { %13512 = vmatmul.mubr.msk.bf16.gmra.mrb[60].mxu0 %vm668_vm3, %v3556_v13 }
 0x397   :  { %13515 = vmatprep.mubr.msk.bf16.mxu0 %vm15594_vm2, %v15593_v41 }
 0x399   :  { %v3966_v30 = vpop.f32.mrb[72].mxu1 }
 0x39a   :  { %v3968_v23 = vpop.f32.mrb[73].mxu1 }
 0x39b   :  { %v3969_v25 = vpop.f32.mrb[74].mxu1 }
 0x39c   :  { %v4017_v32 = vpack.c.bf16 %v3969_v25, %v3966_v30  ;;  %v3971_v6 = vpop.f32.mrb[75].mxu1 }
 0x39e   :  { %13516 = vmatmul.mubr.msk.bf16.gmra.mrb[64].mxu0 %vm668_vm3, %v3557_v45 }
 0x39f   :  { %13519 = vmatprep.mubr.msk.bf16.mxu0 %vm15594_vm2, %v15593_v41 }
 0x3a1   :  { %v3974_v21 = vpop.f32.mrb[76].mxu1 }
 0x3a2   :  { %v3976_v12 = vpop.f32.mrb[77].mxu1 }
 0x3a3   :  { %v3977_v38 = vpop.f32.mrb[78].mxu1 }
 0x3a4   :  { %v4018_v13 = vpack.c.bf16 %v3977_v38, %v3974_v21  ;;  %v3979_v46 = vpop.f32.mrb[79].mxu1 }
 0x3a6   :  { %13520 = vmatmul.mubr.msk.bf16.gmra.mrb[68].mxu0 %vm668_vm3, %v3558_v16 }
 0x3a7   :  { %13523 = vmatprep.mubr.msk.bf16.mxu0 %vm15594_vm2, %v15593_v41 }
 0x3a9   :  { %v3982_v61 = vpop.f32.mrb[80].mxu1 }
 0x3aa   :  { %v3984_v3 = vpop.f32.mrb[81].mxu1 }
 0x3ab   :  { %v3985_v14 = vpop.f32.mrb[82].mxu1 }
 0x3ac   :  { %v4019_v45 = vpack.c.bf16 %v3985_v14, %v3982_v61  ;;  %v3987_v19 = vpop.f32.mrb[83].mxu1 }
 0x3ae   :  { %13524 = vmatmul.mubr.msk.bf16.gmra.mrb[72].mxu0 %vm668_vm3, %v3559_v44 }
 0x3af   :  { %13527 = vmatprep.mubr.msk.bf16.mxu0 %vm15594_vm2, %v15593_v41 }
 0x3b1   :  { %v3990_v33 = vpop.f32.mrb[84].mxu1 }
 0x3b2   :  { %v3992_v55 = vpop.f32.mrb[85].mxu1 }
 0x3b3   :  { %v3993_v58 = vpop.f32.mrb[86].mxu1 }
 0x3b4   :  { %v4020_v16 = vpack.c.bf16 %v3993_v58, %v3990_v33  ;;  %v3995_v31 = vpop.f32.mrb[87].mxu1 }
 0x3b6   :  { %13528 = vmatmul.mubr.msk.bf16.gmra.mrb[76].mxu0 %vm668_vm3, %v3560_v26  ;;  %v3562_v26 = vpack.c.bf16 %v17544_v39, %v17544_v39 }
 0x3b7   :  { %13531 = vmatprep.mubr.msk.bf16.mxu0 %vm15594_vm2, %v15593_v41 }
 0x3b9   :  { %v3998_v34 = vpop.f32.mrb[88].mxu1 }
 0x3ba   :  { %v4000_v8 = vpop.f32.mrb[89].mxu1 }
 0x3bb   :  { %v4001_v60 = vpop.f32.mrb[90].mxu1 }
 0x3bc   :  { %v4021_v44 = vpack.c.bf16 %v4001_v60, %v3998_v34  ;;  %v4003_v1 = vpop.f32.mrb[91].mxu1 }
 0x3be   :  { %13532 = vmatmul.mubr.msk.bf16.gmra.mrb[80].mxu0 %vm668_vm3, %v3561_v54 }
 0x3bf   :  { %13535 = vmatprep.mubr.msk.bf16.mxu0 %vm15594_vm2, %v15593_v41 }
 0x3c1   :  { %v4006_v62 = vpop.f32.mrb[92].mxu1 }
 0x3c2   :  { %v4008_v51 = vpop.f32.mrb[93].mxu1  ;;  %v4022_v48 = vpack.c.bf16 %v4006_v62, %v4006_v62 }
 0x3c3   :  { %v4009_v5 = vpop.f32.mrb[94].mxu1 }
 0x3c4   :  { %v4010_v63 = vpop.f32.mrb[95].mxu1 }
 0x3c6   :  { %13536 = vmatmul.mubr.msk.bf16.gmra.mrb[84].mxu0 %vm668_vm3, %v3562_v26 }
 0x3c7   :  { %13541 = vmatprep.mubr.msk.bf16.mxu0 %vm15594_vm2, %v15593_v41 }
 0x3ce   :  { %13542 = vmatmul.mubr.msk.bf16.vlgmr.msra.gmra.mrb[44].mxu0 %vm668_vm3, %v4012_v15 }
 0x3cf   :  { %13545 = vmatprep.mubr.msk.bf16.mxu0 %vm15594_vm2, %v15593_v41 }
 0x3d6   :  { %13546 = vmatmul.mubr.msk.bf16.gmra.mrb[48].mxu0 %vm668_vm3, %v4013_v50 }
 0x3d7   :  { %13549 = vmatprep.mubr.msk.bf16.mxu0 %vm15594_vm2, %v15593_v41 }
 0x3de   :  { %13550 = vmatmul.mubr.msk.bf16.gmra.mrb[52].mxu0 %vm668_vm3, %v4014_v37 }
 0x3df   :  { %13553 = vmatprep.mubr.msk.bf16.mxu0 %vm15594_vm2, %v15593_v41 }
 0x3e6   :  { %13554 = vmatmul.mubr.msk.bf16.gmra.mrb[56].mxu0 %vm668_vm3, %v4015_v36 }
 0x3e7   :  { %13557 = vmatprep.mubr.msk.bf16.mxu0 %vm15594_vm2, %v15593_v41 }
 0x3ee   :  { %13558 = vmatmul.mubr.msk.bf16.gmra.mrb[60].mxu0 %vm668_vm3, %v4016_v10 }
 0x3ef   :  { %13561 = vmatprep.mubr.msk.bf16.mxu0 %vm15594_vm2, %v15593_v41 }
 0x3f6   :  { %13562 = vmatmul.mubr.msk.bf16.gmra.mrb[64].mxu0 %vm668_vm3, %v4017_v32 }
 0x3f7   :  { %13565 = vmatprep.mubr.msk.bf16.mxu0 %vm15594_vm2, %v15593_v41 }
 0x3fe   :  { %13566 = vmatmul.mubr.msk.bf16.gmra.mrb[68].mxu0 %vm668_vm3, %v4018_v13 }
 0x3ff   :  { %13569 = vmatprep.mubr.msk.bf16.mxu0 %vm15594_vm2, %v15593_v41 }
 0x406   :  { %13570 = vmatmul.mubr.msk.bf16.gmra.mrb[72].mxu0 %vm668_vm3, %v4019_v45 }
 0x407   :  { %13573 = vmatprep.mubr.msk.bf16.mxu0 %vm15594_vm2, %v15593_v41 }
 0x40e   :  { %13574 = vmatmul.mubr.msk.bf16.gmra.mrb[76].mxu0 %vm668_vm3, %v4020_v16 }
 0x40f   :  { %13577 = vmatprep.mubr.msk.bf16.mxu0 %vm15594_vm2, %v15593_v41 }
 0x416   :  { %13578 = vmatmul.mubr.msk.bf16.gmra.mrb[80].mxu0 %vm668_vm3, %v4021_v44 }
 0x417   :  { %13581 = vmatprep.mubr.msk.bf16.mxu0 %vm15594_vm2, %v15593_v41 }
 0x41e   :  { %13582 = vmatmul.mubr.msk.bf16.gmra.mrb[84].mxu0 %vm668_vm3, %v4022_v48 }
 0x4a1   :  { %v17682_v11 = vpop.f32.mrb[44].mxu0 }
 0x4a2   :  { %v4250_v54 = vmul.f32 %v17682_v11, %v17682_v11  ;;  %v13543_v39 = vpop.f32.mrb[45].mxu0  ;;  %v4202_v43 = vsel %vm4201_vm4, %v17682_v11, 0.0 }
 0x4a3   :  { %v17686_v29 = vpop.f32.mrb[46].mxu0 }
 0x4a4   :  { %v4203_v20 = vsel %vm4201_vm4, %v17686_v29, 0.0  ;;  %v4251_v52 = vmul.f32 %v17686_v29, %v17686_v29  ;;  %v13544_v59 = vpop.f32.mrb[47].mxu0  ;;  %v4271_v15 = vsel %vm4201_vm4, %v4250_v54, 0.0 }
 0x4a5   :  { %v4204_v24 = vadd.f32 %v4203_v20, %v4202_v43 }
 0x4a6   :  { %v4272_v9 = vsel %vm4201_vm4, %v4251_v52, 0.0 }
 0x4a7   :  { %v4273_v7 = vadd.f32 %v4272_v9, %v4271_v15 }
 0x4a9   :  { %v17696_v35 = vpop.f32.mrb[48].mxu0 }
 0x4aa   :  { %v4205_v49 = vsel %vm4201_vm4, %v17696_v35, 0.0  ;;  %v4252_v50 = vmul.f32 %v17696_v35, %v17696_v35  ;;  %v13547_v53 = vpop.f32.mrb[49].mxu0 }
 0x4ab   :  { %v17702_v28 = vpop.f32.mrb[50].mxu0  ;;  %v4206_v47 = vadd.f32 %v4205_v49, %v4204_v24 }
 0x4ac   :  { %v4274_v22 = vsel %vm4201_vm4, %v4252_v50, 0.0  ;;  %v4253_v37 = vmul.f32 %v17702_v28, %v17702_v28  ;;  %v13548_v42 = vpop.f32.mrb[51].mxu0  ;;  %v4207_v57 = vsel %vm4201_vm4, %v17702_v28, 0.0 }
 0x4ad   :  { %v4208_v17 = vadd.f32 %v4207_v57, %v4206_v47  ;;  %v4275_v2 = vadd.f32 %v4274_v22, %v4273_v7 }
 0x4ae   :  { %v4276_v36 = vsel %vm4201_vm4, %v4253_v37, 0.0 }
 0x4af   :  { %v4277_v40 = vadd.f32 %v4276_v36, %v4275_v2  ;;  %v15271_v36 = vld [vmem:[%s19982_s28 + $0x4] ss:$8 sps:$4 sm:$0xff]  }
 0x4b0   :  { %12035 = vmatprep.mubr.msk.bf16.mxu1 %vm215_vm0, %v15271_v36 }
 0x4b1   :  { %v17710_v18 = vpop.f32.mrb[52].mxu0 }
 0x4b2   :  { %v4209_v56 = vsel %vm4201_vm4, %v17710_v18, 0.0  ;;  %v4254_v4 = vmul.f32 %v17710_v18, %v17710_v18  ;;  %v13551_v10 = vpop.f32.mrb[53].mxu0 }
 0x4b3   :  { %v4210_v27 = vadd.f32 %v4209_v56, %v4208_v17  ;;  %v17716_v30 = vpop.f32.mrb[54].mxu0  ;;  %v15274_v56 = vld [vmem:[%s19982_s28 + $0xac] ss:$8 sps:$4 sm:$0xff]  }
 0x4b4   :  { %v4278_v23 = vsel %vm4201_vm4, %v4254_v4, 0.0  ;;  %v4211_v25 = vsel %vm4201_vm4, %v17716_v30, 0.0  ;;  %v4255_v32 = vmul.f32 %v17716_v30, %v17716_v30  ;;  %v13552_v6 = vpop.f32.mrb[55].mxu0  ;;  %12110 = vmatprep.mubr.msk.bf16.mxu0 %vm215_vm0, %v15274_v56 }
 0x4b5   :  { %v4279_v21 = vadd.f32 %v4278_v23, %v4277_v40  ;;  %v4212_v12 = vadd.f32 %v4211_v25, %v4210_v27 }
 0x4b6   :  { %v4280_v38 = vsel %vm4201_vm4, %v4255_v32, 0.0 }
 0x4b7   :  { %v4281_v13 = vadd.f32 %v4280_v38, %v4279_v21 }
 0x4b9   :  { %v17724_v46 = vpop.f32.mrb[56].mxu0 }
 0x4ba   :  { %v4213_v61 = vsel %vm4201_vm4, %v17724_v46, 0.0  ;;  %v4256_v3 = vmul.f32 %v17724_v46, %v17724_v46  ;;  %v13555_v14 = vpop.f32.mrb[57].mxu0 }
 0x4bb   :  { %v4214_v45 = vadd.f32 %v4213_v61, %v4212_v12  ;;  %v17730_v19 = vpop.f32.mrb[58].mxu0 }
 0x4bc   :  { %v4282_v33 = vsel %vm4201_vm4, %v4256_v3, 0.0  ;;  %v4215_v55 = vsel %vm4201_vm4, %v17730_v19, 0.0  ;;  %v4257_v58 = vmul.f32 %v17730_v19, %v17730_v19  ;;  %v13556_v16 = vpop.f32.mrb[59].mxu0 }
 0x4bd   :  { %v4283_v31 = vadd.f32 %v4282_v33, %v4281_v13  ;;  %v4216_v34 = vadd.f32 %v4215_v55, %v4214_v45 }
 0x4be   :  { %v4284_v8 = vsel %vm4201_vm4, %v4257_v58, 0.0 }
 0x4bf   :  { %v4285_v60 = vadd.f32 %v4284_v8, %v4283_v31 }
 0x4c1   :  { %v17738_v44 = vpop.f32.mrb[60].mxu0 }
 0x4c2   :  { %v4217_v1 = vsel %vm4201_vm4, %v17738_v44, 0.0  ;;  %v4258_v62 = vmul.f32 %v17738_v44, %v17738_v44  ;;  %v13559_v51 = vpop.f32.mrb[61].mxu0 }
 0x4c3   :  { %v4218_v5 = vadd.f32 %v4217_v1, %v4216_v34  ;;  %v17744_v26 = vpop.f32.mrb[62].mxu0 }
 0x4c4   :  { %v4286_v63 = vsel %vm4201_vm4, %v4258_v62, 0.0  ;;  %v4219_v48 = vsel %vm4201_vm4, %v17744_v26, 0.0  ;;  %v4259_v54 = vmul.f32 %v17744_v26, %v17744_v26  ;;  %v13560_v39 = vpop.f32.mrb[63].mxu0 }
 0x4c5   :  { %v4287_v43 = vadd.f32 %v4286_v63, %v4285_v60  ;;  %v4220_v20 = vadd.f32 %v4219_v48, %v4218_v5 }
 0x4c6   :  { %v4288_v52 = vsel %vm4201_vm4, %v4259_v54, 0.0 }
 0x4c7   :  { %v4289_v59 = vadd.f32 %v4288_v52, %v4287_v43 }
 0x4c9   :  { %v17752_v24 = vpop.f32.mrb[64].mxu0 }
 0x4ca   :  { %v4221_v15 = vsel %vm4201_vm4, %v17752_v24, 0.0  ;;  %v4260_v9 = vmul.f32 %v17752_v24, %v17752_v24  ;;  %v13563_v7 = vpop.f32.mrb[65].mxu0 }
 0x4cb   :  { %v4222_v49 = vadd.f32 %v4221_v15, %v4220_v20  ;;  %v17758_v50 = vpop.f32.mrb[66].mxu0 }
 0x4cc   :  { %v4290_v53 = vsel %vm4201_vm4, %v4260_v9, 0.0  ;;  %v4223_v47 = vsel %vm4201_vm4, %v17758_v50, 0.0  ;;  %v4261_v22 = vmul.f32 %v17758_v50, %v17758_v50  ;;  %v13564_v37 = vpop.f32.mrb[67].mxu0 }
 0x4cd   :  { %v4291_v42 = vadd.f32 %v4290_v53, %v4289_v59  ;;  %v4224_v57 = vadd.f32 %v4223_v47, %v4222_v49 }
 0x4ce   :  { %v4292_v17 = vsel %vm4201_vm4, %v4261_v22, 0.0 }
 0x4cf   :  { %v4293_v2 = vadd.f32 %v4292_v17, %v4291_v42 }
 0x4d1   :  { %v17769_v40 = vpop.f32.mrb[68].mxu0 }
 0x4d2   :  { %v4225_v4 = vsel %vm4201_vm4, %v17769_v40, 0.0  ;;  %v4262_v10 = vmul.f32 %v17769_v40, %v17769_v40  ;;  %v13567_v27 = vpop.f32.mrb[69].mxu0 }
 0x4d3   :  { %v4226_v23 = vadd.f32 %v4225_v4, %v4224_v57  ;;  %v17779_v25 = vpop.f32.mrb[70].mxu0 }
 0x4d4   :  { %v4294_v32 = vsel %vm4201_vm4, %v4262_v10, 0.0  ;;  %v4227_v6 = vsel %vm4201_vm4, %v17779_v25, 0.0  ;;  %v4263_v21 = vmul.f32 %v17779_v25, %v17779_v25  ;;  %v13568_v12 = vpop.f32.mrb[71].mxu0 }
 0x4d5   :  { %v4295_v38 = vadd.f32 %v4294_v32, %v4293_v2  ;;  %v4228_v13 = vadd.f32 %v4227_v6, %v4226_v23 }
 0x4d6   :  { %v4296_v61 = vsel %vm4201_vm4, %v4263_v21, 0.0 }
 0x4d7   :  { %v4297_v3 = vadd.f32 %v4296_v61, %v4295_v38 }
 0x4d9   :  { %v17788_v14 = vpop.f32.mrb[72].mxu0 }
 0x4da   :  { %v4229_v45 = vsel %vm4201_vm4, %v17788_v14, 0.0  ;;  %v4264_v33 = vmul.f32 %v17788_v14, %v17788_v14  ;;  %v13571_v55 = vpop.f32.mrb[73].mxu0 }
 0x4db   :  { %v4230_v58 = vadd.f32 %v4229_v45, %v4228_v13  ;;  %v17794_v16 = vpop.f32.mrb[74].mxu0 }
 0x4dc   :  { %v4298_v31 = vsel %vm4201_vm4, %v4264_v33, 0.0  ;;  %v4231_v34 = vsel %vm4201_vm4, %v17794_v16, 0.0  ;;  %v4265_v8 = vmul.f32 %v17794_v16, %v17794_v16  ;;  %v13572_v60 = vpop.f32.mrb[75].mxu0 }
 0x4dd   :  { %v4299_v1 = vadd.f32 %v4298_v31, %v4297_v3  ;;  %v4232_v62 = vadd.f32 %v4231_v34, %v4230_v58 }
 0x4de   :  { %v4300_v51 = vsel %vm4201_vm4, %v4265_v8, 0.0 }
 0x4df   :  { %v4301_v5 = vadd.f32 %v4300_v51, %v4299_v1 }
 0x4e1   :  { %v17802_v63 = vpop.f32.mrb[76].mxu0 }
 0x4e2   :  { %v4233_v48 = vsel %vm4201_vm4, %v17802_v63, 0.0  ;;  %v4266_v54 = vmul.f32 %v17802_v63, %v17802_v63  ;;  %v13575_v39 = vpop.f32.mrb[77].mxu0 }
 0x4e3   :  { %v4234_v43 = vadd.f32 %v4233_v48, %v4232_v62  ;;  %v17808_v20 = vpop.f32.mrb[78].mxu0 }
 0x4e4   :  { %v4302_v52 = vsel %vm4201_vm4, %v4266_v54, 0.0  ;;  %v4235_v59 = vsel %vm4201_vm4, %v17808_v20, 0.0  ;;  %v4267_v15 = vmul.f32 %v17808_v20, %v17808_v20  ;;  %v13576_v9 = vpop.f32.mrb[79].mxu0 }
 0x4e5   :  { %v4303_v7 = vadd.f32 %v4302_v52, %v4301_v5  ;;  %v4236_v49 = vadd.f32 %v4235_v59, %v4234_v43 }
 0x4e6   :  { %v4304_v53 = vsel %vm4201_vm4, %v4267_v15, 0.0 }
 0x4e7   :  { %v4305_v47 = vadd.f32 %v4304_v53, %v4303_v7 }
 0x4e9   :  { %v17816_v22 = vpop.f32.mrb[80].mxu0 }
 0x4ea   :  { %v4237_v37 = vsel %vm4201_vm4, %v17816_v22, 0.0  ;;  %v4268_v42 = vmul.f32 %v17816_v22, %v17816_v22  ;;  %v13579_v57 = vpop.f32.mrb[81].mxu0 }
 0x4eb   :  { %v4238_v17 = vadd.f32 %v4237_v37, %v4236_v49  ;;  %v17822_v2 = vpop.f32.mrb[82].mxu0  ;;  %v4330_v49 = vlaneseq }
 0x4ec   :  { %v4306_v36 = vsel %vm4201_vm4, %v4268_v42, 0.0  ;;  %v4239_v56 = vsel %vm4201_vm4, %v17822_v2, 0.0  ;;  %v4269_v4 = vmul.f32 %v17822_v2, %v17822_v2  ;;  %v13580_v10 = vpop.f32.mrb[83].mxu0 }
 0x4ed   :  { %v4307_v27 = vadd.f32 %v4306_v36, %v4305_v47  ;;  %v4240_v23 = vadd.f32 %v4239_v56, %v4238_v17  ;;  %v4331_v53 = vshrl.u32 %v4330_v49, 7  ;;  %v4322_v47 = vld [vmem:[%s19983_s21] sm:$0x1] }
 0x4ee   :  { %v4308_v32 = vsel %vm4201_vm4, %v4269_v4, 0.0  ;;  %v4326_v17 = vld [vmem:[%s19954_s4] sm:$0x1] }
 0x4ef   :  { %v4309_v6 = vadd.f32 %v4308_v32, %v4307_v27  ;;  %v17835_v37 = vsub.s32 0, %v4331_v53 }
 0x4f1   :  { %v4174_v21 = vpop.f32.mrb[84].mxu0 }
 0x4f2   :  { %v4241_v12 = vsel %vm4201_vm4, %v4174_v21, 0.0  ;;  %v4270_v38 = vmul.f32 %v4174_v21, %v4174_v21  ;;  %v13583_v13 = vpop.f32.mrb[85].mxu0 }
 0x4f3   :  { %v4242_v61 = vadd.f32 %v4241_v12, %v4240_v23  ;;  %v4177_v3 = vpop.f32.mrb[86].mxu0 }
 0x4f4   :  { %v4310_v45 = vsel %vm4201_vm4, %v4270_v38, 0.0  ;;  %v13584_v33 = vpop.f32.mrb[87].mxu0 }
 0x4f5   :  { %v4243_v55 = vrot.slane %v4242_v61, 4  ;;  %v4311_v58 = vadd.f32 %v4310_v45, %v4309_v6 }
 0x4f7   :  { %v4244_v31 = vadd.f32 %v4243_v55, %v4242_v61  ;;  %v4312_v34 = vrot.slane %v4311_v58, 4 }
 0x4f9   :  { %v4245_v8 = vrot.slane %v4244_v31, 2  ;;  %v4313_v60 = vadd.f32 %v4312_v34, %v4311_v58 }
 0x4fb   :  { %v4246_v1 = vadd.f32 %v4245_v8, %v4244_v31  ;;  %v4314_v62 = vrot.slane %v4313_v60, 2 }
 0x4fd   :  { %v4247_v51 = vrot.slane %v4246_v1, 1  ;;  %v4315_v5 = vadd.f32 %v4314_v62, %v4313_v60 }
 0x4ff   :  { %v4248_v48 = vadd.f32 %v4247_v51, %v4246_v1  ;;  %v4316_v54 = vrot.slane %v4315_v5, 1 }
 0x501   :  { %v4249_v39 = vmul.f32 0.0061728396, %v4248_v48  ;;  %v4317_v43 = vadd.f32 %v4316_v54, %v4315_v5 }
 0x503   :  { %v4318_v52 = vmul.f32 0.0061728396, %v4317_v43  ;;  %v4319_v59 = vmul.f32 %v4249_v39, %v4249_v39 }
 0x505   :  { %v4320_v15 = vsub.f32 %v4318_v52, %v4319_v59 }
 0x507   :  { %v4321_v9 = vmax.f32 %v4320_v15, 0.0 }
 0x509   :  { %v4323_v7 = vadd.f32 1e-05, %v4321_v9 }
 0x50b   :  { %15584 = vrsqrt.f32 %v4323_v7 }
 0x515   :  { %v15585_v42 = vpop.eup %15584 }
 0x516   :  { %v4325_v57 = vmul.f32 %v15585_v42, %v4322_v47 }
 0x518   :  { %v4327_v36 = vmul.f32 %v4325_v57, %v4249_v39  ;;  %v17841_v56 = vrot.slane %v4325_v57, %v17835_v37 }
 0x51a   :  { %v4328_v4 = vsub.f32 %v4326_v17, %v4327_v36  ;;  %v4355_v10 = vmul.f32 %v17841_v56, %v4174_v21  ;;  %v4335_v27 = vmul.f32 %v17841_v56, %v17682_v11  ;;  %v4336_v23 = vmul.f32 %v17841_v56, %v17686_v29 }
 0x51b   :  { %v4337_v32 = vmul.f32 %v17841_v56, %v17696_v35  ;;  %v4338_v6 = vmul.f32 %v17841_v56, %v17702_v28  ;;  %v4339_v12 = vmul.f32 %v17841_v56, %v17710_v18  ;;  %v4340_v38 = vmul.f32 %v17841_v56, %v17716_v30 }
 0x51c   :  { %v17857_v21 = vrot.slane %v4328_v4, %v17835_v37  ;;  %v4341_v11 = vmul.f32 %v17841_v56, %v17724_v46  ;;  %v4342_v29 = vmul.f32 %v17841_v56, %v17730_v19  ;;  %v4343_v35 = vmul.f32 %v17841_v56, %v17738_v44 }
 0x51d   :  { %v4344_v28 = vmul.f32 %v17841_v56, %v17744_v26  ;;  %v4345_v18 = vmul.f32 %v17841_v56, %v17752_v24  ;;  %v4346_v30 = vmul.f32 %v17841_v56, %v17758_v50  ;;  %v4347_v13 = vmul.f32 %v17841_v56, %v17769_v40 }
 0x51e   :  { %v17874_v46 = vadd.f32 %v17857_v21, %v4355_v10  ;;  %v4362_v19 = vadd.f32 %v17857_v21, %v4335_v27  ;;  %v4363_v61 = vadd.f32 %v17857_v21, %v4336_v23  ;;  %v4364_v44 = vadd.f32 %v17857_v21, %v4337_v32 }
 0x51f   :  { %v4365_v26 = vadd.f32 %v17857_v21, %v4338_v6  ;;  %v4366_v3 = vadd.f32 %v17857_v21, %v4339_v12  ;;  %v4367_v24 = vadd.f32 %v17857_v21, %v4340_v38  ;;  %v4368_v50 = vadd.f32 %v17857_v21, %v4341_v11 }
 0x520   :  { %vm4383_vm5 = vcmp.ge.f32.partialorder %v4362_v19, 0.0  ;;  %vm4384_vm6 = vcmp.ge.f32.partialorder %v4363_v61, 0.0  ;;  %v4404_v40 = vmul.f32 0.01, %v4362_v19  ;;  %v4405_v45 = vmul.f32 0.01, %v4363_v61 }
 0x521   :  { %vm4385_vm7 = vcmp.ge.f32.partialorder %v4364_v44, 0.0  ;;  %vm4386_vm8 = vcmp.ge.f32.partialorder %v4365_v26, 0.0  ;;  %v4406_v33 = vmul.f32 0.01, %v4364_v44  ;;  %v4407_v55 = vmul.f32 0.01, %v4365_v26 }
 0x522   :  { %v4425_v58 = vsel %vm4383_vm5, %v4362_v19, %v4404_v40  ;;  %v4426_v31 = vsel %vm4384_vm6, %v4363_v61, %v4405_v45  ;;  %vm4387_vm9 = vcmp.ge.f32.partialorder %v4366_v3, 0.0  ;;  %vm4388_vm10 = vcmp.ge.f32.partialorder %v4367_v24, 0.0 }
 0x523   :  { %v17883_v34 = vpack.c.bf16 %v4426_v31, %v4425_v58  ;;  %v4427_v8 = vsel %vm4385_vm7, %v4364_v44, %v4406_v33  ;;  %v4428_v60 = vsel %vm4386_vm8, %v4365_v26, %v4407_v55  ;;  %v4408_v1 = vmul.f32 0.01, %v4366_v3 }
 0x524   :  { %v17885_v62 = vpack.c.bf16 %v4428_v60, %v4427_v8  ;;  %v4409_v51 = vmul.f32 0.01, %v4367_v24  ;;  %v4369_v5 = vadd.f32 %v17857_v21, %v4342_v29  ;;  %vm4389_vm11 = vcmp.ge.f32.partialorder %v4368_v50, 0.0 }
 0x525   :  { %4513 = vmatpush1.bf16.msra.mxu1 %v17883_v34  ;;  %5159 = vmatpush1.bf16.msra.mxu0 %v17883_v34  ;;  %v4429_v48 = vsel %vm4387_vm9, %v4366_v3, %v4408_v1  ;;  %v4410_v54 = vmul.f32 0.01, %v4368_v50  ;;  %v4370_v39 = vadd.f32 %v17857_v21, %v4343_v35  ;;  %v4371_v59 = vadd.f32 %v17857_v21, %v4344_v28 }
 0x526   :  { %4514 = vmatprep.subr.bf16.mxu1 %v15592_v0  ;;  %5160 = vmatprep.subr.bf16.mxu0 %v15592_v0  ;;  %v4430_v43 = vsel %vm4388_vm10, %v4367_v24, %v4409_v51  ;;  %vm4390_vm12 = vcmp.ge.f32.partialorder %v4369_v5, 0.0  ;;  %v4411_v52 = vmul.f32 0.01, %v4369_v5  ;;  %v4372_v47 = vadd.f32 %v17857_v21, %v4345_v18 }
 0x527   :  { %v17895_v15 = vpack.c.bf16 %v4430_v43, %v4429_v48  ;;  %v4431_v9 = vsel %vm4389_vm11, %v4368_v50, %v4410_v54  ;;  %vm4391_vm13 = vcmp.ge.f32.partialorder %v4370_v39, 0.0  ;;  %v4412_v7 = vmul.f32 0.01, %v4370_v39  ;;  %v15272_v43 = vld [vmem:[%s19982_s28 + $0xa8] ss:$8 sps:$4 sm:$0xff]  }
 0x528   :  { %v4432_v49 = vsel %vm4390_vm12, %v4369_v5, %v4411_v52  ;;  %vm4392_vm14 = vcmp.ge.f32.partialorder %v4371_v59, 0.0  ;;  %v4413_v53 = vmul.f32 0.01, %v4371_v59  ;;  %v4373_v17 = vadd.f32 %v17857_v21, %v4346_v30  ;;  %v15277_v52 = vld [vmem:[%s19982_s28 + $0x14] ss:$8 sps:$4 sm:$0xff]  }
 0x529   :  { %4515 = vmatpush1.bf16.msra.mxu1 %v17885_v62  ;;  %5161 = vmatpush1.bf16.msra.mxu0 %v17885_v62  ;;  %v17900_v42 = vpack.c.bf16 %v4432_v49, %v4431_v9  ;;  %v4433_v57 = vsel %vm4391_vm13, %v4370_v39, %v4412_v7  ;;  %vm4393_vm15 = vcmp.ge.f32.partialorder %v4372_v47, 0.0  ;;  %v4414_v4 = vmul.f32 0.01, %v4372_v47  ;;  %v15275_v9 = vld [vmem:[%s19982_s28 + $0x10] ss:$8 sps:$4 sm:$0xff]  }
 0x52a   :  { %4516 = vmatprep.subr.bf16.mxu1 %v15592_v0  ;;  %5162 = vmatprep.subr.bf16.mxu0 %v15592_v0  ;;  %v4434_v36 = vsel %vm4392_vm14, %v4371_v59, %v4413_v53  ;;  %v4348_v10 = vmul.f32 %v17841_v56, %v17779_v25  ;;  %vm4394_vm3 = vcmp.ge.f32.partialorder %v4373_v17, 0.0  ;;  %v4415_v23 = vmul.f32 0.01, %v4373_v17  ;;  %v15278_v59 = vld [vmem:[%s19982_s28 + $0xbc] ss:$8 sps:$4 sm:$0xff]  }
 0x52b   :  { %v17907_v27 = vpack.c.bf16 %v4434_v36, %v4433_v57  ;;  %v4374_v32 = vadd.f32 %v17857_v21, %v4347_v13  ;;  %v4435_v6 = vsel %vm4393_vm15, %v4372_v47, %v4414_v4  ;;  %v4349_v38 = vmul.f32 %v17841_v56, %v17788_v14  ;;  %v15280_v7 = vld [vmem:[%s19982_s28 + $0xb8] ss:$8 sps:$4 sm:$0xff]   ;;  %v15283_v49 = vld [vmem:[%s19982_s28 + $0x24] ss:$8 sps:$4 sm:$0xff]   ;;  %v15286_v57 = vld [vmem:[%s19982_s28 + $0xc8] ss:$8 sps:$4 sm:$0xff]  }
 0x52c   :  { %v4375_v12 = vadd.f32 %v17857_v21, %v4348_v10  ;;  %v4350_v11 = vmul.f32 %v17841_v56, %v17794_v16  ;;  %v4436_v25 = vsel %vm4394_vm3, %v4373_v17, %v4415_v23  ;;  %v4351_v35 = vmul.f32 %v17841_v56, %v17802_v63  ;;  %v15284_v53 = vld [vmem:[%s19982_s28 + $0xcc] ss:$8 sps:$4 sm:$0xff]   ;;  %v15281_v47 = vld [vmem:[%s19982_s28 + $0x20] ss:$8 sps:$4 sm:$0xff]   ;;  %v12101_v36 = vld [vmem:[%s19982_s28 + $0xd8] sm:$0xff] }
 0x52d   :  { %4517 = vmatpush1.bf16.msra.mxu1 %v17895_v15  ;;  %5163 = vmatpush1.bf16.msra.mxu0 %v17895_v15  ;;  %vm4395_vm5 = vcmp.ge.f32.partialorder %v4374_v32, 0.0  ;;  %v4416_v29 = vmul.f32 0.01, %v4374_v32  ;;  %v17921_v28 = vpack.c.bf16 %v4436_v25, %v4435_v6  ;;  %v4376_v16 = vadd.f32 %v17857_v21, %v4349_v38  ;;  %v4463_v17 = vld [vmem:[%s19982_s28 + $0x30] sm:$0xff]  ;;  %v15293_v6 = vld [vmem:[%s19982_s28 + $0x3c] ss:$8 sps:$4 sm:$0xff]  }
 0x52e   :  { %4518 = vmatprep.subr.bf16.mxu1 %v15592_v0  ;;  %5164 = vmatprep.subr.bf16.mxu0 %v15592_v0  ;;  %vm4396_vm6 = vcmp.ge.f32.partialorder %v4375_v12, 0.0  ;;  %v4417_v14 = vmul.f32 0.01, %v4375_v12  ;;  %v4377_v30 = vadd.f32 %v17857_v21, %v4350_v11  ;;  %v4352_v13 = vmul.f32 %v17841_v56, %v17808_v20  ;;  %v15291_v38 = vld [vmem:[%s19982_s28 + $0x38] ss:$8 sps:$4 sm:$0xff]  }
 0x52f   :  { %v4437_v18 = vsel %vm4395_vm5, %v4374_v32, %v4416_v29  ;;  %v4378_v19 = vadd.f32 %v17857_v21, %v4351_v35  ;;  %vm4397_vm7 = vcmp.ge.f32.partialorder %v4376_v16, 0.0  ;;  %v4418_v63 = vmul.f32 0.01, %v4376_v16  ;;  %v15294_v11 = vld [vmem:[%s19982_s28 + $0xe0] ss:$8 sps:$4 sm:$0xff]  }
 0x530   :  { %v4438_v61 = vsel %vm4396_vm6, %v4375_v12, %v4417_v14  ;;  %v4353_v44 = vmul.f32 %v17841_v56, %v17816_v22  ;;  %vm4398_vm8 = vcmp.ge.f32.partialorder %v4377_v30, 0.0  ;;  %v4419_v3 = vmul.f32 0.01, %v4377_v30  ;;  %v15296_v12 = vld [vmem:[%s19982_s28 + $0xe4] ss:$8 sps:$4 sm:$0xff]  }
 0x531   :  { %4519 = vmatpush1.bf16.msra.mxu1 %v17900_v42  ;;  %5165 = vmatpush1.bf16.msra.mxu0 %v17900_v42  ;;  %v17932_v26 = vpack.c.bf16 %v4438_v61, %v4437_v18  ;;  %v4379_v24 = vadd.f32 %v17857_v21, %v4352_v13  ;;  %v4439_v20 = vsel %vm4397_vm7, %v4376_v16, %v4418_v63  ;;  %vm4399_vm9 = vcmp.ge.f32.partialorder %v4378_v19, 0.0  ;;  %v15299_v25 = vld [vmem:[%s19982_s28 + $0x4c] ss:$8 sps:$4 sm:$0xff]   ;;  %v15297_v35 = vld [vmem:[%s19982_s28 + $0x48] ss:$8 sps:$4 sm:$0xff]  }
 0x532   :  { %4520 = vmatprep.subr.bf16.mxu1 %v15592_v0  ;;  %5166 = vmatprep.subr.bf16.mxu0 %v15592_v0  ;;  %v4420_v50 = vmul.f32 0.01, %v4378_v19  ;;  %v4354_v22 = vmul.f32 %v17841_v56, %v17822_v2  ;;  %v4440_v40 = vsel %vm4398_vm8, %v4377_v30, %v4419_v3  ;;  %v4380_v33 = vadd.f32 %v17857_v21, %v4353_v44  ;;  %v15303_v29 = vld [vmem:[%s19982_s28 + $0xf4] ss:$8 sps:$4 sm:$0xff]   ;;  %v15305_v14 = vld [vmem:[%s19982_s28 + $0xf0] ss:$8 sps:$4 sm:$0xff]  }
 0x533   :  { %vm4400_vm10 = vcmp.ge.f32.partialorder %v4379_v24, 0.0  ;;  %v4421_v45 = vmul.f32 0.01, %v4379_v24  ;;  %v17940_v55 = vpack.c.bf16 %v4440_v40, %v4439_v20  ;;  %v4424_v5 = vmul.f32 0.01, %v17874_v46  ;;  %v12045_v30 = vld [vmem:[%s19982_s28 + $0x68] sm:$0xff] }
 0x534   :  { %v4441_v58 = vsel %vm4399_vm9, %v4378_v19, %v4420_v50  ;;  %v4381_v31 = vadd.f32 %v17857_v21, %v4354_v22  ;;  %vm4401_vm11 = vcmp.ge.f32.partialorder %v4380_v33, 0.0  ;;  %v4422_v60 = vmul.f32 0.01, %v4380_v33  ;;  %v15302_v16 = vld [vmem:[%s19982_s28 + $0x5c] ss:$8 sps:$4 sm:$0xff]   ;;  %v12126_v13 = vld [vmem:[%s19982_s28 + $0x110] sm:$0xff] }
 0x535   :  { %4521 = vmatpush1.bf16.msra.mxu1 %v17907_v27  ;;  %5167 = vmatpush1.bf16.msra.mxu0 %v17907_v27  ;;  %v4442_v8 = vsel %vm4400_vm10, %v4379_v24, %v4421_v45  ;;  %vm4403_vm13 = vcmp.ge.f32.partialorder %v17874_v46, 0.0  ;;  %v12034_v4 = vcombine.high %v4463_v17, %v4463_v17  ;;  %v12109_v10 = vcombine.high %v12101_v36, %v12101_v36  ;;  %v15308_v18 = vld [vmem:[%s19982_s28 + $0x104] ss:$8 sps:$4 sm:$0xff]   ;;  %v15300_v19 = vld [vmem:[%s19982_s28 + $0x58] ss:$8 sps:$4 sm:$0xff]  }
 0x536   :  { %4522 = vmatprep.subr.bf16.mxu1 %v15592_v0  ;;  %5168 = vmatprep.subr.bf16.mxu0 %v15592_v0  ;;  %v17947_v2 = vpack.c.bf16 %v4442_v8, %v4441_v58  ;;  %vm4402_vm12 = vcmp.ge.f32.partialorder %v4381_v31, 0.0  ;;  %v4423_v56 = vmul.f32 0.01, %v4381_v31  ;;  %v4443_v1 = vsel %vm4401_vm11, %v4380_v33, %v4422_v60  ;;  %v15310_v61 = vld [vmem:[%s19982_s28 + $0x100] ss:$8 sps:$4 sm:$0xff]  }
 0x537   :  { %v4445_v48 = vsel %vm4403_vm13, %v17874_v46, %v4424_v5  ;;  %v15269_v46 = vld [vmem:[%s19982_s28] ss:$8 sps:$4 sm:$0xff]   ;;  %v12033_v23 = vcombine.low %v4463_v17, %v4463_v17  ;;  %v12108_v32 = vcombine.low %v12101_v36, %v12101_v36  ;;  %v12053_v63 = vcombine.high %v12045_v30, %v12045_v30  ;;  %v15315_v20 = vld [vmem:[%s19982_s28 + $0x154] ss:$8 sps:$4 sm:$0xff]   ;;  %v15313_v50 = vld [vmem:[%s19982_s28 + $0x150] ss:$8 sps:$4 sm:$0xff]  }
 0x538   :  { %v4444_v51 = vsel %vm4402_vm12, %v4381_v31, %v4423_v56  ;;  %v4456_v54 = vpack.c.bf16 %v4445_v48, %v4445_v48  ;;  %v12134_v44 = vcombine.high %v12126_v13, %v12126_v13  ;;  %v12052_v3 = vcombine.low %v12045_v30, %v12045_v30  ;;  %v15316_v22 = vld [vmem:[%s19982_s28 + $0x164] ss:$8 sps:$4 sm:$0xff]   ;;  %v15318_v40 = vld [vmem:[%s19982_s28 + $0x160] ss:$8 sps:$4 sm:$0xff]   ;;  %v15319_v45 = vld [vmem:[%s19982_s28 + $0x174] ss:$8 sps:$4 sm:$0xff]  }
 0x539   :  { %4523 = vmatpush1.bf16.msra.mxu1 %v17921_v28  ;;  %5169 = vmatpush1.bf16.msra.mxu0 %v17921_v28  ;;  %v17951_v21 = vpack.c.bf16 %v4444_v51, %v4443_v1  ;;  %v12133_v24 = vcombine.low %v12126_v13, %v12126_v13  ;;  %v12176_v33 = vld [vmem:[%s19982_s28 + $0x180] sm:$0xff]  ;;  %v15321_v58 = vld [vmem:[%s19982_s28 + $0x170] ss:$8 sps:$4 sm:$0xff]   ;;  %v15326_v60 = vld [vmem:[%s19982_s28 + $0x18c] ss:$8 sps:$4 sm:$0xff]  }
 0x53a   :  { %4524 = vmatprep.subr.bf16.mxu1 %v15592_v0  ;;  %5170 = vmatprep.subr.bf16.mxu0 %v15592_v0  ;;  %v17975_v39 = vsel %vm249_vm1, %v4456_v54, 0  ;;  %v12184_v31 = vcombine.high %v12176_v33, %v12176_v33  ;;  %v12183_v8 = vcombine.low %v12176_v33, %v12176_v33  ;;  %v15324_v56 = vld [vmem:[%s19982_s28 + $0x188] ss:$8 sps:$4 sm:$0xff]   ;;  %v15328_v51 = vld [vmem:[%s19955_s6 + $0x18] sm:$0xff]   ;;  %v15329_v5 = vld [vmem:[%s19955_s6] sm:$0xff]  }
 0x53b   :  { %v15327_v1 = vld [vmem:[%s19955_s6 + $0x10] sm:$0xff]   ;;  %v15330_v13 = vld [vmem:[%s19955_s6 + $0x8] sm:$0xff]  }
 0x53d   :  { %4525 = vmatpush1.bf16.msra.mxu1 %v17932_v26  ;;  %5171 = vmatpush1.bf16.msra.mxu0 %v17932_v26 }
 0x53e   :  { %4526 = vmatprep.subr.bf16.mxu1 %v15592_v0  ;;  %5172 = vmatprep.subr.bf16.mxu0 %v15592_v0 }
 0x541   :  { %4527 = vmatpush1.bf16.msra.mxu1 %v17940_v55  ;;  %5173 = vmatpush1.bf16.msra.mxu0 %v17940_v55 }
 0x542   :  { %4528 = vmatprep.subr.bf16.mxu1 %v15592_v0  ;;  %5174 = vmatprep.subr.bf16.mxu0 %v15592_v0 }
 0x545   :  { %4529 = vmatpush1.bf16.msra.mxu1 %v17947_v2  ;;  %5175 = vmatpush1.bf16.msra.mxu0 %v17947_v2 }
 0x546   :  { %4530 = vmatprep.subr.bf16.mxu1 %v15592_v0  ;;  %5176 = vmatprep.subr.bf16.mxu0 %v15592_v0 }
 0x549   :  { %4531 = vmatpush1.bf16.msra.mxu1 %v17951_v21  ;;  %5177 = vmatpush1.bf16.msra.mxu0 %v17951_v21 }
 0x54a   :  { %4532 = vmatprep.subr.bf16.mxu1 %v15592_v0  ;;  %5178 = vmatprep.subr.bf16.mxu0 %v15592_v0 }
 0x54d   :  { %4533 = vmatpush1.bf16.msra.mxu1 %v17975_v39  ;;  %5179 = vmatpush1.bf16.msra.mxu0 %v17975_v39 }
 0x54e   :  { %4637 = vmatprep.subr.bf16.mxu1 %v15592_v0  ;;  %5378 = vmatprep.subr.bf16.mxu0 %v15592_v0 }
 0x550   :  { %4545 = vmatmul.mubr.bf16.vlgmr.msra.gmra.mrb[96].mxu1 %v15269_v46  ;;  %5191 = vmatmul.mubr.bf16.vlgmr.msra.gmra.mrb[88].mxu0 %v15272_v43 }
 0x551   :  { %4638 = vmatpush1.bf16.msra.mxu1 %v17883_v34  ;;  %5379 = vmatpush1.bf16.msra.mxu0 %v17883_v34 }
 0x552   :  { %4639 = vmatprep.subr.bf16.mxu1 %v15592_v0  ;;  %5380 = vmatprep.subr.bf16.mxu0 %v15592_v0 }
 0x553   :  { %12036 = vmatprep.mubr.msk.bf16.mxu1 %vm215_vm0, %v15277_v52  ;;  %12111 = vmatprep.mubr.msk.bf16.mxu0 %vm215_vm0, %v15278_v59 }
 0x555   :  { %4640 = vmatpush1.bf16.msra.mxu1 %v17885_v62  ;;  %5381 = vmatpush1.bf16.msra.mxu0 %v17885_v62 }
 0x556   :  { %4641 = vmatprep.subr.bf16.mxu1 %v15592_v0  ;;  %5382 = vmatprep.subr.bf16.mxu0 %v15592_v0 }
 0x558   :  { %4553 = vmatmul.mubr.bf16.gmra.mrb[100].mxu1 %v15275_v9  ;;  %5199 = vmatmul.mubr.bf16.gmra.mrb[92].mxu0 %v15280_v7 }
 0x559   :  { %4642 = vmatpush1.bf16.msra.mxu1 %v17895_v15  ;;  %5383 = vmatpush1.bf16.msra.mxu0 %v17895_v15 }
 0x55a   :  { %4643 = vmatprep.subr.bf16.mxu1 %v15592_v0  ;;  %5384 = vmatprep.subr.bf16.mxu0 %v15592_v0 }
 0x55b   :  { %12037 = vmatprep.mubr.msk.bf16.mxu1 %vm215_vm0, %v15283_v49  ;;  %12112 = vmatprep.mubr.msk.bf16.mxu0 %vm215_vm0, %v15284_v53 }
 0x55d   :  { %4644 = vmatpush1.bf16.msra.mxu1 %v17900_v42  ;;  %5385 = vmatpush1.bf16.msra.mxu0 %v17900_v42 }
 0x55e   :  { %4645 = vmatprep.subr.bf16.mxu1 %v15592_v0  ;;  %5386 = vmatprep.subr.bf16.mxu0 %v15592_v0 }
 0x560   :  { %4561 = vmatmul.mubr.bf16.gmra.mrb[104].mxu1 %v15281_v47  ;;  %5207 = vmatmul.mubr.bf16.gmra.mrb[96].mxu0 %v15286_v57 }
 0x561   :  { %4646 = vmatpush1.bf16.msra.mxu1 %v17907_v27  ;;  %5387 = vmatpush1.bf16.msra.mxu0 %v17907_v27 }
 0x562   :  { %4647 = vmatprep.subr.bf16.mxu1 %v15592_v0  ;;  %5388 = vmatprep.subr.bf16.mxu0 %v15592_v0 }
 0x563   :  { %12038 = vmatprep.mubr.msk.bf16.mxu1 %vm215_vm0, %v12034_v4  ;;  %12113 = vmatprep.mubr.msk.bf16.mxu0 %vm215_vm0, %v12109_v10 }
 0x565   :  { %4648 = vmatpush1.bf16.msra.mxu1 %v17921_v28  ;;  %5389 = vmatpush1.bf16.msra.mxu0 %v17921_v28 }
 0x566   :  { %4649 = vmatprep.subr.bf16.mxu1 %v15592_v0  ;;  %5390 = vmatprep.subr.bf16.mxu0 %v15592_v0 }
 0x568   :  { %4569 = vmatmul.mubr.bf16.gmra.mrb[108].mxu1 %v12033_v23  ;;  %5215 = vmatmul.mubr.bf16.gmra.mrb[100].mxu0 %v12108_v32 }
 0x569   :  { %4650 = vmatpush1.bf16.msra.mxu1 %v17932_v26  ;;  %5391 = vmatpush1.bf16.msra.mxu0 %v17932_v26 }
 0x56a   :  { %4651 = vmatprep.subr.bf16.mxu1 %v15592_v0  ;;  %5392 = vmatprep.subr.bf16.mxu0 %v15592_v0 }
 0x56b   :  { %12054 = vmatprep.mubr.msk.bf16.mxu1 %vm215_vm0, %v15293_v6  ;;  %12135 = vmatprep.mubr.msk.bf16.mxu0 %vm215_vm0, %v15296_v12 }
 0x56d   :  { %4652 = vmatpush1.bf16.msra.mxu1 %v17940_v55  ;;  %5393 = vmatpush1.bf16.msra.mxu0 %v17940_v55 }
 0x56e   :  { %4653 = vmatprep.subr.bf16.mxu1 %v15592_v0  ;;  %5394 = vmatprep.subr.bf16.mxu0 %v15592_v0 }
 0x571   :  { %4654 = vmatpush1.bf16.msra.mxu1 %v17947_v2  ;;  %5395 = vmatpush1.bf16.msra.mxu0 %v17947_v2 }
 0x572   :  { %4655 = vmatprep.subr.bf16.mxu1 %v15592_v0  ;;  %5396 = vmatprep.subr.bf16.mxu0 %v15592_v0 }
 0x575   :  { %4656 = vmatpush1.bf16.msra.mxu1 %v17951_v21  ;;  %5397 = vmatpush1.bf16.msra.mxu0 %v17951_v21 }
 0x576   :  { %4657 = vmatprep.subr.bf16.mxu1 %v15592_v0  ;;  %5398 = vmatprep.subr.bf16.mxu0 %v15592_v0 }
 0x579   :  { %4658 = vmatpush1.bf16.msra.mxu1 %v17975_v39  ;;  %5399 = vmatpush1.bf16.msra.mxu0 %v17975_v39 }
 0x57a   :  { %5818 = vmatprep.subr.bf16.mxu0 %v15592_v0  ;;  %13585 = vmatprep.subr.bf16.mxu1 %v15327_v1 }
 0x57c   :  { %4670 = vmatmul.mubr.bf16.vlgmr.msra.gmra.mrb[112].mxu1 %v15291_v38  ;;  %5411 = vmatmul.mubr.bf16.vlgmr.msra.gmra.mrb[104].mxu0 %v15294_v11 }
 0x57d   :  { %5819 = vmatpush1.bf16.msra.mxu0 %v17883_v34  ;;  %12055 = vmatprep.mubr.msk.bf16.mxu1 %vm215_vm0, %v15299_v25 }
 0x57e   :  { %5820 = vmatprep.subr.bf16.mxu0 %v15592_v0  ;;  %12136 = vmatprep.mubr.msk.bf16.mxu0 %vm215_vm0, %v15303_v29 }
 0x57f   :  { %13586 = vmatpush3.bf16.msra.mxu1 %v15327_v1  ;;  %v15337_v1 = vld [vmem:[%s19982_s28 + $0x90] ss:$8 sps:$4 sm:$0xff]  }
 0x580   :  { %13587 = vmatprep.subr.bf16.mxu1 %v15328_v51 }
 0x581   :  { %5821 = vmatpush1.bf16.msra.mxu0 %v17885_v62 }
 0x582   :  { %5822 = vmatprep.subr.bf16.mxu0 %v15592_v0 }
 0x583   :  { %13588 = vmatpush3.bf16.msra.mxu1 %v15328_v51 }
 0x584   :  { %4678 = vmatmul.mubr.bf16.gmra.mrb[116].mxu1 %v15297_v35  ;;  %5419 = vmatmul.mubr.bf16.gmra.mrb[108].mxu0 %v15305_v14 }
 0x585   :  { %5823 = vmatpush1.bf16.msra.mxu0 %v17895_v15  ;;  %12056 = vmatprep.mubr.msk.bf16.mxu1 %vm215_vm0, %v15302_v16 }
 0x586   :  { %5824 = vmatprep.subr.bf16.mxu0 %v15592_v0  ;;  %12137 = vmatprep.mubr.msk.bf16.mxu0 %vm215_vm0, %v15308_v18 }
 0x587   :  { %13597 = vmatprep.subr.bf16.mxu1 %v15329_v5 }
 0x589   :  { %5825 = vmatpush1.bf16.msra.mxu0 %v17900_v42 }
 0x58a   :  { %5826 = vmatprep.subr.bf16.mxu0 %v15592_v0 }
 0x58c   :  { %4686 = vmatmul.mubr.bf16.gmra.mrb[120].mxu1 %v15300_v19  ;;  %5427 = vmatmul.mubr.bf16.gmra.mrb[112].mxu0 %v15310_v61 }
 0x58d   :  { %5827 = vmatpush1.bf16.msra.mxu0 %v17907_v27  ;;  %12057 = vmatprep.mubr.msk.bf16.mxu1 %vm215_vm0, %v12053_v63 }
 0x58e   :  { %5828 = vmatprep.subr.bf16.mxu0 %v15592_v0  ;;  %12138 = vmatprep.mubr.msk.bf16.mxu0 %vm215_vm0, %v12134_v44 }
 0x591   :  { %5829 = vmatpush1.bf16.msra.mxu0 %v17921_v28 }
 0x592   :  { %5830 = vmatprep.subr.bf16.mxu0 %v15592_v0 }
 0x594   :  { %4694 = vmatmul.mubr.bf16.gmra.mrb[124].mxu1 %v12052_v3  ;;  %5435 = vmatmul.mubr.bf16.gmra.mrb[116].mxu0 %v12133_v24 }
 0x595   :  { %5831 = vmatpush1.bf16.msra.mxu0 %v17932_v26  ;;  %12185 = vmatprep.mubr.msk.bf16.mxu0 %vm215_vm0, %v15315_v20 }
 0x596   :  { %5832 = vmatprep.subr.bf16.mxu0 %v15592_v0 }
 0x599   :  { %5833 = vmatpush1.bf16.msra.mxu0 %v17940_v55 }
 0x59a   :  { %5834 = vmatprep.subr.bf16.mxu0 %v15592_v0 }
 0x59d   :  { %5835 = vmatpush1.bf16.msra.mxu0 %v17947_v2 }
 0x59e   :  { %5836 = vmatprep.subr.bf16.mxu0 %v15592_v0 }
 0x5a1   :  { %5837 = vmatpush1.bf16.msra.mxu0 %v17951_v21 }
 0x5a2   :  { %5838 = vmatprep.subr.bf16.mxu0 %v15592_v0 }
 0x5a5   :  { %5839 = vmatpush1.bf16.msra.mxu0 %v17975_v39 }
 0x5a6   :  { %6038 = vmatprep.subr.bf16.mxu0 %v15592_v0 }
 0x5a8   :  { %5851 = vmatmul.mubr.bf16.vlgmr.msra.gmra.mrb[120].mxu0 %v15313_v50 }
 0x5a9   :  { %6039 = vmatpush1.bf16.msra.mxu0 %v17883_v34  ;;  %12186 = vmatprep.mubr.msk.bf16.mxu0 %vm215_vm0, %v15316_v22 }
 0x5aa   :  { %6040 = vmatprep.subr.bf16.mxu0 %v15592_v0 }
 0x5ad   :  { %6041 = vmatpush1.bf16.msra.mxu0 %v17885_v62 }
 0x5ae   :  { %6042 = vmatprep.subr.bf16.mxu0 %v15592_v0 }
 0x5b0   :  { %5859 = vmatmul.mubr.bf16.gmra.mrb[124].mxu0 %v15318_v40 }
 0x5b1   :  { %6043 = vmatpush1.bf16.msra.mxu0 %v17895_v15  ;;  %12187 = vmatprep.mubr.msk.bf16.mxu0 %vm215_vm0, %v15319_v45  ;;  %v15333_v45 = vld [vmem:[%s19982_s28 + $0x74] ss:$8 sps:$4 sm:$0xff]  }
 0x5b2   :  { %6044 = vmatprep.subr.bf16.mxu0 %v15592_v0 }
 0x5b5   :  { %6045 = vmatpush1.bf16.msra.mxu0 %v17900_v42 }
 0x5b6   :  { %6046 = vmatprep.subr.bf16.mxu0 %v15592_v0 }
 0x5b8   :  { %5867 = vmatmul.mubr.bf16.gmra.mrb[128].mxu0 %v15321_v58  ;;  %v15331_v58 = vld [vmem:[%s19982_s28 + $0x70] ss:$8 sps:$4 sm:$0xff]  }
 0x5b9   :  { %6047 = vmatpush1.bf16.msra.mxu0 %v17907_v27  ;;  %12188 = vmatprep.mubr.msk.bf16.mxu0 %vm215_vm0, %v12184_v31  ;;  %v15336_v31 = vld [vmem:[%s19982_s28 + $0x84] ss:$8 sps:$4 sm:$0xff]  }
 0x5ba   :  { %6048 = vmatprep.subr.bf16.mxu0 %v15592_v0 }
 0x5bd   :  { %6049 = vmatpush1.bf16.msra.mxu0 %v17921_v28 }
 0x5be   :  { %6050 = vmatprep.subr.bf16.mxu0 %v15592_v0 }
 0x5c0   :  { %5875 = vmatmul.mubr.bf16.gmra.mrb[132].mxu0 %v12183_v8  ;;  %v15334_v8 = vld [vmem:[%s19982_s28 + $0x80] ss:$8 sps:$4 sm:$0xff]  }
 0x5c1   :  { %6051 = vmatpush1.bf16.msra.mxu0 %v17932_v26  ;;  %12210 = vmatprep.mubr.msk.bf16.mxu0 %vm215_vm0, %v15326_v60  ;;  %v15339_v60 = vld [vmem:[%s19982_s28 + $0x94] ss:$8 sps:$4 sm:$0xff]  }
 0x5c2   :  { %6052 = vmatprep.subr.bf16.mxu0 %v15592_v0 }
 0x5c5   :  { %6053 = vmatpush1.bf16.msra.mxu0 %v17940_v55 }
 0x5c6   :  { %6054 = vmatprep.subr.bf16.mxu0 %v15592_v0 }
 0x5c9   :  { %6055 = vmatpush1.bf16.msra.mxu0 %v17947_v2 }
 0x5ca   :  { %6056 = vmatprep.subr.bf16.mxu0 %v15592_v0 }
 0x5cd   :  { %6057 = vmatpush1.bf16.msra.mxu0 %v17951_v21 }
 0x5ce   :  { %6058 = vmatprep.subr.bf16.mxu0 %v15592_v0 }
 0x5d1   :  { %6059 = vmatpush1.bf16.msra.mxu0 %v17975_v39 }
 0x5d2   :  { %6258 = vmatprep.subr.bf16.mxu0 %v15592_v0 }
 0x5d4   :  { %6071 = vmatmul.mubr.bf16.vlgmr.msra.gmra.mrb[136].mxu0 %v15324_v56  ;;  %v12076_v56 = vld [vmem:[%s19982_s28 + $0xa0] sm:$0xff] }
 0x5d5   :  { %6259 = vmatpush1.bf16.msra.mxu0 %v17883_v34  ;;  %v12084_v51 = vcombine.high %v12076_v56, %v12076_v56 }
 0x5d6   :  { %6260 = vmatprep.subr.bf16.mxu0 %v15592_v0 }
 0x5d9   :  { %6261 = vmatpush1.bf16.msra.mxu0 %v17885_v62 }
 0x5da   :  { %6262 = vmatprep.subr.bf16.mxu0 %v15592_v0 }
 0x5dd   :  { %6263 = vmatpush1.bf16.msra.mxu0 %v17895_v15 }
 0x5de   :  { %6264 = vmatprep.subr.bf16.mxu0 %v15592_v0 }
 0x5e1   :  { %6265 = vmatpush1.bf16.msra.mxu0 %v17900_v42 }
 0x5e2   :  { %6266 = vmatprep.subr.bf16.mxu0 %v15592_v0 }
 0x5e5   :  { %6267 = vmatpush1.bf16.msra.mxu0 %v17907_v27 }
 0x5e6   :  { %6268 = vmatprep.subr.bf16.mxu0 %v15592_v0 }
 0x5e9   :  { %6269 = vmatpush1.bf16.msra.mxu0 %v17921_v28 }
 0x5ea   :  { %6270 = vmatprep.subr.bf16.mxu0 %v15592_v0 }
 0x5ed   :  { %6271 = vmatpush1.bf16.msra.mxu0 %v17932_v26 }
 0x5ee   :  { %6272 = vmatprep.subr.bf16.mxu0 %v15592_v0 }
 0x5f1   :  { %6273 = vmatpush1.bf16.msra.mxu0 %v17940_v55 }
 0x5f2   :  { %6274 = vmatprep.subr.bf16.mxu0 %v15592_v0 }
 0x5f5   :  { %6275 = vmatpush1.bf16.msra.mxu0 %v17947_v2 }
 0x5f6   :  { %6276 = vmatprep.subr.bf16.mxu0 %v15592_v0 }
 0x5f9   :  { %6277 = vmatpush1.bf16.msra.mxu0 %v17951_v21 }
 0x5fa   :  { %6278 = vmatprep.subr.bf16.mxu0 %v15592_v0 }
 0x5fd   :  { %6279 = vmatpush1.bf16.msra.mxu0 %v17975_v39 }
 0x623   :  { %v4546_v48 = vpop.f32.mrb[96].mxu1 }
 0x624   :  { %v4548_v54 = vpop.f32.mrb[97].mxu1 }
 0x625   :  { %v4549_v46 = vpop.f32.mrb[98].mxu1  ;;  %v15343_v54 = vld [vmem:[%s19955_s6 + $0x28] sm:$0xff]  }
 0x626   :  { %v4576_v43 = vpack.c.bf16 %v4549_v46, %v4546_v48  ;;  %v4551_v52 = vpop.f32.mrb[99].mxu1  ;;  %v15342_v48 = vld [vmem:[%s19955_s6 + $0x20] sm:$0xff]   ;;  %v18286_v46 = vpop.f32.mrb[88].mxu0 }
 0x62b   :  { %v4554_v59 = vpop.f32.mrb[100].mxu1 }
 0x62c   :  { %v4556_v9 = vpop.f32.mrb[101].mxu1 }
 0x62d   :  { %v4557_v7 = vpop.f32.mrb[102].mxu1 }
 0x62e   :  { %v4577_v49 = vpack.c.bf16 %v4557_v7, %v4554_v59  ;;  %v4559_v53 = vpop.f32.mrb[103].mxu1  ;;  %v18295_v7 = vld [vmem:[%s19955_s6 + $0x30] sm:$0xff]  }
 0x633   :  { %v4562_v47 = vpop.f32.mrb[104].mxu1 }
 0x634   :  { %v4564_v57 = vpop.f32.mrb[105].mxu1 }
 0x635   :  { %v4565_v17 = vpop.f32.mrb[106].mxu1 }
 0x636   :  { %v4578_v36 = vpack.c.bf16 %v4565_v17, %v4562_v47  ;;  %v4567_v4 = vpop.f32.mrb[107].mxu1 }
 0x63b   :  { %v4570_v10 = vpop.f32.mrb[108].mxu1 }
 0x63c   :  { %v4572_v23 = vpop.f32.mrb[109].mxu1  ;;  %v4579_v33 = vpack.c.bf16 %v4570_v10, %v4570_v10 }
 0x63d   :  { %v4573_v32 = vpop.f32.mrb[110].mxu1 }
 0x63e   :  { %v4574_v6 = vpop.f32.mrb[111].mxu1 }
 0x64f   :  { %v4671_v12 = vpop.f32.mrb[112].mxu1 }
 0x650   :  { %v4673_v38 = vpop.f32.mrb[113].mxu1 }
 0x651   :  { %v4674_v11 = vpop.f32.mrb[114].mxu1 }
 0x652   :  { %v4701_v25 = vpack.c.bf16 %v4674_v11, %v4671_v12  ;;  %v4676_v29 = vpop.f32.mrb[115].mxu1 }
 0x654   :  { %13589 = vmatprep.mubr.msk.bf16.mxu1 %vm4201_vm4, %v4701_v25 }
 0x657   :  { %v4679_v35 = vpop.f32.mrb[116].mxu1 }
 0x658   :  { %v4681_v14 = vpop.f32.mrb[117].mxu1 }
 0x659   :  { %v4682_v16 = vpop.f32.mrb[118].mxu1 }
 0x65a   :  { %v4702_v18 = vpack.c.bf16 %v4682_v16, %v4679_v35  ;;  %v4684_v30 = vpop.f32.mrb[119].mxu1 }
 0x65c   :  { %13590 = vmatmul.mubr.msk.bf16.vlgmr.msra.gmra.mrb[128].mxu1 %vm4201_vm4, %v4702_v18 }
 0x65d   :  { %13598 = vmatpush3.bf16.msra.mxu1 %v15329_v5  ;;  %v12083_v5 = vcombine.low %v12076_v56, %v12076_v56 }
 0x65e   :  { %13599 = vmatprep.subr.bf16.mxu1 %v15330_v13 }
 0x65f   :  { %v4687_v19 = vpop.f32.mrb[120].mxu1 }
 0x660   :  { %v4689_v61 = vpop.f32.mrb[121].mxu1 }
 0x661   :  { %v4690_v63 = vpop.f32.mrb[122].mxu1  ;;  %13600 = vmatpush3.bf16.msra.mxu1 %v15330_v13 }
 0x662   :  { %v4703_v44 = vpack.c.bf16 %v4690_v63, %v4687_v19  ;;  %v4692_v3 = vpop.f32.mrb[123].mxu1  ;;  %4938 = vmatprep.subr.bf16.mxu1 %v15592_v0 }
 0x664   :  { %13593 = vmatprep.mubr.msk.bf16.mxu1 %vm4201_vm4, %v4703_v44 }
 0x667   :  { %v4695_v24 = vpop.f32.mrb[124].mxu1 }
 0x668   :  { %v4704_v20 = vpack.c.bf16 %v4695_v24, %v4695_v24  ;;  %v4697_v50 = vpop.f32.mrb[125].mxu1 }
 0x669   :  { %v4698_v22 = vpop.f32.mrb[126].mxu1 }
 0x66a   :  { %13594 = vmatmul.mubr.msk.bf16.gmra.mrb[132].mxu1 %vm4201_vm4, %v4704_v20  ;;  %v4699_v40 = vpop.f32.mrb[127].mxu1 }
 0x66b   :  { %13601 = vmatprep.mubr.msk.bf16.mxu1 %vm4201_vm4, %v4576_v43  ;;  %v5194_v43 = vpop.f32.mrb[89].mxu0 }
 0x66c   :  { %v18288_v52 = vpop.f32.mrb[90].mxu0 }
 0x66d   :  { %v5197_v59 = vpop.f32.mrb[91].mxu0  ;;  %v5222_v9 = vpack.c.bf16 %v18288_v52, %v18286_v46 }
 0x672   :  { %13602 = vmatmul.mubr.msk.bf16.vlgmr.msra.gmra.mrb[128].mxu1 %vm4201_vm4, %v4577_v49  ;;  %v18297_v49 = vpop.f32.mrb[92].mxu0 }
 0x673   :  { %4939 = vmatpush1.bf16.msra.mxu1 %v17883_v34  ;;  %13605 = vmatprep.mubr.msk.bf16.mxu1 %vm4201_vm4, %v4578_v36  ;;  %v5202_v53 = vpop.f32.mrb[93].mxu0 }
 0x674   :  { %4940 = vmatprep.subr.bf16.mxu1 %v15592_v0  ;;  %v18300_v47 = vpop.f32.mrb[94].mxu0  ;;  %v15367_v53 = vld [vmem:[%s19982_s28 + $0x1c0] ss:$8 sps:$4 sm:$0xff]  }
 0x675   :  { %v5223_v57 = vpack.c.bf16 %v18300_v47, %v18297_v49  ;;  %v5205_v17 = vpop.f32.mrb[95].mxu0 }
 0x676   :  { %v18304_v36 = vpop.f32.mrb[96].mxu0 }
 0x677   :  { %4941 = vmatpush1.bf16.msra.mxu1 %v17885_v62  ;;  %v5210_v4 = vpop.f32.mrb[97].mxu0 }
 0x678   :  { %4942 = vmatprep.subr.bf16.mxu1 %v15592_v0  ;;  %v18306_v10 = vpop.f32.mrb[98].mxu0  ;;  %v15370_v4 = vld [vmem:[%s19982_s28 + $0x1d4] ss:$8 sps:$4 sm:$0xff]  }
 0x679   :  { %v5224_v23 = vpack.c.bf16 %v18306_v10, %v18304_v36  ;;  %v5213_v32 = vpop.f32.mrb[99].mxu0 }
 0x67a   :  { %13606 = vmatmul.mubr.msk.bf16.gmra.mrb[132].mxu1 %vm4201_vm4, %v4579_v33  ;;  %v18310_v6 = vpop.f32.mrb[100].mxu0  ;;  %v15354_v33 = vld [vmem:[%s19982_s28 + $0x19c] ss:$8 sps:$4 sm:$0xff]  }
 0x67b   :  { %4943 = vmatpush1.bf16.msra.mxu1 %v17895_v15  ;;  %12085 = vmatprep.mubr.msk.bf16.mxu1 %vm215_vm0, %v15333_v45  ;;  %v5218_v12 = vpop.f32.mrb[101].mxu0  ;;  %v5225_v46 = vpack.c.bf16 %v18310_v6, %v18310_v6 }
 0x67c   :  { %4944 = vmatprep.subr.bf16.mxu1 %v15592_v0  ;;  %v5219_v38 = vpop.f32.mrb[102].mxu0  ;;  %12211 = vmatprep.mubr.msk.bf16.mxu0 %vm215_vm0, %v15354_v33 }
 0x67d   :  { %v5220_v11 = vpop.f32.mrb[103].mxu0 }
 0x67e   :  { %v18312_v25 = vpop.f32.mrb[104].mxu0 }
 0x67f   :  { %4945 = vmatpush1.bf16.msra.mxu1 %v17900_v42  ;;  %v5414_v29 = vpop.f32.mrb[105].mxu0 }
 0x680   :  { %4946 = vmatprep.subr.bf16.mxu1 %v15592_v0  ;;  %v18314_v35 = vpop.f32.mrb[106].mxu0 }
 0x681   :  { %v5442_v14 = vpack.c.bf16 %v18314_v35, %v18312_v25  ;;  %v5417_v16 = vpop.f32.mrb[107].mxu0  ;;  %v15379_v25 = vld [vmem:[%s19955_s6 + $0x58] sm:$0xff]  }
 0x682   :  { %v18318_v18 = vpop.f32.mrb[108].mxu0 }
 0x683   :  { %4947 = vmatpush1.bf16.msra.mxu1 %v17907_v27  ;;  %v5422_v30 = vpop.f32.mrb[109].mxu0 }
 0x684   :  { %4948 = vmatprep.subr.bf16.mxu1 %v15592_v0  ;;  %v18320_v13 = vpop.f32.mrb[110].mxu0 }
 0x685   :  { %v5443_v19 = vpack.c.bf16 %v18320_v13, %v18318_v18  ;;  %v5425_v61 = vpop.f32.mrb[111].mxu0 }
 0x686   :  { %v18324_v63 = vpop.f32.mrb[112].mxu0 }
 0x687   :  { %4949 = vmatpush1.bf16.msra.mxu1 %v17921_v28  ;;  %v5430_v44 = vpop.f32.mrb[113].mxu0 }
 0x688   :  { %4950 = vmatprep.subr.bf16.mxu1 %v15592_v0  ;;  %v18326_v3 = vpop.f32.mrb[114].mxu0 }
 0x689   :  { %v5444_v24 = vpack.c.bf16 %v18326_v3, %v18324_v63  ;;  %v5433_v20 = vpop.f32.mrb[115].mxu0 }
 0x68a   :  { %v18330_v50 = vpop.f32.mrb[116].mxu0  ;;  %v15372_v20 = vld [vmem:[%s19982_s28 + $0x1d0] ss:$8 sps:$4 sm:$0xff]  }
 0x68b   :  { %4951 = vmatpush1.bf16.msra.mxu1 %v17932_v26  ;;  %v5438_v22 = vpop.f32.mrb[117].mxu0  ;;  %v5445_v52 = vpack.c.bf16 %v18330_v50, %v18330_v50 }
 0x68c   :  { %4952 = vmatprep.subr.bf16.mxu1 %v15592_v0  ;;  %v5439_v40 = vpop.f32.mrb[118].mxu0  ;;  %v15373_v22 = vld [vmem:[%s19982_s28 + $0x1e4] ss:$8 sps:$4 sm:$0xff]  }
 0x68d   :  { %v5440_v45 = vpop.f32.mrb[119].mxu0 }
 0x68f   :  { %4953 = vmatpush1.bf16.msra.mxu1 %v17940_v55 }
 0x690   :  { %4954 = vmatprep.subr.bf16.mxu1 %v15592_v0 }
 0x693   :  { %4955 = vmatpush1.bf16.msra.mxu1 %v17947_v2 }
 0x694   :  { %4956 = vmatprep.subr.bf16.mxu1 %v15592_v0 }
 0x697   :  { %4957 = vmatpush1.bf16.msra.mxu1 %v17951_v21 }
 0x698   :  { %4958 = vmatprep.subr.bf16.mxu1 %v15592_v0 }
 0x69b   :  { %4959 = vmatpush1.bf16.msra.mxu1 %v17975_v39 }
 0x69c   :  { %13609 = vmatprep.subr.bf16.mxu1 %v15342_v48 }
 0x69e   :  { %4971 = vmatmul.mubr.bf16.vlgmr.msra.gmra.mrb[136].mxu1 %v15331_v58  ;;  %v15356_v58 = vld [vmem:[%s19982_s28 + $0x198] ss:$8 sps:$4 sm:$0xff]  }
 0x69f   :  { %12086 = vmatprep.mubr.msk.bf16.mxu1 %vm215_vm0, %v15336_v31  ;;  %13610 = vmatpush3.bf16.msra.mxu1 %v15342_v48  ;;  %v15360_v31 = vld [vmem:[%s19982_s28 + $0x1ac] ss:$8 sps:$4 sm:$0xff]  }
 0x6a0   :  { %13611 = vmatprep.subr.bf16.mxu1 %v15343_v54  ;;  %6079 = vmatmul.mubr.bf16.gmra.mrb[140].mxu0 %v15356_v58 }
 0x6a1   :  { %12212 = vmatprep.mubr.msk.bf16.mxu0 %vm215_vm0, %v15360_v31 }
 0x6a3   :  { %13612 = vmatpush3.bf16.msra.mxu1 %v15343_v54 }
 0x6a4   :  { %13621 = vmatprep.subr.bf16.mxu1 %v18295_v7 }
 0x6a6   :  { %4979 = vmatmul.mubr.bf16.gmra.mrb[140].mxu1 %v15334_v8  ;;  %v15362_v8 = vld [vmem:[%s19982_s28 + $0x1a8] ss:$8 sps:$4 sm:$0xff]  }
 0x6a7   :  { %12087 = vmatprep.mubr.msk.bf16.mxu1 %vm215_vm0, %v15339_v60  ;;  %v12201_v60 = vld [vmem:[%s19982_s28 + $0x1b8] sm:$0xff] }
 0x6a8   :  { %6087 = vmatmul.mubr.bf16.gmra.mrb[144].mxu0 %v15362_v8  ;;  %v12209_v56 = vcombine.high %v12201_v60, %v12201_v60  ;;  %v15345_v8 = vld [vmem:[%s19955_s6 + $0x38] sm:$0xff]  }
 0x6aa   :  { %12213 = vmatprep.mubr.msk.bf16.mxu0 %vm215_vm0, %v12209_v56  ;;  %v15375_v56 = vld [vmem:[%s19982_s28 + $0x1e0] ss:$8 sps:$4 sm:$0xff]  }
 0x6ae   :  { %4987 = vmatmul.mubr.bf16.gmra.mrb[144].mxu1 %v15337_v1  ;;  %v12208_v1 = vcombine.low %v12201_v60, %v12201_v60  ;;  %v12226_v60 = vld [vmem:[%s19982_s28 + $0x1f0] sm:$0xff] }
 0x6af   :  { %12088 = vmatprep.mubr.msk.bf16.mxu1 %vm215_vm0, %v12084_v51  ;;  %v15369_v51 = vld [vmem:[%s19982_s28 + $0x1c4] ss:$8 sps:$4 sm:$0xff]  }
 0x6b0   :  { %6095 = vmatmul.mubr.bf16.gmra.mrb[148].mxu0 %v12208_v1  ;;  %v12234_v1 = vcombine.high %v12226_v60, %v12226_v60 }
 0x6b1   :  { %12235 = vmatprep.mubr.msk.bf16.mxu0 %vm215_vm0, %v15369_v51  ;;  %v15346_v51 = vld [vmem:[%s19955_s6 + $0x40] sm:$0xff]  }
 0x6b6   :  { %4995 = vmatmul.mubr.bf16.gmra.mrb[148].mxu1 %v12083_v5  ;;  %v18353_v5 = vpop.f32.mrb[120].mxu0 }
 0x6b7   :  { %v5854_v48 = vpop.f32.mrb[121].mxu0 }
 0x6b8   :  { %v18356_v54 = vpop.f32.mrb[122].mxu0  ;;  %6291 = vmatmul.mubr.bf16.vlgmr.msra.gmra.mrb[152].mxu0 %v15367_v53 }
 0x6b9   :  { %v5882_v43 = vpack.c.bf16 %v18356_v54, %v18353_v5  ;;  %v5857_v59 = vpop.f32.mrb[123].mxu0  ;;  %12236 = vmatprep.mubr.msk.bf16.mxu0 %vm215_vm0, %v15370_v4 }
 0x6ba   :  { %v18363_v17 = vpop.f32.mrb[124].mxu0 }
 0x6bb   :  { %v5862_v32 = vpop.f32.mrb[125].mxu0 }
 0x6bc   :  { %v18368_v12 = vpop.f32.mrb[126].mxu0 }
 0x6bd   :  { %v5883_v11 = vpack.c.bf16 %v18368_v12, %v18363_v17  ;;  %v5865_v29 = vpop.f32.mrb[127].mxu0 }
 0x6c0   :  { %6299 = vmatmul.mubr.bf16.gmra.mrb[156].mxu0 %v15372_v20 }
 0x6c1   :  { %12237 = vmatprep.mubr.msk.bf16.mxu0 %vm215_vm0, %v15373_v22 }
 0x6c8   :  { %6307 = vmatmul.mubr.bf16.gmra.mrb[160].mxu0 %v15375_v56 }
 0x6c9   :  { %12238 = vmatprep.mubr.msk.bf16.mxu0 %vm215_vm0, %v12234_v1 }
 0x771   :  { %v4972_v38 = vpop.f32.mrb[136].mxu1 }
 0x772   :  { %v4974_v16 = vpop.f32.mrb[137].mxu1 }
 0x773   :  { %v4975_v30 = vpop.f32.mrb[138].mxu1 }
 0x774   :  { %v5002_v61 = vpack.c.bf16 %v4975_v30, %v4972_v38  ;;  %v4977_v44 = vpop.f32.mrb[139].mxu1  ;;  %v12233_v38 = vcombine.low %v12226_v60, %v12226_v60 }
 0x775   :  { %v15347_v44 = vld [vmem:[%s19955_s6 + $0x48] sm:$0xff]  }
 0x776   :  { %13613 = vmatprep.mubr.msk.bf16.mxu1 %vm4201_vm4, %v5002_v61  ;;  %6315 = vmatmul.mubr.bf16.gmra.mrb[164].mxu0 %v12233_v38 }
 0x779   :  { %v4980_v40 = vpop.f32.mrb[140].mxu1 }
 0x77a   :  { %v4982_v45 = vpop.f32.mrb[141].mxu1 }
 0x77b   :  { %v4983_v33 = vpop.f32.mrb[142].mxu1 }
 0x77c   :  { %v5003_v58 = vpack.c.bf16 %v4983_v33, %v4980_v40  ;;  %v4985_v31 = vpop.f32.mrb[143].mxu1 }
 0x77e   :  { %13614 = vmatmul.mubr.msk.bf16.vlgmr.msra.gmra.mrb[128].mxu1 %vm4201_vm4, %v5003_v58 }
 0x77f   :  { %13622 = vmatpush3.bf16.msra.mxu1 %v18295_v7 }
 0x780   :  { %13623 = vmatprep.subr.bf16.mxu1 %v15345_v8 }
 0x781   :  { %v4988_v48 = vpop.f32.mrb[144].mxu1 }
 0x782   :  { %v4990_v59 = vpop.f32.mrb[145].mxu1 }
 0x783   :  { %v4991_v53 = vpop.f32.mrb[146].mxu1  ;;  %13624 = vmatpush3.bf16.msra.mxu1 %v15345_v8 }
 0x784   :  { %v5004_v4 = vpack.c.bf16 %v4991_v53, %v4988_v48  ;;  %v4993_v32 = vpop.f32.mrb[147].mxu1  ;;  %13633 = vmatprep.subr.bf16.mxu1 %v15346_v51  ;;  %v15383_v48 = vld [vmem:[%s19955_s6 + $0x80] sm:$0xff]   ;;  %v15385_v53 = vld [vmem:[%s19955_s6 + $0x88] sm:$0xff]  }
 0x785   :  { %13681 = vmatprep.subr.bf16.mxu0 %v15383_v48 }
 0x786   :  { %13617 = vmatprep.mubr.msk.bf16.mxu1 %vm4201_vm4, %v5004_v4  ;;  %13682 = vmatpush3.bf16.msra.mxu0 %v15383_v48  ;;  %v15384_v48 = vld [vmem:[%s19955_s6 + $0x78] sm:$0xff]  }
 0x787   :  { %13683 = vmatprep.subr.bf16.mxu0 %v15385_v53 }
 0x789   :  { %v4996_v7 = vpop.f32.mrb[148].mxu1 }
 0x78a   :  { %v5005_v29 = vpack.c.bf16 %v4996_v7, %v4996_v7  ;;  %v4998_v16 = vpop.f32.mrb[149].mxu1  ;;  %13684 = vmatpush3.bf16.msra.mxu0 %v15385_v53 }
 0x78b   :  { %v4999_v30 = vpop.f32.mrb[150].mxu1 }
 0x78c   :  { %13618 = vmatmul.mubr.msk.bf16.gmra.mrb[132].mxu1 %vm4201_vm4, %v5005_v29  ;;  %v5000_v61 = vpop.f32.mrb[151].mxu1 }
 0x78d   :  { %13625 = vmatprep.mubr.msk.bf16.mxu1 %vm4201_vm4, %v5222_v9  ;;  %v15350_v9 = vld [vmem:[%s19982_s28 + $0x11c] ss:$8 sps:$4 sm:$0xff]  }
 0x794   :  { %13626 = vmatmul.mubr.msk.bf16.vlgmr.msra.gmra.mrb[128].mxu1 %vm4201_vm4, %v5223_v57  ;;  %v15378_v57 = vld [vmem:[%s19955_s6 + $0x50] sm:$0xff]  }
 0x795   :  { %13629 = vmatprep.mubr.msk.bf16.mxu1 %vm4201_vm4, %v5224_v23  ;;  %13634 = vmatpush3.bf16.msra.mxu1 %v15346_v51 }
 0x796   :  { %13635 = vmatprep.subr.bf16.mxu1 %v15347_v44 }
 0x799   :  { %13636 = vmatpush3.bf16.msra.mxu1 %v15347_v44 }
 0x79a   :  { %5598 = vmatprep.subr.bf16.mxu1 %v15592_v0 }
 0x79c   :  { %13630 = vmatmul.mubr.msk.bf16.gmra.mrb[132].mxu1 %vm4201_vm4, %v5225_v46 }
 0x79d   :  { %13637 = vmatprep.mubr.msk.bf16.mxu1 %vm4201_vm4, %v5442_v14 }
 0x7a4   :  { %13638 = vmatmul.mubr.msk.bf16.vlgmr.msra.gmra.mrb[128].mxu1 %vm4201_vm4, %v5443_v19  ;;  %v15380_v19 = vld [vmem:[%s19955_s6 + $0x60] sm:$0xff]  }
 0x7a5   :  { %5599 = vmatpush1.bf16.msra.mxu1 %v17883_v34  ;;  %13641 = vmatprep.mubr.msk.bf16.mxu1 %vm4201_vm4, %v5444_v24  ;;  %v15348_v34 = vld [vmem:[%s19982_s28 + $0x118] ss:$8 sps:$4 sm:$0xff]  }
 0x7a6   :  { %5600 = vmatprep.subr.bf16.mxu1 %v15592_v0 }
 0x7a9   :  { %5601 = vmatpush1.bf16.msra.mxu1 %v17885_v62  ;;  %v15353_v62 = vld [vmem:[%s19982_s28 + $0x12c] ss:$8 sps:$4 sm:$0xff]  }
 0x7aa   :  { %5602 = vmatprep.subr.bf16.mxu1 %v15592_v0 }
 0x7ac   :  { %13642 = vmatmul.mubr.msk.bf16.gmra.mrb[132].mxu1 %vm4201_vm4, %v5445_v52 }
 0x7ad   :  { %5603 = vmatpush1.bf16.msra.mxu1 %v17895_v15  ;;  %12160 = vmatprep.mubr.msk.bf16.mxu1 %vm215_vm0, %v15350_v9  ;;  %v15351_v15 = vld [vmem:[%s19982_s28 + $0x128] ss:$8 sps:$4 sm:$0xff]  }
 0x7ae   :  { %5604 = vmatprep.subr.bf16.mxu1 %v15592_v0 }
 0x7b1   :  { %5605 = vmatpush1.bf16.msra.mxu1 %v17900_v42  ;;  %v12151_v42 = vld [vmem:[%s19982_s28 + $0x148] sm:$0xff] }
 0x7b2   :  { %5606 = vmatprep.subr.bf16.mxu1 %v15592_v0 }
 0x7b5   :  { %5607 = vmatpush1.bf16.msra.mxu1 %v17907_v27  ;;  %v15357_v27 = vld [vmem:[%s19982_s28 + $0x138] ss:$8 sps:$4 sm:$0xff]  }
 0x7b6   :  { %5608 = vmatprep.subr.bf16.mxu1 %v15592_v0 }
 0x7b9   :  { %5609 = vmatpush1.bf16.msra.mxu1 %v17921_v28  ;;  %v12159_v28 = vcombine.high %v12151_v42, %v12151_v42 }
 0x7ba   :  { %5610 = vmatprep.subr.bf16.mxu1 %v15592_v0 }
 0x7bd   :  { %5611 = vmatpush1.bf16.msra.mxu1 %v17932_v26  ;;  %v12158_v26 = vcombine.low %v12151_v42, %v12151_v42 }
 0x7be   :  { %5612 = vmatprep.subr.bf16.mxu1 %v15592_v0 }
 0x7c1   :  { %5613 = vmatpush1.bf16.msra.mxu1 %v17940_v55  ;;  %v18478_v55 = vpop.f32.mrb[128].mxu0 }
 0x7c2   :  { %5614 = vmatprep.subr.bf16.mxu1 %v15592_v0 }
 0x7c5   :  { %5615 = vmatpush1.bf16.msra.mxu1 %v17947_v2  ;;  %v5870_v2 = vpop.f32.mrb[129].mxu0 }
 0x7c6   :  { %5616 = vmatprep.subr.bf16.mxu1 %v15592_v0 }
 0x7c9   :  { %5617 = vmatpush1.bf16.msra.mxu1 %v17951_v21  ;;  %v18480_v21 = vpop.f32.mrb[130].mxu0 }
 0x7ca   :  { %5618 = vmatprep.subr.bf16.mxu1 %v15592_v0  ;;  %v15359_v0 = vld [vmem:[%s19982_s28 + $0x13c] ss:$8 sps:$4 sm:$0xff]   ;;  %v5884_v49 = vpack.c.bf16 %v18480_v21, %v18478_v55 }
 0x7cd   :  { %5619 = vmatpush1.bf16.msra.mxu1 %v17975_v39  ;;  %v5873_v39 = vpop.f32.mrb[131].mxu0 }
 0x7ce   :  { %v18484_v47 = vpop.f32.mrb[132].mxu0  ;;  %13645 = vmatprep.subr.bf16.mxu1 %v15378_v57 }
 0x7cf   :  { %v5878_v36 = vpop.f32.mrb[133].mxu0  ;;  %v5885_v5 = vpack.c.bf16 %v18484_v47, %v18484_v47 }
 0x7d0   :  { %5631 = vmatmul.mubr.bf16.vlgmr.msra.gmra.mrb[152].mxu1 %v15348_v34  ;;  %v5879_v10 = vpop.f32.mrb[134].mxu0 }
 0x7d1   :  { %12161 = vmatprep.mubr.msk.bf16.mxu1 %vm215_vm0, %v15353_v62  ;;  %v5880_v23 = vpop.f32.mrb[135].mxu0  ;;  %13646 = vmatpush3.bf16.msra.mxu1 %v15378_v57 }
 0x7d2   :  { %v18489_v6 = vpop.f32.mrb[136].mxu0  ;;  %13647 = vmatprep.subr.bf16.mxu1 %v15379_v25 }
 0x7d3   :  { %v6074_v35 = vpop.f32.mrb[137].mxu0 }
 0x7d4   :  { %v18494_v14 = vpop.f32.mrb[138].mxu0  ;;  %v15381_v35 = vld [vmem:[%s19955_s6 + $0x68] sm:$0xff]  }
 0x7d5   :  { %v6077_v18 = vpop.f32.mrb[139].mxu0  ;;  %13648 = vmatpush3.bf16.msra.mxu1 %v15379_v25  ;;  %v6102_v13 = vpack.c.bf16 %v18494_v14, %v18489_v6  ;;  %v15386_v6 = vld [vmem:[%s19956_s9] sm:$0xff]   ;;  %v15388_v14 = vld [vmem:[%s19956_s9 + $0x38] sm:$0xff]  }
 0x7d6   :  { %v18501_v63 = vpop.f32.mrb[140].mxu0  ;;  %13657 = vmatprep.subr.bf16.mxu1 %v15380_v19  ;;  %v15382_v18 = vld [vmem:[%s19955_s6 + $0x70] sm:$0xff]  }
 0x7d7   :  { %v6082_v3 = vpop.f32.mrb[141].mxu0 }
 0x7d8   :  { %5639 = vmatmul.mubr.bf16.gmra.mrb[156].mxu1 %v15351_v15  ;;  %v18503_v24 = vpop.f32.mrb[142].mxu0 }
 0x7d9   :  { %12162 = vmatprep.mubr.msk.bf16.mxu1 %vm215_vm0, %v15359_v0  ;;  %v6103_v50 = vpack.c.bf16 %v18503_v24, %v18501_v63  ;;  %v6085_v20 = vpop.f32.mrb[143].mxu0 }
 0x7da   :  { %v18507_v22 = vpop.f32.mrb[144].mxu0 }
 0x7db   :  { %v6090_v40 = vpop.f32.mrb[145].mxu0 }
 0x7dc   :  { %v18509_v45 = vpop.f32.mrb[146].mxu0 }
 0x7dd   :  { %v6104_v33 = vpack.c.bf16 %v18509_v45, %v18507_v22  ;;  %v6093_v58 = vpop.f32.mrb[147].mxu0 }
 0x7de   :  { %v18513_v31 = vpop.f32.mrb[148].mxu0 }
 0x7df   :  { %v6098_v8 = vpop.f32.mrb[149].mxu0  ;;  %v6105_v54 = vpack.c.bf16 %v18513_v31, %v18513_v31 }
 0x7e0   :  { %5647 = vmatmul.mubr.bf16.gmra.mrb[160].mxu1 %v15357_v27  ;;  %v6099_v60 = vpop.f32.mrb[150].mxu0 }
 0x7e1   :  { %12163 = vmatprep.mubr.msk.bf16.mxu1 %vm215_vm0, %v12159_v28  ;;  %v6100_v56 = vpop.f32.mrb[151].mxu0  ;;  %vm6559_vm0 = vcmask 457728  }
 0x7e2   :  { %v6292_v1 = vpop.f32.mrb[152].mxu0 }
 0x7e3   :  { %v6294_v51 = vpop.f32.mrb[153].mxu0 }
 0x7e4   :  { %v6295_v59 = vpop.f32.mrb[154].mxu0 }
 0x7e5   :  { %v6322_v4 = vpack.c.bf16 %v6295_v59, %v6292_v1  ;;  %v6297_v32 = vpop.f32.mrb[155].mxu0 }
 0x7e6   :  { %v6300_v38 = vpop.f32.mrb[156].mxu0 }
 0x7e7   :  { %v6302_v7 = vpop.f32.mrb[157].mxu0  ;;  %13685 = vmatprep.mubr.msk.bf16.mxu0 %vm4201_vm4, %v6322_v4 }
 0x7e8   :  { %5655 = vmatmul.mubr.bf16.gmra.mrb[164].mxu1 %v12158_v26  ;;  %v6303_v29 = vpop.f32.mrb[158].mxu0 }
 0x7e9   :  { %v6323_v16 = vpack.c.bf16 %v6303_v29, %v6300_v38  ;;  %v6305_v30 = vpop.f32.mrb[159].mxu0 }
 0x7ea   :  { %v6308_v61 = vpop.f32.mrb[160].mxu0 }
 0x7eb   :  { %v6310_v44 = vpop.f32.mrb[161].mxu0  ;;  %13686 = vmatmul.mubr.msk.bf16.vlgmr.msra.gmra.mrb[168].mxu0 %vm4201_vm4, %v6323_v16 }
 0x7ec   :  { %v6311_v46 = vpop.f32.mrb[162].mxu0 }
 0x7ed   :  { %v6324_v52 = vpack.c.bf16 %v6311_v46, %v6308_v61  ;;  %v6313_v9 = vpop.f32.mrb[163].mxu0 }
 0x7ef   :  { %13689 = vmatprep.mubr.msk.bf16.mxu0 %vm4201_vm4, %v6324_v52 }
 0x849   :  { %v6316_v34 = vpop.f32.mrb[164].mxu0 }
 0x84a   :  { %v6325_v62 = vpack.c.bf16 %v6316_v34, %v6316_v34  ;;  %v6318_v15 = vpop.f32.mrb[165].mxu0 }
 0x84b   :  { %v6319_v0 = vpop.f32.mrb[166].mxu0 }
 0x84c   :  { %13690 = vmatmul.mubr.msk.bf16.gmra.mrb[172].mxu0 %vm4201_vm4, %v6325_v62  ;;  %v6320_v42 = vpop.f32.mrb[167].mxu0 }
 0x84d   :  { %13765 = vmatprep.mubr.msk.bf16.mxu0 %vm6559_vm0, %v15388_v14 }
 0x8a3   :  { %v5632_v27 = vpop.f32.mrb[152].mxu1 }
 0x8a4   :  { %v5634_v28 = vpop.f32.mrb[153].mxu1 }
 0x8a5   :  { %v5635_v26 = vpop.f32.mrb[154].mxu1 }
 0x8a6   :  { %v5662_v2 = vpack.c.bf16 %v5635_v26, %v5632_v27  ;;  %v5637_v39 = vpop.f32.mrb[155].mxu1 }
 0x8a8   :  { %13649 = vmatprep.mubr.msk.bf16.mxu1 %vm4201_vm4, %v5662_v2 }
 0x8ab   :  { %v5640_v57 = vpop.f32.mrb[156].mxu1 }
 0x8ac   :  { %v5642_v36 = vpop.f32.mrb[157].mxu1 }
 0x8ad   :  { %v5643_v10 = vpop.f32.mrb[158].mxu1 }
 0x8ae   :  { %v5663_v23 = vpack.c.bf16 %v5643_v10, %v5640_v57  ;;  %v5645_v25 = vpop.f32.mrb[159].mxu1 }
 0x8b0   :  { %13650 = vmatmul.mubr.msk.bf16.vlgmr.msra.gmra.mrb[128].mxu1 %vm4201_vm4, %v5663_v23 }
 0x8b1   :  { %13658 = vmatpush3.bf16.msra.mxu1 %v15380_v19 }
 0x8b2   :  { %13659 = vmatprep.subr.bf16.mxu1 %v15381_v35 }
 0x8b3   :  { %v5648_v3 = vpop.f32.mrb[160].mxu1 }
 0x8b4   :  { %v5650_v20 = vpop.f32.mrb[161].mxu1 }
 0x8b5   :  { %v5651_v40 = vpop.f32.mrb[162].mxu1  ;;  %13660 = vmatpush3.bf16.msra.mxu1 %v15381_v35 }
 0x8b6   :  { %v5664_v58 = vpack.c.bf16 %v5651_v40, %v5648_v3  ;;  %v5653_v8 = vpop.f32.mrb[163].mxu1  ;;  %13669 = vmatprep.subr.bf16.mxu1 %v15382_v18 }
 0x8b8   :  { %13653 = vmatprep.mubr.msk.bf16.mxu1 %vm4201_vm4, %v5664_v58 }
 0x8bb   :  { %v5656_v60 = vpop.f32.mrb[164].mxu1 }
 0x8bc   :  { %v5665_v56 = vpack.c.bf16 %v5656_v60, %v5656_v60  ;;  %v5658_v1 = vpop.f32.mrb[165].mxu1 }
 0x8bd   :  { %v5659_v51 = vpop.f32.mrb[166].mxu1 }
 0x8be   :  { %13654 = vmatmul.mubr.msk.bf16.gmra.mrb[132].mxu1 %vm4201_vm4, %v5665_v56  ;;  %v5660_v19 = vpop.f32.mrb[167].mxu1 }
 0x8bf   :  { %13661 = vmatprep.mubr.msk.bf16.mxu1 %vm4201_vm4, %v5882_v43  ;;  %v13687_v43 = vpop.f32.mrb[168].mxu0 }
 0x8c0   :  { %v6388_v17 = vpop.f32.mrb[169].mxu0 }
 0x8c1   :  { %v13688_v12 = vpop.f32.mrb[170].mxu0 }
 0x8c6   :  { %13662 = vmatmul.mubr.msk.bf16.vlgmr.msra.gmra.mrb[128].mxu1 %vm4201_vm4, %v5883_v11  ;;  %v6391_v11 = vpop.f32.mrb[171].mxu0 }
 0x8c7   :  { %13665 = vmatprep.mubr.msk.bf16.mxu1 %vm4201_vm4, %v5884_v49  ;;  %13670 = vmatpush3.bf16.msra.mxu1 %v15382_v18 }
 0x8c8   :  { %13671 = vmatprep.subr.bf16.mxu1 %v15384_v48 }
 0x8cb   :  { %13672 = vmatpush3.bf16.msra.mxu1 %v15384_v48 }
 0x8ce   :  { %13666 = vmatmul.mubr.msk.bf16.gmra.mrb[132].mxu1 %vm4201_vm4, %v5885_v5 }
 0x8cf   :  { %13673 = vmatprep.mubr.msk.bf16.mxu1 %vm4201_vm4, %v6102_v13 }
 0x8d6   :  { %13674 = vmatmul.mubr.msk.bf16.vlgmr.msra.gmra.mrb[128].mxu1 %vm4201_vm4, %v6103_v50 }
 0x8d7   :  { %13677 = vmatprep.mubr.msk.bf16.mxu1 %vm4201_vm4, %v6104_v33 }
 0x8de   :  { %13678 = vmatmul.mubr.msk.bf16.gmra.mrb[132].mxu1 %vm4201_vm4, %v6105_v54  ;;  %vm6425_vm4 = vcmask 523264  }
 0x8df   :  { %13701 = vmatprep.mubr.msk.bf16.mxu1 %vm6559_vm0, %v15386_v6 }
 0x91f   :  { %v13691_v55 = vpop.f32.mrb[172].mxu0 }
 0x920   :  { %v6404_v21 = vpop.f32.mrb[173].mxu0 }
 0x921   :  { %v13692_v49 = vpop.f32.mrb[174].mxu0 }
 0x922   :  { %v6407_v47 = vpop.f32.mrb[175].mxu0 }
 0x9a9   :  { %v13675_v13 = vpop.f32.mrb[128].mxu1 }
 0x9aa   :  { %v18576_v63 = vadd.f32 %v13687_v43, %v13675_v13  ;;  %v6168_v24 = vpop.f32.mrb[129].mxu1 }
 0x9ab   :  { %v18578_v50 = vadd.f32 %v6388_v17, %v6168_v24  ;;  %v13676_v22 = vpop.f32.mrb[130].mxu1 }
 0x9ac   :  { %v18580_v45 = vadd.f32 %v13688_v12, %v13676_v22  ;;  %v6171_v33 = vpop.f32.mrb[131].mxu1  ;;  %v6448_v53 = vmul.f32 %v18576_v63, %v18576_v63  ;;  %v6429_v29 = vsel %vm6425_vm4, %v18576_v63, 0.0 }
 0x9ad   :  { %v6446_v31 = vmul.f32 %v18578_v50, %v18578_v50  ;;  %v18584_v59 = vadd.f32 %v6391_v11, %v6171_v33  ;;  %v6426_v4 = vsel %vm6425_vm4, %v18578_v50, 0.0 }
 0x9ae   :  { %v6449_v30 = vmul.f32 %v18580_v45, %v18580_v45  ;;  %v6456_v62 = vsel %vm6425_vm4, %v6448_v53, 0.0  ;;  %v6431_v15 = vsel %vm6425_vm4, %v18580_v45, 0.0 }
 0x9af   :  { %v6427_v32 = vsel %vm6425_vm4, %v18584_v59, 0.0  ;;  %v6447_v38 = vmul.f32 %v18584_v59, %v18584_v59  ;;  %v6453_v16 = vsel %vm6425_vm4, %v6446_v31, 0.0  ;;  %v6476_v31 = vld [vmem:[%s19957_s7] sm:$0x1] }
 0x9b0   :  { %v6428_v7 = vadd.f32 %v6427_v32, %v6426_v4  ;;  %v6458_v2 = vsel %vm6425_vm4, %v6449_v30, 0.0  ;;  %v6480_v32 = vld [vmem:[%s19958_s8] sm:$0x1] }
 0x9b1   :  { %v6454_v61 = vsel %vm6425_vm4, %v6447_v38, 0.0  ;;  %v13679_v44 = vpop.f32.mrb[132].mxu1 }
 0x9b2   :  { %v6430_v46 = vadd.f32 %v6429_v29, %v6428_v7  ;;  %v6455_v52 = vadd.f32 %v6454_v61, %v6453_v16  ;;  %v14453_v9 = vadd.f32 %v13691_v55, %v13679_v44  ;;  %v6184_v34 = vpop.f32.mrb[133].mxu1 }
 0x9b3   :  { %v14454_v0 = vadd.f32 %v6404_v21, %v6184_v34  ;;  %v13680_v42 = vpop.f32.mrb[134].mxu1 }
 0x9b4   :  { %v6457_v27 = vadd.f32 %v6456_v62, %v6455_v52  ;;  %v6432_v28 = vadd.f32 %v6431_v15, %v6430_v46  ;;  %v6187_v26 = vpop.f32.mrb[135].mxu1  ;;  %v6452_v25 = vmul.f32 %v14453_v9, %v14453_v9  ;;  %v6437_v58 = vsel %vm6425_vm4, %v14453_v9, 0.0 }
 0x9b5   :  { %v6433_v39 = vsel %vm6425_vm4, %v14454_v0, 0.0  ;;  %v6450_v57 = vmul.f32 %v14454_v0, %v14454_v0  ;;  %v14455_v36 = vadd.f32 %v6407_v47, %v6187_v26 }
 0x9b6   :  { %v6434_v10 = vadd.f32 %v6433_v39, %v6432_v28  ;;  %v6459_v23 = vadd.f32 %v6458_v2, %v6457_v27  ;;  %v6464_v1 = vsel %vm6425_vm4, %v6452_v25, 0.0 }
 0x9b7   :  { %v6460_v35 = vsel %vm6425_vm4, %v6450_v57, 0.0  ;;  %v6435_v18 = vsel %vm6425_vm4, %v14455_v36, 0.0  ;;  %v6451_v3 = vmul.f32 %v14455_v36, %v14455_v36 }
 0x9b8   :  { %v6461_v20 = vadd.f32 %v6460_v35, %v6459_v23  ;;  %v6436_v40 = vadd.f32 %v6435_v18, %v6434_v10 }
 0x9b9   :  { %v6462_v8 = vsel %vm6425_vm4, %v6451_v3, 0.0 }
 0x9ba   :  { %v6438_v60 = vadd.f32 %v6437_v58, %v6436_v40  ;;  %v6463_v56 = vadd.f32 %v6462_v8, %v6461_v20 }
 0x9bc   :  { %v6439_v51 = vrot.slane %v6438_v60, 4  ;;  %v6465_v19 = vadd.f32 %v6464_v1, %v6463_v56  ;;  %v15387_v56 = vld [vmem:[%s19956_s9 + $0x8] sm:$0xff]   ;;  %v15389_v1 = vld [vmem:[%s19956_s9 + $0x40] sm:$0xff]  }
 0x9be   :  { %v6440_v48 = vadd.f32 %v6439_v51, %v6438_v60  ;;  %v6466_v5 = vrot.slane %v6465_v19, 4  ;;  %v15390_v51 = vld [vmem:[%s19956_s9 + $0x10] sm:$0xff]  }
 0x9c0   :  { %v6441_v54 = vrot.slane %v6440_v48, 2  ;;  %v6467_v43 = vadd.f32 %v6466_v5, %v6465_v19  ;;  %v15392_v19 = vld [vmem:[%s19956_s9 + $0x48] sm:$0xff]   ;;  %v15393_v5 = vld [vmem:[%s19956_s9 + $0x50] ss:$0 sps:$4 sm:$0xff]  }
 0x9c2   :  { %v6442_v17 = vadd.f32 %v6441_v54, %v6440_v48  ;;  %v6468_v12 = vrot.slane %v6467_v43, 2  ;;  %v15391_v48 = vld [vmem:[%s19956_s9 + $0x18] ss:$0 sps:$4 sm:$0xff]   ;;  %v15394_v54 = vld [vmem:[%s19956_s9 + $0x1c] sm:$0xff]  }
 0x9c4   :  { %v6443_v11 = vrot.slane %v6442_v17, 1  ;;  %v6469_v55 = vadd.f32 %v6468_v12, %v6467_v43  ;;  %v15396_v43 = vld [vmem:[%s19956_s9 + $0x54] sm:$0xff]   ;;  %v15395_v12 = vld [vmem:[%s19956_s9 + $0x24] sm:$0xff]  }
 0x9c6   :  { %v6444_v21 = vadd.f32 %v6443_v11, %v6442_v17  ;;  %v6470_v49 = vrot.slane %v6469_v55, 1  ;;  %v15422_v17 = vld [vmem:[%s19959_s10 + $0x20] sm:$0xff]  }
 0x9c7   :  { %v15397_v11 = vld [vmem:[%s19956_s9 + $0x5c] sm:$0xff]  }
 0x9c8   :  { %v6445_v47 = vmul.f32 0.02, %v6444_v21  ;;  %v6471_v6 = vadd.f32 %v6470_v49, %v6469_v55  ;;  %v15398_v55 = vld [vmem:[%s19956_s9 + $0x2c] sm:$0xff]   ;;  %v15400_v21 = vld [vmem:[%s19956_s9 + $0x64] sm:$0xff]   ;;  %v15399_v49 = vld [vmem:[%s19956_s9 + $0x34] ss:$0 sps:$4 sm:$0xff]  }
 0x9ca   :  { %v6472_v14 = vmul.f32 0.02, %v6471_v6  ;;  %v6473_v13 = vmul.f32 %v6445_v47, %v6445_v47  ;;  %v15402_v6 = vld [vmem:[%s19956_s9 + $0x70] sm:$0xff]  }
 0x9cc   :  { %v6474_v24 = vsub.f32 %v6472_v14, %v6473_v13  ;;  %v15403_v14 = vld [vmem:[%s19956_s9 + $0x78] sm:$0xff]   ;;  %v15404_v13 = vld [vmem:[%s19956_s9 + $0x80] sm:$0xff]  }
 0x9ce   :  { %v6475_v22 = vmax.f32 %v6474_v24, 0.0  ;;  %v15405_v24 = vld [vmem:[%s19956_s9 + $0x88] ss:$0 sps:$4 sm:$0xff]  }
 0x9d0   :  { %v6477_v33 = vadd.f32 1e-05, %v6475_v22  ;;  %v15406_v22 = vld [vmem:[%s19956_s9 + $0x8c] sm:$0xff]  }
 0x9d2   :  { %15586 = vrsqrt.f32 %v6477_v33  ;;  %v15407_v33 = vld [vmem:[%s19956_s9 + $0x94] sm:$0xff]  }
 0x9dc   :  { %v15587_v53 = vpop.eup %15586 }
 0x9dd   :  { %v6479_v4 = vmul.f32 %v15587_v53, %v6476_v31  ;;  %v15408_v31 = vld [vmem:[%s19956_s9 + $0x9c] sm:$0xff]   ;;  %v15409_v53 = vld [vmem:[%s19956_s9 + $0xa4] ss:$0 sps:$4 sm:$0xff]  }
 0x9df   :  { %v6481_v38 = vmul.f32 %v6479_v4, %v6445_v47  ;;  %v6487_v7 = vrot.slane %v6479_v4, %v17835_v37  ;;  %v15401_v47 = vld [vmem:[%s19956_s9 + $0x6c] ss:$0 sps:$4 sm:$0xff]  }
 0x9e0   :  { %v15410_v4 = vld [vmem:[%s19956_s9 + $0xa8] sm:$0xff]  }
 0x9e1   :  { %v6482_v29 = vsub.f32 %v6480_v32, %v6481_v38  ;;  %v6489_v16 = vmul.f32 %v18578_v50, %v6487_v7  ;;  %v6490_v30 = vmul.f32 %v18584_v59, %v6487_v7  ;;  %v6491_v61 = vmul.f32 %v18576_v63, %v6487_v7  ;;  %v15411_v32 = vld [vmem:[%s19956_s9 + $0xb0] sm:$0xff]   ;;  %v15412_v38 = vld [vmem:[%s19956_s9 + $0xb8] sm:$0xff]  }
 0x9e2   :  { %v6492_v44 = vmul.f32 %v18580_v45, %v6487_v7  ;;  %v6493_v46 = vmul.f32 %v14454_v0, %v6487_v7  ;;  %v6494_v52 = vmul.f32 %v14455_v36, %v6487_v7  ;;  %v6495_v34 = vmul.f32 %v14453_v9, %v6487_v7  ;;  %v15413_v7 = vld [vmem:[%s19956_s9 + $0xc0] ss:$0 sps:$4 sm:$0xff]  }
 0x9e3   :  { %v6500_v62 = vrot.slane %v6482_v29, %v17835_v37  ;;  %v15414_v29 = vld [vmem:[%s19956_s9 + $0xc4] sm:$0xff]  }
 0x9e5   :  { %v6502_v15 = vadd.f32 %v6500_v62, %v6489_v16  ;;  %v6503_v42 = vadd.f32 %v6500_v62, %v6490_v30  ;;  %v6504_v27 = vadd.f32 %v6500_v62, %v6491_v61  ;;  %v6505_v28 = vadd.f32 %v6500_v62, %v6492_v44  ;;  %v15415_v16 = vld [vmem:[%s19956_s9 + $0xcc] sm:$0xff]   ;;  %v15416_v30 = vld [vmem:[%s19956_s9 + $0xd4] sm:$0xff]   ;;  %v15417_v61 = vld [vmem:[%s19956_s9 + $0xdc] ss:$0 sps:$4 sm:$0xff]  }
 0x9e6   :  { %v6506_v26 = vadd.f32 %v6500_v62, %v6493_v46  ;;  %v6507_v2 = vadd.f32 %v6500_v62, %v6494_v52  ;;  %v6508_v39 = vadd.f32 %v6500_v62, %v6495_v34  ;;  %v15418_v44 = vld [vmem:[%s19956_s9 + $0xe0] sm:$0xff]   ;;  %v15423_v46 = vld [vmem:[%s19959_s10 + $0x28] sm:$0xff]   ;;  %v15420_v34 = vld [vmem:[%s19956_s9 + $0xf0] sm:$0xff]  }
 0x9e7   :  { %vm6509_vm14 = vcmp.ge.f32.partialorder %v6502_v15, 0.0  ;;  %vm6510_vm15 = vcmp.ge.f32.partialorder %v6503_v42, 0.0  ;;  %vm6511_vm3 = vcmp.ge.f32.partialorder %v6504_v27, 0.0  ;;  %vm6512_vm5 = vcmp.ge.f32.partialorder %v6505_v28, 0.0  ;;  %v15419_v52 = vld [vmem:[%s19956_s9 + $0xe8] sm:$0xff]   ;;  %v15424_v62 = vld [vmem:[%s19959_s10 + $0x30] sm:$0xff]  }
 0x9e8   :  { %vm6513_vm6 = vcmp.ge.f32.partialorder %v6506_v26, 0.0  ;;  %vm6514_vm7 = vcmp.ge.f32.partialorder %v6507_v2, 0.0  ;;  %vm6515_vm8 = vcmp.ge.f32.partialorder %v6508_v39, 0.0  ;;  %v6516_v63 = vmul.f32 0.01, %v6502_v15 }
 0x9e9   :  { %v6517_v50 = vmul.f32 0.01, %v6503_v42  ;;  %v6518_v45 = vmul.f32 0.01, %v6504_v27  ;;  %v6519_v59 = vmul.f32 0.01, %v6505_v28 }
 0x9ea   :  { %v6520_v9 = vmul.f32 0.01, %v6506_v26  ;;  %v6521_v0 = vmul.f32 0.01, %v6507_v2  ;;  %v6522_v57 = vmul.f32 0.01, %v6508_v39  ;;  %v6523_v36 = vsel %vm6509_vm14, %v6502_v15, %v6516_v63 }
 0x9eb   :  { %v6524_v10 = vsel %vm6510_vm15, %v6503_v42, %v6517_v50  ;;  %v6525_v23 = vsel %vm6511_vm3, %v6504_v27, %v6518_v45  ;;  %v6526_v25 = vsel %vm6512_vm5, %v6505_v28, %v6519_v59  ;;  %v15421_v15 = vld [vmem:[%s19956_s9 + $0xf8] ss:$0 sps:$4 sm:$0xff]   ;;  %v15426_v27 = vld [vmem:[%s19959_s10] sm:$0xff]   ;;  %vm10090_vm5 = vcmask 195584  }
 0x9ec   :  { %v6527_v35 = vsel %vm6513_vm6, %v6506_v26, %v6520_v9  ;;  %v6528_v18 = vsel %vm6514_vm7, %v6507_v2, %v6521_v0  ;;  %v6529_v3 = vsel %vm6515_vm8, %v6508_v39, %v6522_v57  ;;  %v18622_v20 = vpack.c.bf16 %v6524_v10, %v6523_v36  ;;  %v15425_v42 = vld [vmem:[%s19959_s10 + $0x38] sm:$0xff]  }
 0x9ed   :  { %v18624_v40 = vpack.c.bf16 %v6526_v25, %v6525_v23  ;;  %v18626_v58 = vpack.c.bf16 %v6528_v18, %v6527_v35  ;;  %v18628_v8 = vpack.c.bf16 %v6529_v3, %v6529_v3 }
 0x9ee   :  { %13693 = vmatprep.subr.bf16.mxu1 %v18622_v20  ;;  %13757 = vmatprep.subr.bf16.mxu0 %v18622_v20 }
 0x9ef   :  { %13694 = vmatpush3.bf16.msra.mxu1 %v18622_v20  ;;  %13758 = vmatpush3.bf16.msra.mxu0 %v18622_v20  ;;  %v18636_v60 = vsel %vm249_vm1, %v18628_v8, 0 }
 0x9f0   :  { %13695 = vmatprep.subr.bf16.mxu1 %v18624_v40  ;;  %13759 = vmatprep.subr.bf16.mxu0 %v18624_v40 }
 0x9f3   :  { %13696 = vmatpush3.bf16.msra.mxu1 %v18624_v40  ;;  %13760 = vmatpush3.bf16.msra.mxu0 %v18624_v40 }
 0x9f4   :  { %13697 = vmatprep.subr.bf16.mxu1 %v18626_v58  ;;  %13761 = vmatprep.subr.bf16.mxu0 %v18626_v58 }
 0x9f7   :  { %13698 = vmatpush3.bf16.msra.mxu1 %v18626_v58  ;;  %13762 = vmatpush3.bf16.msra.mxu0 %v18626_v58 }
 0x9f8   :  { %14960 = vmatprep.subr.msk.bf16.mxu1 %vm249_vm1, %v18628_v8  ;;  %14962 = vmatprep.subr.msk.bf16.mxu0 %vm249_vm1, %v18628_v8 }
 0x9fb   :  { %13700 = vmatpush3.bf16.msra.mxu1 %v18636_v60  ;;  %13764 = vmatpush3.bf16.msra.mxu0 %v18636_v60 }
 0x9fc   :  { %13709 = vmatprep.subr.bf16.mxu1 %v18622_v20  ;;  %13789 = vmatprep.subr.bf16.mxu0 %v18622_v20 }
 0x9fe   :  { %13702 = vmatmul.mubr.msk.bf16.vlgmr.msra.gmra.mrb[168].mxu1 %vm6559_vm0, %v15387_v56  ;;  %13766 = vmatmul.mubr.msk.bf16.vlgmr.msra.gmra.mrb[176].mxu0 %vm6559_vm0, %v15389_v1 }
 0x9ff   :  { %13710 = vmatpush3.bf16.msra.mxu1 %v18622_v20  ;;  %13790 = vmatpush3.bf16.msra.mxu0 %v18622_v20 }
 0xa00   :  { %13711 = vmatprep.subr.bf16.mxu1 %v18624_v40  ;;  %13791 = vmatprep.subr.bf16.mxu0 %v18624_v40 }
 0xa01   :  { %13705 = vmatprep.mubr.msk.bf16.mxu1 %vm6559_vm0, %v15390_v51  ;;  %13769 = vmatprep.mubr.msk.bf16.mxu0 %vm6559_vm0, %v15392_v19 }
 0xa03   :  { %13712 = vmatpush3.bf16.msra.mxu1 %v18624_v40  ;;  %13792 = vmatpush3.bf16.msra.mxu0 %v18624_v40 }
 0xa04   :  { %13713 = vmatprep.subr.bf16.mxu1 %v18626_v58  ;;  %13793 = vmatprep.subr.bf16.mxu0 %v18626_v58 }
 0xa06   :  { %13706 = vmatmul.mubr.msk.bf16.gmra.mrb[172].mxu1 %vm6559_vm0, %v15391_v48  ;;  %13770 = vmatmul.mubr.msk.bf16.gmra.mrb[180].mxu0 %vm6559_vm0, %v15393_v5 }
 0xa07   :  { %13714 = vmatpush3.bf16.msra.mxu1 %v18626_v58  ;;  %13794 = vmatpush3.bf16.msra.mxu0 %v18626_v58 }
 0xa08   :  { %14961 = vmatprep.subr.msk.bf16.mxu1 %vm249_vm1, %v18628_v8  ;;  %14963 = vmatprep.subr.msk.bf16.mxu0 %vm249_vm1, %v18628_v8 }
 0xa09   :  { %13717 = vmatprep.mubr.msk.bf16.mxu1 %vm6559_vm0, %v15394_v54  ;;  %13797 = vmatprep.mubr.msk.bf16.mxu0 %vm6559_vm0, %v15396_v43 }
 0xa0b   :  { %13716 = vmatpush3.bf16.msra.mxu1 %v18636_v60  ;;  %13796 = vmatpush3.bf16.msra.mxu0 %v18636_v60 }
 0xa0c   :  { %13821 = vmatprep.subr.bf16.mxu0 %v18622_v20  ;;  %13725 = vmatprep.subr.bf16.mxu1 %v15422_v17 }
 0xa0e   :  { %13718 = vmatmul.mubr.msk.bf16.vlgmr.msra.gmra.mrb[176].mxu1 %vm6559_vm0, %v15395_v12  ;;  %13798 = vmatmul.mubr.msk.bf16.vlgmr.msra.gmra.mrb[184].mxu0 %vm6559_vm0, %v15397_v11 }
 0xa0f   :  { %13822 = vmatpush3.bf16.msra.mxu0 %v18622_v20  ;;  %13721 = vmatprep.mubr.msk.bf16.mxu1 %vm6559_vm0, %v15398_v55  ;;  %v15427_v55 = vld [vmem:[%s19959_s10 + $0x8] sm:$0xff]  }
 0xa10   :  { %13823 = vmatprep.subr.bf16.mxu0 %v18624_v40  ;;  %13801 = vmatprep.mubr.msk.bf16.mxu0 %vm6559_vm0, %v15400_v21 }
 0xa11   :  { %13726 = vmatpush3.bf16.msra.mxu1 %v15422_v17 }
 0xa12   :  { %13727 = vmatprep.subr.bf16.mxu1 %v15423_v46 }
 0xa13   :  { %13824 = vmatpush3.bf16.msra.mxu0 %v18624_v40 }
 0xa14   :  { %13825 = vmatprep.subr.bf16.mxu0 %v18626_v58 }
 0xa15   :  { %13728 = vmatpush3.bf16.msra.mxu1 %v15423_v46  ;;  %v15431_v46 = vld [vmem:[%s19959_s10 + $0x48] sm:$0xff]  }
 0xa16   :  { %13722 = vmatmul.mubr.msk.bf16.gmra.mrb[180].mxu1 %vm6559_vm0, %v15399_v49  ;;  %13802 = vmatmul.mubr.msk.bf16.gmra.mrb[188].mxu0 %vm6559_vm0, %v15401_v47 }
 0xa17   :  { %13826 = vmatpush3.bf16.msra.mxu0 %v18626_v58  ;;  %13829 = vmatprep.mubr.msk.bf16.mxu0 %vm6559_vm0, %v15402_v6  ;;  %v15428_v6 = vld [vmem:[%s19959_s10 + $0x10] sm:$0xff]  }
 0xa18   :  { %14964 = vmatprep.subr.msk.bf16.mxu0 %vm249_vm1, %v18628_v8  ;;  %13729 = vmatprep.subr.bf16.mxu1 %v15424_v62 }
 0xa19   :  { %13730 = vmatpush3.bf16.msra.mxu1 %v15424_v62 }
 0xa1a   :  { %13731 = vmatprep.subr.bf16.mxu1 %v15425_v42 }
 0xa1b   :  { %13828 = vmatpush3.bf16.msra.mxu0 %v18636_v60 }
 0xa1c   :  { %13853 = vmatprep.subr.bf16.mxu0 %v18622_v20 }
 0xa1d   :  { %13732 = vmatpush3.bf16.msra.mxu1 %v15425_v42 }
 0xa1e   :  { %13830 = vmatmul.mubr.msk.bf16.vlgmr.msra.gmra.mrb[192].mxu0 %vm6559_vm0, %v15403_v14  ;;  %13741 = vmatprep.subr.bf16.mxu1 %v15426_v27 }
 0xa1f   :  { %13854 = vmatpush3.bf16.msra.mxu0 %v18622_v20  ;;  %13833 = vmatprep.mubr.msk.bf16.mxu0 %vm6559_vm0, %v15404_v13 }
 0xa20   :  { %13855 = vmatprep.subr.bf16.mxu0 %v18624_v40 }
 0xa23   :  { %13856 = vmatpush3.bf16.msra.mxu0 %v18624_v40 }
 0xa24   :  { %13857 = vmatprep.subr.bf16.mxu0 %v18626_v58 }
 0xa26   :  { %13834 = vmatmul.mubr.msk.bf16.gmra.mrb[196].mxu0 %vm6559_vm0, %v15405_v24 }
 0xa27   :  { %13858 = vmatpush3.bf16.msra.mxu0 %v18626_v58  ;;  %13861 = vmatprep.mubr.msk.bf16.mxu0 %vm6559_vm0, %v15406_v22 }
 0xa28   :  { %14965 = vmatprep.subr.msk.bf16.mxu0 %vm249_vm1, %v18628_v8 }
 0xa2b   :  { %13860 = vmatpush3.bf16.msra.mxu0 %v18636_v60 }
 0xa2c   :  { %13885 = vmatprep.subr.bf16.mxu0 %v18622_v20 }
 0xa2e   :  { %13862 = vmatmul.mubr.msk.bf16.vlgmr.msra.gmra.mrb[200].mxu0 %vm6559_vm0, %v15407_v33 }
 0xa2f   :  { %13886 = vmatpush3.bf16.msra.mxu0 %v18622_v20  ;;  %13865 = vmatprep.mubr.msk.bf16.mxu0 %vm6559_vm0, %v15408_v31 }
 0xa30   :  { %13887 = vmatprep.subr.bf16.mxu0 %v18624_v40 }
 0xa33   :  { %13888 = vmatpush3.bf16.msra.mxu0 %v18624_v40 }
 0xa34   :  { %13889 = vmatprep.subr.bf16.mxu0 %v18626_v58 }
 0xa36   :  { %13866 = vmatmul.mubr.msk.bf16.gmra.mrb[204].mxu0 %vm6559_vm0, %v15409_v53 }
 0xa37   :  { %13890 = vmatpush3.bf16.msra.mxu0 %v18626_v58  ;;  %13893 = vmatprep.mubr.msk.bf16.mxu0 %vm6559_vm0, %v15410_v4 }
 0xa38   :  { %14966 = vmatprep.subr.msk.bf16.mxu0 %vm249_vm1, %v18628_v8 }
 0xa3b   :  { %13892 = vmatpush3.bf16.msra.mxu0 %v18636_v60 }
 0xa3c   :  { %13917 = vmatprep.subr.bf16.mxu0 %v18622_v20 }
 0xa3e   :  { %13894 = vmatmul.mubr.msk.bf16.vlgmr.msra.gmra.mrb[208].mxu0 %vm6559_vm0, %v15411_v32  ;;  %v15429_v32 = vld [vmem:[%s19959_s10 + $0x18] sm:$0xff]  }
 0xa3f   :  { %13918 = vmatpush3.bf16.msra.mxu0 %v18622_v20  ;;  %13897 = vmatprep.mubr.msk.bf16.mxu0 %vm6559_vm0, %v15412_v38 }
 0xa40   :  { %13919 = vmatprep.subr.bf16.mxu0 %v18624_v40 }
 0xa43   :  { %13920 = vmatpush3.bf16.msra.mxu0 %v18624_v40 }
 0xa44   :  { %13921 = vmatprep.subr.bf16.mxu0 %v18626_v58 }
 0xa46   :  { %13898 = vmatmul.mubr.msk.bf16.gmra.mrb[212].mxu0 %vm6559_vm0, %v15413_v7  ;;  %v15430_v7 = vld [vmem:[%s19959_s10 + $0x40] sm:$0xff]  }
 0xa47   :  { %13922 = vmatpush3.bf16.msra.mxu0 %v18626_v58  ;;  %13925 = vmatprep.mubr.msk.bf16.mxu0 %vm6559_vm0, %v15414_v29 }
 0xa48   :  { %14967 = vmatprep.subr.msk.bf16.mxu0 %vm249_vm1, %v18628_v8 }
 0xa4b   :  { %13924 = vmatpush3.bf16.msra.mxu0 %v18636_v60 }
 0xa4c   :  { %13949 = vmatprep.subr.bf16.mxu0 %v18622_v20 }
 0xa4e   :  { %13926 = vmatmul.mubr.msk.bf16.vlgmr.msra.gmra.mrb[216].mxu0 %vm6559_vm0, %v15415_v16 }
 0xa4f   :  { %13950 = vmatpush3.bf16.msra.mxu0 %v18622_v20  ;;  %13929 = vmatprep.mubr.msk.bf16.mxu0 %vm6559_vm0, %v15416_v30 }
 0xa50   :  { %13951 = vmatprep.subr.bf16.mxu0 %v18624_v40 }
 0xa53   :  { %13952 = vmatpush3.bf16.msra.mxu0 %v18624_v40 }
 0xa54   :  { %13953 = vmatprep.subr.bf16.mxu0 %v18626_v58 }
 0xa56   :  { %13930 = vmatmul.mubr.msk.bf16.gmra.mrb[220].mxu0 %vm6559_vm0, %v15417_v61 }
 0xa57   :  { %13954 = vmatpush3.bf16.msra.mxu0 %v18626_v58  ;;  %13957 = vmatprep.mubr.msk.bf16.mxu0 %vm6559_vm0, %v15418_v44 }
 0xa58   :  { %14968 = vmatprep.subr.msk.bf16.mxu0 %vm249_vm1, %v18628_v8 }
 0xa5b   :  { %13956 = vmatpush3.bf16.msra.mxu0 %v18636_v60 }
 0xa5e   :  { %13958 = vmatmul.mubr.msk.bf16.vlgmr.msra.gmra.mrb[224].mxu0 %vm6559_vm0, %v15419_v52 }
 0xa5f   :  { %13961 = vmatprep.mubr.msk.bf16.mxu0 %vm6559_vm0, %v15420_v34  ;;  %v15432_v34 = vld [vmem:[%s19959_s10 + $0x50] sm:$0xff]  }
 0xa66   :  { %13962 = vmatmul.mubr.msk.bf16.gmra.mrb[228].mxu0 %vm6559_vm0, %v15421_v15 }
 0xad1   :  { %v18866_v28 = vpop.f32.mrb[168].mxu1  ;;  %v18868_v26 = vpop.f32.mrb[176].mxu0 }
 0xad2   :  { %v6609_v2 = vpop.f32.mrb[169].mxu1  ;;  %v18870_v39 = vpop.f32.mrb[177].mxu0 }
 0xad3   :  { %v18872_v63 = vpop.f32.mrb[170].mxu1  ;;  %v18874_v50 = vpop.f32.mrb[178].mxu0 }
 0xad4   :  { %v6640_v45 = vpack.c.bf16 %v18872_v63, %v18866_v28  ;;  %v6612_v59 = vpop.f32.mrb[171].mxu1  ;;  %v7068_v9 = vpack.c.bf16 %v18874_v50, %v18868_v26  ;;  %v18880_v0 = vpop.f32.mrb[179].mxu0 }
 0xad5   :  { %v6639_v57 = vpack.c.bf16 %v6612_v59, %v6609_v2  ;;  %v7067_v36 = vpack.c.bf16 %v18880_v0, %v18870_v39  ;;  %v15433_v2 = vld [vmem:[%s19959_s10 + $0x58] sm:$0xff]   ;;  %v15435_v0 = vld [vmem:[%s19959_s10 + $0x68] sm:$0xff]  }
 0xad9   :  { %v18884_v10 = vpop.f32.mrb[172].mxu1  ;;  %v18886_v23 = vpop.f32.mrb[180].mxu0 }
 0xada   :  { %v6625_v25 = vpop.f32.mrb[173].mxu1  ;;  %v18888_v35 = vpop.f32.mrb[181].mxu0  ;;  %v6642_v28 = vpack.c.bf16 %v18884_v10, %v18884_v10  ;;  %v7070_v50 = vpack.c.bf16 %v18886_v23, %v18886_v23  ;;  %v15438_v23 = vld [vmem:[%s19959_s10 + $0x80] sm:$0xff]  }
 0xadb   :  { %v13708_v18 = vpop.f32.mrb[174].mxu1  ;;  %v13772_v3 = vpop.f32.mrb[182].mxu0 }
 0xadc   :  { %v6628_v20 = vpop.f32.mrb[175].mxu1  ;;  %v18890_v40 = vpop.f32.mrb[183].mxu0  ;;  %v15436_v18 = vld [vmem:[%s19959_s10 + $0x70] sm:$0xff]  }
 0xadd   :  { %v6641_v58 = vpack.c.bf16 %v6628_v20, %v6625_v25  ;;  %v7069_v8 = vpack.c.bf16 %v18890_v40, %v18888_v35 }
 0xae1   :  { %v13719_v60 = vpop.f32.mrb[176].mxu1  ;;  %v18894_v56 = vpop.f32.mrb[184].mxu0 }
 0xae2   :  { %v6723_v1 = vpop.f32.mrb[177].mxu1  ;;  %v18896_v51 = vpop.f32.mrb[185].mxu0 }
 0xae3   :  { %v13720_v19 = vpop.f32.mrb[178].mxu1  ;;  %v18898_v48 = vpop.f32.mrb[186].mxu0 }
 0xae4   :  { %v6754_v5 = vpack.c.bf16 %v13720_v19, %v13719_v60  ;;  %v6726_v54 = vpop.f32.mrb[179].mxu1  ;;  %v7289_v43 = vpack.c.bf16 %v18898_v48, %v18894_v56  ;;  %v18902_v17 = vpop.f32.mrb[187].mxu0  ;;  %v15439_v19 = vld [vmem:[%s19959_s10 + $0x88] sm:$0xff]  }
 0xae5   :  { %v6753_v12 = vpack.c.bf16 %v6726_v54, %v6723_v1  ;;  %v7288_v11 = vpack.c.bf16 %v18902_v17, %v18896_v51  ;;  %v15440_v54 = vld [vmem:[%s19959_s10 + $0x90] sm:$0xff]  }
 0xae7   :  { %13733 = vmatprep.mubr.msk.bf16.mxu1 %vm6425_vm4, %v6753_v12 }
 0xae8   :  { %13734 = vmatmul.mubr.msk.bf16.vlgmr.msra.gmra.mrb[184].mxu1 %vm6425_vm4, %v6754_v5 }
 0xae9   :  { %v13723_v21 = vpop.f32.mrb[180].mxu1  ;;  %13742 = vmatpush3.bf16.msra.mxu1 %v15426_v27  ;;  %v18911_v49 = vpop.f32.mrb[188].mxu0 }
 0xaea   :  { %v6739_v47 = vpop.f32.mrb[181].mxu1  ;;  %13743 = vmatprep.subr.bf16.mxu1 %v15427_v55  ;;  %v18916_v14 = vpop.f32.mrb[189].mxu0  ;;  %v6756_v4 = vpack.c.bf16 %v13723_v21, %v13723_v21  ;;  %v7291_v48 = vpack.c.bf16 %v18911_v49, %v18911_v49  ;;  %v15442_v21 = vld [vmem:[%s19959_s10 + $0xa0] sm:$0xff]  }
 0xaeb   :  { %v13724_v13 = vpop.f32.mrb[182].mxu1  ;;  %v13804_v24 = vpop.f32.mrb[190].mxu0 }
 0xaec   :  { %v6742_v22 = vpop.f32.mrb[183].mxu1  ;;  %v18918_v33 = vpop.f32.mrb[191].mxu0  ;;  %v15443_v24 = vld [vmem:[%s19959_s10 + $0xa8] sm:$0xff]  }
 0xaed   :  { %v6755_v31 = vpack.c.bf16 %v6742_v22, %v6739_v47  ;;  %13744 = vmatpush3.bf16.msra.mxu1 %v15427_v55  ;;  %v7290_v53 = vpack.c.bf16 %v18918_v33, %v18916_v14  ;;  %v15444_v33 = vld [vmem:[%s19959_s10 + $0xb0] sm:$0xff]  }
 0xaee   :  { %13745 = vmatprep.subr.bf16.mxu1 %v15428_v6 }
 0xaef   :  { %13737 = vmatprep.mubr.msk.bf16.mxu1 %vm6425_vm4, %v6755_v31 }
 0xaf0   :  { %13738 = vmatmul.mubr.msk.bf16.gmra.mrb[188].mxu1 %vm6425_vm4, %v6756_v4 }
 0xaf1   :  { %13746 = vmatpush3.bf16.msra.mxu1 %v15428_v6  ;;  %13749 = vmatprep.mubr.msk.bf16.mxu1 %vm6425_vm4, %v6639_v57  ;;  %v18928_v38 = vpop.f32.mrb[192].mxu0 }
 0xaf2   :  { %13747 = vmatprep.subr.bf16.mxu1 %v15429_v32  ;;  %v18933_v29 = vpop.f32.mrb[193].mxu0 }
 0xaf3   :  { %v18935_v16 = vpop.f32.mrb[194].mxu0 }
 0xaf4   :  { %v7510_v30 = vpack.c.bf16 %v18935_v16, %v18928_v38  ;;  %v18939_v61 = vpop.f32.mrb[195].mxu0  ;;  %v15446_v16 = vld [vmem:[%s19959_s10 + $0xc0] sm:$0xff]  }
 0xaf5   :  { %13748 = vmatpush3.bf16.msra.mxu1 %v15429_v32  ;;  %v7509_v44 = vpack.c.bf16 %v18939_v61, %v18933_v29 }
 0xaf6   :  { %13773 = vmatprep.subr.bf16.mxu1 %v15430_v7 }
 0xaf8   :  { %13750 = vmatmul.mubr.msk.bf16.vlgmr.msra.gmra.mrb[184].mxu1 %vm6425_vm4, %v6640_v45  ;;  %v15434_v45 = vld [vmem:[%s19959_s10 + $0x60] sm:$0xff]  }
 0xaf9   :  { %13774 = vmatpush3.bf16.msra.mxu1 %v15430_v7  ;;  %13753 = vmatprep.mubr.msk.bf16.mxu1 %vm6425_vm4, %v6641_v58  ;;  %v18951_v52 = vpop.f32.mrb[196].mxu0  ;;  %v15445_v7 = vld [vmem:[%s19959_s10 + $0xb8] sm:$0xff]  }
 0xafa   :  { %13775 = vmatprep.subr.bf16.mxu1 %v15431_v46  ;;  %v18956_v62 = vpop.f32.mrb[197].mxu0  ;;  %v7512_v38 = vpack.c.bf16 %v18951_v52, %v18951_v52 }
 0xafb   :  { %v13836_v15 = vpop.f32.mrb[198].mxu0 }
 0xafc   :  { %v18958_v42 = vpop.f32.mrb[199].mxu0  ;;  %v15448_v15 = vld [vmem:[%s19959_s10 + $0xd0] sm:$0xff]  }
 0xafd   :  { %13776 = vmatpush3.bf16.msra.mxu1 %v15431_v46  ;;  %v7511_v27 = vpack.c.bf16 %v18958_v42, %v18956_v62 }
 0xafe   :  { %13777 = vmatprep.subr.bf16.mxu1 %v15432_v34 }
 0xb00   :  { %13754 = vmatmul.mubr.msk.bf16.gmra.mrb[188].mxu1 %vm6425_vm4, %v6642_v28 }
 0xb01   :  { %13778 = vmatpush3.bf16.msra.mxu1 %v15432_v34  ;;  %13781 = vmatprep.mubr.msk.bf16.mxu1 %vm6425_vm4, %v7067_v36  ;;  %v18972_v63 = vpop.f32.mrb[200].mxu0  ;;  %v15447_v34 = vld [vmem:[%s19959_s10 + $0xc8] sm:$0xff]  }
 0xb02   :  { %13779 = vmatprep.subr.bf16.mxu1 %v15433_v2  ;;  %v18977_v59 = vpop.f32.mrb[201].mxu0 }
 0xb03   :  { %v18979_v57 = vpop.f32.mrb[202].mxu0 }
 0xb04   :  { %v7731_v10 = vpack.c.bf16 %v18979_v57, %v18972_v63  ;;  %v18983_v25 = vpop.f32.mrb[203].mxu0  ;;  %v15451_v57 = vld [vmem:[%s19959_s10 + $0xe8] sm:$0xff]  }
 0xb05   :  { %13780 = vmatpush3.bf16.msra.mxu1 %v15433_v2  ;;  %v7730_v39 = vpack.c.bf16 %v18983_v25, %v18977_v59  ;;  %v15450_v59 = vld [vmem:[%s19959_s10 + $0xe0] sm:$0xff]  }
 0xb06   :  { %13805 = vmatprep.subr.bf16.mxu1 %v15434_v45 }
 0xb08   :  { %13782 = vmatmul.mubr.msk.bf16.vlgmr.msra.gmra.mrb[184].mxu1 %vm6425_vm4, %v7068_v9  ;;  %v15437_v9 = vld [vmem:[%s19959_s10 + $0x78] sm:$0xff]  }
 0xb09   :  { %13806 = vmatpush3.bf16.msra.mxu1 %v15434_v45  ;;  %13785 = vmatprep.mubr.msk.bf16.mxu1 %vm6425_vm4, %v7069_v8  ;;  %v18998_v36 = vpop.f32.mrb[204].mxu0  ;;  %v15449_v45 = vld [vmem:[%s19959_s10 + $0xd8] sm:$0xff]  }
 0xb0a   :  { %13807 = vmatprep.subr.bf16.mxu1 %v15435_v0  ;;  %v19003_v3 = vpop.f32.mrb[205].mxu0  ;;  %v7733_v63 = vpack.c.bf16 %v18998_v36, %v18998_v36  ;;  %v15455_v36 = vld [vmem:[%s19959_s10 + $0x108] sm:$0xff]  }
 0xb0b   :  { %v13868_v20 = vpop.f32.mrb[206].mxu0 }
 0xb0c   :  { %v19005_v58 = vpop.f32.mrb[207].mxu0  ;;  %v15457_v20 = vld [vmem:[%s19959_s10 + $0x118] sm:$0xff]  }
 0xb0d   :  { %13808 = vmatpush3.bf16.msra.mxu1 %v15435_v0  ;;  %v7732_v26 = vpack.c.bf16 %v19005_v58, %v19003_v3  ;;  %v15454_v0 = vld [vmem:[%s19959_s10 + $0x100] sm:$0xff]  }
 0xb0e   :  { %13809 = vmatprep.subr.bf16.mxu1 %v15436_v18 }
 0xb10   :  { %13786 = vmatmul.mubr.msk.bf16.gmra.mrb[188].mxu1 %vm6425_vm4, %v7070_v50 }
 0xb11   :  { %13810 = vmatpush3.bf16.msra.mxu1 %v15436_v18  ;;  %13813 = vmatprep.mubr.msk.bf16.mxu1 %vm6425_vm4, %v7288_v11  ;;  %v19019_v35 = vpop.f32.mrb[208].mxu0  ;;  %v15456_v18 = vld [vmem:[%s19959_s10 + $0x110] sm:$0xff]  }
 0xb12   :  { %13811 = vmatprep.subr.bf16.mxu1 %v15437_v9  ;;  %v19024_v40 = vpop.f32.mrb[209].mxu0 }
 0xb13   :  { %v19026_v8 = vpop.f32.mrb[210].mxu0 }
 0xb14   :  { %v7952_v60 = vpack.c.bf16 %v19026_v8, %v19019_v35  ;;  %v19030_v1 = vpop.f32.mrb[211].mxu0 }
 0xb15   :  { %13812 = vmatpush3.bf16.msra.mxu1 %v15437_v9  ;;  %v7951_v51 = vpack.c.bf16 %v19030_v1, %v19024_v40 }
 0xb16   :  { %13837 = vmatprep.subr.bf16.mxu1 %v15438_v23 }
 0xb18   :  { %13814 = vmatmul.mubr.msk.bf16.vlgmr.msra.gmra.mrb[184].mxu1 %vm6425_vm4, %v7289_v43  ;;  %v15441_v43 = vld [vmem:[%s19959_s10 + $0x98] sm:$0xff]  }
 0xb19   :  { %13838 = vmatpush3.bf16.msra.mxu1 %v15438_v23  ;;  %13817 = vmatprep.mubr.msk.bf16.mxu1 %vm6425_vm4, %v7290_v53  ;;  %v19045_v5 = vpop.f32.mrb[212].mxu0 }
 0xb1a   :  { %13839 = vmatprep.subr.bf16.mxu1 %v15439_v19  ;;  %v19050_v17 = vpop.f32.mrb[213].mxu0  ;;  %v7954_v25 = vpack.c.bf16 %v19045_v5, %v19045_v5 }
 0xb1b   :  { %v13900_v12 = vpop.f32.mrb[214].mxu0 }
 0xb1c   :  { %v19052_v11 = vpop.f32.mrb[215].mxu0 }
 0xb1d   :  { %13840 = vmatpush3.bf16.msra.mxu1 %v15439_v19  ;;  %v7953_v56 = vpack.c.bf16 %v19052_v11, %v19050_v17 }
 0xb1e   :  { %13841 = vmatprep.subr.bf16.mxu1 %v15440_v54 }
 0xb20   :  { %13818 = vmatmul.mubr.msk.bf16.gmra.mrb[188].mxu1 %vm6425_vm4, %v7291_v48 }
 0xb21   :  { %13842 = vmatpush3.bf16.msra.mxu1 %v15440_v54  ;;  %13845 = vmatprep.mubr.msk.bf16.mxu1 %vm6425_vm4, %v7509_v44  ;;  %v19066_v55 = vpop.f32.mrb[216].mxu0 }
 0xb22   :  { %13843 = vmatprep.subr.bf16.mxu1 %v15441_v43  ;;  %v19071_v49 = vpop.f32.mrb[217].mxu0 }
 0xb23   :  { %v19073_v47 = vpop.f32.mrb[218].mxu0 }
 0xb24   :  { %v8173_v6 = vpack.c.bf16 %v19073_v47, %v19066_v55  ;;  %v19077_v14 = vpop.f32.mrb[219].mxu0 }
 0xb25   :  { %13844 = vmatpush3.bf16.msra.mxu1 %v15441_v43  ;;  %v8172_v13 = vpack.c.bf16 %v19077_v14, %v19071_v49 }
 0xb26   :  { %13869 = vmatprep.subr.bf16.mxu1 %v15442_v21 }
 0xb28   :  { %13846 = vmatmul.mubr.msk.bf16.vlgmr.msra.gmra.mrb[184].mxu1 %vm6425_vm4, %v7510_v30 }
 0xb29   :  { %13870 = vmatpush3.bf16.msra.mxu1 %v15442_v21  ;;  %13849 = vmatprep.mubr.msk.bf16.mxu1 %vm6425_vm4, %v7511_v27  ;;  %v19092_v22 = vpop.f32.mrb[220].mxu0 }
 0xb2a   :  { %13871 = vmatprep.subr.bf16.mxu1 %v15443_v24  ;;  %v19097_v31 = vpop.f32.mrb[221].mxu0  ;;  %v8175_v3 = vpack.c.bf16 %v19092_v22, %v19092_v22 }
 0xb2b   :  { %v13932_v53 = vpop.f32.mrb[222].mxu0 }
 0xb2c   :  { %v8161_v4 = vpop.f32.mrb[223].mxu0 }
 0xb2d   :  { %13872 = vmatpush3.bf16.msra.mxu1 %v15443_v24  ;;  %v8174_v32 = vpack.c.bf16 %v8161_v4, %v19097_v31 }
 0xb2e   :  { %13873 = vmatprep.subr.bf16.mxu1 %v15444_v33 }
 0xb30   :  { %13850 = vmatmul.mubr.msk.bf16.gmra.mrb[188].mxu1 %vm6425_vm4, %v7512_v38 }
 0xb31   :  { %13874 = vmatpush3.bf16.msra.mxu1 %v15444_v33  ;;  %13877 = vmatprep.mubr.msk.bf16.mxu1 %vm6425_vm4, %v7730_v39  ;;  %v19110_v29 = vpop.f32.mrb[224].mxu0  ;;  %v15453_v39 = vld [vmem:[%s19959_s10 + $0xf8] sm:$0xff]  }
 0xb32   :  { %13875 = vmatprep.subr.bf16.mxu1 %v15445_v7  ;;  %v8363_v30 = vpop.f32.mrb[225].mxu0 }
 0xb33   :  { %v13960_v61 = vpop.f32.mrb[226].mxu0 }
 0xb34   :  { %v8394_v44 = vpack.c.bf16 %v13960_v61, %v19110_v29  ;;  %v8366_v46 = vpop.f32.mrb[227].mxu0 }
 0xb35   :  { %13876 = vmatpush3.bf16.msra.mxu1 %v15445_v7  ;;  %v8393_v52 = vpack.c.bf16 %v8366_v46, %v8363_v30 }
 0xb36   :  { %13901 = vmatprep.subr.bf16.mxu1 %v15446_v16 }
 0xb38   :  { %13878 = vmatmul.mubr.msk.bf16.vlgmr.msra.gmra.mrb[184].mxu1 %vm6425_vm4, %v7731_v10  ;;  %v15452_v10 = vld [vmem:[%s19959_s10 + $0xf0] sm:$0xff]  }
 0xb39   :  { %13902 = vmatpush3.bf16.msra.mxu1 %v15446_v16  ;;  %13881 = vmatprep.mubr.msk.bf16.mxu1 %vm6425_vm4, %v7732_v26  ;;  %v13963_v62 = vpop.f32.mrb[228].mxu0  ;;  %v15458_v26 = vld [vmem:[%s19960_s13] sm:$0xff]  }
 0xb3a   :  { %13903 = vmatprep.subr.bf16.mxu1 %v15447_v34  ;;  %v8379_v42 = vpop.f32.mrb[229].mxu0  ;;  %v8396_v58 = vpack.c.bf16 %v13963_v62, %v13963_v62  ;;  %13989 = vmatprep.mubr.msk.bf16.mxu0 %vm6559_vm0, %v15458_v26 }
 0xb3b   :  { %v13964_v27 = vpop.f32.mrb[230].mxu0 }
 0xb3c   :  { %v8382_v28 = vpop.f32.mrb[231].mxu0 }
 0xb3d   :  { %13904 = vmatpush3.bf16.msra.mxu1 %v15447_v34  ;;  %v8395_v2 = vpack.c.bf16 %v8382_v28, %v8379_v42 }
 0xb3e   :  { %13905 = vmatprep.subr.bf16.mxu1 %v15448_v15 }
 0xb40   :  { %13882 = vmatmul.mubr.msk.bf16.gmra.mrb[188].mxu1 %vm6425_vm4, %v7733_v63 }
 0xb41   :  { %13906 = vmatpush3.bf16.msra.mxu1 %v15448_v15  ;;  %13909 = vmatprep.mubr.msk.bf16.mxu1 %vm6425_vm4, %v7951_v51 }
 0xb42   :  { %13907 = vmatprep.subr.bf16.mxu1 %v15449_v45 }
 0xb45   :  { %13908 = vmatpush3.bf16.msra.mxu1 %v15449_v45 }
 0xb46   :  { %13933 = vmatprep.subr.bf16.mxu1 %v15450_v59 }
 0xb48   :  { %13910 = vmatmul.mubr.msk.bf16.vlgmr.msra.gmra.mrb[184].mxu1 %vm6425_vm4, %v7952_v60 }
 0xb49   :  { %13934 = vmatpush3.bf16.msra.mxu1 %v15450_v59  ;;  %13913 = vmatprep.mubr.msk.bf16.mxu1 %vm6425_vm4, %v7953_v56 }
 0xb4a   :  { %13935 = vmatprep.subr.bf16.mxu1 %v15451_v57 }
 0xb4d   :  { %13936 = vmatpush3.bf16.msra.mxu1 %v15451_v57 }
 0xb4e   :  { %13937 = vmatprep.subr.bf16.mxu1 %v15452_v10 }
 0xb50   :  { %13914 = vmatmul.mubr.msk.bf16.gmra.mrb[188].mxu1 %vm6425_vm4, %v7954_v25 }
 0xb51   :  { %13938 = vmatpush3.bf16.msra.mxu1 %v15452_v10  ;;  %13941 = vmatprep.mubr.msk.bf16.mxu1 %vm6425_vm4, %v8172_v13 }
 0xb52   :  { %13939 = vmatprep.subr.bf16.mxu1 %v15453_v39 }
 0xb55   :  { %13940 = vmatpush3.bf16.msra.mxu1 %v15453_v39 }
 0xb56   :  { %13965 = vmatprep.subr.bf16.mxu1 %v15454_v0 }
 0xb58   :  { %13942 = vmatmul.mubr.msk.bf16.vlgmr.msra.gmra.mrb[184].mxu1 %vm6425_vm4, %v8173_v6 }
 0xb59   :  { %13966 = vmatpush3.bf16.msra.mxu1 %v15454_v0  ;;  %13945 = vmatprep.mubr.msk.bf16.mxu1 %vm6425_vm4, %v8174_v32 }
 0xb5a   :  { %13967 = vmatprep.subr.bf16.mxu1 %v15455_v36 }
 0xb5d   :  { %13968 = vmatpush3.bf16.msra.mxu1 %v15455_v36 }
 0xb5e   :  { %13969 = vmatprep.subr.bf16.mxu1 %v15456_v18 }
 0xb60   :  { %13946 = vmatmul.mubr.msk.bf16.gmra.mrb[188].mxu1 %vm6425_vm4, %v8175_v3 }
 0xb61   :  { %13970 = vmatpush3.bf16.msra.mxu1 %v15456_v18  ;;  %13973 = vmatprep.mubr.msk.bf16.mxu1 %vm6425_vm4, %v8393_v52 }
 0xb62   :  { %13971 = vmatprep.subr.bf16.mxu1 %v15457_v20 }
 0xb65   :  { %13972 = vmatpush3.bf16.msra.mxu1 %v15457_v20  ;;  %v8562_v20 = vld [vmem:[%s19961_s11] sm:$0x1] }
 0xb68   :  { %13974 = vmatmul.mubr.msk.bf16.vlgmr.msra.gmra.mrb[184].mxu1 %vm6425_vm4, %v8394_v44 }
 0xb69   :  { %13977 = vmatprep.mubr.msk.bf16.mxu1 %vm6425_vm4, %v8395_v2 }
 0xb70   :  { %13978 = vmatmul.mubr.msk.bf16.gmra.mrb[188].mxu1 %vm6425_vm4, %v8396_v58 }
 0xc3b   :  { %v19195_v50 = vpop.f32.mrb[184].mxu1 }
 0xc3c   :  { %v19197_v9 = vpop.f32.mrb[185].mxu1  ;;  %v8534_v8 = vmul.f32 %v19195_v50, %v19195_v50  ;;  %v8515_v5 = vsel %vm6425_vm4, %v19195_v50, 0.0 }
 0xc3d   :  { %v8532_v35 = vmul.f32 %v19197_v9, %v19197_v9  ;;  %v19201_v23 = vpop.f32.mrb[186].mxu1  ;;  %v8512_v60 = vsel %vm6425_vm4, %v19197_v9, 0.0 }
 0xc3e   :  { %v19203_v40 = vpop.f32.mrb[187].mxu1  ;;  %v8535_v17 = vmul.f32 %v19201_v23, %v19201_v23  ;;  %v8542_v48 = vsel %vm6425_vm4, %v8534_v8, 0.0  ;;  %v8517_v43 = vsel %vm6425_vm4, %v19201_v23, 0.0 }
 0xc3f   :  { %v8513_v1 = vsel %vm6425_vm4, %v19203_v40, 0.0  ;;  %v8533_v51 = vmul.f32 %v19203_v40, %v19203_v40  ;;  %v8539_v54 = vsel %vm6425_vm4, %v8532_v35, 0.0  ;;  %v8566_v35 = vld [vmem:[%s19962_s12] sm:$0x1] }
 0xc40   :  { %v8514_v19 = vadd.f32 %v8513_v1, %v8512_v60  ;;  %v8544_v6 = vsel %vm6425_vm4, %v8535_v17, 0.0 }
 0xc41   :  { %v8540_v12 = vsel %vm6425_vm4, %v8533_v51, 0.0 }
 0xc42   :  { %v8516_v11 = vadd.f32 %v8515_v5, %v8514_v19  ;;  %v8541_v56 = vadd.f32 %v8540_v12, %v8539_v54 }
 0xc43   :  { %v13979_v55 = vpop.f32.mrb[188].mxu1 }
 0xc44   :  { %v8543_v21 = vadd.f32 %v8542_v48, %v8541_v56  ;;  %v8491_v49 = vpop.f32.mrb[189].mxu1  ;;  %v8518_v47 = vadd.f32 %v8517_v43, %v8516_v11  ;;  %v8538_v53 = vmul.f32 %v13979_v55, %v13979_v55  ;;  %v8523_v16 = vsel %vm6425_vm4, %v13979_v55, 0.0 }
 0xc45   :  { %v8519_v14 = vsel %vm6425_vm4, %v8491_v49, 0.0  ;;  %v8536_v13 = vmul.f32 %v8491_v49, %v8491_v49  ;;  %v13980_v24 = vpop.f32.mrb[190].mxu1 }
 0xc46   :  { %v8520_v22 = vadd.f32 %v8519_v14, %v8518_v47  ;;  %v8545_v33 = vadd.f32 %v8544_v6, %v8543_v21  ;;  %v8494_v31 = vpop.f32.mrb[191].mxu1  ;;  %v8550_v46 = vsel %vm6425_vm4, %v8538_v53, 0.0 }
 0xc47   :  { %v8546_v4 = vsel %vm6425_vm4, %v8536_v13, 0.0  ;;  %v8521_v32 = vsel %vm6425_vm4, %v8494_v31, 0.0  ;;  %v8537_v38 = vmul.f32 %v8494_v31, %v8494_v31 }
 0xc48   :  { %v8547_v7 = vadd.f32 %v8546_v4, %v8545_v33  ;;  %v8522_v29 = vadd.f32 %v8521_v32, %v8520_v22 }
 0xc49   :  { %v8548_v30 = vsel %vm6425_vm4, %v8537_v38, 0.0 }
 0xc4a   :  { %v8524_v61 = vadd.f32 %v8523_v16, %v8522_v29  ;;  %v8549_v44 = vadd.f32 %v8548_v30, %v8547_v7 }
 0xc4c   :  { %v8525_v52 = vrot.slane %v8524_v61, 4  ;;  %v8551_v34 = vadd.f32 %v8550_v46, %v8549_v44  ;;  %v15459_v44 = vld [vmem:[%s19960_s13 + $0x8] ss:$0 sps:$4 sm:$0xff]   ;;  %v15460_v46 = vld [vmem:[%s19960_s13 + $0xc] sm:$0xff]  }
 0xc4e   :  { %v8526_v62 = vadd.f32 %v8525_v52, %v8524_v61  ;;  %v8552_v15 = vrot.slane %v8551_v34, 4  ;;  %v15476_v52 = vld [vmem:[%s19963_s14 + $0x20] sm:$0xff]  }
 0xc4f   :  { %14005 = vmatprep.subr.bf16.mxu1 %v15476_v52 }
 0xc50   :  { %v8527_v42 = vrot.slane %v8526_v62, 2  ;;  %v8553_v27 = vadd.f32 %v8552_v15, %v8551_v34  ;;  %v15477_v34 = vld [vmem:[%s19963_s14 + $0x28] sm:$0xff]   ;;  %14006 = vmatpush3.bf16.msra.mxu1 %v15476_v52  ;;  %v15462_v15 = vld [vmem:[%s19960_s13 + $0x18] sm:$0xff]   ;;  %v15494_v52 = vld [vmem:[%s19963_s14 + $0x90] sm:$0xff]  }
 0xc51   :  { %14007 = vmatprep.subr.bf16.mxu1 %v15477_v34 }
 0xc52   :  { %v8528_v28 = vadd.f32 %v8527_v42, %v8526_v62  ;;  %v8554_v2 = vrot.slane %v8553_v27, 2  ;;  %v15461_v62 = vld [vmem:[%s19960_s13 + $0x14] ss:$0 sps:$4 sm:$0xff]   ;;  %v15463_v42 = vld [vmem:[%s19960_s13 + $0x20] ss:$0 sps:$4 sm:$0xff]  }
 0xc54   :  { %v8529_v63 = vrot.slane %v8528_v28, 1  ;;  %v8555_v45 = vadd.f32 %v8554_v2, %v8553_v27  ;;  %14008 = vmatpush3.bf16.msra.mxu1 %v15477_v34  ;;  %v15464_v27 = vld [vmem:[%s19960_s13 + $0x24] sm:$0xff]   ;;  %v15466_v2 = vld [vmem:[%s19960_s13 + $0x30] sm:$0xff]   ;;  %v15495_v34 = vld [vmem:[%s19963_s14 + $0x98] sm:$0xff]  }
 0xc56   :  { %v8530_v59 = vadd.f32 %v8529_v63, %v8528_v28  ;;  %v8556_v57 = vrot.slane %v8555_v45, 1  ;;  %v15465_v28 = vld [vmem:[%s19960_s13 + $0x2c] ss:$0 sps:$4 sm:$0xff]   ;;  %v15467_v63 = vld [vmem:[%s19960_s13 + $0x38] ss:$0 sps:$4 sm:$0xff]  }
 0xc58   :  { %v8531_v10 = vmul.f32 0.02, %v8530_v59  ;;  %v8557_v25 = vadd.f32 %v8556_v57, %v8555_v45  ;;  %v15468_v45 = vld [vmem:[%s19960_s13 + $0x3c] sm:$0xff]   ;;  %v15469_v59 = vld [vmem:[%s19960_s13 + $0x44] ss:$0 sps:$4 sm:$0xff]   ;;  %v15470_v57 = vld [vmem:[%s19960_s13 + $0x48] sm:$0xff]  }
 0xc5a   :  { %v8558_v39 = vmul.f32 0.02, %v8557_v25  ;;  %v8559_v0 = vmul.f32 %v8531_v10, %v8531_v10  ;;  %v15471_v25 = vld [vmem:[%s19960_s13 + $0x50] ss:$0 sps:$4 sm:$0xff]  }
 0xc5c   :  { %v8560_v36 = vsub.f32 %v8558_v39, %v8559_v0  ;;  %v15472_v39 = vld [vmem:[%s19960_s13 + $0x54] sm:$0xff]  }
 0xc5d   :  { %v15479_v0 = vld [vmem:[%s19963_s14 + $0x38] sm:$0xff]  }
 0xc5e   :  { %v8561_v18 = vmax.f32 %v8560_v36, 0.0  ;;  %v15480_v36 = vld [vmem:[%s19963_s14] sm:$0xff]  }
 0xc60   :  { %v8563_v3 = vadd.f32 1e-05, %v8561_v18  ;;  %v15473_v18 = vld [vmem:[%s19960_s13 + $0x5c] ss:$0 sps:$4 sm:$0xff]  }
 0xc62   :  { %15588 = vrsqrt.f32 %v8563_v3  ;;  %v15474_v3 = vld [vmem:[%s19960_s13 + $0x60] sm:$0xff]  }
 0xc6c   :  { %v15589_v58 = vpop.eup %15588 }
 0xc6d   :  { %v8565_v26 = vmul.f32 %v15589_v58, %v8562_v20  ;;  %v15475_v20 = vld [vmem:[%s19960_s13 + $0x68] ss:$0 sps:$4 sm:$0xff]  }
 0xc6f   :  { %v8567_v8 = vmul.f32 %v8565_v26, %v8531_v10  ;;  %v8573_v60 = vrot.slane %v8565_v26, %v17835_v37  ;;  %v15478_v10 = vld [vmem:[%s19963_s14 + $0x30] sm:$0xff]  }
 0xc70   :  { %14009 = vmatprep.subr.bf16.mxu1 %v15478_v10 }
 0xc71   :  { %v8568_v1 = vsub.f32 %v8566_v35, %v8567_v8  ;;  %v8575_v51 = vmul.f32 %v8573_v60, %v19197_v9  ;;  %v8576_v19 = vmul.f32 %v8573_v60, %v19203_v40  ;;  %v8577_v5 = vmul.f32 %v19195_v50, %v8573_v60  ;;  %14010 = vmatpush3.bf16.msra.mxu1 %v15478_v10 }
 0xc72   :  { %v8578_v54 = vmul.f32 %v19201_v23, %v8573_v60  ;;  %v8579_v17 = vmul.f32 %v8573_v60, %v8491_v49  ;;  %v8580_v12 = vmul.f32 %v8573_v60, %v8494_v31  ;;  %v8581_v11 = vmul.f32 %v13979_v55, %v8573_v60  ;;  %14011 = vmatprep.subr.bf16.mxu1 %v15479_v0 }
 0xc73   :  { %v8586_v56 = vrot.slane %v8568_v1, %v17835_v37 }
 0xc75   :  { %v8588_v48 = vadd.f32 %v8586_v56, %v8575_v51  ;;  %v8589_v43 = vadd.f32 %v8586_v56, %v8576_v19  ;;  %v8590_v21 = vadd.f32 %v8586_v56, %v8577_v5  ;;  %v8591_v47 = vadd.f32 %v8586_v56, %v8578_v54  ;;  %14012 = vmatpush3.bf16.msra.mxu1 %v15479_v0 }
 0xc76   :  { %v8592_v6 = vadd.f32 %v8586_v56, %v8579_v17  ;;  %v8593_v14 = vadd.f32 %v8586_v56, %v8580_v12  ;;  %v8594_v13 = vadd.f32 %v8586_v56, %v8581_v11  ;;  %14017 = vmatprep.subr.bf16.mxu1 %v15480_v36  ;;  %v15481_v12 = vld [vmem:[%s19963_s14 + $0x8] sm:$0xff]   ;;  %v15482_v11 = vld [vmem:[%s19963_s14 + $0x10] sm:$0xff]   ;;  %v15483_v56 = vld [vmem:[%s19963_s14 + $0x18] sm:$0xff]  }
 0xc77   :  { %vm8595_vm9 = vcmp.ge.f32.partialorder %v8588_v48, 0.0  ;;  %vm8596_vm10 = vcmp.ge.f32.partialorder %v8589_v43, 0.0  ;;  %vm8597_vm11 = vcmp.ge.f32.partialorder %v8590_v21, 0.0  ;;  %vm8598_vm12 = vcmp.ge.f32.partialorder %v8591_v47, 0.0 }
 0xc78   :  { %vm8599_vm13 = vcmp.ge.f32.partialorder %v8592_v6, 0.0  ;;  %vm8600_vm14 = vcmp.ge.f32.partialorder %v8593_v14, 0.0  ;;  %v8602_v50 = vmul.f32 0.01, %v8588_v48  ;;  %v8603_v9 = vmul.f32 0.01, %v8589_v43 }
 0xc79   :  { %v8604_v23 = vmul.f32 0.01, %v8590_v21  ;;  %v8605_v40 = vmul.f32 0.01, %v8591_v47  ;;  %v8606_v55 = vmul.f32 0.01, %v8592_v6 }
 0xc7a   :  { %v8607_v49 = vmul.f32 0.01, %v8593_v14  ;;  %v8609_v24 = vsel %vm8595_vm9, %v8588_v48, %v8602_v50  ;;  %v8610_v22 = vsel %vm8596_vm10, %v8589_v43, %v8603_v9  ;;  %v8608_v29 = vmul.f32 0.01, %v8594_v13  ;;  %v15484_v43 = vld [vmem:[%s19963_s14 + $0x40] sm:$0xff]   ;;  %v15485_v50 = vld [vmem:[%s19963_s14 + $0x48] sm:$0xff]  }
 0xc7b   :  { %v8611_v33 = vsel %vm8597_vm11, %v8590_v21, %v8604_v23  ;;  %v8612_v31 = vsel %vm8598_vm12, %v8591_v47, %v8605_v40  ;;  %v8613_v53 = vsel %vm8599_vm13, %v8592_v6, %v8606_v55  ;;  %v19241_v32 = vpack.c.bf16 %v8610_v22, %v8609_v24  ;;  %v15486_v9 = vld [vmem:[%s19963_s14 + $0x50] sm:$0xff]   ;;  %v15487_v23 = vld [vmem:[%s19963_s14 + $0x58] sm:$0xff]   ;;  %v15488_v55 = vld [vmem:[%s19963_s14 + $0x60] sm:$0xff]  }
 0xc7c   :  { %v8614_v4 = vsel %vm8600_vm14, %v8593_v14, %v8607_v49  ;;  %v19243_v38 = vpack.c.bf16 %v8612_v31, %v8611_v33  ;;  %vm8601_vm15 = vcmp.ge.f32.partialorder %v8594_v13, 0.0 }
 0xc7d   :  { %v19245_v7 = vpack.c.bf16 %v8614_v4, %v8613_v53  ;;  %13981 = vmatprep.subr.bf16.mxu0 %v19241_v32  ;;  %v8615_v16 = vsel %vm8601_vm15, %v8594_v13, %v8608_v29  ;;  %v15489_v53 = vld [vmem:[%s19963_s14 + $0x68] sm:$0xff]   ;;  %v15490_v4 = vld [vmem:[%s19963_s14 + $0x70] sm:$0xff]  }
 0xc7e   :  { %13982 = vmatpush3.bf16.msra.mxu0 %v19241_v32  ;;  %v19252_v30 = vpack.c.bf16 %v8615_v16, %v8615_v16 }
 0xc7f   :  { %13983 = vmatprep.subr.bf16.mxu0 %v19243_v38 }
 0xc80   :  { %v19259_v61 = vsel %vm249_vm1, %v19252_v30, 0 }
 0xc82   :  { %13984 = vmatpush3.bf16.msra.mxu0 %v19243_v38 }
 0xc83   :  { %13985 = vmatprep.subr.bf16.mxu0 %v19245_v7 }
 0xc86   :  { %13986 = vmatpush3.bf16.msra.mxu0 %v19245_v7 }
 0xc87   :  { %14969 = vmatprep.subr.msk.bf16.mxu0 %vm249_vm1, %v19252_v30 }
 0xc8a   :  { %13988 = vmatpush3.bf16.msra.mxu0 %v19259_v61 }
 0xc8b   :  { %13993 = vmatprep.subr.bf16.mxu0 %v19241_v32 }
 0xc8d   :  { %13990 = vmatmul.mubr.msk.bf16.vlgmr.msra.gmra.mrb[232].mxu0 %vm6559_vm0, %v15459_v44 }
 0xc8e   :  { %13994 = vmatpush3.bf16.msra.mxu0 %v19241_v32  ;;  %14001 = vmatprep.mubr.msk.bf16.mxu0 %vm6559_vm0, %v15460_v46  ;;  %v15493_v46 = vld [vmem:[%s19963_s14 + $0x88] sm:$0xff]  }
 0xc8f   :  { %13995 = vmatprep.subr.bf16.mxu0 %v19243_v38 }
 0xc92   :  { %13996 = vmatpush3.bf16.msra.mxu0 %v19243_v38 }
 0xc93   :  { %13997 = vmatprep.subr.bf16.mxu0 %v19245_v7 }
 0xc96   :  { %13998 = vmatpush3.bf16.msra.mxu0 %v19245_v7 }
 0xc97   :  { %14970 = vmatprep.subr.msk.bf16.mxu0 %vm249_vm1, %v19252_v30 }
 0xc9a   :  { %14000 = vmatpush3.bf16.msra.mxu0 %v19259_v61 }
 0xc9b   :  { %14029 = vmatprep.subr.bf16.mxu0 %v19241_v32 }
 0xc9d   :  { %14002 = vmatmul.mubr.msk.bf16.vlgmr.msra.gmra.mrb[236].mxu0 %vm6559_vm0, %v15461_v62 }
 0xc9e   :  { %14030 = vmatpush3.bf16.msra.mxu0 %v19241_v32  ;;  %14037 = vmatprep.mubr.msk.bf16.mxu0 %vm6559_vm0, %v15462_v15  ;;  %v15496_v15 = vld [vmem:[%s19963_s14 + $0xa0] sm:$0xff]  }
 0xc9f   :  { %14031 = vmatprep.subr.bf16.mxu0 %v19243_v38 }
 0xca2   :  { %14032 = vmatpush3.bf16.msra.mxu0 %v19243_v38 }
 0xca3   :  { %14033 = vmatprep.subr.bf16.mxu0 %v19245_v7 }
 0xca6   :  { %14034 = vmatpush3.bf16.msra.mxu0 %v19245_v7 }
 0xca7   :  { %14971 = vmatprep.subr.msk.bf16.mxu0 %vm249_vm1, %v19252_v30 }
 0xcaa   :  { %14036 = vmatpush3.bf16.msra.mxu0 %v19259_v61 }
 0xcab   :  { %14053 = vmatprep.subr.bf16.mxu0 %v19241_v32 }
 0xcad   :  { %14038 = vmatmul.mubr.msk.bf16.vlgmr.msra.gmra.mrb[240].mxu0 %vm6559_vm0, %v15463_v42 }
 0xcae   :  { %14054 = vmatpush3.bf16.msra.mxu0 %v19241_v32  ;;  %14061 = vmatprep.mubr.msk.bf16.mxu0 %vm6559_vm0, %v15464_v27 }
 0xcaf   :  { %14055 = vmatprep.subr.bf16.mxu0 %v19243_v38 }
 0xcb2   :  { %14056 = vmatpush3.bf16.msra.mxu0 %v19243_v38 }
 0xcb3   :  { %14057 = vmatprep.subr.bf16.mxu0 %v19245_v7 }
 0xcb6   :  { %14058 = vmatpush3.bf16.msra.mxu0 %v19245_v7 }
 0xcb7   :  { %14972 = vmatprep.subr.msk.bf16.mxu0 %vm249_vm1, %v19252_v30 }
 0xcba   :  { %14060 = vmatpush3.bf16.msra.mxu0 %v19259_v61 }
 0xcbb   :  { %14077 = vmatprep.subr.bf16.mxu0 %v19241_v32 }
 0xcbd   :  { %14062 = vmatmul.mubr.msk.bf16.vlgmr.msra.gmra.mrb[244].mxu0 %vm6559_vm0, %v15465_v28 }
 0xcbe   :  { %14078 = vmatpush3.bf16.msra.mxu0 %v19241_v32  ;;  %14085 = vmatprep.mubr.msk.bf16.mxu0 %vm6559_vm0, %v15466_v2 }
 0xcbf   :  { %14079 = vmatprep.subr.bf16.mxu0 %v19243_v38 }
 0xcc2   :  { %14080 = vmatpush3.bf16.msra.mxu0 %v19243_v38 }
 0xcc3   :  { %14081 = vmatprep.subr.bf16.mxu0 %v19245_v7 }
 0xcc6   :  { %14082 = vmatpush3.bf16.msra.mxu0 %v19245_v7 }
 0xcc7   :  { %14973 = vmatprep.subr.msk.bf16.mxu0 %vm249_vm1, %v19252_v30 }
 0xcca   :  { %14084 = vmatpush3.bf16.msra.mxu0 %v19259_v61 }
 0xccb   :  { %14101 = vmatprep.subr.bf16.mxu0 %v19241_v32 }
 0xccd   :  { %14086 = vmatmul.mubr.msk.bf16.vlgmr.msra.gmra.mrb[248].mxu0 %vm6559_vm0, %v15467_v63 }
 0xcce   :  { %14102 = vmatpush3.bf16.msra.mxu0 %v19241_v32  ;;  %14109 = vmatprep.mubr.msk.bf16.mxu0 %vm6559_vm0, %v15468_v45  ;;  %v15497_v45 = vld [vmem:[%s19963_s14 + $0xa8] sm:$0xff]  }
 0xccf   :  { %14103 = vmatprep.subr.bf16.mxu0 %v19243_v38 }
 0xcd2   :  { %14104 = vmatpush3.bf16.msra.mxu0 %v19243_v38 }
 0xcd3   :  { %14105 = vmatprep.subr.bf16.mxu0 %v19245_v7 }
 0xcd6   :  { %14106 = vmatpush3.bf16.msra.mxu0 %v19245_v7 }
 0xcd7   :  { %14974 = vmatprep.subr.msk.bf16.mxu0 %vm249_vm1, %v19252_v30 }
 0xcda   :  { %14108 = vmatpush3.bf16.msra.mxu0 %v19259_v61 }
 0xcdb   :  { %14125 = vmatprep.subr.bf16.mxu0 %v19241_v32 }
 0xcdd   :  { %14110 = vmatmul.mubr.msk.bf16.vlgmr.msra.gmra.mrb[252].mxu0 %vm6559_vm0, %v15469_v59  ;;  %v15498_v59 = vld [vmem:[%s19963_s14 + $0xb0] sm:$0xff]  }
 0xcde   :  { %14126 = vmatpush3.bf16.msra.mxu0 %v19241_v32  ;;  %14133 = vmatprep.mubr.msk.bf16.mxu0 %vm6559_vm0, %v15470_v57  ;;  %v15499_v57 = vld [vmem:[%s19963_s14 + $0xb8] sm:$0xff]  }
 0xcdf   :  { %14127 = vmatprep.subr.bf16.mxu0 %v19243_v38 }
 0xce2   :  { %14128 = vmatpush3.bf16.msra.mxu0 %v19243_v38 }
 0xce3   :  { %14129 = vmatprep.subr.bf16.mxu0 %v19245_v7 }
 0xce6   :  { %14130 = vmatpush3.bf16.msra.mxu0 %v19245_v7 }
 0xce7   :  { %14975 = vmatprep.subr.msk.bf16.mxu0 %vm249_vm1, %v19252_v30 }
 0xcea   :  { %14132 = vmatpush3.bf16.msra.mxu0 %v19259_v61 }
 0xceb   :  { %14149 = vmatprep.subr.bf16.mxu0 %v19241_v32 }
 0xced   :  { %14134 = vmatmul.mubr.msk.bf16.vlgmr.msra.gmra.mrb[0].mxu0 %vm6559_vm0, %v15471_v25  ;;  %v15500_v25 = vld [vmem:[%s19963_s14 + $0xc0] sm:$0xff]  }
 0xcee   :  { %14150 = vmatpush3.bf16.msra.mxu0 %v19241_v32  ;;  %14157 = vmatprep.mubr.msk.bf16.mxu0 %vm6559_vm0, %v15472_v39 }
 0xcef   :  { %14151 = vmatprep.subr.bf16.mxu0 %v19243_v38 }
 0xcf2   :  { %14152 = vmatpush3.bf16.msra.mxu0 %v19243_v38 }
 0xcf3   :  { %14153 = vmatprep.subr.bf16.mxu0 %v19245_v7 }
 0xcf6   :  { %14154 = vmatpush3.bf16.msra.mxu0 %v19245_v7 }
 0xcf7   :  { %14976 = vmatprep.subr.msk.bf16.mxu0 %vm249_vm1, %v19252_v30 }
 0xcfa   :  { %14156 = vmatpush3.bf16.msra.mxu0 %v19259_v61 }
 0xcfb   :  { %14173 = vmatprep.subr.bf16.mxu0 %v19241_v32 }
 0xcfd   :  { %14158 = vmatmul.mubr.msk.bf16.vlgmr.msra.gmra.mrb[4].mxu0 %vm6559_vm0, %v15473_v18 }
 0xcfe   :  { %14174 = vmatpush3.bf16.msra.mxu0 %v19241_v32  ;;  %14181 = vmatprep.mubr.msk.bf16.mxu0 %vm6559_vm0, %v15474_v3  ;;  %v15491_v32 = vld [vmem:[%s19963_s14 + $0x78] sm:$0xff]  }
 0xcff   :  { %14175 = vmatprep.subr.bf16.mxu0 %v19243_v38 }
 0xd02   :  { %14176 = vmatpush3.bf16.msra.mxu0 %v19243_v38 }
 0xd03   :  { %14177 = vmatprep.subr.bf16.mxu0 %v19245_v7 }
 0xd06   :  { %14178 = vmatpush3.bf16.msra.mxu0 %v19245_v7  ;;  %v15492_v7 = vld [vmem:[%s19963_s14 + $0x80] sm:$0xff]  }
 0xd07   :  { %14977 = vmatprep.subr.msk.bf16.mxu0 %vm249_vm1, %v19252_v30 }
 0xd0a   :  { %14180 = vmatpush3.bf16.msra.mxu0 %v19259_v61 }
 0xd0b   :  { %14197 = vmatprep.subr.bf16.mxu0 %v15593_v41 }
 0xd0d   :  { %14182 = vmatmul.mubr.msk.bf16.vlgmr.msra.gmra.mrb[8].mxu0 %vm6559_vm0, %v15475_v20  ;;  %v15501_v20 = vld [vmem:[%s19963_s14 + $0xc8] sm:$0xff]  }
 0xd0e   :  { %14201 = vmatprep.mubr.msk.bf16.mxu0 %vm15594_vm2, %v15593_v41 }
 0xd60   :  { %v13991_v58 = vpop.f32.mrb[232].mxu0 }
 0xd61   :  { %v8674_v26 = vpop.f32.mrb[233].mxu0  ;;  %v8689_v13 = vpack.c.bf16 %v13991_v58, %v13991_v58  ;;  %v15502_v58 = vld [vmem:[%s19963_s14 + $0xd0] sm:$0xff]  }
 0xd62   :  { %v13992_v35 = vpop.f32.mrb[234].mxu0 }
 0xd63   :  { %v8677_v8 = vpop.f32.mrb[235].mxu0 }
 0xd64   :  { %v8688_v60 = vpack.c.bf16 %v8677_v8, %v8674_v26  ;;  %v15503_v26 = vld [vmem:[%s19963_s14 + $0xd8] sm:$0xff]   ;;  %v15504_v8 = vld [vmem:[%s19963_s14 + $0xe0] sm:$0xff]  }
 0xd70   :  { %v14003_v1 = vpop.f32.mrb[236].mxu0 }
 0xd71   :  { %v8750_v51 = vpop.f32.mrb[237].mxu0  ;;  %v8765_v17 = vpack.c.bf16 %v14003_v1, %v14003_v1 }
 0xd72   :  { %v14004_v19 = vpop.f32.mrb[238].mxu0 }
 0xd73   :  { %v8753_v5 = vpop.f32.mrb[239].mxu0 }
 0xd74   :  { %v8764_v54 = vpack.c.bf16 %v8753_v5, %v8750_v51 }
 0xd76   :  { %14013 = vmatprep.mubr.msk.bf16.mxu1 %vm6425_vm4, %v8764_v54  ;;  %v15505_v54 = vld [vmem:[%s19963_s14 + $0xe8] sm:$0xff]  }
 0xd77   :  { %14014 = vmatmul.mubr.msk.bf16.vlgmr.msra.gmra.mrb[192].mxu1 %vm6425_vm4, %v8765_v17  ;;  %v15506_v17 = vld [vmem:[%s19963_s14 + $0xf0] sm:$0xff]  }
 0xd78   :  { %14018 = vmatpush3.bf16.msra.mxu1 %v15480_v36  ;;  %14025 = vmatprep.mubr.msk.bf16.mxu1 %vm6425_vm4, %v8688_v60 }
 0xd79   :  { %14019 = vmatprep.subr.bf16.mxu1 %v15481_v12 }
 0xd7c   :  { %14020 = vmatpush3.bf16.msra.mxu1 %v15481_v12  ;;  %v15507_v12 = vld [vmem:[%s19963_s14 + $0xf8] sm:$0xff]  }
 0xd7d   :  { %14021 = vmatprep.subr.bf16.mxu1 %v15482_v11 }
 0xd80   :  { %14022 = vmatpush3.bf16.msra.mxu1 %v15482_v11  ;;  %v14039_v48 = vpop.f32.mrb[240].mxu0 }
 0xd81   :  { %14023 = vmatprep.subr.bf16.mxu1 %v15483_v56  ;;  %v8982_v21 = vpop.f32.mrb[241].mxu0  ;;  %v8997_v31 = vpack.c.bf16 %v14039_v48, %v14039_v48 }
 0xd82   :  { %v14040_v47 = vpop.f32.mrb[242].mxu0 }
 0xd83   :  { %v8985_v6 = vpop.f32.mrb[243].mxu0 }
 0xd84   :  { %14024 = vmatpush3.bf16.msra.mxu1 %v15483_v56  ;;  %v8996_v14 = vpack.c.bf16 %v8985_v6, %v8982_v21  ;;  %v15508_v56 = vld [vmem:[%s19963_s14 + $0x100] sm:$0xff]  }
 0xd85   :  { %14041 = vmatprep.subr.bf16.mxu1 %v15484_v43 }
 0xd87   :  { %14026 = vmatmul.mubr.msk.bf16.vlgmr.msra.gmra.mrb[192].mxu1 %vm6425_vm4, %v8689_v13  ;;  %v15510_v13 = vld [vmem:[%s19963_s14 + $0x110] sm:$0xff]  }
 0xd88   :  { %14042 = vmatpush3.bf16.msra.mxu1 %v15484_v43  ;;  %14049 = vmatprep.mubr.msk.bf16.mxu1 %vm6425_vm4, %v8996_v14  ;;  %v15509_v14 = vld [vmem:[%s19963_s14 + $0x108] sm:$0xff]  }
 0xd89   :  { %14043 = vmatprep.subr.bf16.mxu1 %v15485_v50 }
 0xd8c   :  { %14044 = vmatpush3.bf16.msra.mxu1 %v15485_v50  ;;  %v15511_v50 = vld [vmem:[%s19963_s14 + $0x118] sm:$0xff]  }
 0xd8d   :  { %14045 = vmatprep.subr.bf16.mxu1 %v15486_v9 }
 0xd90   :  { %14046 = vmatpush3.bf16.msra.mxu1 %v15486_v9  ;;  %v14063_v40 = vpop.f32.mrb[244].mxu0 }
 0xd91   :  { %14047 = vmatprep.subr.bf16.mxu1 %v15487_v23  ;;  %v9139_v49 = vpop.f32.mrb[245].mxu0  ;;  %v9154_v44 = vpack.c.bf16 %v14063_v40, %v14063_v40 }
 0xd92   :  { %v14064_v24 = vpop.f32.mrb[246].mxu0 }
 0xd93   :  { %v9142_v22 = vpop.f32.mrb[247].mxu0 }
 0xd94   :  { %14048 = vmatpush3.bf16.msra.mxu1 %v15487_v23  ;;  %v9153_v33 = vpack.c.bf16 %v9142_v22, %v9139_v49 }
 0xd95   :  { %14065 = vmatprep.subr.bf16.mxu1 %v15488_v55 }
 0xd97   :  { %14050 = vmatmul.mubr.msk.bf16.vlgmr.msra.gmra.mrb[192].mxu1 %vm6425_vm4, %v8997_v31 }
 0xd98   :  { %14066 = vmatpush3.bf16.msra.mxu1 %v15488_v55  ;;  %14073 = vmatprep.mubr.msk.bf16.mxu1 %vm6425_vm4, %v9153_v33 }
 0xd99   :  { %14067 = vmatprep.subr.bf16.mxu1 %v15489_v53 }
 0xd9c   :  { %14068 = vmatpush3.bf16.msra.mxu1 %v15489_v53 }
 0xd9d   :  { %14069 = vmatprep.subr.bf16.mxu1 %v15490_v4 }
 0xda0   :  { %14070 = vmatpush3.bf16.msra.mxu1 %v15490_v4  ;;  %v14087_v38 = vpop.f32.mrb[248].mxu0 }
 0xda1   :  { %14071 = vmatprep.subr.bf16.mxu1 %v15491_v32  ;;  %v9296_v29 = vpop.f32.mrb[249].mxu0  ;;  %v9311_v63 = vpack.c.bf16 %v14087_v38, %v14087_v38 }
 0xda2   :  { %v14088_v16 = vpop.f32.mrb[250].mxu0 }
 0xda3   :  { %v9299_v30 = vpop.f32.mrb[251].mxu0 }
 0xda4   :  { %14072 = vmatpush3.bf16.msra.mxu1 %v15491_v32  ;;  %v9310_v61 = vpack.c.bf16 %v9299_v30, %v9296_v29 }
 0xda5   :  { %14089 = vmatprep.subr.bf16.mxu1 %v15492_v7 }
 0xda7   :  { %14074 = vmatmul.mubr.msk.bf16.vlgmr.msra.gmra.mrb[192].mxu1 %vm6425_vm4, %v9154_v44 }
 0xda8   :  { %14090 = vmatpush3.bf16.msra.mxu1 %v15492_v7  ;;  %14097 = vmatprep.mubr.msk.bf16.mxu1 %vm6425_vm4, %v9310_v61 }
 0xda9   :  { %14091 = vmatprep.subr.bf16.mxu1 %v15493_v46 }
 0xdac   :  { %14092 = vmatpush3.bf16.msra.mxu1 %v15493_v46 }
 0xdad   :  { %14093 = vmatprep.subr.bf16.mxu1 %v15494_v52 }
 0xdb0   :  { %14094 = vmatpush3.bf16.msra.mxu1 %v15494_v52  ;;  %v14111_v62 = vpop.f32.mrb[252].mxu0 }
 0xdb1   :  { %14095 = vmatprep.subr.bf16.mxu1 %v15495_v34  ;;  %v9453_v42 = vpop.f32.mrb[253].mxu0  ;;  %v9468_v3 = vpack.c.bf16 %v14111_v62, %v14111_v62 }
 0xdb2   :  { %v14112_v27 = vpop.f32.mrb[254].mxu0 }
 0xdb3   :  { %v9456_v28 = vpop.f32.mrb[255].mxu0 }
 0xdb4   :  { %14096 = vmatpush3.bf16.msra.mxu1 %v15495_v34  ;;  %v9467_v2 = vpack.c.bf16 %v9456_v28, %v9453_v42 }
 0xdb5   :  { %14113 = vmatprep.subr.bf16.mxu1 %v15496_v15 }
 0xdb7   :  { %14098 = vmatmul.mubr.msk.bf16.vlgmr.msra.gmra.mrb[192].mxu1 %vm6425_vm4, %v9311_v63 }
 0xdb8   :  { %14114 = vmatpush3.bf16.msra.mxu1 %v15496_v15  ;;  %14121 = vmatprep.mubr.msk.bf16.mxu1 %vm6425_vm4, %v9467_v2 }
 0xdb9   :  { %14115 = vmatprep.subr.bf16.mxu1 %v15497_v45 }
 0xdbc   :  { %14116 = vmatpush3.bf16.msra.mxu1 %v15497_v45 }
 0xdbd   :  { %14117 = vmatprep.subr.bf16.mxu1 %v15498_v59 }
 0xdc0   :  { %14118 = vmatpush3.bf16.msra.mxu1 %v15498_v59  ;;  %v14135_v10 = vpop.f32.mrb[0].mxu0  ;;  %v10053_v59 = vld [vmem:[%s19965_s15] sm:$0x1] }
 0xdc1   :  { %14119 = vmatprep.subr.bf16.mxu1 %v15499_v57  ;;  %v9610_v39 = vpop.f32.mrb[1].mxu0  ;;  %v9625_v5 = vpack.c.bf16 %v14135_v10, %v14135_v10 }
 0xdc2   :  { %v14136_v0 = vpop.f32.mrb[2].mxu0 }
 0xdc3   :  { %v9613_v36 = vpop.f32.mrb[3].mxu0 }
 0xdc4   :  { %14120 = vmatpush3.bf16.msra.mxu1 %v15499_v57  ;;  %v9624_v18 = vpack.c.bf16 %v9613_v36, %v9610_v39 }
 0xdc5   :  { %14137 = vmatprep.subr.bf16.mxu1 %v15500_v25 }
 0xdc7   :  { %14122 = vmatmul.mubr.msk.bf16.vlgmr.msra.gmra.mrb[192].mxu1 %vm6425_vm4, %v9468_v3 }
 0xdc8   :  { %14138 = vmatpush3.bf16.msra.mxu1 %v15500_v25  ;;  %14145 = vmatprep.mubr.msk.bf16.mxu1 %vm6425_vm4, %v9624_v18  ;;  %v10057_v25 = vld [vmem:[%s19966_s16] sm:$0x1] }
 0xdc9   :  { %14139 = vmatprep.subr.bf16.mxu1 %v15501_v20 }
 0xdcc   :  { %14140 = vmatpush3.bf16.msra.mxu1 %v15501_v20 }
 0xdcd   :  { %14141 = vmatprep.subr.bf16.mxu1 %v15502_v58 }
 0xdd0   :  { %14142 = vmatpush3.bf16.msra.mxu1 %v15502_v58  ;;  %v14159_v35 = vpop.f32.mrb[4].mxu0 }
 0xdd1   :  { %14143 = vmatprep.subr.bf16.mxu1 %v15503_v26  ;;  %v9767_v60 = vpop.f32.mrb[5].mxu0  ;;  %v9782_v6 = vpack.c.bf16 %v14159_v35, %v14159_v35 }
 0xdd2   :  { %v14160_v1 = vpop.f32.mrb[6].mxu0 }
 0xdd3   :  { %v9770_v51 = vpop.f32.mrb[7].mxu0 }
 0xdd4   :  { %14144 = vmatpush3.bf16.msra.mxu1 %v15503_v26  ;;  %v9781_v19 = vpack.c.bf16 %v9770_v51, %v9767_v60 }
 0xdd5   :  { %14161 = vmatprep.subr.bf16.mxu1 %v15504_v8 }
 0xdd7   :  { %14146 = vmatmul.mubr.msk.bf16.vlgmr.msra.gmra.mrb[192].mxu1 %vm6425_vm4, %v9625_v5 }
 0xdd8   :  { %14162 = vmatpush3.bf16.msra.mxu1 %v15504_v8  ;;  %14169 = vmatprep.mubr.msk.bf16.mxu1 %vm6425_vm4, %v9781_v19 }
 0xdd9   :  { %14163 = vmatprep.subr.bf16.mxu1 %v15505_v54 }
 0xddc   :  { %14164 = vmatpush3.bf16.msra.mxu1 %v15505_v54 }
 0xddd   :  { %14165 = vmatprep.subr.bf16.mxu1 %v15506_v17 }
 0xde0   :  { %14166 = vmatpush3.bf16.msra.mxu1 %v15506_v17  ;;  %v14183_v11 = vpop.f32.mrb[8].mxu0 }
 0xde1   :  { %14167 = vmatprep.subr.bf16.mxu1 %v15507_v12  ;;  %v9924_v48 = vpop.f32.mrb[9].mxu0  ;;  %v9939_v9 = vpack.c.bf16 %v14183_v11, %v14183_v11  ;;  %v10089_v11 = vld [vmem:[%s19967_s17] sm:$0x1] }
 0xde2   :  { %v14184_v43 = vpop.f32.mrb[10].mxu0 }
 0xde3   :  { %v9927_v21 = vpop.f32.mrb[11].mxu0  ;;  %v15513_v43 = vld [vmem:[%s19964_s18 + $0x48] sm:$0xff]  }
 0xde4   :  { %14168 = vmatpush3.bf16.msra.mxu1 %v15507_v12  ;;  %v9938_v47 = vpack.c.bf16 %v9927_v21, %v9924_v48  ;;  %v15512_v48 = vld [vmem:[%s19964_s18 + $0x40] sm:$0xff]   ;;  %v15514_v21 = vld [vmem:[%s19964_s18 + $0x50] sm:$0xff]  }
 0xde5   :  { %14185 = vmatprep.subr.bf16.mxu1 %v15508_v56 }
 0xde7   :  { %14170 = vmatmul.mubr.msk.bf16.vlgmr.msra.gmra.mrb[192].mxu1 %vm6425_vm4, %v9782_v6  ;;  %v15516_v6 = vld [vmem:[%s19964_s18 + $0x60] sm:$0xff]  }
 0xde8   :  { %14186 = vmatpush3.bf16.msra.mxu1 %v15508_v56  ;;  %14193 = vmatprep.mubr.msk.bf16.mxu1 %vm6425_vm4, %v9938_v47  ;;  %v12560_v56 = vld [vmem:[%s19967_s17 + $0x1] sm:$0x1]  ;;  %v15515_v47 = vld [vmem:[%s19964_s18 + $0x58] sm:$0xff]  }
 0xde9   :  { %14187 = vmatprep.subr.bf16.mxu1 %v15509_v14 }
 0xdec   :  { %14188 = vmatpush3.bf16.msra.mxu1 %v15509_v14  ;;  %v15517_v14 = vld [vmem:[%s19964_s18 + $0x68] sm:$0xff]  }
 0xded   :  { %14189 = vmatprep.subr.bf16.mxu1 %v15510_v13 }
 0xdf0   :  { %14190 = vmatpush3.bf16.msra.mxu1 %v15510_v13  ;;  %v15518_v13 = vld [vmem:[%s19964_s18 + $0x70] sm:$0xff]  }
 0xdf1   :  { %14191 = vmatprep.subr.bf16.mxu1 %v15511_v50 }
 0xdf4   :  { %14192 = vmatpush3.bf16.msra.mxu1 %v15511_v50  ;;  %v15520_v50 = vld [vmem:[%s19964_s18] sm:$0xff]  }
 0xdf5   :  { %14233 = vmatprep.subr.bf16.mxu1 %v15593_v41 }
 0xdf7   :  { %14194 = vmatmul.mubr.msk.bf16.vlgmr.msra.gmra.mrb[192].mxu1 %vm6425_vm4, %v9939_v9  ;;  %v15521_v9 = vld [vmem:[%s19964_s18 + $0x8] sm:$0xff]  }
 0xdf8   :  { %14249 = vmatprep.mubr.msk.bf16.mxu1 %vm15594_vm2, %v15593_v41  ;;  %14234 = vmatpush3.bf16.msra.mxu1 %v15520_v50  ;;  %v15546_v50 = vld [vmem:[%s19964_s18 + $0x110] sm:$0xff]  }
 0xdf9   :  { %14235 = vmatprep.subr.bf16.mxu1 %v15593_v41 }
 0xdfc   :  { %14236 = vmatpush3.bf16.msra.mxu1 %v15521_v9  ;;  %v15549_v9 = vld [vmem:[%s19964_s18 + $0x148] sm:$0xff]  }
 0xdfd   :  { %14237 = vmatprep.subr.bf16.mxu1 %v15593_v41 }
 0xeca   :  { %v14195_v23 = vpop.f32.mrb[192].mxu1 }
 0xecb   :  { %v10012_v40 = vpop.f32.mrb[193].mxu1  ;;  %v10040_v31 = vmul.f32 %v14195_v23, %v14195_v23 }
 0xecc   :  { %v14196_v55 = vpop.f32.mrb[194].mxu1  ;;  %v10038_v24 = vmul.f32 %v10012_v40, %v10012_v40 }
 0xecd   :  { %v10015_v49 = vpop.f32.mrb[195].mxu1  ;;  %v15524_v55 = vld [vmem:[%s19964_s18 + $0x20] sm:$0xff]  }
 0xece   :  { %v10029_v22 = vadd.f32 %v10015_v49, %v10012_v40  ;;  %v10039_v33 = vmul.f32 %v10015_v49, %v10015_v49 }
 0xed0   :  { %v10030_v53 = vadd.f32 %v14195_v23, %v10029_v22  ;;  %v10041_v4 = vadd.f32 %v10039_v33, %v10038_v24  ;;  %v15525_v24 = vld [vmem:[%s19964_s18 + $0x28] sm:$0xff]   ;;  %v15526_v22 = vld [vmem:[%s19964_s18 + $0x30] sm:$0xff]   ;;  %v15527_v33 = vld [vmem:[%s19964_s18 + $0x38] sm:$0xff]  }
 0xed2   :  { %v10031_v32 = vrot.slane %v10030_v53, 4  ;;  %v10042_v38 = vadd.f32 %v10041_v4, %v10040_v31 }
 0xed4   :  { %v10032_v7 = vadd.f32 %v10031_v32, %v10030_v53  ;;  %v10043_v29 = vrot.slane %v10042_v38, 4  ;;  %v15528_v53 = vld [vmem:[%s19964_s18 + $0x80] sm:$0xff]  }
 0xed6   :  { %v10033_v16 = vrot.slane %v10032_v7, 2  ;;  %v10044_v30 = vadd.f32 %v10043_v29, %v10042_v38  ;;  %v15529_v29 = vld [vmem:[%s19964_s18 + $0x88] sm:$0xff]  }
 0xed8   :  { %v10034_v61 = vadd.f32 %v10033_v16, %v10032_v7  ;;  %v10045_v44 = vrot.slane %v10044_v30, 2 }
 0xeda   :  { %v10035_v46 = vrot.slane %v10034_v61, 1  ;;  %v10046_v52 = vadd.f32 %v10045_v44, %v10044_v30  ;;  %v15530_v44 = vld [vmem:[%s19964_s18 + $0x90] sm:$0xff]  }
 0xedc   :  { %v10036_v34 = vadd.f32 %v10035_v46, %v10034_v61  ;;  %v10047_v62 = vrot.slane %v10046_v52, 1 }
 0xede   :  { %v10037_v15 = vmul.f32 0.055555556, %v10036_v34  ;;  %v10048_v42 = vadd.f32 %v10047_v62, %v10046_v52  ;;  %v15532_v34 = vld [vmem:[%s19964_s18 + $0x98] sm:$0xff]   ;;  %v12578_v62 = vld [vmem:[%s19967_s17 + $0x2] sm:$0x1] }
 0xee0   :  { %v10049_v27 = vmul.f32 0.055555556, %v10048_v42  ;;  %v10050_v28 = vmul.f32 %v10037_v15, %v10037_v15  ;;  %v15536_v42 = vld [vmem:[%s19964_s18 + $0xa8] sm:$0xff]  }
 0xee2   :  { %v10051_v2 = vsub.f32 %v10049_v27, %v10050_v28  ;;  %v12588_v27 = vld [vmem:[%s19967_s17 + $0x3] sm:$0x1] }
 0xee3   :  { %v15531_v28 = vld [vmem:[%s19964_s18 + $0xc0] sm:$0xff]  }
 0xee4   :  { %v10052_v63 = vmax.f32 %v10051_v2, 0.0  ;;  %v15538_v2 = vld [vmem:[%s19964_s18 + $0xb0] sm:$0xff]  }
 0xee6   :  { %v10054_v45 = vadd.f32 1e-05, %v10052_v63  ;;  %v15533_v63 = vld [vmem:[%s19964_s18 + $0xc8] sm:$0xff]  }
 0xee8   :  { %15590 = vrsqrt.f32 %v10054_v45  ;;  %v15535_v45 = vld [vmem:[%s19964_s18 + $0xd0] sm:$0xff]  }
 0xef2   :  { %v15591_v57 = vpop.eup %15590 }
 0xef3   :  { %v10056_v10 = vmul.f32 %v15591_v57, %v10053_v59  ;;  %v15537_v59 = vld [vmem:[%s19964_s18 + $0xd8] sm:$0xff]   ;;  %v15539_v57 = vld [vmem:[%s19964_s18 + $0xe0] sm:$0xff]  }
 0xef5   :  { %v10058_v39 = vmul.f32 %v10056_v10, %v10037_v15  ;;  %v10064_v0 = vrot.slane %v10056_v10, %v17835_v37  ;;  %v15534_v15 = vld [vmem:[%s19964_s18 + $0xa0] sm:$0xff]   ;;  %v15540_v10 = vld [vmem:[%s19964_s18 + $0xb8] sm:$0xff]  }
 0xef7   :  { %v10059_v36 = vsub.f32 %v10057_v25, %v10058_v39  ;;  %v10066_v18 = vmul.f32 %v10064_v0, %v10012_v40  ;;  %v10067_v3 = vmul.f32 %v10064_v0, %v10015_v49  ;;  %v10068_v20 = vmul.f32 %v14195_v23, %v10064_v0  ;;  %v15522_v23 = vld [vmem:[%s19964_s18 + $0x10] sm:$0xff]   ;;  %v15523_v40 = vld [vmem:[%s19964_s18 + $0x18] sm:$0xff]   ;;  %v15541_v25 = vld [vmem:[%s19964_s18 + $0xe8] sm:$0xff]  }
 0xef8   :  { %14238 = vmatpush3.bf16.msra.mxu1 %v15522_v23  ;;  %v15519_v49 = vld [vmem:[%s19964_s18 + $0x78] sm:$0xff]   ;;  %v15542_v39 = vld [vmem:[%s19964_s18 + $0xf0] sm:$0xff]  }
 0xef9   :  { %v10073_v58 = vrot.slane %v10059_v36, %v17835_v37  ;;  %14239 = vmatprep.subr.bf16.mxu1 %v15593_v41  ;;  %v15543_v0 = vld [vmem:[%s19964_s18 + $0xf8] sm:$0xff]  }
 0xefa   :  { %v15548_v23 = vld [vmem:[%s19964_s18 + $0x118] sm:$0xff]  }
 0xefb   :  { %v10075_v26 = vadd.f32 %v10073_v58, %v10066_v18  ;;  %v10076_v35 = vadd.f32 %v10073_v58, %v10067_v3  ;;  %v10077_v8 = vadd.f32 %v10073_v58, %v10068_v20 }
 0xefc   :  { %14240 = vmatpush3.bf16.msra.mxu1 %v15523_v40  ;;  %v15551_v40 = vld [vmem:[%s19964_s18 + $0x150] sm:$0xff]  }
 0xefd   :  { %vm10078_vm0 = vcmp.ge.f32.partialorder %v10075_v26, 0.0  ;;  %vm10079_vm4 = vcmp.ge.f32.partialorder %v10076_v35, 0.0  ;;  %vm10080_vm3 = vcmp.ge.f32.partialorder %v10077_v8, 0.0  ;;  %v10081_v60 = vmul.f32 0.01, %v10075_v26  ;;  %14241 = vmatprep.subr.bf16.mxu1 %v15593_v41 }
 0xefe   :  { %v10082_v1 = vmul.f32 0.01, %v10076_v35  ;;  %v10083_v51 = vmul.f32 0.01, %v10077_v8 }
 0xeff   :  { %v10084_v19 = vsel %vm10078_vm0, %v10075_v26, %v10081_v60 }
 0xf00   :  { %v10085_v5 = vsel %vm10079_vm4, %v10076_v35, %v10082_v1  ;;  %v10086_v54 = vsel %vm10080_vm3, %v10077_v8, %v10083_v51  ;;  %14242 = vmatpush3.bf16.msra.mxu1 %v15524_v55  ;;  %v15550_v55 = vld [vmem:[%s19964_s18 + $0x120] sm:$0xff]  }
 0xf01   :  { %v19542_v17 = vpack.c.bf16 %v10085_v5, %v10084_v19  ;;  %v10088_v12 = vpack.c.bf16 %v10086_v54, %v10086_v54  ;;  %14243 = vmatprep.subr.bf16.mxu1 %v15593_v41 }
 0xf03   :  { %14198 = vmatpush3.bf16.msra.mxu0 %v19542_v17  ;;  %v19547_v37 = vsel %vm249_vm1, %v10088_v12, 0  ;;  %vm11457_vm1 = vcmask 517120  }
 0xf04   :  { %14199 = vmatprep.subr.bf16.mxu0 %v15593_v41  ;;  %14244 = vmatpush3.bf16.msra.mxu1 %v15525_v24  ;;  %v15552_v24 = vld [vmem:[%s19964_s18 + $0x128] sm:$0xff]  }
 0xf05   :  { %14245 = vmatprep.subr.bf16.mxu1 %v15593_v41 }
 0xf07   :  { %14200 = vmatpush3.bf16.msra.mxu0 %v19547_v37 }
 0xf08   :  { %14205 = vmatprep.subr.bf16.mxu0 %v15593_v41  ;;  %14246 = vmatpush3.bf16.msra.mxu1 %v15526_v22  ;;  %v15554_v22 = vld [vmem:[%s19964_s18 + $0x130] sm:$0xff]  }
 0xf09   :  { %14247 = vmatprep.subr.bf16.mxu1 %v15593_v41 }
 0xf0a   :  { %14202 = vmatmul.mubr.msk.bf16.vlgmr.msra.gmra.mrb[12].mxu0 %vm10090_vm5, %v10089_v11  ;;  %v12598_v11 = vld [vmem:[%s19967_s17 + $0x4] sm:$0x1] }
 0xf0b   :  { %14206 = vmatpush3.bf16.msra.mxu0 %v19542_v17  ;;  %14209 = vmatprep.mubr.msk.bf16.mxu0 %vm15594_vm2, %v15593_v41 }
 0xf0c   :  { %14207 = vmatprep.subr.bf16.mxu0 %v15593_v41  ;;  %14248 = vmatpush3.bf16.msra.mxu1 %v15527_v33  ;;  %v15555_v33 = vld [vmem:[%s19964_s18 + $0x160] sm:$0xff]  }
 0xf0d   :  { %14261 = vmatprep.subr.bf16.mxu1 %v15593_v41 }
 0xf0f   :  { %14208 = vmatpush3.bf16.msra.mxu0 %v19547_v37 }
 0xf10   :  { %14213 = vmatprep.subr.bf16.mxu0 %v15593_v41 }
 0xf12   :  { %14210 = vmatmul.mubr.msk.bf16.vlgmr.msra.gmra.mrb[16].mxu0 %vm10090_vm5, %v12560_v56 }
 0xf13   :  { %14214 = vmatpush3.bf16.msra.mxu0 %v15512_v48  ;;  %14229 = vmatprep.mubr.msk.bf16.mxu0 %vm15594_vm2, %v15593_v41  ;;  %v15544_v48 = vld [vmem:[%s19964_s18 + $0x100] sm:$0xff]  }
 0xf14   :  { %14215 = vmatprep.subr.bf16.mxu0 %v15593_v41 }
 0xf17   :  { %14216 = vmatpush3.bf16.msra.mxu0 %v15513_v43 }
 0xf18   :  { %14217 = vmatprep.subr.bf16.mxu0 %v15593_v41 }
 0xf1b   :  { %14218 = vmatpush3.bf16.msra.mxu0 %v15514_v21 }
 0xf1c   :  { %14219 = vmatprep.subr.bf16.mxu0 %v15593_v41 }
 0xf1f   :  { %14220 = vmatpush3.bf16.msra.mxu0 %v15515_v47 }
 0xf20   :  { %14221 = vmatprep.subr.bf16.mxu0 %v15593_v41 }
 0xf23   :  { %14222 = vmatpush3.bf16.msra.mxu0 %v15516_v6  ;;  %v15545_v6 = vld [vmem:[%s19964_s18 + $0x108] sm:$0xff]  }
 0xf24   :  { %14223 = vmatprep.subr.bf16.mxu0 %v15593_v41 }
 0xf27   :  { %14224 = vmatpush3.bf16.msra.mxu0 %v15517_v14  ;;  %v12608_v14 = vld [vmem:[%s19967_s17 + $0x5] sm:$0x1] }
 0xf28   :  { %14225 = vmatprep.subr.bf16.mxu0 %v15593_v41 }
 0xf2b   :  { %14226 = vmatpush3.bf16.msra.mxu0 %v15518_v13  ;;  %v15547_v13 = vld [vmem:[%s19964_s18 + $0x140] sm:$0xff]  }
 0xf2c   :  { %14227 = vmatprep.subr.bf16.mxu0 %v15593_v41 }
 0xf2f   :  { %14228 = vmatpush3.bf16.msra.mxu0 %v15519_v49  ;;  %v15553_v49 = vld [vmem:[%s19964_s18 + $0x158] sm:$0xff]  }
 0xf30   :  { %14253 = vmatprep.subr.bf16.mxu0 %v15593_v41 }
 0xfdd   :  { %v10131_v31 = vpop.f32.mrb[12].mxu0 }
 0xfde   :  { %v10137_v4 = vpack.c.bf16 %v10131_v31, %v10131_v31  ;;  %v14203_v32 = vpop.f32.mrb[13].mxu0  ;;  %v15556_v31 = vld [vmem:[%s19964_s18 + $0x138] sm:$0xff]  }
 0xfdf   :  { %v10134_v38 = vpop.f32.mrb[14].mxu0  ;;  %v15559_v32 = vld [vmem:[%s19964_s18 + $0x178] sm:$0xff]  }
 0xfe0   :  { %v14204_v7 = vpop.f32.mrb[15].mxu0  ;;  %14250 = vmatmul.mubr.bf16.vlgmr.msra.gmra.mrb[196].mxu1 %v10137_v4  ;;  %v15558_v4 = vld [vmem:[%s19964_s18 + $0x170] sm:$0xff]  }
 0xfe1   :  { %14262 = vmatpush3.bf16.msra.mxu1 %v15528_v53  ;;  %14277 = vmatprep.mubr.msk.bf16.mxu1 %vm15594_vm2, %v15593_v41  ;;  %v15557_v53 = vld [vmem:[%s19964_s18 + $0x168] sm:$0xff]  }
 0xfe2   :  { %14263 = vmatprep.subr.bf16.mxu1 %v15593_v41 }
 0xfe5   :  { %v10193_v16 = vpop.f32.mrb[16].mxu0  ;;  %14264 = vmatpush3.bf16.msra.mxu1 %v15529_v29 }
 0xfe6   :  { %v10199_v30 = vpack.c.bf16 %v10193_v16, %v10193_v16  ;;  %v14211_v61 = vpop.f32.mrb[17].mxu0  ;;  %14265 = vmatprep.subr.bf16.mxu1 %v15593_v41 }
 0xfe7   :  { %v10196_v46 = vpop.f32.mrb[18].mxu0 }
 0xfe8   :  { %14230 = vmatmul.mubr.bf16.vlgmr.msra.gmra.mrb[20].mxu0 %v10199_v30  ;;  %v14212_v52 = vpop.f32.mrb[19].mxu0 }
 0xfe9   :  { %14254 = vmatpush3.bf16.msra.mxu0 %v19542_v17  ;;  %14257 = vmatprep.mubr.msk.bf16.mxu0 %vm15594_vm2, %v15593_v41 }
 0xfea   :  { %14255 = vmatprep.subr.bf16.mxu0 %v15593_v41  ;;  %14266 = vmatpush3.bf16.msra.mxu1 %v15530_v44 }
 0xfeb   :  { %14267 = vmatprep.subr.bf16.mxu1 %v15593_v41 }
 0xfed   :  { %14256 = vmatpush3.bf16.msra.mxu0 %v19547_v37 }
 0xfee   :  { %14281 = vmatprep.subr.bf16.mxu0 %v15593_v41  ;;  %14268 = vmatpush3.bf16.msra.mxu1 %v15532_v34 }
 0xfef   :  { %14269 = vmatprep.subr.bf16.mxu1 %v15593_v41 }
 0xff0   :  { %14258 = vmatmul.mubr.msk.bf16.vlgmr.msra.gmra.mrb[24].mxu0 %vm10090_vm5, %v12578_v62 }
 0xff1   :  { %14282 = vmatpush3.bf16.msra.mxu0 %v19542_v17  ;;  %14285 = vmatprep.mubr.msk.bf16.mxu0 %vm15594_vm2, %v15593_v41 }
 0xff2   :  { %14283 = vmatprep.subr.bf16.mxu0 %v15593_v41  ;;  %14270 = vmatpush3.bf16.msra.mxu1 %v15534_v15 }
 0xff3   :  { %14271 = vmatprep.subr.bf16.mxu1 %v15593_v41 }
 0xff5   :  { %14284 = vmatpush3.bf16.msra.mxu0 %v19547_v37 }
 0xff6   :  { %14289 = vmatprep.subr.bf16.mxu0 %v15593_v41  ;;  %14272 = vmatpush3.bf16.msra.mxu1 %v15536_v42 }
 0xff7   :  { %14273 = vmatprep.subr.bf16.mxu1 %v15593_v41 }
 0xff8   :  { %14286 = vmatmul.mubr.msk.bf16.vlgmr.msra.gmra.mrb[28].mxu0 %vm10090_vm5, %v12588_v27 }
 0xff9   :  { %14290 = vmatpush3.bf16.msra.mxu0 %v15531_v28  ;;  %14305 = vmatprep.mubr.msk.bf16.mxu0 %vm15594_vm2, %v15593_v41 }
 0xffa   :  { %14291 = vmatprep.subr.bf16.mxu0 %v15593_v41  ;;  %14274 = vmatpush3.bf16.msra.mxu1 %v15538_v2 }
 0xffb   :  { %14275 = vmatprep.subr.bf16.mxu1 %v15593_v41 }
 0xffd   :  { %14292 = vmatpush3.bf16.msra.mxu0 %v15533_v63  ;;  %v12618_v63 = vld [vmem:[%s19967_s17 + $0x6] sm:$0x1] }
 0xffe   :  { %14293 = vmatprep.subr.bf16.mxu0 %v15593_v41  ;;  %14276 = vmatpush3.bf16.msra.mxu1 %v15540_v10 }
 0xfff   :  { %14309 = vmatprep.subr.bf16.mxu1 %v15593_v41 }
0x1001   :  { %14294 = vmatpush3.bf16.msra.mxu0 %v15535_v45 }
0x1002   :  { %14295 = vmatprep.subr.bf16.mxu0 %v15593_v41 }
0x1005   :  { %14296 = vmatpush3.bf16.msra.mxu0 %v15537_v59  ;;  %v15560_v59 = vld [vmem:[%s19964_s18 + $0x180] sm:$0xff]  }
0x1006   :  { %14297 = vmatprep.subr.bf16.mxu0 %v15593_v41 }
0x1009   :  { %14298 = vmatpush3.bf16.msra.mxu0 %v15539_v57 }
0x100a   :  { %14299 = vmatprep.subr.bf16.mxu0 %v15593_v41 }
0x100d   :  { %14300 = vmatpush3.bf16.msra.mxu0 %v15541_v25 }
0x100e   :  { %14301 = vmatprep.subr.bf16.mxu0 %v15593_v41 }
0x1011   :  { %14302 = vmatpush3.bf16.msra.mxu0 %v15542_v39  ;;  %v15561_v39 = vld [vmem:[%s19964_s18 + $0x188] sm:$0xff]  }
0x1012   :  { %14303 = vmatprep.subr.bf16.mxu0 %v15593_v41 }
0x1015   :  { %14304 = vmatpush3.bf16.msra.mxu0 %v15543_v0  ;;  %v12628_v0 = vld [vmem:[%s19967_s17 + $0x7] sm:$0x1] }
0x1016   :  { %14337 = vmatprep.subr.bf16.mxu0 %v15593_v41 }
0x10b3   :  { %v10386_v36 = vpop.f32.mrb[196].mxu1 }
0x10b4   :  { %v14251_v18 = vpop.f32.mrb[197].mxu1 }
0x10b5   :  { %v10389_v3 = vpop.f32.mrb[198].mxu1  ;;  %v15562_v18 = vld [vmem:[%s19964_s18 + $0x190] sm:$0xff]  }
0x10b6   :  { %v14252_v20 = vpop.f32.mrb[199].mxu1  ;;  %v15565_v3 = vld [vmem:[%s19964_s18 + $0x1c8] sm:$0xff]  }
0x10b7   :  { %v15564_v20 = vld [vmem:[%s19964_s18 + $0x198] sm:$0xff]  }
0x10bb   :  { %v10298_v58 = vpop.f32.mrb[20].mxu0 }
0x10bc   :  { %v14231_v26 = vpop.f32.mrb[21].mxu0  ;;  %v19719_v35 = vadd.f32 %v10386_v36, %v10298_v58  ;;  %v15563_v36 = vld [vmem:[%s19964_s18 + $0x1c0] sm:$0xff]   ;;  %v15567_v58 = vld [vmem:[%s19964_s18 + $0x1d0] sm:$0xff]  }
0x10bd   :  { %v10301_v8 = vpop.f32.mrb[22].mxu0  ;;  %v15566_v26 = vld [vmem:[%s19964_s18 + $0x1a0] sm:$0xff]  }
0x10be   :  { %v14232_v60 = vpop.f32.mrb[23].mxu0  ;;  %v15569_v8 = vld [vmem:[%s19964_s18 + $0x1d8] sm:$0xff]  }
0x10bf   :  { %v15570_v60 = vld [vmem:[%s19964_s18 + $0x1b0] sm:$0xff]  }
0x10c3   :  { %v10431_v1 = vpop.f32.mrb[24].mxu0 }
0x10c4   :  { %v10437_v51 = vpack.c.bf16 %v10431_v1, %v10431_v1  ;;  %v14259_v19 = vpop.f32.mrb[25].mxu0  ;;  %v15571_v1 = vld [vmem:[%s19964_s18 + $0x1e0] sm:$0xff]  }
0x10c5   :  { %v10434_v5 = vpop.f32.mrb[26].mxu0  ;;  %v15573_v19 = vld [vmem:[%s19964_s18 + $0x1e8] sm:$0xff]  }
0x10c6   :  { %14278 = vmatmul.mubr.bf16.vlgmr.msra.gmra.mrb[200].mxu1 %v10437_v51  ;;  %v14260_v54 = vpop.f32.mrb[27].mxu0  ;;  %v15572_v51 = vld [vmem:[%s19964_s18 + $0x1b8] sm:$0xff]   ;;  %v15574_v5 = vld [vmem:[%s19964_s18 + $0x1f0] sm:$0xff]  }
0x10c7   :  { %14310 = vmatpush3.bf16.msra.mxu1 %v19542_v17  ;;  %14313 = vmatprep.mubr.msk.bf16.mxu1 %vm15594_vm2, %v15593_v41  ;;  %v15575_v54 = vld [vmem:[%s19964_s18 + $0x1f8] sm:$0xff]  }
0x10c8   :  { %14311 = vmatprep.subr.bf16.mxu1 %v15593_v41 }
0x10cb   :  { %14312 = vmatpush3.bf16.msra.mxu1 %v19547_v37  ;;  %v10582_v12 = vpop.f32.mrb[28].mxu0 }
0x10cc   :  { %v10588_v56 = vpack.c.bf16 %v10582_v12, %v10582_v12  ;;  %14317 = vmatprep.subr.bf16.mxu1 %v15593_v41  ;;  %v14287_v43 = vpop.f32.mrb[29].mxu0 }
0x10cd   :  { %v10585_v21 = vpop.f32.mrb[30].mxu0 }
0x10ce   :  { %14306 = vmatmul.mubr.bf16.vlgmr.msra.gmra.mrb[32].mxu0 %v10588_v56  ;;  %14314 = vmatmul.mubr.msk.bf16.vlgmr.msra.gmra.mrb[204].mxu1 %vm10090_vm5, %v12598_v11  ;;  %v14288_v47 = vpop.f32.mrb[31].mxu0 }
0x10cf   :  { %14338 = vmatpush3.bf16.msra.mxu0 %v19542_v17  ;;  %14341 = vmatprep.mubr.msk.bf16.mxu0 %vm15594_vm2, %v15593_v41 }
0x10d0   :  { %14339 = vmatprep.subr.bf16.mxu0 %v15593_v41  ;;  %14318 = vmatpush3.bf16.msra.mxu1 %v15544_v48 }
0x10d1   :  { %14319 = vmatprep.subr.bf16.mxu1 %v15593_v41  ;;  %14333 = vmatprep.mubr.msk.bf16.mxu1 %vm15594_vm2, %v15593_v41 }
0x10d3   :  { %14340 = vmatpush3.bf16.msra.mxu0 %v19547_v37 }
0x10d4   :  { %14320 = vmatpush3.bf16.msra.mxu1 %v15545_v6  ;;  %14345 = vmatprep.subr.bf16.mxu0 %v15593_v41 }
0x10d5   :  { %14321 = vmatprep.subr.bf16.mxu1 %v15593_v41 }
0x10d6   :  { %14342 = vmatmul.mubr.msk.bf16.vlgmr.msra.gmra.mrb[36].mxu0 %vm10090_vm5, %v12608_v14 }
0x10d7   :  { %14346 = vmatpush3.bf16.msra.mxu0 %v15547_v13  ;;  %14361 = vmatprep.mubr.msk.bf16.mxu0 %vm15594_vm2, %v15593_v41 }
0x10d8   :  { %14322 = vmatpush3.bf16.msra.mxu1 %v15546_v50  ;;  %14347 = vmatprep.subr.bf16.mxu0 %v15593_v41 }
0x10d9   :  { %14323 = vmatprep.subr.bf16.mxu1 %v15593_v41 }
0x10db   :  { %14348 = vmatpush3.bf16.msra.mxu0 %v15549_v9 }
0x10dc   :  { %14324 = vmatpush3.bf16.msra.mxu1 %v15548_v23  ;;  %14349 = vmatprep.subr.bf16.mxu0 %v15593_v41 }
0x10dd   :  { %14325 = vmatprep.subr.bf16.mxu1 %v15593_v41 }
0x10df   :  { %14350 = vmatpush3.bf16.msra.mxu0 %v15551_v40 }
0x10e0   :  { %14326 = vmatpush3.bf16.msra.mxu1 %v15550_v55  ;;  %14351 = vmatprep.subr.bf16.mxu0 %v15593_v41 }
0x10e1   :  { %14327 = vmatprep.subr.bf16.mxu1 %v15593_v41 }
0x10e3   :  { %14352 = vmatpush3.bf16.msra.mxu0 %v15553_v49 }
0x10e4   :  { %14328 = vmatpush3.bf16.msra.mxu1 %v15552_v24  ;;  %14353 = vmatprep.subr.bf16.mxu0 %v15593_v41  ;;  %v12638_v24 = vld [vmem:[%s19967_s17 + $0x8] sm:$0x1] }
0x10e5   :  { %14329 = vmatprep.subr.bf16.mxu1 %v15593_v41 }
0x10e7   :  { %14354 = vmatpush3.bf16.msra.mxu0 %v15555_v33 }
0x10e8   :  { %14330 = vmatpush3.bf16.msra.mxu1 %v15554_v22  ;;  %14355 = vmatprep.subr.bf16.mxu0 %v15593_v41  ;;  %v15576_v22 = vld [vmem:[%s19964_s18 + $0x200] sm:$0xff]  }
0x10e9   :  { %14331 = vmatprep.subr.bf16.mxu1 %v15593_v41 }
0x10eb   :  { %14356 = vmatpush3.bf16.msra.mxu0 %v15557_v53 }
0x10ec   :  { %14332 = vmatpush3.bf16.msra.mxu1 %v15556_v31  ;;  %14357 = vmatprep.subr.bf16.mxu0 %v15593_v41 }
0x10ed   :  { %14365 = vmatprep.subr.bf16.mxu1 %v15593_v41 }
0x10ef   :  { %14358 = vmatpush3.bf16.msra.mxu0 %v15558_v4  ;;  %v15578_v4 = vld [vmem:[%s19964_s18 + $0x210] sm:$0xff]  }
0x10f0   :  { %14359 = vmatprep.subr.bf16.mxu0 %v15593_v41 }
0x10f3   :  { %14360 = vmatpush3.bf16.msra.mxu0 %v15559_v32  ;;  %v15579_v32 = vld [vmem:[%s19964_s18 + $0x218] sm:$0xff]  }
0x10f4   :  { %14393 = vmatprep.subr.bf16.mxu0 %v15593_v41 }
0x1199   :  { %v10536_v38 = vpop.f32.mrb[200].mxu1 }
0x119a   :  { %v10542_v7 = vadd.f32 %v10536_v38, %v19719_v35  ;;  %v14279_v29 = vpop.f32.mrb[201].mxu1  ;;  %v15568_v35 = vld [vmem:[%s19964_s18 + $0x1a8] sm:$0xff]   ;;  %v15580_v38 = vld [vmem:[%s19964_s18 + $0x220] sm:$0xff]  }
0x119b   :  { %v10539_v16 = vpop.f32.mrb[202].mxu1  ;;  %v15582_v29 = vld [vmem:[%s19964_s18 + $0x230] sm:$0xff]  }
0x119c   :  { %v14280_v30 = vpop.f32.mrb[203].mxu1  ;;  %v15583_v16 = vld [vmem:[%s19964_s18 + $0x238] sm:$0xff]  }
0x11a1   :  { %v10687_v61 = vpop.f32.mrb[32].mxu0  ;;  %v10733_v44 = vpop.f32.mrb[204].mxu1 }
0x11a2   :  { %v19810_v46 = vadd.f32 %v10687_v61, %v10542_v7  ;;  %v10739_v52 = vpack.c.bf16 %v10733_v44, %v10733_v44  ;;  %v14307_v34 = vpop.f32.mrb[33].mxu0  ;;  %v14315_v62 = vpop.f32.mrb[205].mxu1  ;;  %v15581_v7 = vld [vmem:[%s19964_s18 + $0x228] sm:$0xff]  }
0x11a3   :  { %v10690_v15 = vpop.f32.mrb[34].mxu0  ;;  %v10736_v42 = vpop.f32.mrb[206].mxu1 }
0x11a4   :  { %14334 = vmatmul.mubr.bf16.vlgmr.msra.gmra.mrb[208].mxu1 %v10739_v52  ;;  %v14308_v27 = vpop.f32.mrb[35].mxu0  ;;  %v14316_v28 = vpop.f32.mrb[207].mxu1 }
0x11a5   :  { %14366 = vmatpush3.bf16.msra.mxu1 %v19542_v17  ;;  %14369 = vmatprep.mubr.msk.bf16.mxu1 %vm15594_vm2, %v15593_v41 }
0x11a6   :  { %14367 = vmatprep.subr.bf16.mxu1 %v15593_v41 }
0x11a9   :  { %14368 = vmatpush3.bf16.msra.mxu1 %v19547_v37  ;;  %v10884_v2 = vpop.f32.mrb[36].mxu0 }
0x11aa   :  { %v10890_v45 = vpack.c.bf16 %v10884_v2, %v10884_v2  ;;  %14373 = vmatprep.subr.bf16.mxu1 %v15593_v41  ;;  %v14343_v57 = vpop.f32.mrb[37].mxu0 }
0x11ab   :  { %v10887_v10 = vpop.f32.mrb[38].mxu0  ;;  %v12648_v57 = vld [vmem:[%s19968_s19] ss:$0 sm:$0xff] }
0x11ac   :  { %14362 = vmatmul.mubr.bf16.vlgmr.msra.gmra.mrb[40].mxu0 %v10890_v45  ;;  %14370 = vmatmul.mubr.msk.bf16.vlgmr.msra.gmra.mrb[212].mxu1 %vm10090_vm5, %v12618_v63  ;;  %v14344_v25 = vpop.f32.mrb[39].mxu0 }
0x11ad   :  { %14394 = vmatpush3.bf16.msra.mxu0 %v19542_v17  ;;  %14397 = vmatprep.mubr.msk.bf16.mxu0 %vm15594_vm2, %v15593_v41 }
0x11ae   :  { %14395 = vmatprep.subr.bf16.mxu0 %v15593_v41  ;;  %14374 = vmatpush3.bf16.msra.mxu1 %v15560_v59 }
0x11af   :  { %14375 = vmatprep.subr.bf16.mxu1 %v15593_v41  ;;  %14389 = vmatprep.mubr.msk.bf16.mxu1 %vm15594_vm2, %v15593_v41 }
0x11b1   :  { %14396 = vmatpush3.bf16.msra.mxu0 %v19547_v37 }
0x11b2   :  { %14376 = vmatpush3.bf16.msra.mxu1 %v15561_v39  ;;  %14401 = vmatprep.subr.bf16.mxu0 %v15593_v41 }
0x11b3   :  { %14377 = vmatprep.subr.bf16.mxu1 %v15593_v41 }
0x11b4   :  { %14398 = vmatmul.mubr.msk.bf16.vlgmr.msra.gmra.mrb[44].mxu0 %vm10090_vm5, %v12628_v0 }
0x11b5   :  { %14402 = vmatpush3.bf16.msra.mxu0 %v15563_v36  ;;  %14417 = vmatprep.mubr.msk.bf16.mxu0 %vm15594_vm2, %v15593_v41 }
0x11b6   :  { %14378 = vmatpush3.bf16.msra.mxu1 %v15562_v18  ;;  %14403 = vmatprep.subr.bf16.mxu0 %v15593_v41 }
0x11b7   :  { %14379 = vmatprep.subr.bf16.mxu1 %v15593_v41 }
0x11b9   :  { %14404 = vmatpush3.bf16.msra.mxu0 %v15565_v3 }
0x11ba   :  { %14380 = vmatpush3.bf16.msra.mxu1 %v15564_v20  ;;  %14405 = vmatprep.subr.bf16.mxu0 %v15593_v41 }
0x11bb   :  { %14381 = vmatprep.subr.bf16.mxu1 %v15593_v41 }
0x11bd   :  { %14406 = vmatpush3.bf16.msra.mxu0 %v15567_v58 }
0x11be   :  { %14382 = vmatpush3.bf16.msra.mxu1 %v15566_v26  ;;  %14407 = vmatprep.subr.bf16.mxu0 %v15593_v41 }
0x11bf   :  { %14383 = vmatprep.subr.bf16.mxu1 %v15593_v41 }
0x11c1   :  { %14408 = vmatpush3.bf16.msra.mxu0 %v15569_v8 }
0x11c2   :  { %14384 = vmatpush3.bf16.msra.mxu1 %v15568_v35  ;;  %14409 = vmatprep.subr.bf16.mxu0 %v15593_v41 }
0x11c3   :  { %14385 = vmatprep.subr.bf16.mxu1 %v15593_v41 }
0x11c5   :  { %14410 = vmatpush3.bf16.msra.mxu0 %v15571_v1 }
0x11c6   :  { %14386 = vmatpush3.bf16.msra.mxu1 %v15570_v60  ;;  %14411 = vmatprep.subr.bf16.mxu0 %v15593_v41 }
0x11c7   :  { %14387 = vmatprep.subr.bf16.mxu1 %v15593_v41 }
0x11c9   :  { %14412 = vmatpush3.bf16.msra.mxu0 %v15573_v19 }
0x11ca   :  { %14388 = vmatpush3.bf16.msra.mxu1 %v15572_v51  ;;  %14413 = vmatprep.subr.bf16.mxu0 %v15593_v41 }
0x11cb   :  { %14421 = vmatprep.subr.bf16.mxu1 %v15593_v41 }
0x11cd   :  { %14414 = vmatpush3.bf16.msra.mxu0 %v15574_v5 }
0x11ce   :  { %14415 = vmatprep.subr.bf16.mxu0 %v15593_v41 }
0x11d1   :  { %14416 = vmatpush3.bf16.msra.mxu0 %v15575_v54 }
0x1277   :  { %v10838_v12 = vpop.f32.mrb[208].mxu1 }
0x1278   :  { %v10844_v11 = vadd.f32 %v10838_v12, %v19810_v46  ;;  %v14335_v56 = vpop.f32.mrb[209].mxu1 }
0x1279   :  { %v10841_v48 = vpop.f32.mrb[210].mxu1 }
0x127a   :  { %v14336_v43 = vpop.f32.mrb[211].mxu1 }
0x127f   :  { %v10989_v21 = vpop.f32.mrb[40].mxu0  ;;  %v11035_v47 = vpop.f32.mrb[212].mxu1 }
0x1280   :  { %v10995_v6 = vadd.f32 %v10989_v21, %v10844_v11  ;;  %v11041_v14 = vpack.c.bf16 %v11035_v47, %v11035_v47  ;;  %v14363_v13 = vpop.f32.mrb[41].mxu0  ;;  %v14371_v50 = vpop.f32.mrb[213].mxu1 }
0x1281   :  { %v10992_v9 = vpop.f32.mrb[42].mxu0  ;;  %v11038_v23 = vpop.f32.mrb[214].mxu1 }
0x1282   :  { %14390 = vmatmul.mubr.bf16.vlgmr.msra.gmra.mrb[216].mxu1 %v11041_v14  ;;  %v14364_v40 = vpop.f32.mrb[43].mxu0  ;;  %v14372_v55 = vpop.f32.mrb[215].mxu1 }
0x1283   :  { %14422 = vmatpush3.bf16.msra.mxu1 %v19542_v17  ;;  %14425 = vmatprep.mubr.msk.bf16.mxu1 %vm15594_vm2, %v15593_v41 }
0x1284   :  { %14423 = vmatprep.subr.bf16.mxu1 %v15593_v41 }
0x1287   :  { %14424 = vmatpush3.bf16.msra.mxu1 %v19547_v37  ;;  %v11186_v49 = vpop.f32.mrb[44].mxu0  ;;  %v15577_v37 = vld [vmem:[%s19964_s18 + $0x208] sm:$0xff]  }
0x1288   :  { %v11192_v33 = vpack.c.bf16 %v11186_v49, %v11186_v49  ;;  %14429 = vmatprep.subr.bf16.mxu1 %v15593_v41  ;;  %v14399_v17 = vpop.f32.mrb[45].mxu0 }
0x1289   :  { %v11189_v31 = vpop.f32.mrb[46].mxu0 }
0x128a   :  { %14418 = vmatmul.mubr.bf16.vlgmr.msra.gmra.mrb[48].mxu0 %v11192_v33  ;;  %14426 = vmatmul.mubr.msk.bf16.vlgmr.msra.gmra.mrb[220].mxu1 %vm10090_vm5, %v12638_v24  ;;  %v14400_v53 = vpop.f32.mrb[47].mxu0 }
0x128b   :  { %14430 = vmatpush3.bf16.msra.mxu1 %v15576_v22  ;;  %14445 = vmatprep.mubr.msk.bf16.mxu1 %vm15594_vm2, %v15593_v41 }
0x128c   :  { %14431 = vmatprep.subr.bf16.mxu1 %v15593_v41 }
0x128f   :  { %14432 = vmatpush3.bf16.msra.mxu1 %v15577_v37 }
0x1290   :  { %14433 = vmatprep.subr.bf16.mxu1 %v15593_v41 }
0x1293   :  { %14434 = vmatpush3.bf16.msra.mxu1 %v15578_v4 }
0x1294   :  { %14435 = vmatprep.subr.bf16.mxu1 %v15593_v41 }
0x1297   :  { %14436 = vmatpush3.bf16.msra.mxu1 %v15579_v32 }
0x1298   :  { %14437 = vmatprep.subr.bf16.mxu1 %v15593_v41 }
0x129b   :  { %14438 = vmatpush3.bf16.msra.mxu1 %v15580_v38 }
0x129c   :  { %14439 = vmatprep.subr.bf16.mxu1 %v15593_v41 }
0x129f   :  { %14440 = vmatpush3.bf16.msra.mxu1 %v15581_v7 }
0x12a0   :  { %14441 = vmatprep.subr.bf16.mxu1 %v15593_v41 }
0x12a3   :  { %14442 = vmatpush3.bf16.msra.mxu1 %v15582_v29 }
0x12a4   :  { %14443 = vmatprep.subr.bf16.mxu1 %v15593_v41 }
0x12a7   :  { %14444 = vmatpush3.bf16.msra.mxu1 %v15583_v16 }
0x1355   :  { %v11140_v30 = vpop.f32.mrb[216].mxu1 }
0x1356   :  { %v11146_v61 = vadd.f32 %v11140_v30, %v10995_v6  ;;  %v14391_v44 = vpop.f32.mrb[217].mxu1 }
0x1357   :  { %v11143_v46 = vpop.f32.mrb[218].mxu1 }
0x1358   :  { %v14392_v52 = vpop.f32.mrb[219].mxu1 }
0x135d   :  { %v11291_v34 = vpop.f32.mrb[48].mxu0  ;;  %v11337_v62 = vpop.f32.mrb[220].mxu1 }
0x135e   :  { %v11297_v15 = vadd.f32 %v11291_v34, %v11146_v61  ;;  %v11343_v42 = vpack.c.bf16 %v11337_v62, %v11337_v62  ;;  %v14427_v27 = vpop.f32.mrb[221].mxu1  ;;  %v14419_v28 = vpop.f32.mrb[49].mxu0 }
0x135f   :  { %v11340_v2 = vpop.f32.mrb[222].mxu1  ;;  %v11294_v63 = vpop.f32.mrb[50].mxu0 }
0x1360   :  { %14446 = vmatmul.mubr.bf16.vlgmr.msra.gmra.mrb[224].mxu1 %v11343_v42  ;;  %v14428_v41 = vpop.f32.mrb[223].mxu1  ;;  %v14420_v45 = vpop.f32.mrb[51].mxu0 }
0x1433   :  { %v11442_v59 = vpop.f32.mrb[224].mxu1 }
0x1434   :  { %v11448_v10 = vadd.f32 %v11442_v59, %v11297_v15  ;;  %v14447_v25 = vpop.f32.mrb[225].mxu1 }
0x1435   :  { %v11445_v39 = vpop.f32.mrb[226].mxu1 }
0x1436   :  { %v11456_v0 = vadd.f32 %v12648_v57, %v11448_v10  ;;  %v14448_v36 = vpop.f32.mrb[227].mxu1 }
0x1438   :  { %11458 = vst.msk [vmem:[%s19969_s20] sm:$0x3] %vm11457_vm1, %v11456_v0 }

</bundles_post_ra>
